<compile_context>
chip_gen: v7x
topology: tpu7x:2x2x1
jax: 0.10.0
libtpu: 0.0.40
codegen_flags: <defaults>
</compile_context>

<pallas_src>
import functools

import jax
import jax.numpy as jnp
from jax.experimental import pallas as pl
from jax.experimental.pallas import tpu as pltpu


# ----------------------------- in-kernel helpers ---------------------------- #

def _shift_rows(v, off):
    """u[r, :] = v[r + off, :], zero fill for out-of-range rows (off is static)."""
    if off == 0:
        return v
    rows, lanes = v.shape
    zeros = jnp.zeros((abs(off), lanes), v.dtype)
    if off > 0:
        return jnp.concatenate([v[off:, :], zeros], axis=0)
    return jnp.concatenate([zeros, v[:rows + off, :]], axis=0)


def _accum_conv(x_bf16, w_taps_ref, acc_ref, offs):
    """acc += 3x3x3 conv (padded-row layout) as 9 shifted banded matmuls."""
    for t, off in enumerate(offs):
        contrib = jnp.dot(x_bf16, w_taps_ref[t],
                          preferred_element_type=jnp.float32)
        acc_ref[...] += _shift_rows(contrib, off)


# ------------------------------ Pallas kernels ------------------------------ #

def _conv3x3_kernel(x_ref, w_ref, b_ref, m_ref, o_ref, acc_ref, *, offs, relu):
    """Single 3x3x3 conv (+bias, optional ReLU) in padded-row layout."""
    xv = x_ref[0]                                     # (Rp, W*Cin)  bf16
    acc_ref[...] = jnp.zeros_like(acc_ref)
    _accum_conv(xv, w_ref, acc_ref, offs)
    acc = acc_ref[...] + b_ref[...]                   # bias tiled over W lanes
    if relu:
        acc = jnp.maximum(acc, 0.0)
    o_ref[0] = (acc * m_ref[...]).astype(o_ref.dtype)   # zero the border rows


def _cab_kernel(x_ref, w1_ref, w2_ref, ca1_ref, ca2_ref, s_ref, st_ref, m_ref,
                o_ref, acc_ref, *, offs):
    """Fused CAB: conv3 -> ReLU -> conv3 -> CALayer -> channel scale -> +x."""
    mask = m_ref[...]                                 # (Rp, 1), 1 on interior rows
    xv = x_ref[0]                                     # (Rp, W*C) bf16

    # conv3x3x3 + ReLU  (bias=False)
    acc_ref[...] = jnp.zeros_like(acc_ref)
    _accum_conv(xv, w1_ref, acc_ref, offs)
    h1 = (jnp.maximum(acc_ref[...], 0.0) * mask).astype(jnp.bfloat16)

    # conv3x3x3  (bias=False)
    acc_ref[...] = jnp.zeros_like(acc_ref)
    _accum_conv(h1, w2_ref, acc_ref, offs)
    h2 = acc_ref[...] * mask                          # (Rp, W*C) f32

    # CALayer: global avg pool -> 1x1 -> ReLU -> 1x1 -> sigmoid
    pooled = jnp.dot(jnp.sum(h2, axis=0, keepdims=True), s_ref[...],
                     preferred_element_type=jnp.float32)           # (1, C) mean
    z = jnp.maximum(jnp.dot(pooled, ca1_ref[...],
                            preferred_element_type=jnp.float32), 0.0)
    y = jax.nn.sigmoid(jnp.dot(z, ca2_ref[...],
                               preferred_element_type=jnp.float32))  # (1, C)
    y_lanes = jnp.dot(y, st_ref[...],
                      preferred_element_type=jnp.float32)            # (1, W*C)

    # channel scale + CAB residual
    o_ref[0] = (h2 * y_lanes + xv.astype(jnp.float32)).astype(o_ref.dtype)


def _rowlinear_kernel(x_ref, w_ref, o_ref):
    """Row-wise lane mixing (block-diagonal 1x1x1 conv) in padded-row layout."""
    o_ref[0] = jnp.dot(x_ref[0], w_ref[...],
                       preferred_element_type=jnp.float32).astype(o_ref.dtype)


# ------------------------- wrapper-side constant glue ----------------------- #

def _band_weights(wc, W):
    """Torch Conv3d weight (Cout,Cin,3,3,3) -> (9, W*Cin, W*Cout) banded matrices,
    one per (kd, kh) tap; kw taps + W zero-padding folded into the lane band."""
    taps = []
    for kd in range(3):
        for kh in range(3):
            band = jnp.zeros((W * wc.shape[1], W * wc.shape[0]), jnp.float32)
            for kw in range(3):
                sel = jnp.eye(W, k=1 - kw, dtype=jnp.float32)  # [wi,wo]=1 iff wi-wo=kw-1
                band = band + jnp.kron(sel, wc[:, :, kd, kh, kw].T.astype(jnp.float32))
            taps.append(band)
    return jnp.stack(taps, axis=0)


def _tap_offsets(H):
    return tuple((kd - 1) * (H + 2) + (kh - 1) for kd in range(3) for kh in range(3))


def _row_mask(D, H):
    m = jnp.zeros((D + 2, H + 2), jnp.float32).at[1:D + 1, 1:H + 1].set(1.0)
    return m.reshape((D + 2) * (H + 2), 1)


def _ca_pool_mats(W, C, n_vox):
    eye = jnp.eye(C, dtype=jnp.float32)
    s = jnp.kron(jnp.ones((W, 1), jnp.float32), eye) / float(n_vox)  # (W*C, C) lane-sum/mean
    st = jnp.kron(jnp.ones((1, W), jnp.float32), eye)                # (C, W*C) tile back
    return s, st


def _to_padded(x):
    """(N, D, H, W, C) -> padded-row layout (N, (D+2)*(H+2), W*C)."""
    N, D, H, W, C = x.shape
    xp = jnp.pad(x, ((0, 0), (1, 1), (1, 1), (0, 0), (0, 0)))
    return xp.reshape(N, (D + 2) * (H + 2), W * C)


def _from_padded(xp, D, H, W, C):
    N = xp.shape[0]
    x = xp.reshape(N, D + 2, H + 2, W, C)
    return x[:, 1:D + 1, 1:H + 1]


def _parallel_params():
    return pltpu.CompilerParams(dimension_semantics=("parallel",))


# ------------------------------ Pallas wrappers ------------------------------ #

def stem_conv(xp, wc, bias, *, D, H, W, relu=False):
    """Stem Conv3d(kernel=3, pad=1, bias=True) in padded-row layout."""
    N, Rp, Lin = xp.shape
    Cout = wc.shape[0]
    Lout = W * Cout
    wb = _band_weights(wc, W).astype(jnp.bfloat16)
    brow = jnp.tile(bias.astype(jnp.float32), W).reshape(1, Lout)
    mask = _row_mask(D, H)
    kern = functools.partial(_conv3x3_kernel, offs=_tap_offsets(H), relu=relu)
    return pl.pallas_call(
        kern,
        out_shape=jax.ShapeDtypeStruct((N, Rp, Lout), jnp.bfloat16),
        grid_spec=pltpu.PrefetchScalarGridSpec(
            num_scalar_prefetch=0,
            grid=(N,),
            in_specs=[
                pl.BlockSpec((1, Rp, Lin), lambda n: (n, 0, 0)),
                pl.BlockSpec((9, Lin, Lout), lambda n: (0, 0, 0)),
                pl.BlockSpec((1, Lout), lambda n: (0, 0)),
                pl.BlockSpec((Rp, 1), lambda n: (0, 0)),
            ],
            out_specs=pl.BlockSpec((1, Rp, Lout), lambda n: (n, 0, 0)),
            scratch_shapes=[pltpu.VMEM((Rp, Lout), jnp.float32)],
        ),
        compiler_params=_parallel_params(),
    )(xp, wb, brow, mask)


def cab(xp, p, *, D, H, W):
    """One fused CAB block in padded-row layout."""
    N, Rp, L = xp.shape
    C = p['w1'].shape[0]
    Cr = p['ca_w1'].shape[1]
    assert L == W * C
    w1b = _band_weights(p['w1'], W).astype(jnp.bfloat16)
    w2b = _band_weights(p['w2'], W).astype(jnp.bfloat16)
    s, st = _ca_pool_mats(W, C, D * H * W)
    mask = _row_mask(D, H)
    kern = functools.partial(_cab_kernel, offs=_tap_offsets(H))
    return pl.pallas_call(
        kern,
        out_shape=jax.ShapeDtypeStruct((N, Rp, L), jnp.bfloat16),
        grid_spec=pltpu.PrefetchScalarGridSpec(
            num_scalar_prefetch=0,
            grid=(N,),
            in_specs=[
                pl.BlockSpec((1, Rp, L), lambda n: (n, 0, 0)),
                pl.BlockSpec((9, L, L), lambda n: (0, 0, 0)),
                pl.BlockSpec((9, L, L), lambda n: (0, 0, 0)),
                pl.BlockSpec((C, Cr), lambda n: (0, 0)),
                pl.BlockSpec((Cr, C), lambda n: (0, 0)),
                pl.BlockSpec((W * C, C), lambda n: (0, 0)),
                pl.BlockSpec((C, W * C), lambda n: (0, 0)),
                pl.BlockSpec((Rp, 1), lambda n: (0, 0)),
            ],
            out_specs=pl.BlockSpec((1, Rp, L), lambda n: (n, 0, 0)),
            scratch_shapes=[pltpu.VMEM((Rp, L), jnp.float32)],
        ),
        compiler_params=_parallel_params(),
    )(xp, w1b, w2b,
      p['ca_w1'].astype(jnp.float32), p['ca_w2'].astype(jnp.float32),
      s, st, mask)


def downsample(xp, w1x1, *, D, H, W, C):
    """DownSample: Upsample(0.5, trilinear, align_corners=False) + 1x1x1 conv.
    For even dims the resize is exactly a 2x2x2 average pool (tiny wrapper
    reshape/mean); the 1x1x1 conv runs as a lane-dense Pallas matmul that emits
    the next level's padded-row layout directly."""
    N = xp.shape[0]
    Do, Ho, Wo = D // 2, H // 2, W // 2
    Cout = w1x1.shape[0]
    x = _from_padded(xp, D, H, W, C).astype(jnp.float32)
    pooled = x.reshape(N, Do, 2, Ho, 2, Wo, 2, C).mean(axis=(2, 4, 6))
    xp2 = _to_padded(pooled.astype(jnp.bfloat16))                  # (N, Rp2, Wo*C)
    Rp2 = (Do + 2) * (Ho + 2)
    wb = jnp.kron(jnp.eye(Wo, dtype=jnp.float32),
                  w1x1.reshape(Cout, C).T.astype(jnp.float32)).astype(jnp.bfloat16)
    return pl.pallas_call(
        _rowlinear_kernel,
        out_shape=jax.ShapeDtypeStruct((N, Rp2, Wo * Cout), jnp.bfloat16),
        grid_spec=pltpu.PrefetchScalarGridSpec(
            num_scalar_prefetch=0,
            grid=(N,),
            in_specs=[
                pl.BlockSpec((1, Rp2, Wo * C), lambda n: (n, 0, 0)),
                pl.BlockSpec((Wo * C, Wo * Cout), lambda n: (0, 0)),
            ],
            out_specs=pl.BlockSpec((1, Rp2, Wo * Cout), lambda n: (n, 0, 0)),
        ),
        compiler_params=_parallel_params(),
    )(xp2, wb)


# ------------------------------ Encoder forward ------------------------------ #

def encoder_forward(x_ncdhw, params):
    """x: (N, Cin, D, H, W) (PyTorch NCDHW); returns [enc1, enc2, enc3] NCDHW f32."""
    x = jnp.transpose(x_ncdhw, (0, 2, 3, 4, 1))                    # NDHWC
    N, D, H, W, _ = x.shape
    c1 = params['conv_w'].shape[0]
    c2 = params['down12'].shape[0]
    c3 = params['down23'].shape[0]

    xp = _to_padded(x.astype(jnp.bfloat16))
    xp = stem_conv(xp, params['conv_w'], params['conv_b'], D=D, H=H, W=W)
    for p in params['enc1']:
        xp = cab(xp, p, D=D, H=H, W=W)
    enc1 = _from_padded(xp, D, H, W, c1)

    xp = downsample(xp, params['down12'], D=D, H=H, W=W, C=c1)
    D2, H2, W2 = D // 2, H // 2, W // 2
    for p in params['enc2']:
        xp = cab(xp, p, D=D2, H=H2, W=W2)
    enc2 = _from_padded(xp, D2, H2, W2, c2)

    xp = downsample(xp, params['down23'], D=D2, H=H2, W=W2, C=c2)
    D3, H3, W3 = D2 // 2, H2 // 2, W2 // 2
    for p in params['enc3']:
        xp = cab(xp, p, D=D3, H=H3, W=W3)
    enc3 = _from_padded(xp, D3, H3, W3, c3)

    to_ncdhw = lambda t: jnp.transpose(t.astype(jnp.float32), (0, 4, 1, 2, 3))
    return [to_ncdhw(enc1), to_ncdhw(enc2), to_ncdhw(enc3)]


# ---------------------------- parameter creation ----------------------------- #

def init_params(key, n_feat, kernel_size, reduction, scale_unetfeats, in_channels):
    assert kernel_size == 3
    keys = iter(jax.random.split(key, 64))

    def w(shape, s=0.1):
        return jax.random.normal(next(keys), shape, jnp.float32) * s

    def cab_params(C):
        Cr = max(C // reduction, 1)
        return {
            'w1': w((C, C, 3, 3, 3)),          # body convs, bias=False
            'w2': w((C, C, 3, 3, 3)),
            'ca_w1': w((C, Cr)),               # CALayer 1x1 convs (bias=False)
            'ca_w2': w((Cr, C)),               # stored directly as matmul matrices
        }

    return {
        # stem conv(in_channels, n_feat, 3, 1, 1) -> Conv3d(..., bias=True)
        'conv_w': w((n_feat, in_channels, 3, 3, 3)),
        'conv_b': w((n_feat,)),
        'enc1': [cab_params(n_feat) for _ in range(2)],
        'enc2': [cab_params(n_feat + scale_unetfeats) for _ in range(2)],
        'enc3': [cab_params(n_feat + 2 * scale_unetfeats) for _ in range(2)],
        'down12': w((n_feat + scale_unetfeats, n_feat, 1, 1, 1)),
        'down23': w((n_feat + 2 * scale_unetfeats, n_feat + scale_unetfeats, 1, 1, 1)),
    }


# ------------------------- pure-JAX reference (f32) -------------------------- #

def _ref_conv3d(x, wc, b=None):
    y = jax.lax.conv_general_dilated(
        x, wc, window_strides=(1, 1, 1), padding=((1, 1), (1, 1), (1, 1)),
        dimension_numbers=('NCDHW', 'OIDHW', 'NCDHW'),
        precision=jax.lax.Precision.HIGHEST)
    if b is not None:
        y = y + b.reshape(1, -1, 1, 1, 1)
    return y


def _ref_cab(x, p):
    h = jax.nn.relu(_ref_conv3d(x, p['w1']))
    h = _ref_conv3d(h, p['w2'])
    pooled = jnp.mean(h, axis=(2, 3, 4))
    z = jax.nn.relu(pooled @ p['ca_w1'])
    y = jax.nn.sigmoid(z @ p['ca_w2'])
    return h * y[:, :, None, None, None] + x


def _ref_down(x, w1x1):
    N, C, D, H, W = x.shape
    pooled = x.reshape(N, C, D // 2, 2, H // 2, 2, W // 2, 2).mean(axis=(3, 5, 7))
    return jnp.einsum('ncdhw,oc->nodhw', pooled, w1x1.reshape(w1x1.shape[0], C),
                      precision=jax.lax.Precision.HIGHEST)


def _ref_encoder(x, params):
    x = _ref_conv3d(x, params['conv_w'], params['conv_b'])
    enc1 = x
    for p in params['enc1']:
        enc1 = _ref_cab(enc1, p)
    x = _ref_down(enc1, params['down12'])
    enc2 = x
    for p in params['enc2']:
        enc2 = _ref_cab(enc2, p)
    x = _ref_down(enc2, params['down23'])
    enc3 = x
    for p in params['enc3']:
        enc3 = _ref_cab(enc3, p)
    return [enc1, enc2, enc3]


# ---------------------------------- main ------------------------------------- #

if __name__ == "__main__":
    n_feat, kernel_size, reduction, scale_unetfeats = 16, 3, 4, 8
    N, Cin, D, H, W = 2, 1, 8, 8, 8

    key = jax.random.PRNGKey(0)
    kp, kx = jax.random.split(key)
    params = init_params(kp, n_feat, kernel_size, reduction, scale_unetfeats, Cin)
    x = jax.random.normal(kx, (N, Cin, D, H, W), jnp.float32)     # NCDHW like PyTorch

    fwd = jax.jit(encoder_forward)
    enc1, enc2, enc3 = jax.block_until_ready(fwd(x, params))

    assert enc1.shape == (N, n_feat, D, H, W)
    assert enc2.shape == (N, n_feat + scale_unetfeats, D // 2, H // 2, W // 2)
    assert enc3.shape == (N, n_feat + 2 * scale_unetfeats, D // 4, H // 4, W // 4)
    assert all(bool(jnp.all(jnp.isfinite(e))) for e in (enc1, enc2, enc3))

    # numerical sanity check vs. a pure-JAX f32 reference (bf16 operands -> loose tol)
    refs = _ref_encoder(x, params)
    for got, ref in zip((enc1, enc2, enc3), refs):
        rel = float(jnp.linalg.norm(got - ref) / (jnp.linalg.norm(ref) + 1e-8))
        assert rel < 5e-2, f"relative error too large: {rel}"

    print("KERNEL_OK")
</pallas_src>

<mosaic_0001>
module attributes {stable_mosaic.version = 11 : i64} {
  func.func @_conv3x3_kernel(%arg0: i32, %arg1: memref<1x100x8xbf16, #tpu.memory_space<vmem>>, %arg2: memref<9x8x128xbf16, #tpu.memory_space<vmem>>, %arg3: memref<1x128xf32, #tpu.memory_space<vmem>>, %arg4: memref<100x1xf32, #tpu.memory_space<vmem>>, %arg5: memref<1x100x128xbf16, #tpu.memory_space<vmem>>, %arg6: memref<100x128xf32, #tpu.memory_space<vmem>>) attributes {dimension_semantics = [#tpu.dimension_semantics<parallel>], iteration_bounds = array<i64: 2>, scalar_prefetch = 0 : i64, scratch_operands = 1 : i64, tpu.core_type = #tpu.core_type<tc>, window_params = [{transform_indices = @transform_0, window_bounds = array<i64: 1, 100, 8>}, {pipeline_mode = #tpu.pipeline_mode<synchronous>, transform_indices = @transform_1, window_bounds = array<i64: 9, 8, 128>}, {pipeline_mode = #tpu.pipeline_mode<synchronous>, transform_indices = @transform_2, window_bounds = array<i64: 1, 128>}, {pipeline_mode = #tpu.pipeline_mode<synchronous>, transform_indices = @transform_3, window_bounds = array<i64: 100, 1>}, {transform_indices = @transform_4, window_bounds = array<i64: 1, 100, 128>}]} {
    %c0 = arith.constant 0 : index
    %c0_0 = arith.constant 0 : index
    %c0_1 = arith.constant 0 : index
    %0 = vector.load %arg1[%c0, %c0_0, %c0_1] : memref<1x100x8xbf16, #tpu.memory_space<vmem>>, vector<1x100x8xbf16>
    %1 = vector.shape_cast %0 : vector<1x100x8xbf16> to vector<100x8xbf16>
    %cst = arith.constant 0.000000e+00 : f32
    %2 = vector.broadcast %cst : f32 to vector<100x128xf32>
    %c0_2 = arith.constant 0 : index
    %c0_3 = arith.constant 0 : index
    %3 = vector.load %arg6[%c0_2, %c0_3] : memref<100x128xf32, #tpu.memory_space<vmem>>, vector<100x128xf32>
    tpu.vector_store %arg6[%c0_2, %c0_3], %2 {strides = array<i32>} : memref<100x128xf32, #tpu.memory_space<vmem>>, vector<100x128xf32>,
    %c0_4 = arith.constant 0 : index
    %c0_5 = arith.constant 0 : index
    %c0_6 = arith.constant 0 : index
    %4 = vector.load %arg2[%c0_4, %c0_5, %c0_6] : memref<9x8x128xbf16, #tpu.memory_space<vmem>>, vector<1x8x128xbf16>
    %5 = vector.shape_cast %4 : vector<1x8x128xbf16> to vector<8x128xbf16>
    %cst_7 = arith.constant dense<0.000000e+00> : vector<100x128xf32>
    %6 = tpu.matmul %1, %5, %cst_7 {dimension_numbers = #tpu.dot_dimension_numbers<[1], [0], [0], [1], [0, 0, 1, 1], [], []>} : vector<100x8xbf16>, vector<8x128xbf16>, vector<100x128xf32> -> vector<100x128xf32>
    %c0_8 = arith.constant 0 : index
    %c0_9 = arith.constant 0 : index
    %7 = vector.load %arg6[%c0_8, %c0_9] : memref<100x128xf32, #tpu.memory_space<vmem>>, vector<100x128xf32>
    %cst_10 = arith.constant 0.000000e+00 : f32
    %8 = vector.broadcast %cst_10 : f32 to vector<11x128xf32>
    %9 = vector.extract_strided_slice %6 {offsets = [0, 0], sizes = [89, 128], strides = [1, 1]} : vector<100x128xf32> to vector<89x128xf32>
    %10 = tpu.concatenate %8, %9 in 0 : vector<11x128xf32>, vector<89x128xf32> -> vector<100x128xf32>
    %11 = arith.addf %7, %10 : vector<100x128xf32>
    %c0_11 = arith.constant 0 : index
    %c0_12 = arith.constant 0 : index
    %12 = vector.load %arg6[%c0_11, %c0_12] : memref<100x128xf32, #tpu.memory_space<vmem>>, vector<100x128xf32>
    tpu.vector_store %arg6[%c0_11, %c0_12], %11 {strides = array<i32>} : memref<100x128xf32, #tpu.memory_space<vmem>>, vector<100x128xf32>,
    %c1 = arith.constant 1 : index
    %c0_13 = arith.constant 0 : index
    %c0_14 = arith.constant 0 : index
    %13 = vector.load %arg2[%c1, %c0_13, %c0_14] : memref<9x8x128xbf16, #tpu.memory_space<vmem>>, vector<1x8x128xbf16>
    %14 = vector.shape_cast %13 : vector<1x8x128xbf16> to vector<8x128xbf16>
    %cst_15 = arith.constant dense<0.000000e+00> : vector<100x128xf32>
    %15 = tpu.matmul %1, %14, %cst_15 {dimension_numbers = #tpu.dot_dimension_numbers<[1], [0], [0], [1], [0, 0, 1, 1], [], []>} : vector<100x8xbf16>, vector<8x128xbf16>, vector<100x128xf32> -> vector<100x128xf32>
    %c0_16 = arith.constant 0 : index
    %c0_17 = arith.constant 0 : index
    %16 = vector.load %arg6[%c0_16, %c0_17] : memref<100x128xf32, #tpu.memory_space<vmem>>, vector<100x128xf32>
    %cst_18 = arith.constant 0.000000e+00 : f32
    %17 = vector.broadcast %cst_18 : f32 to vector<10x128xf32>
    %18 = vector.extract_strided_slice %15 {offsets = [0, 0], sizes = [90, 128], strides = [1, 1]} : vector<100x128xf32> to vector<90x128xf32>
    %19 = tpu.concatenate %17, %18 in 0 : vector<10x128xf32>, vector<90x128xf32> -> vector<100x128xf32>
    %20 = arith.addf %16, %19 : vector<100x128xf32>
    %c0_19 = arith.constant 0 : index
    %c0_20 = arith.constant 0 : index
    %21 = vector.load %arg6[%c0_19, %c0_20] : memref<100x128xf32, #tpu.memory_space<vmem>>, vector<100x128xf32>
    tpu.vector_store %arg6[%c0_19, %c0_20], %20 {strides = array<i32>} : memref<100x128xf32, #tpu.memory_space<vmem>>, vector<100x128xf32>,
    %c2 = arith.constant 2 : index
    %c0_21 = arith.constant 0 : index
    %c0_22 = arith.constant 0 : index
    %22 = vector.load %arg2[%c2, %c0_21, %c0_22] : memref<9x8x128xbf16, #tpu.memory_space<vmem>>, vector<1x8x128xbf16>
    %23 = vector.shape_cast %22 : vector<1x8x128xbf16> to vector<8x128xbf16>
    %cst_23 = arith.constant dense<0.000000e+00> : vector<100x128xf32>
    %24 = tpu.matmul %1, %23, %cst_23 {dimension_numbers = #tpu.dot_dimension_numbers<[1], [0], [0], [1], [0, 0, 1, 1], [], []>} : vector<100x8xbf16>, vector<8x128xbf16>, vector<100x128xf32> -> vector<100x128xf32>
    %c0_24 = arith.constant 0 : index
    %c0_25 = arith.constant 0 : index
    %25 = vector.load %arg6[%c0_24, %c0_25] : memref<100x128xf32, #tpu.memory_space<vmem>>, vector<100x128xf32>
    %cst_26 = arith.constant 0.000000e+00 : f32
    %26 = vector.broadcast %cst_26 : f32 to vector<9x128xf32>
    %27 = vector.extract_strided_slice %24 {offsets = [0, 0], sizes = [91, 128], strides = [1, 1]} : vector<100x128xf32> to vector<91x128xf32>
    %28 = tpu.concatenate %26, %27 in 0 : vector<9x128xf32>, vector<91x128xf32> -> vector<100x128xf32>
    %29 = arith.addf %25, %28 : vector<100x128xf32>
    %c0_27 = arith.constant 0 : index
    %c0_28 = arith.constant 0 : index
    %30 = vector.load %arg6[%c0_27, %c0_28] : memref<100x128xf32, #tpu.memory_space<vmem>>, vector<100x128xf32>
    tpu.vector_store %arg6[%c0_27, %c0_28], %29 {strides = array<i32>} : memref<100x128xf32, #tpu.memory_space<vmem>>, vector<100x128xf32>,
    %c3 = arith.constant 3 : index
    %c0_29 = arith.constant 0 : index
    %c0_30 = arith.constant 0 : index
    %31 = vector.load %arg2[%c3, %c0_29, %c0_30] : memref<9x8x128xbf16, #tpu.memory_space<vmem>>, vector<1x8x128xbf16>
    %32 = vector.shape_cast %31 : vector<1x8x128xbf16> to vector<8x128xbf16>
    %cst_31 = arith.constant dense<0.000000e+00> : vector<100x128xf32>
    %33 = tpu.matmul %1, %32, %cst_31 {dimension_numbers = #tpu.dot_dimension_numbers<[1], [0], [0], [1], [0, 0, 1, 1], [], []>} : vector<100x8xbf16>, vector<8x128xbf16>, vector<100x128xf32> -> vector<100x128xf32>
    %c0_32 = arith.constant 0 : index
    %c0_33 = arith.constant 0 : index
    %34 = vector.load %arg6[%c0_32, %c0_33] : memref<100x128xf32, #tpu.memory_space<vmem>>, vector<100x128xf32>
    %cst_34 = arith.constant 0.000000e+00 : f32
    %35 = vector.broadcast %cst_34 : f32 to vector<1x128xf32>
    %36 = vector.extract_strided_slice %33 {offsets = [0, 0], sizes = [99, 128], strides = [1, 1]} : vector<100x128xf32> to vector<99x128xf32>
    %37 = tpu.concatenate %35, %36 in 0 : vector<1x128xf32>, vector<99x128xf32> -> vector<100x128xf32>
    %38 = arith.addf %34, %37 : vector<100x128xf32>
    %c0_35 = arith.constant 0 : index
    %c0_36 = arith.constant 0 : index
    %39 = vector.load %arg6[%c0_35, %c0_36] : memref<100x128xf32, #tpu.memory_space<vmem>>, vector<100x128xf32>
    tpu.vector_store %arg6[%c0_35, %c0_36], %38 {strides = array<i32>} : memref<100x128xf32, #tpu.memory_space<vmem>>, vector<100x128xf32>,
    %c4 = arith.constant 4 : index
    %c0_37 = arith.constant 0 : index
    %c0_38 = arith.constant 0 : index
    %40 = vector.load %arg2[%c4, %c0_37, %c0_38] : memref<9x8x128xbf16, #tpu.memory_space<vmem>>, vector<1x8x128xbf16>
    %41 = vector.shape_cast %40 : vector<1x8x128xbf16> to vector<8x128xbf16>
    %cst_39 = arith.constant dense<0.000000e+00> : vector<100x128xf32>
    %42 = tpu.matmul %1, %41, %cst_39 {dimension_numbers = #tpu.dot_dimension_numbers<[1], [0], [0], [1], [0, 0, 1, 1], [], []>} : vector<100x8xbf16>, vector<8x128xbf16>, vector<100x128xf32> -> vector<100x128xf32>
    %c0_40 = arith.constant 0 : index
    %c0_41 = arith.constant 0 : index
    %43 = vector.load %arg6[%c0_40, %c0_41] : memref<100x128xf32, #tpu.memory_space<vmem>>, vector<100x128xf32>
    %44 = arith.addf %43, %42 : vector<100x128xf32>
    %c0_42 = arith.constant 0 : index
    %c0_43 = arith.constant 0 : index
    %45 = vector.load %arg6[%c0_42, %c0_43] : memref<100x128xf32, #tpu.memory_space<vmem>>, vector<100x128xf32>
    tpu.vector_store %arg6[%c0_42, %c0_43], %44 {strides = array<i32>} : memref<100x128xf32, #tpu.memory_space<vmem>>, vector<100x128xf32>,
    %c5 = arith.constant 5 : index
    %c0_44 = arith.constant 0 : index
    %c0_45 = arith.constant 0 : index
    %46 = vector.load %arg2[%c5, %c0_44, %c0_45] : memref<9x8x128xbf16, #tpu.memory_space<vmem>>, vector<1x8x128xbf16>
    %47 = vector.shape_cast %46 : vector<1x8x128xbf16> to vector<8x128xbf16>
    %cst_46 = arith.constant dense<0.000000e+00> : vector<100x128xf32>
    %48 = tpu.matmul %1, %47, %cst_46 {dimension_numbers = #tpu.dot_dimension_numbers<[1], [0], [0], [1], [0, 0, 1, 1], [], []>} : vector<100x8xbf16>, vector<8x128xbf16>, vector<100x128xf32> -> vector<100x128xf32>
    %c0_47 = arith.constant 0 : index
    %c0_48 = arith.constant 0 : index
    %49 = vector.load %arg6[%c0_47, %c0_48] : memref<100x128xf32, #tpu.memory_space<vmem>>, vector<100x128xf32>
    %cst_49 = arith.constant 0.000000e+00 : f32
    %50 = vector.broadcast %cst_49 : f32 to vector<1x128xf32>
    %51 = vector.extract_strided_slice %48 {offsets = [1, 0], sizes = [99, 128], strides = [1, 1]} : vector<100x128xf32> to vector<99x128xf32>
    %52 = tpu.concatenate %51, %50 in 0 : vector<99x128xf32>, vector<1x128xf32> -> vector<100x128xf32>
    %53 = arith.addf %49, %52 : vector<100x128xf32>
    %c0_50 = arith.constant 0 : index
    %c0_51 = arith.constant 0 : index
    %54 = vector.load %arg6[%c0_50, %c0_51] : memref<100x128xf32, #tpu.memory_space<vmem>>, vector<100x128xf32>
    tpu.vector_store %arg6[%c0_50, %c0_51], %53 {strides = array<i32>} : memref<100x128xf32, #tpu.memory_space<vmem>>, vector<100x128xf32>,
    %c6 = arith.constant 6 : index
    %c0_52 = arith.constant 0 : index
    %c0_53 = arith.constant 0 : index
    %55 = vector.load %arg2[%c6, %c0_52, %c0_53] : memref<9x8x128xbf16, #tpu.memory_space<vmem>>, vector<1x8x128xbf16>
    %56 = vector.shape_cast %55 : vector<1x8x128xbf16> to vector<8x128xbf16>
    %cst_54 = arith.constant dense<0.000000e+00> : vector<100x128xf32>
    %57 = tpu.matmul %1, %56, %cst_54 {dimension_numbers = #tpu.dot_dimension_numbers<[1], [0], [0], [1], [0, 0, 1, 1], [], []>} : vector<100x8xbf16>, vector<8x128xbf16>, vector<100x128xf32> -> vector<100x128xf32>
    %c0_55 = arith.constant 0 : index
    %c0_56 = arith.constant 0 : index
    %58 = vector.load %arg6[%c0_55, %c0_56] : memref<100x128xf32, #tpu.memory_space<vmem>>, vector<100x128xf32>
    %cst_57 = arith.constant 0.000000e+00 : f32
    %59 = vector.broadcast %cst_57 : f32 to vector<9x128xf32>
    %60 = vector.extract_strided_slice %57 {offsets = [9, 0], sizes = [91, 128], strides = [1, 1]} : vector<100x128xf32> to vector<91x128xf32>
    %61 = tpu.concatenate %60, %59 in 0 : vector<91x128xf32>, vector<9x128xf32> -> vector<100x128xf32>
    %62 = arith.addf %58, %61 : vector<100x128xf32>
    %c0_58 = arith.constant 0 : index
    %c0_59 = arith.constant 0 : index
    %63 = vector.load %arg6[%c0_58, %c0_59] : memref<100x128xf32, #tpu.memory_space<vmem>>, vector<100x128xf32>
    tpu.vector_store %arg6[%c0_58, %c0_59], %62 {strides = array<i32>} : memref<100x128xf32, #tpu.memory_space<vmem>>, vector<100x128xf32>,
    %c7 = arith.constant 7 : index
    %c0_60 = arith.constant 0 : index
    %c0_61 = arith.constant 0 : index
    %64 = vector.load %arg2[%c7, %c0_60, %c0_61] : memref<9x8x128xbf16, #tpu.memory_space<vmem>>, vector<1x8x128xbf16>
    %65 = vector.shape_cast %64 : vector<1x8x128xbf16> to vector<8x128xbf16>
    %cst_62 = arith.constant dense<0.000000e+00> : vector<100x128xf32>
    %66 = tpu.matmul %1, %65, %cst_62 {dimension_numbers = #tpu.dot_dimension_numbers<[1], [0], [0], [1], [0, 0, 1, 1], [], []>} : vector<100x8xbf16>, vector<8x128xbf16>, vector<100x128xf32> -> vector<100x128xf32>
    %c0_63 = arith.constant 0 : index
    %c0_64 = arith.constant 0 : index
    %67 = vector.load %arg6[%c0_63, %c0_64] : memref<100x128xf32, #tpu.memory_space<vmem>>, vector<100x128xf32>
    %cst_65 = arith.constant 0.000000e+00 : f32
    %68 = vector.broadcast %cst_65 : f32 to vector<10x128xf32>
    %69 = vector.extract_strided_slice %66 {offsets = [10, 0], sizes = [90, 128], strides = [1, 1]} : vector<100x128xf32> to vector<90x128xf32>
    %70 = tpu.concatenate %69, %68 in 0 : vector<90x128xf32>, vector<10x128xf32> -> vector<100x128xf32>
    %71 = arith.addf %67, %70 : vector<100x128xf32>
    %c0_66 = arith.constant 0 : index
    %c0_67 = arith.constant 0 : index
    %72 = vector.load %arg6[%c0_66, %c0_67] : memref<100x128xf32, #tpu.memory_space<vmem>>, vector<100x128xf32>
    tpu.vector_store %arg6[%c0_66, %c0_67], %71 {strides = array<i32>} : memref<100x128xf32, #tpu.memory_space<vmem>>, vector<100x128xf32>,
    %c8 = arith.constant 8 : index
    %c0_68 = arith.constant 0 : index
    %c0_69 = arith.constant 0 : index
    %73 = vector.load %arg2[%c8, %c0_68, %c0_69] : memref<9x8x128xbf16, #tpu.memory_space<vmem>>, vector<1x8x128xbf16>
    %74 = vector.shape_cast %73 : vector<1x8x128xbf16> to vector<8x128xbf16>
    %cst_70 = arith.constant dense<0.000000e+00> : vector<100x128xf32>
    %75 = tpu.matmul %1, %74, %cst_70 {dimension_numbers = #tpu.dot_dimension_numbers<[1], [0], [0], [1], [0, 0, 1, 1], [], []>} : vector<100x8xbf16>, vector<8x128xbf16>, vector<100x128xf32> -> vector<100x128xf32>
    %c0_71 = arith.constant 0 : index
    %c0_72 = arith.constant 0 : index
    %76 = vector.load %arg6[%c0_71, %c0_72] : memref<100x128xf32, #tpu.memory_space<vmem>>, vector<100x128xf32>
    %cst_73 = arith.constant 0.000000e+00 : f32
    %77 = vector.broadcast %cst_73 : f32 to vector<11x128xf32>
    %78 = vector.extract_strided_slice %75 {offsets = [11, 0], sizes = [89, 128], strides = [1, 1]} : vector<100x128xf32> to vector<89x128xf32>
    %79 = tpu.concatenate %78, %77 in 0 : vector<89x128xf32>, vector<11x128xf32> -> vector<100x128xf32>
    %80 = arith.addf %76, %79 : vector<100x128xf32>
    %c0_74 = arith.constant 0 : index
    %c0_75 = arith.constant 0 : index
    %81 = vector.load %arg6[%c0_74, %c0_75] : memref<100x128xf32, #tpu.memory_space<vmem>>, vector<100x128xf32>
    tpu.vector_store %arg6[%c0_74, %c0_75], %80 {strides = array<i32>} : memref<100x128xf32, #tpu.memory_space<vmem>>, vector<100x128xf32>,
    %c0_76 = arith.constant 0 : index
    %c0_77 = arith.constant 0 : index
    %82 = vector.load %arg6[%c0_76, %c0_77] : memref<100x128xf32, #tpu.memory_space<vmem>>, vector<100x128xf32>
    %c0_78 = arith.constant 0 : index
    %c0_79 = arith.constant 0 : index
    %83 = vector.load %arg3[%c0_78, %c0_79] : memref<1x128xf32, #tpu.memory_space<vmem>>, vector<1x128xf32>
    %84 = vector.broadcast %83 : vector<1x128xf32> to vector<100x128xf32>
    %85 = arith.addf %82, %84 : vector<100x128xf32>
    %c0_80 = arith.constant 0 : index
    %c0_81 = arith.constant 0 : index
    %86 = vector.load %arg4[%c0_80, %c0_81] : memref<100x1xf32, #tpu.memory_space<vmem>>, vector<100x1xf32>
    %87 = vector.broadcast %86 : vector<100x1xf32> to vector<100x128xf32>
    %88 = arith.mulf %85, %87 : vector<100x128xf32>
    %89 = arith.truncf %88 : vector<100x128xf32> to vector<100x128xbf16>
    %c0_82 = arith.constant 0 : index
    %c0_83 = arith.constant 0 : index
    %c0_84 = arith.constant 0 : index
    %90 = vector.load %arg5[%c0_82, %c0_83, %c0_84] : memref<1x100x128xbf16, #tpu.memory_space<vmem>>, vector<1x100x128xbf16>
    %91 = vector.shape_cast %90 : vector<1x100x128xbf16> to vector<100x128xbf16>
    %92 = vector.shape_cast %89 : vector<100x128xbf16> to vector<1x100x128xbf16>
    tpu.vector_store %arg5[%c0_82, %c0_83, %c0_84], %92 {strides = array<i32>} : memref<1x100x128xbf16, #tpu.memory_space<vmem>>, vector<1x100x128xbf16>,
    return
  }
  func.func @transform_0(%arg0: i32) -> (i32, i32, i32) {
    %c0_i32 = arith.constant 0 : i32
    %c0_i32_0 = arith.constant 0 : i32
    %c0_i32_1 = arith.constant 0 : i32
    return %arg0, %c0_i32, %c0_i32_0 : i32, i32, i32
  }
  func.func @transform_1(%arg0: i32) -> (i32, i32, i32) {
    %c0_i32 = arith.constant 0 : i32
    %c0_i32_0 = arith.constant 0 : i32
    %c0_i32_1 = arith.constant 0 : i32
    %c0_i32_2 = arith.constant 0 : i32
    return %c0_i32, %c0_i32_0, %c0_i32_1 : i32, i32, i32
  }
  func.func @transform_2(%arg0: i32) -> (i32, i32) {
    %c0_i32 = arith.constant 0 : i32
    %c0_i32_0 = arith.constant 0 : i32
    %c0_i32_1 = arith.constant 0 : i32
    return %c0_i32, %c0_i32_0 : i32, i32
  }
  func.func @transform_3(%arg0: i32) -> (i32, i32) {
    %c0_i32 = arith.constant 0 : i32
    %c0_i32_0 = arith.constant 0 : i32
    %c0_i32_1 = arith.constant 0 : i32
    return %c0_i32, %c0_i32_0 : i32, i32
  }
  func.func @transform_4(%arg0: i32) -> (i32, i32, i32) {
    %c0_i32 = arith.constant 0 : i32
    %c0_i32_0 = arith.constant 0 : i32
    %c0_i32_1 = arith.constant 0 : i32
    return %arg0, %c0_i32, %c0_i32_0 : i32, i32, i32
  }
}

module attributes {stable_mosaic.version = 11 : i64} {
  func.func @_cab_kernel(%arg0: i32, %arg1: memref<1x100x128xbf16, #tpu.memory_space<vmem>>, %arg2: memref<9x128x128xbf16, #tpu.memory_space<vmem>>, %arg3: memref<9x128x128xbf16, #tpu.memory_space<vmem>>, %arg4: memref<16x4xf32, #tpu.memory_space<vmem>>, %arg5: memref<4x16xf32, #tpu.memory_space<vmem>>, %arg6: memref<128x16xf32, #tpu.memory_space<vmem>>, %arg7: memref<16x128xf32, #tpu.memory_space<vmem>>, %arg8: memref<100x1xf32, #tpu.memory_space<vmem>>, %arg9: memref<1x100x128xbf16, #tpu.memory_space<vmem>>, %arg10: memref<100x128xf32, #tpu.memory_space<vmem>>) attributes {dimension_semantics = [#tpu.dimension_semantics<parallel>], iteration_bounds = array<i64: 2>, scalar_prefetch = 0 : i64, scratch_operands = 1 : i64, tpu.core_type = #tpu.core_type<tc>, window_params = [{transform_indices = @transform_0, window_bounds = array<i64: 1, 100, 128>}, {pipeline_mode = #tpu.pipeline_mode<synchronous>, transform_indices = @transform_1, window_bounds = array<i64: 9, 128, 128>}, {pipeline_mode = #tpu.pipeline_mode<synchronous>, transform_indices = @transform_2, window_bounds = array<i64: 9, 128, 128>}, {pipeline_mode = #tpu.pipeline_mode<synchronous>, transform_indices = @transform_3, window_bounds = array<i64: 16, 4>}, {pipeline_mode = #tpu.pipeline_mode<synchronous>, transform_indices = @transform_4, window_bounds = array<i64: 4, 16>}, {pipeline_mode = #tpu.pipeline_mode<synchronous>, transform_indices = @transform_5, window_bounds = array<i64: 128, 16>}, {pipeline_mode = #tpu.pipeline_mode<synchronous>, transform_indices = @transform_6, window_bounds = array<i64: 16, 128>}, {pipeline_mode = #tpu.pipeline_mode<synchronous>, transform_indices = @transform_7, window_bounds = array<i64: 100, 1>}, {transform_indices = @transform_8, window_bounds = array<i64: 1, 100, 128>}]} {
    %c0 = arith.constant 0 : index
    %c0_0 = arith.constant 0 : index
    %0 = vector.load %arg8[%c0, %c0_0] : memref<100x1xf32, #tpu.memory_space<vmem>>, vector<100x1xf32>
    %c0_1 = arith.constant 0 : index
    %c0_2 = arith.constant 0 : index
    %c0_3 = arith.constant 0 : index
    %1 = vector.load %arg1[%c0_1, %c0_2, %c0_3] : memref<1x100x128xbf16, #tpu.memory_space<vmem>>, vector<1x100x128xbf16>
    %2 = vector.shape_cast %1 : vector<1x100x128xbf16> to vector<100x128xbf16>
    %cst = arith.constant 0.000000e+00 : f32
    %3 = vector.broadcast %cst : f32 to vector<100x128xf32>
    %c0_4 = arith.constant 0 : index
    %c0_5 = arith.constant 0 : index
    %4 = vector.load %arg10[%c0_4, %c0_5] : memref<100x128xf32, #tpu.memory_space<vmem>>, vector<100x128xf32>
    tpu.vector_store %arg10[%c0_4, %c0_5], %3 {strides = array<i32>} : memref<100x128xf32, #tpu.memory_space<vmem>>, vector<100x128xf32>,
    %c0_6 = arith.constant 0 : index
    %c0_7 = arith.constant 0 : index
    %c0_8 = arith.constant 0 : index
    %5 = vector.load %arg2[%c0_6, %c0_7, %c0_8] : memref<9x128x128xbf16, #tpu.memory_space<vmem>>, vector<1x128x128xbf16>
    %6 = vector.shape_cast %5 : vector<1x128x128xbf16> to vector<128x128xbf16>
    %cst_9 = arith.constant dense<0.000000e+00> : vector<100x128xf32>
    %7 = tpu.matmul %2, %6, %cst_9 {dimension_numbers = #tpu.dot_dimension_numbers<[1], [0], [0], [1], [0, 0, 1, 1], [], []>} : vector<100x128xbf16>, vector<128x128xbf16>, vector<100x128xf32> -> vector<100x128xf32>
    %c0_10 = arith.constant 0 : index
    %c0_11 = arith.constant 0 : index
    %8 = vector.load %arg10[%c0_10, %c0_11] : memref<100x128xf32, #tpu.memory_space<vmem>>, vector<100x128xf32>
    %cst_12 = arith.constant 0.000000e+00 : f32
    %9 = vector.broadcast %cst_12 : f32 to vector<11x128xf32>
    %10 = vector.extract_strided_slice %7 {offsets = [0, 0], sizes = [89, 128], strides = [1, 1]} : vector<100x128xf32> to vector<89x128xf32>
    %11 = tpu.concatenate %9, %10 in 0 : vector<11x128xf32>, vector<89x128xf32> -> vector<100x128xf32>
    %12 = arith.addf %8, %11 : vector<100x128xf32>
    %c0_13 = arith.constant 0 : index
    %c0_14 = arith.constant 0 : index
    %13 = vector.load %arg10[%c0_13, %c0_14] : memref<100x128xf32, #tpu.memory_space<vmem>>, vector<100x128xf32>
    tpu.vector_store %arg10[%c0_13, %c0_14], %12 {strides = array<i32>} : memref<100x128xf32, #tpu.memory_space<vmem>>, vector<100x128xf32>,
    %c1 = arith.constant 1 : index
    %c0_15 = arith.constant 0 : index
    %c0_16 = arith.constant 0 : index
    %14 = vector.load %arg2[%c1, %c0_15, %c0_16] : memref<9x128x128xbf16, #tpu.memory_space<vmem>>, vector<1x128x128xbf16>
    %15 = vector.shape_cast %14 : vector<1x128x128xbf16> to vector<128x128xbf16>
    %cst_17 = arith.constant dense<0.000000e+00> : vector<100x128xf32>
    %16 = tpu.matmul %2, %15, %cst_17 {dimension_numbers = #tpu.dot_dimension_numbers<[1], [0], [0], [1], [0, 0, 1, 1], [], []>} : vector<100x128xbf16>, vector<128x128xbf16>, vector<100x128xf32> -> vector<100x128xf32>
    %c0_18 = arith.constant 0 : index
    %c0_19 = arith.constant 0 : index
    %17 = vector.load %arg10[%c0_18, %c0_19] : memref<100x128xf32, #tpu.memory_space<vmem>>, vector<100x128xf32>
    %cst_20 = arith.constant 0.000000e+00 : f32
    %18 = vector.broadcast %cst_20 : f32 to vector<10x128xf32>
    %19 = vector.extract_strided_slice %16 {offsets = [0, 0], sizes = [90, 128], strides = [1, 1]} : vector<100x128xf32> to vector<90x128xf32>
    %20 = tpu.concatenate %18, %19 in 0 : vector<10x128xf32>, vector<90x128xf32> -> vector<100x128xf32>
    %21 = arith.addf %17, %20 : vector<100x128xf32>
    %c0_21 = arith.constant 0 : index
    %c0_22 = arith.constant 0 : index
    %22 = vector.load %arg10[%c0_21, %c0_22] : memref<100x128xf32, #tpu.memory_space<vmem>>, vector<100x128xf32>
    tpu.vector_store %arg10[%c0_21, %c0_22], %21 {strides = array<i32>} : memref<100x128xf32, #tpu.memory_space<vmem>>, vector<100x128xf32>,
    %c2 = arith.constant 2 : index
    %c0_23 = arith.constant 0 : index
    %c0_24 = arith.constant 0 : index
    %23 = vector.load %arg2[%c2, %c0_23, %c0_24] : memref<9x128x128xbf16, #tpu.memory_space<vmem>>, vector<1x128x128xbf16>
    %24 = vector.shape_cast %23 : vector<1x128x128xbf16> to vector<128x128xbf16>
    %cst_25 = arith.constant dense<0.000000e+00> : vector<100x128xf32>
    %25 = tpu.matmul %2, %24, %cst_25 {dimension_numbers = #tpu.dot_dimension_numbers<[1], [0], [0], [1], [0, 0, 1, 1], [], []>} : vector<100x128xbf16>, vector<128x128xbf16>, vector<100x128xf32> -> vector<100x128xf32>
    %c0_26 = arith.constant 0 : index
    %c0_27 = arith.constant 0 : index
    %26 = vector.load %arg10[%c0_26, %c0_27] : memref<100x128xf32, #tpu.memory_space<vmem>>, vector<100x128xf32>
    %cst_28 = arith.constant 0.000000e+00 : f32
    %27 = vector.broadcast %cst_28 : f32 to vector<9x128xf32>
    %28 = vector.extract_strided_slice %25 {offsets = [0, 0], sizes = [91, 128], strides = [1, 1]} : vector<100x128xf32> to vector<91x128xf32>
    %29 = tpu.concatenate %27, %28 in 0 : vector<9x128xf32>, vector<91x128xf32> -> vector<100x128xf32>
    %30 = arith.addf %26, %29 : vector<100x128xf32>
    %c0_29 = arith.constant 0 : index
    %c0_30 = arith.constant 0 : index
    %31 = vector.load %arg10[%c0_29, %c0_30] : memref<100x128xf32, #tpu.memory_space<vmem>>, vector<100x128xf32>
    tpu.vector_store %arg10[%c0_29, %c0_30], %30 {strides = array<i32>} : memref<100x128xf32, #tpu.memory_space<vmem>>, vector<100x128xf32>,
    %c3 = arith.constant 3 : index
    %c0_31 = arith.constant 0 : index
    %c0_32 = arith.constant 0 : index
    %32 = vector.load %arg2[%c3, %c0_31, %c0_32] : memref<9x128x128xbf16, #tpu.memory_space<vmem>>, vector<1x128x128xbf16>
    %33 = vector.shape_cast %32 : vector<1x128x128xbf16> to vector<128x128xbf16>
    %cst_33 = arith.constant dense<0.000000e+00> : vector<100x128xf32>
    %34 = tpu.matmul %2, %33, %cst_33 {dimension_numbers = #tpu.dot_dimension_numbers<[1], [0], [0], [1], [0, 0, 1, 1], [], []>} : vector<100x128xbf16>, vector<128x128xbf16>, vector<100x128xf32> -> vector<100x128xf32>
    %c0_34 = arith.constant 0 : index
    %c0_35 = arith.constant 0 : index
    %35 = vector.load %arg10[%c0_34, %c0_35] : memref<100x128xf32, #tpu.memory_space<vmem>>, vector<100x128xf32>
    %cst_36 = arith.constant 0.000000e+00 : f32
    %36 = vector.broadcast %cst_36 : f32 to vector<1x128xf32>
    %37 = vector.extract_strided_slice %34 {offsets = [0, 0], sizes = [99, 128], strides = [1, 1]} : vector<100x128xf32> to vector<99x128xf32>
    %38 = tpu.concatenate %36, %37 in 0 : vector<1x128xf32>, vector<99x128xf32> -> vector<100x128xf32>
    %39 = arith.addf %35, %38 : vector<100x128xf32>
    %c0_37 = arith.constant 0 : index
    %c0_38 = arith.constant 0 : index
    %40 = vector.load %arg10[%c0_37, %c0_38] : memref<100x128xf32, #tpu.memory_space<vmem>>, vector<100x128xf32>
    tpu.vector_store %arg10[%c0_37, %c0_38], %39 {strides = array<i32>} : memref<100x128xf32, #tpu.memory_space<vmem>>, vector<100x128xf32>,
    %c4 = arith.constant 4 : index
    %c0_39 = arith.constant 0 : index
    %c0_40 = arith.constant 0 : index
    %41 = vector.load %arg2[%c4, %c0_39, %c0_40] : memref<9x128x128xbf16, #tpu.memory_space<vmem>>, vector<1x128x128xbf16>
    %42 = vector.shape_cast %41 : vector<1x128x128xbf16> to vector<128x128xbf16>
    %cst_41 = arith.constant dense<0.000000e+00> : vector<100x128xf32>
    %43 = tpu.matmul %2, %42, %cst_41 {dimension_numbers = #tpu.dot_dimension_numbers<[1], [0], [0], [1], [0, 0, 1, 1], [], []>} : vector<100x128xbf16>, vector<128x128xbf16>, vector<100x128xf32> -> vector<100x128xf32>
    %c0_42 = arith.constant 0 : index
    %c0_43 = arith.constant 0 : index
    %44 = vector.load %arg10[%c0_42, %c0_43] : memref<100x128xf32, #tpu.memory_space<vmem>>, vector<100x128xf32>
    %45 = arith.addf %44, %43 : vector<100x128xf32>
    %c0_44 = arith.constant 0 : index
    %c0_45 = arith.constant 0 : index
    %46 = vector.load %arg10[%c0_44, %c0_45] : memref<100x128xf32, #tpu.memory_space<vmem>>, vector<100x128xf32>
    tpu.vector_store %arg10[%c0_44, %c0_45], %45 {strides = array<i32>} : memref<100x128xf32, #tpu.memory_space<vmem>>, vector<100x128xf32>,
    %c5 = arith.constant 5 : index
    %c0_46 = arith.constant 0 : index
    %c0_47 = arith.constant 0 : index
    %47 = vector.load %arg2[%c5, %c0_46, %c0_47] : memref<9x128x128xbf16, #tpu.memory_space<vmem>>, vector<1x128x128xbf16>
    %48 = vector.shape_cast %47 : vector<1x128x128xbf16> to vector<128x128xbf16>
    %cst_48 = arith.constant dense<0.000000e+00> : vector<100x128xf32>
    %49 = tpu.matmul %2, %48, %cst_48 {dimension_numbers = #tpu.dot_dimension_numbers<[1], [0], [0], [1], [0, 0, 1, 1], [], []>} : vector<100x128xbf16>, vector<128x128xbf16>, vector<100x128xf32> -> vector<100x128xf32>
    %c0_49 = arith.constant 0 : index
    %c0_50 = arith.constant 0 : index
    %50 = vector.load %arg10[%c0_49, %c0_50] : memref<100x128xf32, #tpu.memory_space<vmem>>, vector<100x128xf32>
    %cst_51 = arith.constant 0.000000e+00 : f32
    %51 = vector.broadcast %cst_51 : f32 to vector<1x128xf32>
    %52 = vector.extract_strided_slice %49 {offsets = [1, 0], sizes = [99, 128], strides = [1, 1]} : vector<100x128xf32> to vector<99x128xf32>
    %53 = tpu.concatenate %52, %51 in 0 : vector<99x128xf32>, vector<1x128xf32> -> vector<100x128xf32>
    %54 = arith.addf %50, %53 : vector<100x128xf32>
    %c0_52 = arith.constant 0 : index
    %c0_53 = arith.constant 0 : index
    %55 = vector.load %arg10[%c0_52, %c0_53] : memref<100x128xf32, #tpu.memory_space<vmem>>, vector<100x128xf32>
    tpu.vector_store %arg10[%c0_52, %c0_53], %54 {strides = array<i32>} : memref<100x128xf32, #tpu.memory_space<vmem>>, vector<100x128xf32>,
    %c6 = arith.constant 6 : index
    %c0_54 = arith.constant 0 : index
    %c0_55 = arith.constant 0 : index
    %56 = vector.load %arg2[%c6, %c0_54, %c0_55] : memref<9x128x128xbf16, #tpu.memory_space<vmem>>, vector<1x128x128xbf16>
    %57 = vector.shape_cast %56 : vector<1x128x128xbf16> to vector<128x128xbf16>
    %cst_56 = arith.constant dense<0.000000e+00> : vector<100x128xf32>
    %58 = tpu.matmul %2, %57, %cst_56 {dimension_numbers = #tpu.dot_dimension_numbers<[1], [0], [0], [1], [0, 0, 1, 1], [], []>} : vector<100x128xbf16>, vector<128x128xbf16>, vector<100x128xf32> -> vector<100x128xf32>
    %c0_57 = arith.constant 0 : index
    %c0_58 = arith.constant 0 : index
    %59 = vector.load %arg10[%c0_57, %c0_58] : memref<100x128xf32, #tpu.memory_space<vmem>>, vector<100x128xf32>
    %cst_59 = arith.constant 0.000000e+00 : f32
    %60 = vector.broadcast %cst_59 : f32 to vector<9x128xf32>
    %61 = vector.extract_strided_slice %58 {offsets = [9, 0], sizes = [91, 128], strides = [1, 1]} : vector<100x128xf32> to vector<91x128xf32>
    %62 = tpu.concatenate %61, %60 in 0 : vector<91x128xf32>, vector<9x128xf32> -> vector<100x128xf32>
    %63 = arith.addf %59, %62 : vector<100x128xf32>
    %c0_60 = arith.constant 0 : index
    %c0_61 = arith.constant 0 : index
    %64 = vector.load %arg10[%c0_60, %c0_61] : memref<100x128xf32, #tpu.memory_space<vmem>>, vector<100x128xf32>
    tpu.vector_store %arg10[%c0_60, %c0_61], %63 {strides = array<i32>} : memref<100x128xf32, #tpu.memory_space<vmem>>, vector<100x128xf32>,
    %c7 = arith.constant 7 : index
    %c0_62 = arith.constant 0 : index
    %c0_63 = arith.constant 0 : index
    %65 = vector.load %arg2[%c7, %c0_62, %c0_63] : memref<9x128x128xbf16, #tpu.memory_space<vmem>>, vector<1x128x128xbf16>
    %66 = vector.shape_cast %65 : vector<1x128x128xbf16> to vector<128x128xbf16>
    %cst_64 = arith.constant dense<0.000000e+00> : vector<100x128xf32>
    %67 = tpu.matmul %2, %66, %cst_64 {dimension_numbers = #tpu.dot_dimension_numbers<[1], [0], [0], [1], [0, 0, 1, 1], [], []>} : vector<100x128xbf16>, vector<128x128xbf16>, vector<100x128xf32> -> vector<100x128xf32>
    %c0_65 = arith.constant 0 : index
    %c0_66 = arith.constant 0 : index
    %68 = vector.load %arg10[%c0_65, %c0_66] : memref<100x128xf32, #tpu.memory_space<vmem>>, vector<100x128xf32>
    %cst_67 = arith.constant 0.000000e+00 : f32
    %69 = vector.broadcast %cst_67 : f32 to vector<10x128xf32>
    %70 = vector.extract_strided_slice %67 {offsets = [10, 0], sizes = [90, 128], strides = [1, 1]} : vector<100x128xf32> to vector<90x128xf32>
    %71 = tpu.concatenate %70, %69 in 0 : vector<90x128xf32>, vector<10x128xf32> -> vector<100x128xf32>
    %72 = arith.addf %68, %71 : vector<100x128xf32>
    %c0_68 = arith.constant 0 : index
    %c0_69 = arith.constant 0 : index
    %73 = vector.load %arg10[%c0_68, %c0_69] : memref<100x128xf32, #tpu.memory_space<vmem>>, vector<100x128xf32>
    tpu.vector_store %arg10[%c0_68, %c0_69], %72 {strides = array<i32>} : memref<100x128xf32, #tpu.memory_space<vmem>>, vector<100x128xf32>,
    %c8 = arith.constant 8 : index
    %c0_70 = arith.constant 0 : index
    %c0_71 = arith.constant 0 : index
    %74 = vector.load %arg2[%c8, %c0_70, %c0_71] : memref<9x128x128xbf16, #tpu.memory_space<vmem>>, vector<1x128x128xbf16>
    %75 = vector.shape_cast %74 : vector<1x128x128xbf16> to vector<128x128xbf16>
    %cst_72 = arith.constant dense<0.000000e+00> : vector<100x128xf32>
    %76 = tpu.matmul %2, %75, %cst_72 {dimension_numbers = #tpu.dot_dimension_numbers<[1], [0], [0], [1], [0, 0, 1, 1], [], []>} : vector<100x128xbf16>, vector<128x128xbf16>, vector<100x128xf32> -> vector<100x128xf32>
    %c0_73 = arith.constant 0 : index
    %c0_74 = arith.constant 0 : index
    %77 = vector.load %arg10[%c0_73, %c0_74] : memref<100x128xf32, #tpu.memory_space<vmem>>, vector<100x128xf32>
    %cst_75 = arith.constant 0.000000e+00 : f32
    %78 = vector.broadcast %cst_75 : f32 to vector<11x128xf32>
    %79 = vector.extract_strided_slice %76 {offsets = [11, 0], sizes = [89, 128], strides = [1, 1]} : vector<100x128xf32> to vector<89x128xf32>
    %80 = tpu.concatenate %79, %78 in 0 : vector<89x128xf32>, vector<11x128xf32> -> vector<100x128xf32>
    %81 = arith.addf %77, %80 : vector<100x128xf32>
    %c0_76 = arith.constant 0 : index
    %c0_77 = arith.constant 0 : index
    %82 = vector.load %arg10[%c0_76, %c0_77] : memref<100x128xf32, #tpu.memory_space<vmem>>, vector<100x128xf32>
    tpu.vector_store %arg10[%c0_76, %c0_77], %81 {strides = array<i32>} : memref<100x128xf32, #tpu.memory_space<vmem>>, vector<100x128xf32>,
    %c0_78 = arith.constant 0 : index
    %c0_79 = arith.constant 0 : index
    %83 = vector.load %arg10[%c0_78, %c0_79] : memref<100x128xf32, #tpu.memory_space<vmem>>, vector<100x128xf32>
    %cst_80 = arith.constant 0.000000e+00 : f32
    %84 = vector.broadcast %cst_80 : f32 to vector<100x128xf32>
    %85 = arith.maximumf %83, %84 : vector<100x128xf32>
    %86 = vector.broadcast %0 : vector<100x1xf32> to vector<100x128xf32>
    %87 = arith.mulf %85, %86 : vector<100x128xf32>
    %88 = arith.truncf %87 : vector<100x128xf32> to vector<100x128xbf16>
    %cst_81 = arith.constant 0.000000e+00 : f32
    %89 = vector.broadcast %cst_81 : f32 to vector<100x128xf32>
    %c0_82 = arith.constant 0 : index
    %c0_83 = arith.constant 0 : index
    %90 = vector.load %arg10[%c0_82, %c0_83] : memref<100x128xf32, #tpu.memory_space<vmem>>, vector<100x128xf32>
    tpu.vector_store %arg10[%c0_82, %c0_83], %89 {strides = array<i32>} : memref<100x128xf32, #tpu.memory_space<vmem>>, vector<100x128xf32>,
    %c0_84 = arith.constant 0 : index
    %c0_85 = arith.constant 0 : index
    %c0_86 = arith.constant 0 : index
    %91 = vector.load %arg3[%c0_84, %c0_85, %c0_86] : memref<9x128x128xbf16, #tpu.memory_space<vmem>>, vector<1x128x128xbf16>
    %92 = vector.shape_cast %91 : vector<1x128x128xbf16> to vector<128x128xbf16>
    %cst_87 = arith.constant dense<0.000000e+00> : vector<100x128xf32>
    %93 = tpu.matmul %88, %92, %cst_87 {dimension_numbers = #tpu.dot_dimension_numbers<[1], [0], [0], [1], [0, 0, 1, 1], [], []>} : vector<100x128xbf16>, vector<128x128xbf16>, vector<100x128xf32> -> vector<100x128xf32>
    %c0_88 = arith.constant 0 : index
    %c0_89 = arith.constant 0 : index
    %94 = vector.load %arg10[%c0_88, %c0_89] : memref<100x128xf32, #tpu.memory_space<vmem>>, vector<100x128xf32>
    %cst_90 = arith.constant 0.000000e+00 : f32
    %95 = vector.broadcast %cst_90 : f32 to vector<11x128xf32>
    %96 = vector.extract_strided_slice %93 {offsets = [0, 0], sizes = [89, 128], strides = [1, 1]} : vector<100x128xf32> to vector<89x128xf32>
    %97 = tpu.concatenate %95, %96 in 0 : vector<11x128xf32>, vector<89x128xf32> -> vector<100x128xf32>
    %98 = arith.addf %94, %97 : vector<100x128xf32>
    %c0_91 = arith.constant 0 : index
    %c0_92 = arith.constant 0 : index
    %99 = vector.load %arg10[%c0_91, %c0_92] : memref<100x128xf32, #tpu.memory_space<vmem>>, vector<100x128xf32>
    tpu.vector_store %arg10[%c0_91, %c0_92], %98 {strides = array<i32>} : memref<100x128xf32, #tpu.memory_space<vmem>>, vector<100x128xf32>,
    %c1_93 = arith.constant 1 : index
    %c0_94 = arith.constant 0 : index
    %c0_95 = arith.constant 0 : index
    %100 = vector.load %arg3[%c1_93, %c0_94, %c0_95] : memref<9x128x128xbf16, #tpu.memory_space<vmem>>, vector<1x128x128xbf16>
    %101 = vector.shape_cast %100 : vector<1x128x128xbf16> to vector<128x128xbf16>
    %cst_96 = arith.constant dense<0.000000e+00> : vector<100x128xf32>
    %102 = tpu.matmul %88, %101, %cst_96 {dimension_numbers = #tpu.dot_dimension_numbers<[1], [0], [0], [1], [0, 0, 1, 1], [], []>} : vector<100x128xbf16>, vector<128x128xbf16>, vector<100x128xf32> -> vector<100x128xf32>
    %c0_97 = arith.constant 0 : index
    %c0_98 = arith.constant 0 : index
    %103 = vector.load %arg10[%c0_97, %c0_98] : memref<100x128xf32, #tpu.memory_space<vmem>>, vector<100x128xf32>
    %cst_99 = arith.constant 0.000000e+00 : f32
    %104 = vector.broadcast %cst_99 : f32 to vector<10x128xf32>
    %105 = vector.extract_strided_slice %102 {offsets = [0, 0], sizes = [90, 128], strides = [1, 1]} : vector<100x128xf32> to vector<90x128xf32>
    %106 = tpu.concatenate %104, %105 in 0 : vector<10x128xf32>, vector<90x128xf32> -> vector<100x128xf32>
    %107 = arith.addf %103, %106 : vector<100x128xf32>
    %c0_100 = arith.constant 0 : index
    %c0_101 = arith.constant 0 : index
    %108 = vector.load %arg10[%c0_100, %c0_101] : memref<100x128xf32, #tpu.memory_space<vmem>>, vector<100x128xf32>
    tpu.vector_store %arg10[%c0_100, %c0_101], %107 {strides = array<i32>} : memref<100x128xf32, #tpu.memory_space<vmem>>, vector<100x128xf32>,
    %c2_102 = arith.constant 2 : index
    %c0_103 = arith.constant 0 : index
    %c0_104 = arith.constant 0 : index
    %109 = vector.load %arg3[%c2_102, %c0_103, %c0_104] : memref<9x128x128xbf16, #tpu.memory_space<vmem>>, vector<1x128x128xbf16>
    %110 = vector.shape_cast %109 : vector<1x128x128xbf16> to vector<128x128xbf16>
    %cst_105 = arith.constant dense<0.000000e+00> : vector<100x128xf32>
    %111 = tpu.matmul %88, %110, %cst_105 {dimension_numbers = #tpu.dot_dimension_numbers<[1], [0], [0], [1], [0, 0, 1, 1], [], []>} : vector<100x128xbf16>, vector<128x128xbf16>, vector<100x128xf32> -> vector<100x128xf32>
    %c0_106 = arith.constant 0 : index
    %c0_107 = arith.constant 0 : index
    %112 = vector.load %arg10[%c0_106, %c0_107] : memref<100x128xf32, #tpu.memory_space<vmem>>, vector<100x128xf32>
    %cst_108 = arith.constant 0.000000e+00 : f32
    %113 = vector.broadcast %cst_108 : f32 to vector<9x128xf32>
    %114 = vector.extract_strided_slice %111 {offsets = [0, 0], sizes = [91, 128], strides = [1, 1]} : vector<100x128xf32> to vector<91x128xf32>
    %115 = tpu.concatenate %113, %114 in 0 : vector<9x128xf32>, vector<91x128xf32> -> vector<100x128xf32>
    %116 = arith.addf %112, %115 : vector<100x128xf32>
    %c0_109 = arith.constant 0 : index
    %c0_110 = arith.constant 0 : index
    %117 = vector.load %arg10[%c0_109, %c0_110] : memref<100x128xf32, #tpu.memory_space<vmem>>, vector<100x128xf32>
    tpu.vector_store %arg10[%c0_109, %c0_110], %116 {strides = array<i32>} : memref<100x128xf32, #tpu.memory_space<vmem>>, vector<100x128xf32>,
    %c3_111 = arith.constant 3 : index
    %c0_112 = arith.constant 0 : index
    %c0_113 = arith.constant 0 : index
    %118 = vector.load %arg3[%c3_111, %c0_112, %c0_113] : memref<9x128x128xbf16, #tpu.memory_space<vmem>>, vector<1x128x128xbf16>
    %119 = vector.shape_cast %118 : vector<1x128x128xbf16> to vector<128x128xbf16>
    %cst_114 = arith.constant dense<0.000000e+00> : vector<100x128xf32>
    %120 = tpu.matmul %88, %119, %cst_114 {dimension_numbers = #tpu.dot_dimension_numbers<[1], [0], [0], [1], [0, 0, 1, 1], [], []>} : vector<100x128xbf16>, vector<128x128xbf16>, vector<100x128xf32> -> vector<100x128xf32>
    %c0_115 = arith.constant 0 : index
    %c0_116 = arith.constant 0 : index
    %121 = vector.load %arg10[%c0_115, %c0_116] : memref<100x128xf32, #tpu.memory_space<vmem>>, vector<100x128xf32>
    %cst_117 = arith.constant 0.000000e+00 : f32
    %122 = vector.broadcast %cst_117 : f32 to vector<1x128xf32>
    %123 = vector.extract_strided_slice %120 {offsets = [0, 0], sizes = [99, 128], strides = [1, 1]} : vector<100x128xf32> to vector<99x128xf32>
    %124 = tpu.concatenate %122, %123 in 0 : vector<1x128xf32>, vector<99x128xf32> -> vector<100x128xf32>
    %125 = arith.addf %121, %124 : vector<100x128xf32>
    %c0_118 = arith.constant 0 : index
    %c0_119 = arith.constant 0 : index
    %126 = vector.load %arg10[%c0_118, %c0_119] : memref<100x128xf32, #tpu.memory_space<vmem>>, vector<100x128xf32>
    tpu.vector_store %arg10[%c0_118, %c0_119], %125 {strides = array<i32>} : memref<100x128xf32, #tpu.memory_space<vmem>>, vector<100x128xf32>,
    %c4_120 = arith.constant 4 : index
    %c0_121 = arith.constant 0 : index
    %c0_122 = arith.constant 0 : index
    %127 = vector.load %arg3[%c4_120, %c0_121, %c0_122] : memref<9x128x128xbf16, #tpu.memory_space<vmem>>, vector<1x128x128xbf16>
    %128 = vector.shape_cast %127 : vector<1x128x128xbf16> to vector<128x128xbf16>
    %cst_123 = arith.constant dense<0.000000e+00> : vector<100x128xf32>
    %129 = tpu.matmul %88, %128, %cst_123 {dimension_numbers = #tpu.dot_dimension_numbers<[1], [0], [0], [1], [0, 0, 1, 1], [], []>} : vector<100x128xbf16>, vector<128x128xbf16>, vector<100x128xf32> -> vector<100x128xf32>
    %c0_124 = arith.constant 0 : index
    %c0_125 = arith.constant 0 : index
    %130 = vector.load %arg10[%c0_124, %c0_125] : memref<100x128xf32, #tpu.memory_space<vmem>>, vector<100x128xf32>
    %131 = arith.addf %130, %129 : vector<100x128xf32>
    %c0_126 = arith.constant 0 : index
    %c0_127 = arith.constant 0 : index
    %132 = vector.load %arg10[%c0_126, %c0_127] : memref<100x128xf32, #tpu.memory_space<vmem>>, vector<100x128xf32>
    tpu.vector_store %arg10[%c0_126, %c0_127], %131 {strides = array<i32>} : memref<100x128xf32, #tpu.memory_space<vmem>>, vector<100x128xf32>,
    %c5_128 = arith.constant 5 : index
    %c0_129 = arith.constant 0 : index
    %c0_130 = arith.constant 0 : index
    %133 = vector.load %arg3[%c5_128, %c0_129, %c0_130] : memref<9x128x128xbf16, #tpu.memory_space<vmem>>, vector<1x128x128xbf16>
    %134 = vector.shape_cast %133 : vector<1x128x128xbf16> to vector<128x128xbf16>
    %cst_131 = arith.constant dense<0.000000e+00> : vector<100x128xf32>
    %135 = tpu.matmul %88, %134, %cst_131 {dimension_numbers = #tpu.dot_dimension_numbers<[1], [0], [0], [1], [0, 0, 1, 1], [], []>} : vector<100x128xbf16>, vector<128x128xbf16>, vector<100x128xf32> -> vector<100x128xf32>
    %c0_132 = arith.constant 0 : index
    %c0_133 = arith.constant 0 : index
    %136 = vector.load %arg10[%c0_132, %c0_133] : memref<100x128xf32, #tpu.memory_space<vmem>>, vector<100x128xf32>
    %cst_134 = arith.constant 0.000000e+00 : f32
    %137 = vector.broadcast %cst_134 : f32 to vector<1x128xf32>
    %138 = vector.extract_strided_slice %135 {offsets = [1, 0], sizes = [99, 128], strides = [1, 1]} : vector<100x128xf32> to vector<99x128xf32>
    %139 = tpu.concatenate %138, %137 in 0 : vector<99x128xf32>, vector<1x128xf32> -> vector<100x128xf32>
    %140 = arith.addf %136, %139 : vector<100x128xf32>
    %c0_135 = arith.constant 0 : index
    %c0_136 = arith.constant 0 : index
    %141 = vector.load %arg10[%c0_135, %c0_136] : memref<100x128xf32, #tpu.memory_space<vmem>>, vector<100x128xf32>
    tpu.vector_store %arg10[%c0_135, %c0_136], %140 {strides = array<i32>} : memref<100x128xf32, #tpu.memory_space<vmem>>, vector<100x128xf32>,
    %c6_137 = arith.constant 6 : index
    %c0_138 = arith.constant 0 : index
    %c0_139 = arith.constant 0 : index
    %142 = vector.load %arg3[%c6_137, %c0_138, %c0_139] : memref<9x128x128xbf16, #tpu.memory_space<vmem>>, vector<1x128x128xbf16>
    %143 = vector.shape_cast %142 : vector<1x128x128xbf16> to vector<128x128xbf16>
    %cst_140 = arith.constant dense<0.000000e+00> : vector<100x128xf32>
    %144 = tpu.matmul %88, %143, %cst_140 {dimension_numbers = #tpu.dot_dimension_numbers<[1], [0], [0], [1], [0, 0, 1, 1], [], []>} : vector<100x128xbf16>, vector<128x128xbf16>, vector<100x128xf32> -> vector<100x128xf32>
    %c0_141 = arith.constant 0 : index
    %c0_142 = arith.constant 0 : index
    %145 = vector.load %arg10[%c0_141, %c0_142] : memref<100x128xf32, #tpu.memory_space<vmem>>, vector<100x128xf32>
    %cst_143 = arith.constant 0.000000e+00 : f32
    %146 = vector.broadcast %cst_143 : f32 to vector<9x128xf32>
    %147 = vector.extract_strided_slice %144 {offsets = [9, 0], sizes = [91, 128], strides = [1, 1]} : vector<100x128xf32> to vector<91x128xf32>
    %148 = tpu.concatenate %147, %146 in 0 : vector<91x128xf32>, vector<9x128xf32> -> vector<100x128xf32>
    %149 = arith.addf %145, %148 : vector<100x128xf32>
    %c0_144 = arith.constant 0 : index
    %c0_145 = arith.constant 0 : index
    %150 = vector.load %arg10[%c0_144, %c0_145] : memref<100x128xf32, #tpu.memory_space<vmem>>, vector<100x128xf32>
    tpu.vector_store %arg10[%c0_144, %c0_145], %149 {strides = array<i32>} : memref<100x128xf32, #tpu.memory_space<vmem>>, vector<100x128xf32>,
    %c7_146 = arith.constant 7 : index
    %c0_147 = arith.constant 0 : index
    %c0_148 = arith.constant 0 : index
    %151 = vector.load %arg3[%c7_146, %c0_147, %c0_148] : memref<9x128x128xbf16, #tpu.memory_space<vmem>>, vector<1x128x128xbf16>
    %152 = vector.shape_cast %151 : vector<1x128x128xbf16> to vector<128x128xbf16>
    %cst_149 = arith.constant dense<0.000000e+00> : vector<100x128xf32>
    %153 = tpu.matmul %88, %152, %cst_149 {dimension_numbers = #tpu.dot_dimension_numbers<[1], [0], [0], [1], [0, 0, 1, 1], [], []>} : vector<100x128xbf16>, vector<128x128xbf16>, vector<100x128xf32> -> vector<100x128xf32>
    %c0_150 = arith.constant 0 : index
    %c0_151 = arith.constant 0 : index
    %154 = vector.load %arg10[%c0_150, %c0_151] : memref<100x128xf32, #tpu.memory_space<vmem>>, vector<100x128xf32>
    %cst_152 = arith.constant 0.000000e+00 : f32
    %155 = vector.broadcast %cst_152 : f32 to vector<10x128xf32>
    %156 = vector.extract_strided_slice %153 {offsets = [10, 0], sizes = [90, 128], strides = [1, 1]} : vector<100x128xf32> to vector<90x128xf32>
    %157 = tpu.concatenate %156, %155 in 0 : vector<90x128xf32>, vector<10x128xf32> -> vector<100x128xf32>
    %158 = arith.addf %154, %157 : vector<100x128xf32>
    %c0_153 = arith.constant 0 : index
    %c0_154 = arith.constant 0 : index
    %159 = vector.load %arg10[%c0_153, %c0_154] : memref<100x128xf32, #tpu.memory_space<vmem>>, vector<100x128xf32>
    tpu.vector_store %arg10[%c0_153, %c0_154], %158 {strides = array<i32>} : memref<100x128xf32, #tpu.memory_space<vmem>>, vector<100x128xf32>,
    %c8_155 = arith.constant 8 : index
    %c0_156 = arith.constant 0 : index
    %c0_157 = arith.constant 0 : index
    %160 = vector.load %arg3[%c8_155, %c0_156, %c0_157] : memref<9x128x128xbf16, #tpu.memory_space<vmem>>, vector<1x128x128xbf16>
    %161 = vector.shape_cast %160 : vector<1x128x128xbf16> to vector<128x128xbf16>
    %cst_158 = arith.constant dense<0.000000e+00> : vector<100x128xf32>
    %162 = tpu.matmul %88, %161, %cst_158 {dimension_numbers = #tpu.dot_dimension_numbers<[1], [0], [0], [1], [0, 0, 1, 1], [], []>} : vector<100x128xbf16>, vector<128x128xbf16>, vector<100x128xf32> -> vector<100x128xf32>
    %c0_159 = arith.constant 0 : index
    %c0_160 = arith.constant 0 : index
    %163 = vector.load %arg10[%c0_159, %c0_160] : memref<100x128xf32, #tpu.memory_space<vmem>>, vector<100x128xf32>
    %cst_161 = arith.constant 0.000000e+00 : f32
    %164 = vector.broadcast %cst_161 : f32 to vector<11x128xf32>
    %165 = vector.extract_strided_slice %162 {offsets = [11, 0], sizes = [89, 128], strides = [1, 1]} : vector<100x128xf32> to vector<89x128xf32>
    %166 = tpu.concatenate %165, %164 in 0 : vector<89x128xf32>, vector<11x128xf32> -> vector<100x128xf32>
    %167 = arith.addf %163, %166 : vector<100x128xf32>
    %c0_162 = arith.constant 0 : index
    %c0_163 = arith.constant 0 : index
    %168 = vector.load %arg10[%c0_162, %c0_163] : memref<100x128xf32, #tpu.memory_space<vmem>>, vector<100x128xf32>
    tpu.vector_store %arg10[%c0_162, %c0_163], %167 {strides = array<i32>} : memref<100x128xf32, #tpu.memory_space<vmem>>, vector<100x128xf32>,
    %c0_164 = arith.constant 0 : index
    %c0_165 = arith.constant 0 : index
    %169 = vector.load %arg10[%c0_164, %c0_165] : memref<100x128xf32, #tpu.memory_space<vmem>>, vector<100x128xf32>
    %170 = vector.broadcast %0 : vector<100x1xf32> to vector<100x128xf32>
    %171 = arith.mulf %169, %170 : vector<100x128xf32>
    %cst_166 = arith.constant dense<0.000000e+00> : vector<128xf32>
    %172 = vector.multi_reduction <add>, %171, %cst_166 [0] : vector<100x128xf32> to vector<128xf32>
    %173 = vector.shape_cast %172 : vector<128xf32> to vector<1x128xf32>
    %c0_167 = arith.constant 0 : index
    %c0_168 = arith.constant 0 : index
    %174 = vector.load %arg6[%c0_167, %c0_168] : memref<128x16xf32, #tpu.memory_space<vmem>>, vector<128x16xf32>
    %cst_169 = arith.constant dense<0.000000e+00> : vector<1x16xf32>
    %175 = tpu.matmul %173, %174, %cst_169 {dimension_numbers = #tpu.dot_dimension_numbers<[1], [0], [0], [1], [0, 0, 1, 1], [], []>} : vector<1x128xf32>, vector<128x16xf32>, vector<1x16xf32> -> vector<1x16xf32>
    %c0_170 = arith.constant 0 : index
    %c0_171 = arith.constant 0 : index
    %176 = vector.load %arg4[%c0_170, %c0_171] : memref<16x4xf32, #tpu.memory_space<vmem>>, vector<16x4xf32>
    %cst_172 = arith.constant dense<0.000000e+00> : vector<1x4xf32>
    %177 = tpu.matmul %175, %176, %cst_172 {dimension_numbers = #tpu.dot_dimension_numbers<[1], [0], [0], [1], [0, 0, 1, 1], [], []>} : vector<1x16xf32>, vector<16x4xf32>, vector<1x4xf32> -> vector<1x4xf32>
    %cst_173 = arith.constant 0.000000e+00 : f32
    %178 = vector.broadcast %cst_173 : f32 to vector<1x4xf32>
    %179 = arith.maximumf %177, %178 : vector<1x4xf32>
    %c0_174 = arith.constant 0 : index
    %c0_175 = arith.constant 0 : index
    %180 = vector.load %arg5[%c0_174, %c0_175] : memref<4x16xf32, #tpu.memory_space<vmem>>, vector<4x16xf32>
    %cst_176 = arith.constant dense<0.000000e+00> : vector<1x16xf32>
    %181 = tpu.matmul %179, %180, %cst_176 {dimension_numbers = #tpu.dot_dimension_numbers<[1], [0], [0], [1], [0, 0, 1, 1], [], []>} : vector<1x4xf32>, vector<4x16xf32>, vector<1x16xf32> -> vector<1x16xf32>
    %182 = arith.negf %181 : vector<1x16xf32>
    %183 = math.exp %182 : vector<1x16xf32>
    %cst_177 = arith.constant 1.000000e+00 : f32
    %184 = vector.broadcast %cst_177 : f32 to vector<1x16xf32>
    %185 = arith.addf %184, %183 : vector<1x16xf32>
    %186 = arith.divf %184, %185 : vector<1x16xf32>
    %c0_178 = arith.constant 0 : index
    %c0_179 = arith.constant 0 : index
    %187 = vector.load %arg7[%c0_178, %c0_179] : memref<16x128xf32, #tpu.memory_space<vmem>>, vector<16x128xf32>
    %cst_180 = arith.constant dense<0.000000e+00> : vector<1x128xf32>
    %188 = tpu.matmul %186, %187, %cst_180 {dimension_numbers = #tpu.dot_dimension_numbers<[1], [0], [0], [1], [0, 0, 1, 1], [], []>} : vector<1x16xf32>, vector<16x128xf32>, vector<1x128xf32> -> vector<1x128xf32>
    %189 = vector.broadcast %188 : vector<1x128xf32> to vector<100x128xf32>
    %190 = arith.mulf %171, %189 : vector<100x128xf32>
    %191 = arith.extf %2 : vector<100x128xbf16> to vector<100x128xf32>
    %192 = arith.addf %190, %191 : vector<100x128xf32>
    %193 = arith.truncf %192 : vector<100x128xf32> to vector<100x128xbf16>
    %c0_181 = arith.constant 0 : index
    %c0_182 = arith.constant 0 : index
    %c0_183 = arith.constant 0 : index
    %194 = vector.load %arg9[%c0_181, %c0_182, %c0_183] : memref<1x100x128xbf16, #tpu.memory_space<vmem>>, vector<1x100x128xbf16>
    %195 = vector.shape_cast %194 : vector<1x100x128xbf16> to vector<100x128xbf16>
    %196 = vector.shape_cast %193 : vector<100x128xbf16> to vector<1x100x128xbf16>
    tpu.vector_store %arg9[%c0_181, %c0_182, %c0_183], %196 {strides = array<i32>} : memref<1x100x128xbf16, #tpu.memory_space<vmem>>, vector<1x100x128xbf16>,
    return
  }
  func.func @transform_0(%arg0: i32) -> (i32, i32, i32) {
    %c0_i32 = arith.constant 0 : i32
    %c0_i32_0 = arith.constant 0 : i32
    %c0_i32_1 = arith.constant 0 : i32
    return %arg0, %c0_i32, %c0_i32_0 : i32, i32, i32
  }
  func.func @transform_1(%arg0: i32) -> (i32, i32, i32) {
    %c0_i32 = arith.constant 0 : i32
    %c0_i32_0 = arith.constant 0 : i32
    %c0_i32_1 = arith.constant 0 : i32
    %c0_i32_2 = arith.constant 0 : i32
    return %c0_i32, %c0_i32_0, %c0_i32_1 : i32, i32, i32
  }
  func.func @transform_2(%arg0: i32) -> (i32, i32, i32) {
    %c0_i32 = arith.constant 0 : i32
    %c0_i32_0 = arith.constant 0 : i32
    %c0_i32_1 = arith.constant 0 : i32
    %c0_i32_2 = arith.constant 0 : i32
    return %c0_i32, %c0_i32_0, %c0_i32_1 : i32, i32, i32
  }
  func.func @transform_3(%arg0: i32) -> (i32, i32) {
    %c0_i32 = arith.constant 0 : i32
    %c0_i32_0 = arith.constant 0 : i32
    %c0_i32_1 = arith.constant 0 : i32
    return %c0_i32, %c0_i32_0 : i32, i32
  }
  func.func @transform_4(%arg0: i32) -> (i32, i32) {
    %c0_i32 = arith.constant 0 : i32
    %c0_i32_0 = arith.constant 0 : i32
    %c0_i32_1 = arith.constant 0 : i32
    return %c0_i32, %c0_i32_0 : i32, i32
  }
  func.func @transform_5(%arg0: i32) -> (i32, i32) {
    %c0_i32 = arith.constant 0 : i32
    %c0_i32_0 = arith.constant 0 : i32
    %c0_i32_1 = arith.constant 0 : i32
    return %c0_i32, %c0_i32_0 : i32, i32
  }
  func.func @transform_6(%arg0: i32) -> (i32, i32) {
    %c0_i32 = arith.constant 0 : i32
    %c0_i32_0 = arith.constant 0 : i32
    %c0_i32_1 = arith.constant 0 : i32
    return %c0_i32, %c0_i32_0 : i32, i32
  }
  func.func @transform_7(%arg0: i32) -> (i32, i32) {
    %c0_i32 = arith.constant 0 : i32
    %c0_i32_0 = arith.constant 0 : i32
    %c0_i32_1 = arith.constant 0 : i32
    return %c0_i32, %c0_i32_0 : i32, i32
  }
  func.func @transform_8(%arg0: i32) -> (i32, i32, i32) {
    %c0_i32 = arith.constant 0 : i32
    %c0_i32_0 = arith.constant 0 : i32
    %c0_i32_1 = arith.constant 0 : i32
    return %arg0, %c0_i32, %c0_i32_0 : i32, i32, i32
  }
}

module attributes {stable_mosaic.version = 11 : i64} {
  func.func @_rowlinear_kernel(%arg0: i32, %arg1: memref<1x36x64xbf16, #tpu.memory_space<vmem>>, %arg2: memref<64x96xbf16, #tpu.memory_space<vmem>>, %arg3: memref<1x36x96xbf16, #tpu.memory_space<vmem>>) attributes {dimension_semantics = [#tpu.dimension_semantics<parallel>], iteration_bounds = array<i64: 2>, scalar_prefetch = 0 : i64, scratch_operands = 0 : i64, tpu.core_type = #tpu.core_type<tc>, window_params = [{transform_indices = @transform_0, window_bounds = array<i64: 1, 36, 64>}, {pipeline_mode = #tpu.pipeline_mode<synchronous>, transform_indices = @transform_1, window_bounds = array<i64: 64, 96>}, {transform_indices = @transform_2, window_bounds = array<i64: 1, 36, 96>}]} {
    %c0 = arith.constant 0 : index
    %c0_0 = arith.constant 0 : index
    %c0_1 = arith.constant 0 : index
    %0 = vector.load %arg1[%c0, %c0_0, %c0_1] : memref<1x36x64xbf16, #tpu.memory_space<vmem>>, vector<1x36x64xbf16>
    %1 = vector.shape_cast %0 : vector<1x36x64xbf16> to vector<36x64xbf16>
    %c0_2 = arith.constant 0 : index
    %c0_3 = arith.constant 0 : index
    %2 = vector.load %arg2[%c0_2, %c0_3] : memref<64x96xbf16, #tpu.memory_space<vmem>>, vector<64x96xbf16>
    %cst = arith.constant dense<0.000000e+00> : vector<36x96xf32>
    %3 = tpu.matmul %1, %2, %cst {dimension_numbers = #tpu.dot_dimension_numbers<[1], [0], [0], [1], [0, 0, 1, 1], [], []>} : vector<36x64xbf16>, vector<64x96xbf16>, vector<36x96xf32> -> vector<36x96xf32>
    %4 = arith.truncf %3 : vector<36x96xf32> to vector<36x96xbf16>
    %c0_4 = arith.constant 0 : index
    %c0_5 = arith.constant 0 : index
    %c0_6 = arith.constant 0 : index
    %5 = vector.load %arg3[%c0_4, %c0_5, %c0_6] : memref<1x36x96xbf16, #tpu.memory_space<vmem>>, vector<1x36x96xbf16>
    %6 = vector.shape_cast %5 : vector<1x36x96xbf16> to vector<36x96xbf16>
    %7 = vector.shape_cast %4 : vector<36x96xbf16> to vector<1x36x96xbf16>
    tpu.vector_store %arg3[%c0_4, %c0_5, %c0_6], %7 {strides = array<i32>} : memref<1x36x96xbf16, #tpu.memory_space<vmem>>, vector<1x36x96xbf16>,
    return
  }
  func.func @transform_0(%arg0: i32) -> (i32, i32, i32) {
    %c0_i32 = arith.constant 0 : i32
    %c0_i32_0 = arith.constant 0 : i32
    %c0_i32_1 = arith.constant 0 : i32
    return %arg0, %c0_i32, %c0_i32_0 : i32, i32, i32
  }
  func.func @transform_1(%arg0: i32) -> (i32, i32) {
    %c0_i32 = arith.constant 0 : i32
    %c0_i32_0 = arith.constant 0 : i32
    %c0_i32_1 = arith.constant 0 : i32
    return %c0_i32, %c0_i32_0 : i32, i32
  }
  func.func @transform_2(%arg0: i32) -> (i32, i32, i32) {
    %c0_i32 = arith.constant 0 : i32
    %c0_i32_0 = arith.constant 0 : i32
    %c0_i32_1 = arith.constant 0 : i32
    return %arg0, %c0_i32, %c0_i32_0 : i32, i32, i32
  }
}

module attributes {stable_mosaic.version = 11 : i64} {
  func.func @_cab_kernel(%arg0: i32, %arg1: memref<1x36x96xbf16, #tpu.memory_space<vmem>>, %arg2: memref<9x96x96xbf16, #tpu.memory_space<vmem>>, %arg3: memref<9x96x96xbf16, #tpu.memory_space<vmem>>, %arg4: memref<24x6xf32, #tpu.memory_space<vmem>>, %arg5: memref<6x24xf32, #tpu.memory_space<vmem>>, %arg6: memref<96x24xf32, #tpu.memory_space<vmem>>, %arg7: memref<24x96xf32, #tpu.memory_space<vmem>>, %arg8: memref<36x1xf32, #tpu.memory_space<vmem>>, %arg9: memref<1x36x96xbf16, #tpu.memory_space<vmem>>, %arg10: memref<36x96xf32, #tpu.memory_space<vmem>>) attributes {dimension_semantics = [#tpu.dimension_semantics<parallel>], iteration_bounds = array<i64: 2>, scalar_prefetch = 0 : i64, scratch_operands = 1 : i64, tpu.core_type = #tpu.core_type<tc>, window_params = [{transform_indices = @transform_0, window_bounds = array<i64: 1, 36, 96>}, {pipeline_mode = #tpu.pipeline_mode<synchronous>, transform_indices = @transform_1, window_bounds = array<i64: 9, 96, 96>}, {pipeline_mode = #tpu.pipeline_mode<synchronous>, transform_indices = @transform_2, window_bounds = array<i64: 9, 96, 96>}, {pipeline_mode = #tpu.pipeline_mode<synchronous>, transform_indices = @transform_3, window_bounds = array<i64: 24, 6>}, {pipeline_mode = #tpu.pipeline_mode<synchronous>, transform_indices = @transform_4, window_bounds = array<i64: 6, 24>}, {pipeline_mode = #tpu.pipeline_mode<synchronous>, transform_indices = @transform_5, window_bounds = array<i64: 96, 24>}, {pipeline_mode = #tpu.pipeline_mode<synchronous>, transform_indices = @transform_6, window_bounds = array<i64: 24, 96>}, {pipeline_mode = #tpu.pipeline_mode<synchronous>, transform_indices = @transform_7, window_bounds = array<i64: 36, 1>}, {transform_indices = @transform_8, window_bounds = array<i64: 1, 36, 96>}]} {
    %c0 = arith.constant 0 : index
    %c0_0 = arith.constant 0 : index
    %0 = vector.load %arg8[%c0, %c0_0] : memref<36x1xf32, #tpu.memory_space<vmem>>, vector<36x1xf32>
    %c0_1 = arith.constant 0 : index
    %c0_2 = arith.constant 0 : index
    %c0_3 = arith.constant 0 : index
    %1 = vector.load %arg1[%c0_1, %c0_2, %c0_3] : memref<1x36x96xbf16, #tpu.memory_space<vmem>>, vector<1x36x96xbf16>
    %2 = vector.shape_cast %1 : vector<1x36x96xbf16> to vector<36x96xbf16>
    %cst = arith.constant 0.000000e+00 : f32
    %3 = vector.broadcast %cst : f32 to vector<36x96xf32>
    %c0_4 = arith.constant 0 : index
    %c0_5 = arith.constant 0 : index
    %4 = vector.load %arg10[%c0_4, %c0_5] : memref<36x96xf32, #tpu.memory_space<vmem>>, vector<36x96xf32>
    tpu.vector_store %arg10[%c0_4, %c0_5], %3 {strides = array<i32>} : memref<36x96xf32, #tpu.memory_space<vmem>>, vector<36x96xf32>,
    %c0_6 = arith.constant 0 : index
    %c0_7 = arith.constant 0 : index
    %c0_8 = arith.constant 0 : index
    %5 = vector.load %arg2[%c0_6, %c0_7, %c0_8] : memref<9x96x96xbf16, #tpu.memory_space<vmem>>, vector<1x96x96xbf16>
    %6 = vector.shape_cast %5 : vector<1x96x96xbf16> to vector<96x96xbf16>
    %cst_9 = arith.constant dense<0.000000e+00> : vector<36x96xf32>
    %7 = tpu.matmul %2, %6, %cst_9 {dimension_numbers = #tpu.dot_dimension_numbers<[1], [0], [0], [1], [0, 0, 1, 1], [], []>} : vector<36x96xbf16>, vector<96x96xbf16>, vector<36x96xf32> -> vector<36x96xf32>
    %c0_10 = arith.constant 0 : index
    %c0_11 = arith.constant 0 : index
    %8 = vector.load %arg10[%c0_10, %c0_11] : memref<36x96xf32, #tpu.memory_space<vmem>>, vector<36x96xf32>
    %cst_12 = arith.constant 0.000000e+00 : f32
    %9 = vector.broadcast %cst_12 : f32 to vector<7x96xf32>
    %10 = vector.extract_strided_slice %7 {offsets = [0, 0], sizes = [29, 96], strides = [1, 1]} : vector<36x96xf32> to vector<29x96xf32>
    %11 = tpu.concatenate %9, %10 in 0 : vector<7x96xf32>, vector<29x96xf32> -> vector<36x96xf32>
    %12 = arith.addf %8, %11 : vector<36x96xf32>
    %c0_13 = arith.constant 0 : index
    %c0_14 = arith.constant 0 : index
    %13 = vector.load %arg10[%c0_13, %c0_14] : memref<36x96xf32, #tpu.memory_space<vmem>>, vector<36x96xf32>
    tpu.vector_store %arg10[%c0_13, %c0_14], %12 {strides = array<i32>} : memref<36x96xf32, #tpu.memory_space<vmem>>, vector<36x96xf32>,
    %c1 = arith.constant 1 : index
    %c0_15 = arith.constant 0 : index
    %c0_16 = arith.constant 0 : index
    %14 = vector.load %arg2[%c1, %c0_15, %c0_16] : memref<9x96x96xbf16, #tpu.memory_space<vmem>>, vector<1x96x96xbf16>
    %15 = vector.shape_cast %14 : vector<1x96x96xbf16> to vector<96x96xbf16>
    %cst_17 = arith.constant dense<0.000000e+00> : vector<36x96xf32>
    %16 = tpu.matmul %2, %15, %cst_17 {dimension_numbers = #tpu.dot_dimension_numbers<[1], [0], [0], [1], [0, 0, 1, 1], [], []>} : vector<36x96xbf16>, vector<96x96xbf16>, vector<36x96xf32> -> vector<36x96xf32>
    %c0_18 = arith.constant 0 : index
    %c0_19 = arith.constant 0 : index
    %17 = vector.load %arg10[%c0_18, %c0_19] : memref<36x96xf32, #tpu.memory_space<vmem>>, vector<36x96xf32>
    %cst_20 = arith.constant 0.000000e+00 : f32
    %18 = vector.broadcast %cst_20 : f32 to vector<6x96xf32>
    %19 = vector.extract_strided_slice %16 {offsets = [0, 0], sizes = [30, 96], strides = [1, 1]} : vector<36x96xf32> to vector<30x96xf32>
    %20 = tpu.concatenate %18, %19 in 0 : vector<6x96xf32>, vector<30x96xf32> -> vector<36x96xf32>
    %21 = arith.addf %17, %20 : vector<36x96xf32>
    %c0_21 = arith.constant 0 : index
    %c0_22 = arith.constant 0 : index
    %22 = vector.load %arg10[%c0_21, %c0_22] : memref<36x96xf32, #tpu.memory_space<vmem>>, vector<36x96xf32>
    tpu.vector_store %arg10[%c0_21, %c0_22], %21 {strides = array<i32>} : memref<36x96xf32, #tpu.memory_space<vmem>>, vector<36x96xf32>,
    %c2 = arith.constant 2 : index
    %c0_23 = arith.constant 0 : index
    %c0_24 = arith.constant 0 : index
    %23 = vector.load %arg2[%c2, %c0_23, %c0_24] : memref<9x96x96xbf16, #tpu.memory_space<vmem>>, vector<1x96x96xbf16>
    %24 = vector.shape_cast %23 : vector<1x96x96xbf16> to vector<96x96xbf16>
    %cst_25 = arith.constant dense<0.000000e+00> : vector<36x96xf32>
    %25 = tpu.matmul %2, %24, %cst_25 {dimension_numbers = #tpu.dot_dimension_numbers<[1], [0], [0], [1], [0, 0, 1, 1], [], []>} : vector<36x96xbf16>, vector<96x96xbf16>, vector<36x96xf32> -> vector<36x96xf32>
    %c0_26 = arith.constant 0 : index
    %c0_27 = arith.constant 0 : index
    %26 = vector.load %arg10[%c0_26, %c0_27] : memref<36x96xf32, #tpu.memory_space<vmem>>, vector<36x96xf32>
    %cst_28 = arith.constant 0.000000e+00 : f32
    %27 = vector.broadcast %cst_28 : f32 to vector<5x96xf32>
    %28 = vector.extract_strided_slice %25 {offsets = [0, 0], sizes = [31, 96], strides = [1, 1]} : vector<36x96xf32> to vector<31x96xf32>
    %29 = tpu.concatenate %27, %28 in 0 : vector<5x96xf32>, vector<31x96xf32> -> vector<36x96xf32>
    %30 = arith.addf %26, %29 : vector<36x96xf32>
    %c0_29 = arith.constant 0 : index
    %c0_30 = arith.constant 0 : index
    %31 = vector.load %arg10[%c0_29, %c0_30] : memref<36x96xf32, #tpu.memory_space<vmem>>, vector<36x96xf32>
    tpu.vector_store %arg10[%c0_29, %c0_30], %30 {strides = array<i32>} : memref<36x96xf32, #tpu.memory_space<vmem>>, vector<36x96xf32>,
    %c3 = arith.constant 3 : index
    %c0_31 = arith.constant 0 : index
    %c0_32 = arith.constant 0 : index
    %32 = vector.load %arg2[%c3, %c0_31, %c0_32] : memref<9x96x96xbf16, #tpu.memory_space<vmem>>, vector<1x96x96xbf16>
    %33 = vector.shape_cast %32 : vector<1x96x96xbf16> to vector<96x96xbf16>
    %cst_33 = arith.constant dense<0.000000e+00> : vector<36x96xf32>
    %34 = tpu.matmul %2, %33, %cst_33 {dimension_numbers = #tpu.dot_dimension_numbers<[1], [0], [0], [1], [0, 0, 1, 1], [], []>} : vector<36x96xbf16>, vector<96x96xbf16>, vector<36x96xf32> -> vector<36x96xf32>
    %c0_34 = arith.constant 0 : index
    %c0_35 = arith.constant 0 : index
    %35 = vector.load %arg10[%c0_34, %c0_35] : memref<36x96xf32, #tpu.memory_space<vmem>>, vector<36x96xf32>
    %cst_36 = arith.constant 0.000000e+00 : f32
    %36 = vector.broadcast %cst_36 : f32 to vector<1x96xf32>
    %37 = vector.extract_strided_slice %34 {offsets = [0, 0], sizes = [35, 96], strides = [1, 1]} : vector<36x96xf32> to vector<35x96xf32>
    %38 = tpu.concatenate %36, %37 in 0 : vector<1x96xf32>, vector<35x96xf32> -> vector<36x96xf32>
    %39 = arith.addf %35, %38 : vector<36x96xf32>
    %c0_37 = arith.constant 0 : index
    %c0_38 = arith.constant 0 : index
    %40 = vector.load %arg10[%c0_37, %c0_38] : memref<36x96xf32, #tpu.memory_space<vmem>>, vector<36x96xf32>
    tpu.vector_store %arg10[%c0_37, %c0_38], %39 {strides = array<i32>} : memref<36x96xf32, #tpu.memory_space<vmem>>, vector<36x96xf32>,
    %c4 = arith.constant 4 : index
    %c0_39 = arith.constant 0 : index
    %c0_40 = arith.constant 0 : index
    %41 = vector.load %arg2[%c4, %c0_39, %c0_40] : memref<9x96x96xbf16, #tpu.memory_space<vmem>>, vector<1x96x96xbf16>
    %42 = vector.shape_cast %41 : vector<1x96x96xbf16> to vector<96x96xbf16>
    %cst_41 = arith.constant dense<0.000000e+00> : vector<36x96xf32>
    %43 = tpu.matmul %2, %42, %cst_41 {dimension_numbers = #tpu.dot_dimension_numbers<[1], [0], [0], [1], [0, 0, 1, 1], [], []>} : vector<36x96xbf16>, vector<96x96xbf16>, vector<36x96xf32> -> vector<36x96xf32>
    %c0_42 = arith.constant 0 : index
    %c0_43 = arith.constant 0 : index
    %44 = vector.load %arg10[%c0_42, %c0_43] : memref<36x96xf32, #tpu.memory_space<vmem>>, vector<36x96xf32>
    %45 = arith.addf %44, %43 : vector<36x96xf32>
    %c0_44 = arith.constant 0 : index
    %c0_45 = arith.constant 0 : index
    %46 = vector.load %arg10[%c0_44, %c0_45] : memref<36x96xf32, #tpu.memory_space<vmem>>, vector<36x96xf32>
    tpu.vector_store %arg10[%c0_44, %c0_45], %45 {strides = array<i32>} : memref<36x96xf32, #tpu.memory_space<vmem>>, vector<36x96xf32>,
    %c5 = arith.constant 5 : index
    %c0_46 = arith.constant 0 : index
    %c0_47 = arith.constant 0 : index
    %47 = vector.load %arg2[%c5, %c0_46, %c0_47] : memref<9x96x96xbf16, #tpu.memory_space<vmem>>, vector<1x96x96xbf16>
    %48 = vector.shape_cast %47 : vector<1x96x96xbf16> to vector<96x96xbf16>
    %cst_48 = arith.constant dense<0.000000e+00> : vector<36x96xf32>
    %49 = tpu.matmul %2, %48, %cst_48 {dimension_numbers = #tpu.dot_dimension_numbers<[1], [0], [0], [1], [0, 0, 1, 1], [], []>} : vector<36x96xbf16>, vector<96x96xbf16>, vector<36x96xf32> -> vector<36x96xf32>
    %c0_49 = arith.constant 0 : index
    %c0_50 = arith.constant 0 : index
    %50 = vector.load %arg10[%c0_49, %c0_50] : memref<36x96xf32, #tpu.memory_space<vmem>>, vector<36x96xf32>
    %cst_51 = arith.constant 0.000000e+00 : f32
    %51 = vector.broadcast %cst_51 : f32 to vector<1x96xf32>
    %52 = vector.extract_strided_slice %49 {offsets = [1, 0], sizes = [35, 96], strides = [1, 1]} : vector<36x96xf32> to vector<35x96xf32>
    %53 = tpu.concatenate %52, %51 in 0 : vector<35x96xf32>, vector<1x96xf32> -> vector<36x96xf32>
    %54 = arith.addf %50, %53 : vector<36x96xf32>
    %c0_52 = arith.constant 0 : index
    %c0_53 = arith.constant 0 : index
    %55 = vector.load %arg10[%c0_52, %c0_53] : memref<36x96xf32, #tpu.memory_space<vmem>>, vector<36x96xf32>
    tpu.vector_store %arg10[%c0_52, %c0_53], %54 {strides = array<i32>} : memref<36x96xf32, #tpu.memory_space<vmem>>, vector<36x96xf32>,
    %c6 = arith.constant 6 : index
    %c0_54 = arith.constant 0 : index
    %c0_55 = arith.constant 0 : index
    %56 = vector.load %arg2[%c6, %c0_54, %c0_55] : memref<9x96x96xbf16, #tpu.memory_space<vmem>>, vector<1x96x96xbf16>
    %57 = vector.shape_cast %56 : vector<1x96x96xbf16> to vector<96x96xbf16>
    %cst_56 = arith.constant dense<0.000000e+00> : vector<36x96xf32>
    %58 = tpu.matmul %2, %57, %cst_56 {dimension_numbers = #tpu.dot_dimension_numbers<[1], [0], [0], [1], [0, 0, 1, 1], [], []>} : vector<36x96xbf16>, vector<96x96xbf16>, vector<36x96xf32> -> vector<36x96xf32>
    %c0_57 = arith.constant 0 : index
    %c0_58 = arith.constant 0 : index
    %59 = vector.load %arg10[%c0_57, %c0_58] : memref<36x96xf32, #tpu.memory_space<vmem>>, vector<36x96xf32>
    %cst_59 = arith.constant 0.000000e+00 : f32
    %60 = vector.broadcast %cst_59 : f32 to vector<5x96xf32>
    %61 = vector.extract_strided_slice %58 {offsets = [5, 0], sizes = [31, 96], strides = [1, 1]} : vector<36x96xf32> to vector<31x96xf32>
    %62 = tpu.concatenate %61, %60 in 0 : vector<31x96xf32>, vector<5x96xf32> -> vector<36x96xf32>
    %63 = arith.addf %59, %62 : vector<36x96xf32>
    %c0_60 = arith.constant 0 : index
    %c0_61 = arith.constant 0 : index
    %64 = vector.load %arg10[%c0_60, %c0_61] : memref<36x96xf32, #tpu.memory_space<vmem>>, vector<36x96xf32>
    tpu.vector_store %arg10[%c0_60, %c0_61], %63 {strides = array<i32>} : memref<36x96xf32, #tpu.memory_space<vmem>>, vector<36x96xf32>,
    %c7 = arith.constant 7 : index
    %c0_62 = arith.constant 0 : index
    %c0_63 = arith.constant 0 : index
    %65 = vector.load %arg2[%c7, %c0_62, %c0_63] : memref<9x96x96xbf16, #tpu.memory_space<vmem>>, vector<1x96x96xbf16>
    %66 = vector.shape_cast %65 : vector<1x96x96xbf16> to vector<96x96xbf16>
    %cst_64 = arith.constant dense<0.000000e+00> : vector<36x96xf32>
    %67 = tpu.matmul %2, %66, %cst_64 {dimension_numbers = #tpu.dot_dimension_numbers<[1], [0], [0], [1], [0, 0, 1, 1], [], []>} : vector<36x96xbf16>, vector<96x96xbf16>, vector<36x96xf32> -> vector<36x96xf32>
    %c0_65 = arith.constant 0 : index
    %c0_66 = arith.constant 0 : index
    %68 = vector.load %arg10[%c0_65, %c0_66] : memref<36x96xf32, #tpu.memory_space<vmem>>, vector<36x96xf32>
    %cst_67 = arith.constant 0.000000e+00 : f32
    %69 = vector.broadcast %cst_67 : f32 to vector<6x96xf32>
    %70 = vector.extract_strided_slice %67 {offsets = [6, 0], sizes = [30, 96], strides = [1, 1]} : vector<36x96xf32> to vector<30x96xf32>
    %71 = tpu.concatenate %70, %69 in 0 : vector<30x96xf32>, vector<6x96xf32> -> vector<36x96xf32>
    %72 = arith.addf %68, %71 : vector<36x96xf32>
    %c0_68 = arith.constant 0 : index
    %c0_69 = arith.constant 0 : index
    %73 = vector.load %arg10[%c0_68, %c0_69] : memref<36x96xf32, #tpu.memory_space<vmem>>, vector<36x96xf32>
    tpu.vector_store %arg10[%c0_68, %c0_69], %72 {strides = array<i32>} : memref<36x96xf32, #tpu.memory_space<vmem>>, vector<36x96xf32>,
    %c8 = arith.constant 8 : index
    %c0_70 = arith.constant 0 : index
    %c0_71 = arith.constant 0 : index
    %74 = vector.load %arg2[%c8, %c0_70, %c0_71] : memref<9x96x96xbf16, #tpu.memory_space<vmem>>, vector<1x96x96xbf16>
    %75 = vector.shape_cast %74 : vector<1x96x96xbf16> to vector<96x96xbf16>
    %cst_72 = arith.constant dense<0.000000e+00> : vector<36x96xf32>
    %76 = tpu.matmul %2, %75, %cst_72 {dimension_numbers = #tpu.dot_dimension_numbers<[1], [0], [0], [1], [0, 0, 1, 1], [], []>} : vector<36x96xbf16>, vector<96x96xbf16>, vector<36x96xf32> -> vector<36x96xf32>
    %c0_73 = arith.constant 0 : index
    %c0_74 = arith.constant 0 : index
    %77 = vector.load %arg10[%c0_73, %c0_74] : memref<36x96xf32, #tpu.memory_space<vmem>>, vector<36x96xf32>
    %cst_75 = arith.constant 0.000000e+00 : f32
    %78 = vector.broadcast %cst_75 : f32 to vector<7x96xf32>
    %79 = vector.extract_strided_slice %76 {offsets = [7, 0], sizes = [29, 96], strides = [1, 1]} : vector<36x96xf32> to vector<29x96xf32>
    %80 = tpu.concatenate %79, %78 in 0 : vector<29x96xf32>, vector<7x96xf32> -> vector<36x96xf32>
    %81 = arith.addf %77, %80 : vector<36x96xf32>
    %c0_76 = arith.constant 0 : index
    %c0_77 = arith.constant 0 : index
    %82 = vector.load %arg10[%c0_76, %c0_77] : memref<36x96xf32, #tpu.memory_space<vmem>>, vector<36x96xf32>
    tpu.vector_store %arg10[%c0_76, %c0_77], %81 {strides = array<i32>} : memref<36x96xf32, #tpu.memory_space<vmem>>, vector<36x96xf32>,
    %c0_78 = arith.constant 0 : index
    %c0_79 = arith.constant 0 : index
    %83 = vector.load %arg10[%c0_78, %c0_79] : memref<36x96xf32, #tpu.memory_space<vmem>>, vector<36x96xf32>
    %cst_80 = arith.constant 0.000000e+00 : f32
    %84 = vector.broadcast %cst_80 : f32 to vector<36x96xf32>
    %85 = arith.maximumf %83, %84 : vector<36x96xf32>
    %86 = vector.broadcast %0 : vector<36x1xf32> to vector<36x96xf32>
    %87 = arith.mulf %85, %86 : vector<36x96xf32>
    %88 = arith.truncf %87 : vector<36x96xf32> to vector<36x96xbf16>
    %cst_81 = arith.constant 0.000000e+00 : f32
    %89 = vector.broadcast %cst_81 : f32 to vector<36x96xf32>
    %c0_82 = arith.constant 0 : index
    %c0_83 = arith.constant 0 : index
    %90 = vector.load %arg10[%c0_82, %c0_83] : memref<36x96xf32, #tpu.memory_space<vmem>>, vector<36x96xf32>
    tpu.vector_store %arg10[%c0_82, %c0_83], %89 {strides = array<i32>} : memref<36x96xf32, #tpu.memory_space<vmem>>, vector<36x96xf32>,
    %c0_84 = arith.constant 0 : index
    %c0_85 = arith.constant 0 : index
    %c0_86 = arith.constant 0 : index
    %91 = vector.load %arg3[%c0_84, %c0_85, %c0_86] : memref<9x96x96xbf16, #tpu.memory_space<vmem>>, vector<1x96x96xbf16>
    %92 = vector.shape_cast %91 : vector<1x96x96xbf16> to vector<96x96xbf16>
    %cst_87 = arith.constant dense<0.000000e+00> : vector<36x96xf32>
    %93 = tpu.matmul %88, %92, %cst_87 {dimension_numbers = #tpu.dot_dimension_numbers<[1], [0], [0], [1], [0, 0, 1, 1], [], []>} : vector<36x96xbf16>, vector<96x96xbf16>, vector<36x96xf32> -> vector<36x96xf32>
    %c0_88 = arith.constant 0 : index
    %c0_89 = arith.constant 0 : index
    %94 = vector.load %arg10[%c0_88, %c0_89] : memref<36x96xf32, #tpu.memory_space<vmem>>, vector<36x96xf32>
    %cst_90 = arith.constant 0.000000e+00 : f32
    %95 = vector.broadcast %cst_90 : f32 to vector<7x96xf32>
    %96 = vector.extract_strided_slice %93 {offsets = [0, 0], sizes = [29, 96], strides = [1, 1]} : vector<36x96xf32> to vector<29x96xf32>
    %97 = tpu.concatenate %95, %96 in 0 : vector<7x96xf32>, vector<29x96xf32> -> vector<36x96xf32>
    %98 = arith.addf %94, %97 : vector<36x96xf32>
    %c0_91 = arith.constant 0 : index
    %c0_92 = arith.constant 0 : index
    %99 = vector.load %arg10[%c0_91, %c0_92] : memref<36x96xf32, #tpu.memory_space<vmem>>, vector<36x96xf32>
    tpu.vector_store %arg10[%c0_91, %c0_92], %98 {strides = array<i32>} : memref<36x96xf32, #tpu.memory_space<vmem>>, vector<36x96xf32>,
    %c1_93 = arith.constant 1 : index
    %c0_94 = arith.constant 0 : index
    %c0_95 = arith.constant 0 : index
    %100 = vector.load %arg3[%c1_93, %c0_94, %c0_95] : memref<9x96x96xbf16, #tpu.memory_space<vmem>>, vector<1x96x96xbf16>
    %101 = vector.shape_cast %100 : vector<1x96x96xbf16> to vector<96x96xbf16>
    %cst_96 = arith.constant dense<0.000000e+00> : vector<36x96xf32>
    %102 = tpu.matmul %88, %101, %cst_96 {dimension_numbers = #tpu.dot_dimension_numbers<[1], [0], [0], [1], [0, 0, 1, 1], [], []>} : vector<36x96xbf16>, vector<96x96xbf16>, vector<36x96xf32> -> vector<36x96xf32>
    %c0_97 = arith.constant 0 : index
    %c0_98 = arith.constant 0 : index
    %103 = vector.load %arg10[%c0_97, %c0_98] : memref<36x96xf32, #tpu.memory_space<vmem>>, vector<36x96xf32>
    %cst_99 = arith.constant 0.000000e+00 : f32
    %104 = vector.broadcast %cst_99 : f32 to vector<6x96xf32>
    %105 = vector.extract_strided_slice %102 {offsets = [0, 0], sizes = [30, 96], strides = [1, 1]} : vector<36x96xf32> to vector<30x96xf32>
    %106 = tpu.concatenate %104, %105 in 0 : vector<6x96xf32>, vector<30x96xf32> -> vector<36x96xf32>
    %107 = arith.addf %103, %106 : vector<36x96xf32>
    %c0_100 = arith.constant 0 : index
    %c0_101 = arith.constant 0 : index
    %108 = vector.load %arg10[%c0_100, %c0_101] : memref<36x96xf32, #tpu.memory_space<vmem>>, vector<36x96xf32>
    tpu.vector_store %arg10[%c0_100, %c0_101], %107 {strides = array<i32>} : memref<36x96xf32, #tpu.memory_space<vmem>>, vector<36x96xf32>,
    %c2_102 = arith.constant 2 : index
    %c0_103 = arith.constant 0 : index
    %c0_104 = arith.constant 0 : index
    %109 = vector.load %arg3[%c2_102, %c0_103, %c0_104] : memref<9x96x96xbf16, #tpu.memory_space<vmem>>, vector<1x96x96xbf16>
    %110 = vector.shape_cast %109 : vector<1x96x96xbf16> to vector<96x96xbf16>
    %cst_105 = arith.constant dense<0.000000e+00> : vector<36x96xf32>
    %111 = tpu.matmul %88, %110, %cst_105 {dimension_numbers = #tpu.dot_dimension_numbers<[1], [0], [0], [1], [0, 0, 1, 1], [], []>} : vector<36x96xbf16>, vector<96x96xbf16>, vector<36x96xf32> -> vector<36x96xf32>
    %c0_106 = arith.constant 0 : index
    %c0_107 = arith.constant 0 : index
    %112 = vector.load %arg10[%c0_106, %c0_107] : memref<36x96xf32, #tpu.memory_space<vmem>>, vector<36x96xf32>
    %cst_108 = arith.constant 0.000000e+00 : f32
    %113 = vector.broadcast %cst_108 : f32 to vector<5x96xf32>
    %114 = vector.extract_strided_slice %111 {offsets = [0, 0], sizes = [31, 96], strides = [1, 1]} : vector<36x96xf32> to vector<31x96xf32>
    %115 = tpu.concatenate %113, %114 in 0 : vector<5x96xf32>, vector<31x96xf32> -> vector<36x96xf32>
    %116 = arith.addf %112, %115 : vector<36x96xf32>
    %c0_109 = arith.constant 0 : index
    %c0_110 = arith.constant 0 : index
    %117 = vector.load %arg10[%c0_109, %c0_110] : memref<36x96xf32, #tpu.memory_space<vmem>>, vector<36x96xf32>
    tpu.vector_store %arg10[%c0_109, %c0_110], %116 {strides = array<i32>} : memref<36x96xf32, #tpu.memory_space<vmem>>, vector<36x96xf32>,
    %c3_111 = arith.constant 3 : index
    %c0_112 = arith.constant 0 : index
    %c0_113 = arith.constant 0 : index
    %118 = vector.load %arg3[%c3_111, %c0_112, %c0_113] : memref<9x96x96xbf16, #tpu.memory_space<vmem>>, vector<1x96x96xbf16>
    %119 = vector.shape_cast %118 : vector<1x96x96xbf16> to vector<96x96xbf16>
    %cst_114 = arith.constant dense<0.000000e+00> : vector<36x96xf32>
    %120 = tpu.matmul %88, %119, %cst_114 {dimension_numbers = #tpu.dot_dimension_numbers<[1], [0], [0], [1], [0, 0, 1, 1], [], []>} : vector<36x96xbf16>, vector<96x96xbf16>, vector<36x96xf32> -> vector<36x96xf32>
    %c0_115 = arith.constant 0 : index
    %c0_116 = arith.constant 0 : index
    %121 = vector.load %arg10[%c0_115, %c0_116] : memref<36x96xf32, #tpu.memory_space<vmem>>, vector<36x96xf32>
    %cst_117 = arith.constant 0.000000e+00 : f32
    %122 = vector.broadcast %cst_117 : f32 to vector<1x96xf32>
    %123 = vector.extract_strided_slice %120 {offsets = [0, 0], sizes = [35, 96], strides = [1, 1]} : vector<36x96xf32> to vector<35x96xf32>
    %124 = tpu.concatenate %122, %123 in 0 : vector<1x96xf32>, vector<35x96xf32> -> vector<36x96xf32>
    %125 = arith.addf %121, %124 : vector<36x96xf32>
    %c0_118 = arith.constant 0 : index
    %c0_119 = arith.constant 0 : index
    %126 = vector.load %arg10[%c0_118, %c0_119] : memref<36x96xf32, #tpu.memory_space<vmem>>, vector<36x96xf32>
    tpu.vector_store %arg10[%c0_118, %c0_119], %125 {strides = array<i32>} : memref<36x96xf32, #tpu.memory_space<vmem>>, vector<36x96xf32>,
    %c4_120 = arith.constant 4 : index
    %c0_121 = arith.constant 0 : index
    %c0_122 = arith.constant 0 : index
    %127 = vector.load %arg3[%c4_120, %c0_121, %c0_122] : memref<9x96x96xbf16, #tpu.memory_space<vmem>>, vector<1x96x96xbf16>
    %128 = vector.shape_cast %127 : vector<1x96x96xbf16> to vector<96x96xbf16>
    %cst_123 = arith.constant dense<0.000000e+00> : vector<36x96xf32>
    %129 = tpu.matmul %88, %128, %cst_123 {dimension_numbers = #tpu.dot_dimension_numbers<[1], [0], [0], [1], [0, 0, 1, 1], [], []>} : vector<36x96xbf16>, vector<96x96xbf16>, vector<36x96xf32> -> vector<36x96xf32>
    %c0_124 = arith.constant 0 : index
    %c0_125 = arith.constant 0 : index
    %130 = vector.load %arg10[%c0_124, %c0_125] : memref<36x96xf32, #tpu.memory_space<vmem>>, vector<36x96xf32>
    %131 = arith.addf %130, %129 : vector<36x96xf32>
    %c0_126 = arith.constant 0 : index
    %c0_127 = arith.constant 0 : index
    %132 = vector.load %arg10[%c0_126, %c0_127] : memref<36x96xf32, #tpu.memory_space<vmem>>, vector<36x96xf32>
    tpu.vector_store %arg10[%c0_126, %c0_127], %131 {strides = array<i32>} : memref<36x96xf32, #tpu.memory_space<vmem>>, vector<36x96xf32>,
    %c5_128 = arith.constant 5 : index
    %c0_129 = arith.constant 0 : index
    %c0_130 = arith.constant 0 : index
    %133 = vector.load %arg3[%c5_128, %c0_129, %c0_130] : memref<9x96x96xbf16, #tpu.memory_space<vmem>>, vector<1x96x96xbf16>
    %134 = vector.shape_cast %133 : vector<1x96x96xbf16> to vector<96x96xbf16>
    %cst_131 = arith.constant dense<0.000000e+00> : vector<36x96xf32>
    %135 = tpu.matmul %88, %134, %cst_131 {dimension_numbers = #tpu.dot_dimension_numbers<[1], [0], [0], [1], [0, 0, 1, 1], [], []>} : vector<36x96xbf16>, vector<96x96xbf16>, vector<36x96xf32> -> vector<36x96xf32>
    %c0_132 = arith.constant 0 : index
    %c0_133 = arith.constant 0 : index
    %136 = vector.load %arg10[%c0_132, %c0_133] : memref<36x96xf32, #tpu.memory_space<vmem>>, vector<36x96xf32>
    %cst_134 = arith.constant 0.000000e+00 : f32
    %137 = vector.broadcast %cst_134 : f32 to vector<1x96xf32>
    %138 = vector.extract_strided_slice %135 {offsets = [1, 0], sizes = [35, 96], strides = [1, 1]} : vector<36x96xf32> to vector<35x96xf32>
    %139 = tpu.concatenate %138, %137 in 0 : vector<35x96xf32>, vector<1x96xf32> -> vector<36x96xf32>
    %140 = arith.addf %136, %139 : vector<36x96xf32>
    %c0_135 = arith.constant 0 : index
    %c0_136 = arith.constant 0 : index
    %141 = vector.load %arg10[%c0_135, %c0_136] : memref<36x96xf32, #tpu.memory_space<vmem>>, vector<36x96xf32>
    tpu.vector_store %arg10[%c0_135, %c0_136], %140 {strides = array<i32>} : memref<36x96xf32, #tpu.memory_space<vmem>>, vector<36x96xf32>,
    %c6_137 = arith.constant 6 : index
    %c0_138 = arith.constant 0 : index
    %c0_139 = arith.constant 0 : index
    %142 = vector.load %arg3[%c6_137, %c0_138, %c0_139] : memref<9x96x96xbf16, #tpu.memory_space<vmem>>, vector<1x96x96xbf16>
    %143 = vector.shape_cast %142 : vector<1x96x96xbf16> to vector<96x96xbf16>
    %cst_140 = arith.constant dense<0.000000e+00> : vector<36x96xf32>
    %144 = tpu.matmul %88, %143, %cst_140 {dimension_numbers = #tpu.dot_dimension_numbers<[1], [0], [0], [1], [0, 0, 1, 1], [], []>} : vector<36x96xbf16>, vector<96x96xbf16>, vector<36x96xf32> -> vector<36x96xf32>
    %c0_141 = arith.constant 0 : index
    %c0_142 = arith.constant 0 : index
    %145 = vector.load %arg10[%c0_141, %c0_142] : memref<36x96xf32, #tpu.memory_space<vmem>>, vector<36x96xf32>
    %cst_143 = arith.constant 0.000000e+00 : f32
    %146 = vector.broadcast %cst_143 : f32 to vector<5x96xf32>
    %147 = vector.extract_strided_slice %144 {offsets = [5, 0], sizes = [31, 96], strides = [1, 1]} : vector<36x96xf32> to vector<31x96xf32>
    %148 = tpu.concatenate %147, %146 in 0 : vector<31x96xf32>, vector<5x96xf32> -> vector<36x96xf32>
    %149 = arith.addf %145, %148 : vector<36x96xf32>
    %c0_144 = arith.constant 0 : index
    %c0_145 = arith.constant 0 : index
    %150 = vector.load %arg10[%c0_144, %c0_145] : memref<36x96xf32, #tpu.memory_space<vmem>>, vector<36x96xf32>
    tpu.vector_store %arg10[%c0_144, %c0_145], %149 {strides = array<i32>} : memref<36x96xf32, #tpu.memory_space<vmem>>, vector<36x96xf32>,
    %c7_146 = arith.constant 7 : index
    %c0_147 = arith.constant 0 : index
    %c0_148 = arith.constant 0 : index
    %151 = vector.load %arg3[%c7_146, %c0_147, %c0_148] : memref<9x96x96xbf16, #tpu.memory_space<vmem>>, vector<1x96x96xbf16>
    %152 = vector.shape_cast %151 : vector<1x96x96xbf16> to vector<96x96xbf16>
    %cst_149 = arith.constant dense<0.000000e+00> : vector<36x96xf32>
    %153 = tpu.matmul %88, %152, %cst_149 {dimension_numbers = #tpu.dot_dimension_numbers<[1], [0], [0], [1], [0, 0, 1, 1], [], []>} : vector<36x96xbf16>, vector<96x96xbf16>, vector<36x96xf32> -> vector<36x96xf32>
    %c0_150 = arith.constant 0 : index
    %c0_151 = arith.constant 0 : index
    %154 = vector.load %arg10[%c0_150, %c0_151] : memref<36x96xf32, #tpu.memory_space<vmem>>, vector<36x96xf32>
    %cst_152 = arith.constant 0.000000e+00 : f32
    %155 = vector.broadcast %cst_152 : f32 to vector<6x96xf32>
    %156 = vector.extract_strided_slice %153 {offsets = [6, 0], sizes = [30, 96], strides = [1, 1]} : vector<36x96xf32> to vector<30x96xf32>
    %157 = tpu.concatenate %156, %155 in 0 : vector<30x96xf32>, vector<6x96xf32> -> vector<36x96xf32>
    %158 = arith.addf %154, %157 : vector<36x96xf32>
    %c0_153 = arith.constant 0 : index
    %c0_154 = arith.constant 0 : index
    %159 = vector.load %arg10[%c0_153, %c0_154] : memref<36x96xf32, #tpu.memory_space<vmem>>, vector<36x96xf32>
    tpu.vector_store %arg10[%c0_153, %c0_154], %158 {strides = array<i32>} : memref<36x96xf32, #tpu.memory_space<vmem>>, vector<36x96xf32>,
    %c8_155 = arith.constant 8 : index
    %c0_156 = arith.constant 0 : index
    %c0_157 = arith.constant 0 : index
    %160 = vector.load %arg3[%c8_155, %c0_156, %c0_157] : memref<9x96x96xbf16, #tpu.memory_space<vmem>>, vector<1x96x96xbf16>
    %161 = vector.shape_cast %160 : vector<1x96x96xbf16> to vector<96x96xbf16>
    %cst_158 = arith.constant dense<0.000000e+00> : vector<36x96xf32>
    %162 = tpu.matmul %88, %161, %cst_158 {dimension_numbers = #tpu.dot_dimension_numbers<[1], [0], [0], [1], [0, 0, 1, 1], [], []>} : vector<36x96xbf16>, vector<96x96xbf16>, vector<36x96xf32> -> vector<36x96xf32>
    %c0_159 = arith.constant 0 : index
    %c0_160 = arith.constant 0 : index
    %163 = vector.load %arg10[%c0_159, %c0_160] : memref<36x96xf32, #tpu.memory_space<vmem>>, vector<36x96xf32>
    %cst_161 = arith.constant 0.000000e+00 : f32
    %164 = vector.broadcast %cst_161 : f32 to vector<7x96xf32>
    %165 = vector.extract_strided_slice %162 {offsets = [7, 0], sizes = [29, 96], strides = [1, 1]} : vector<36x96xf32> to vector<29x96xf32>
    %166 = tpu.concatenate %165, %164 in 0 : vector<29x96xf32>, vector<7x96xf32> -> vector<36x96xf32>
    %167 = arith.addf %163, %166 : vector<36x96xf32>
    %c0_162 = arith.constant 0 : index
    %c0_163 = arith.constant 0 : index
    %168 = vector.load %arg10[%c0_162, %c0_163] : memref<36x96xf32, #tpu.memory_space<vmem>>, vector<36x96xf32>
    tpu.vector_store %arg10[%c0_162, %c0_163], %167 {strides = array<i32>} : memref<36x96xf32, #tpu.memory_space<vmem>>, vector<36x96xf32>,
    %c0_164 = arith.constant 0 : index
    %c0_165 = arith.constant 0 : index
    %169 = vector.load %arg10[%c0_164, %c0_165] : memref<36x96xf32, #tpu.memory_space<vmem>>, vector<36x96xf32>
    %170 = vector.broadcast %0 : vector<36x1xf32> to vector<36x96xf32>
    %171 = arith.mulf %169, %170 : vector<36x96xf32>
    %cst_166 = arith.constant dense<0.000000e+00> : vector<96xf32>
    %172 = vector.multi_reduction <add>, %171, %cst_166 [0] : vector<36x96xf32> to vector<96xf32>
    %173 = vector.shape_cast %172 : vector<96xf32> to vector<1x96xf32>
    %c0_167 = arith.constant 0 : index
    %c0_168 = arith.constant 0 : index
    %174 = vector.load %arg6[%c0_167, %c0_168] : memref<96x24xf32, #tpu.memory_space<vmem>>, vector<96x24xf32>
    %cst_169 = arith.constant dense<0.000000e+00> : vector<1x24xf32>
    %175 = tpu.matmul %173, %174, %cst_169 {dimension_numbers = #tpu.dot_dimension_numbers<[1], [0], [0], [1], [0, 0, 1, 1], [], []>} : vector<1x96xf32>, vector<96x24xf32>, vector<1x24xf32> -> vector<1x24xf32>
    %c0_170 = arith.constant 0 : index
    %c0_171 = arith.constant 0 : index
    %176 = vector.load %arg4[%c0_170, %c0_171] : memref<24x6xf32, #tpu.memory_space<vmem>>, vector<24x6xf32>
    %cst_172 = arith.constant dense<0.000000e+00> : vector<1x6xf32>
    %177 = tpu.matmul %175, %176, %cst_172 {dimension_numbers = #tpu.dot_dimension_numbers<[1], [0], [0], [1], [0, 0, 1, 1], [], []>} : vector<1x24xf32>, vector<24x6xf32>, vector<1x6xf32> -> vector<1x6xf32>
    %cst_173 = arith.constant 0.000000e+00 : f32
    %178 = vector.broadcast %cst_173 : f32 to vector<1x6xf32>
    %179 = arith.maximumf %177, %178 : vector<1x6xf32>
    %c0_174 = arith.constant 0 : index
    %c0_175 = arith.constant 0 : index
    %180 = vector.load %arg5[%c0_174, %c0_175] : memref<6x24xf32, #tpu.memory_space<vmem>>, vector<6x24xf32>
    %cst_176 = arith.constant dense<0.000000e+00> : vector<1x24xf32>
    %181 = tpu.matmul %179, %180, %cst_176 {dimension_numbers = #tpu.dot_dimension_numbers<[1], [0], [0], [1], [0, 0, 1, 1], [], []>} : vector<1x6xf32>, vector<6x24xf32>, vector<1x24xf32> -> vector<1x24xf32>
    %182 = arith.negf %181 : vector<1x24xf32>
    %183 = math.exp %182 : vector<1x24xf32>
    %cst_177 = arith.constant 1.000000e+00 : f32
    %184 = vector.broadcast %cst_177 : f32 to vector<1x24xf32>
    %185 = arith.addf %184, %183 : vector<1x24xf32>
    %186 = arith.divf %184, %185 : vector<1x24xf32>
    %c0_178 = arith.constant 0 : index
    %c0_179 = arith.constant 0 : index
    %187 = vector.load %arg7[%c0_178, %c0_179] : memref<24x96xf32, #tpu.memory_space<vmem>>, vector<24x96xf32>
    %cst_180 = arith.constant dense<0.000000e+00> : vector<1x96xf32>
    %188 = tpu.matmul %186, %187, %cst_180 {dimension_numbers = #tpu.dot_dimension_numbers<[1], [0], [0], [1], [0, 0, 1, 1], [], []>} : vector<1x24xf32>, vector<24x96xf32>, vector<1x96xf32> -> vector<1x96xf32>
    %189 = vector.broadcast %188 : vector<1x96xf32> to vector<36x96xf32>
    %190 = arith.mulf %171, %189 : vector<36x96xf32>
    %191 = arith.extf %2 : vector<36x96xbf16> to vector<36x96xf32>
    %192 = arith.addf %190, %191 : vector<36x96xf32>
    %193 = arith.truncf %192 : vector<36x96xf32> to vector<36x96xbf16>
    %c0_181 = arith.constant 0 : index
    %c0_182 = arith.constant 0 : index
    %c0_183 = arith.constant 0 : index
    %194 = vector.load %arg9[%c0_181, %c0_182, %c0_183] : memref<1x36x96xbf16, #tpu.memory_space<vmem>>, vector<1x36x96xbf16>
    %195 = vector.shape_cast %194 : vector<1x36x96xbf16> to vector<36x96xbf16>
    %196 = vector.shape_cast %193 : vector<36x96xbf16> to vector<1x36x96xbf16>
    tpu.vector_store %arg9[%c0_181, %c0_182, %c0_183], %196 {strides = array<i32>} : memref<1x36x96xbf16, #tpu.memory_space<vmem>>, vector<1x36x96xbf16>,
    return
  }
  func.func @transform_0(%arg0: i32) -> (i32, i32, i32) {
    %c0_i32 = arith.constant 0 : i32
    %c0_i32_0 = arith.constant 0 : i32
    %c0_i32_1 = arith.constant 0 : i32
    return %arg0, %c0_i32, %c0_i32_0 : i32, i32, i32
  }
  func.func @transform_1(%arg0: i32) -> (i32, i32, i32) {
    %c0_i32 = arith.constant 0 : i32
    %c0_i32_0 = arith.constant 0 : i32
    %c0_i32_1 = arith.constant 0 : i32
    %c0_i32_2 = arith.constant 0 : i32
    return %c0_i32, %c0_i32_0, %c0_i32_1 : i32, i32, i32
  }
  func.func @transform_2(%arg0: i32) -> (i32, i32, i32) {
    %c0_i32 = arith.constant 0 : i32
    %c0_i32_0 = arith.constant 0 : i32
    %c0_i32_1 = arith.constant 0 : i32
    %c0_i32_2 = arith.constant 0 : i32
    return %c0_i32, %c0_i32_0, %c0_i32_1 : i32, i32, i32
  }
  func.func @transform_3(%arg0: i32) -> (i32, i32) {
    %c0_i32 = arith.constant 0 : i32
    %c0_i32_0 = arith.constant 0 : i32
    %c0_i32_1 = arith.constant 0 : i32
    return %c0_i32, %c0_i32_0 : i32, i32
  }
  func.func @transform_4(%arg0: i32) -> (i32, i32) {
    %c0_i32 = arith.constant 0 : i32
    %c0_i32_0 = arith.constant 0 : i32
    %c0_i32_1 = arith.constant 0 : i32
    return %c0_i32, %c0_i32_0 : i32, i32
  }
  func.func @transform_5(%arg0: i32) -> (i32, i32) {
    %c0_i32 = arith.constant 0 : i32
    %c0_i32_0 = arith.constant 0 : i32
    %c0_i32_1 = arith.constant 0 : i32
    return %c0_i32, %c0_i32_0 : i32, i32
  }
  func.func @transform_6(%arg0: i32) -> (i32, i32) {
    %c0_i32 = arith.constant 0 : i32
    %c0_i32_0 = arith.constant 0 : i32
    %c0_i32_1 = arith.constant 0 : i32
    return %c0_i32, %c0_i32_0 : i32, i32
  }
  func.func @transform_7(%arg0: i32) -> (i32, i32) {
    %c0_i32 = arith.constant 0 : i32
    %c0_i32_0 = arith.constant 0 : i32
    %c0_i32_1 = arith.constant 0 : i32
    return %c0_i32, %c0_i32_0 : i32, i32
  }
  func.func @transform_8(%arg0: i32) -> (i32, i32, i32) {
    %c0_i32 = arith.constant 0 : i32
    %c0_i32_0 = arith.constant 0 : i32
    %c0_i32_1 = arith.constant 0 : i32
    return %arg0, %c0_i32, %c0_i32_0 : i32, i32, i32
  }
}

module attributes {stable_mosaic.version = 11 : i64} {
  func.func @_rowlinear_kernel(%arg0: i32, %arg1: memref<1x16x48xbf16, #tpu.memory_space<vmem>>, %arg2: memref<48x64xbf16, #tpu.memory_space<vmem>>, %arg3: memref<1x16x64xbf16, #tpu.memory_space<vmem>>) attributes {dimension_semantics = [#tpu.dimension_semantics<parallel>], iteration_bounds = array<i64: 2>, scalar_prefetch = 0 : i64, scratch_operands = 0 : i64, tpu.core_type = #tpu.core_type<tc>, window_params = [{transform_indices = @transform_0, window_bounds = array<i64: 1, 16, 48>}, {pipeline_mode = #tpu.pipeline_mode<synchronous>, transform_indices = @transform_1, window_bounds = array<i64: 48, 64>}, {transform_indices = @transform_2, window_bounds = array<i64: 1, 16, 64>}]} {
    %c0 = arith.constant 0 : index
    %c0_0 = arith.constant 0 : index
    %c0_1 = arith.constant 0 : index
    %0 = vector.load %arg1[%c0, %c0_0, %c0_1] : memref<1x16x48xbf16, #tpu.memory_space<vmem>>, vector<1x16x48xbf16>
    %1 = vector.shape_cast %0 : vector<1x16x48xbf16> to vector<16x48xbf16>
    %c0_2 = arith.constant 0 : index
    %c0_3 = arith.constant 0 : index
    %2 = vector.load %arg2[%c0_2, %c0_3] : memref<48x64xbf16, #tpu.memory_space<vmem>>, vector<48x64xbf16>
    %cst = arith.constant dense<0.000000e+00> : vector<16x64xf32>
    %3 = tpu.matmul %1, %2, %cst {dimension_numbers = #tpu.dot_dimension_numbers<[1], [0], [0], [1], [0, 0, 1, 1], [], []>} : vector<16x48xbf16>, vector<48x64xbf16>, vector<16x64xf32> -> vector<16x64xf32>
    %4 = arith.truncf %3 : vector<16x64xf32> to vector<16x64xbf16>
    %c0_4 = arith.constant 0 : index
    %c0_5 = arith.constant 0 : index
    %c0_6 = arith.constant 0 : index
    %5 = vector.load %arg3[%c0_4, %c0_5, %c0_6] : memref<1x16x64xbf16, #tpu.memory_space<vmem>>, vector<1x16x64xbf16>
    %6 = vector.shape_cast %5 : vector<1x16x64xbf16> to vector<16x64xbf16>
    %7 = vector.shape_cast %4 : vector<16x64xbf16> to vector<1x16x64xbf16>
    tpu.vector_store %arg3[%c0_4, %c0_5, %c0_6], %7 {strides = array<i32>} : memref<1x16x64xbf16, #tpu.memory_space<vmem>>, vector<1x16x64xbf16>,
    return
  }
  func.func @transform_0(%arg0: i32) -> (i32, i32, i32) {
    %c0_i32 = arith.constant 0 : i32
    %c0_i32_0 = arith.constant 0 : i32
    %c0_i32_1 = arith.constant 0 : i32
    return %arg0, %c0_i32, %c0_i32_0 : i32, i32, i32
  }
  func.func @transform_1(%arg0: i32) -> (i32, i32) {
    %c0_i32 = arith.constant 0 : i32
    %c0_i32_0 = arith.constant 0 : i32
    %c0_i32_1 = arith.constant 0 : i32
    return %c0_i32, %c0_i32_0 : i32, i32
  }
  func.func @transform_2(%arg0: i32) -> (i32, i32, i32) {
    %c0_i32 = arith.constant 0 : i32
    %c0_i32_0 = arith.constant 0 : i32
    %c0_i32_1 = arith.constant 0 : i32
    return %arg0, %c0_i32, %c0_i32_0 : i32, i32, i32
  }
}

module attributes {stable_mosaic.version = 11 : i64} {
  func.func @_cab_kernel(%arg0: i32, %arg1: memref<1x16x64xbf16, #tpu.memory_space<vmem>>, %arg2: memref<9x64x64xbf16, #tpu.memory_space<vmem>>, %arg3: memref<9x64x64xbf16, #tpu.memory_space<vmem>>, %arg4: memref<32x8xf32, #tpu.memory_space<vmem>>, %arg5: memref<8x32xf32, #tpu.memory_space<vmem>>, %arg6: memref<64x32xf32, #tpu.memory_space<vmem>>, %arg7: memref<32x64xf32, #tpu.memory_space<vmem>>, %arg8: memref<16x1xf32, #tpu.memory_space<vmem>>, %arg9: memref<1x16x64xbf16, #tpu.memory_space<vmem>>, %arg10: memref<16x64xf32, #tpu.memory_space<vmem>>) attributes {dimension_semantics = [#tpu.dimension_semantics<parallel>], iteration_bounds = array<i64: 2>, scalar_prefetch = 0 : i64, scratch_operands = 1 : i64, tpu.core_type = #tpu.core_type<tc>, window_params = [{transform_indices = @transform_0, window_bounds = array<i64: 1, 16, 64>}, {pipeline_mode = #tpu.pipeline_mode<synchronous>, transform_indices = @transform_1, window_bounds = array<i64: 9, 64, 64>}, {pipeline_mode = #tpu.pipeline_mode<synchronous>, transform_indices = @transform_2, window_bounds = array<i64: 9, 64, 64>}, {pipeline_mode = #tpu.pipeline_mode<synchronous>, transform_indices = @transform_3, window_bounds = array<i64: 32, 8>}, {pipeline_mode = #tpu.pipeline_mode<synchronous>, transform_indices = @transform_4, window_bounds = array<i64: 8, 32>}, {pipeline_mode = #tpu.pipeline_mode<synchronous>, transform_indices = @transform_5, window_bounds = array<i64: 64, 32>}, {pipeline_mode = #tpu.pipeline_mode<synchronous>, transform_indices = @transform_6, window_bounds = array<i64: 32, 64>}, {pipeline_mode = #tpu.pipeline_mode<synchronous>, transform_indices = @transform_7, window_bounds = array<i64: 16, 1>}, {transform_indices = @transform_8, window_bounds = array<i64: 1, 16, 64>}]} {
    %c0 = arith.constant 0 : index
    %c0_0 = arith.constant 0 : index
    %0 = vector.load %arg8[%c0, %c0_0] : memref<16x1xf32, #tpu.memory_space<vmem>>, vector<16x1xf32>
    %c0_1 = arith.constant 0 : index
    %c0_2 = arith.constant 0 : index
    %c0_3 = arith.constant 0 : index
    %1 = vector.load %arg1[%c0_1, %c0_2, %c0_3] : memref<1x16x64xbf16, #tpu.memory_space<vmem>>, vector<1x16x64xbf16>
    %2 = vector.shape_cast %1 : vector<1x16x64xbf16> to vector<16x64xbf16>
    %cst = arith.constant 0.000000e+00 : f32
    %3 = vector.broadcast %cst : f32 to vector<16x64xf32>
    %c0_4 = arith.constant 0 : index
    %c0_5 = arith.constant 0 : index
    %4 = vector.load %arg10[%c0_4, %c0_5] : memref<16x64xf32, #tpu.memory_space<vmem>>, vector<16x64xf32>
    tpu.vector_store %arg10[%c0_4, %c0_5], %3 {strides = array<i32>} : memref<16x64xf32, #tpu.memory_space<vmem>>, vector<16x64xf32>,
    %c0_6 = arith.constant 0 : index
    %c0_7 = arith.constant 0 : index
    %c0_8 = arith.constant 0 : index
    %5 = vector.load %arg2[%c0_6, %c0_7, %c0_8] : memref<9x64x64xbf16, #tpu.memory_space<vmem>>, vector<1x64x64xbf16>
    %6 = vector.shape_cast %5 : vector<1x64x64xbf16> to vector<64x64xbf16>
    %cst_9 = arith.constant dense<0.000000e+00> : vector<16x64xf32>
    %7 = tpu.matmul %2, %6, %cst_9 {dimension_numbers = #tpu.dot_dimension_numbers<[1], [0], [0], [1], [0, 0, 1, 1], [], []>} : vector<16x64xbf16>, vector<64x64xbf16>, vector<16x64xf32> -> vector<16x64xf32>
    %c0_10 = arith.constant 0 : index
    %c0_11 = arith.constant 0 : index
    %8 = vector.load %arg10[%c0_10, %c0_11] : memref<16x64xf32, #tpu.memory_space<vmem>>, vector<16x64xf32>
    %cst_12 = arith.constant 0.000000e+00 : f32
    %9 = vector.broadcast %cst_12 : f32 to vector<5x64xf32>
    %10 = vector.extract_strided_slice %7 {offsets = [0, 0], sizes = [11, 64], strides = [1, 1]} : vector<16x64xf32> to vector<11x64xf32>
    %11 = tpu.concatenate %9, %10 in 0 : vector<5x64xf32>, vector<11x64xf32> -> vector<16x64xf32>
    %12 = arith.addf %8, %11 : vector<16x64xf32>
    %c0_13 = arith.constant 0 : index
    %c0_14 = arith.constant 0 : index
    %13 = vector.load %arg10[%c0_13, %c0_14] : memref<16x64xf32, #tpu.memory_space<vmem>>, vector<16x64xf32>
    tpu.vector_store %arg10[%c0_13, %c0_14], %12 {strides = array<i32>} : memref<16x64xf32, #tpu.memory_space<vmem>>, vector<16x64xf32>,
    %c1 = arith.constant 1 : index
    %c0_15 = arith.constant 0 : index
    %c0_16 = arith.constant 0 : index
    %14 = vector.load %arg2[%c1, %c0_15, %c0_16] : memref<9x64x64xbf16, #tpu.memory_space<vmem>>, vector<1x64x64xbf16>
    %15 = vector.shape_cast %14 : vector<1x64x64xbf16> to vector<64x64xbf16>
    %cst_17 = arith.constant dense<0.000000e+00> : vector<16x64xf32>
    %16 = tpu.matmul %2, %15, %cst_17 {dimension_numbers = #tpu.dot_dimension_numbers<[1], [0], [0], [1], [0, 0, 1, 1], [], []>} : vector<16x64xbf16>, vector<64x64xbf16>, vector<16x64xf32> -> vector<16x64xf32>
    %c0_18 = arith.constant 0 : index
    %c0_19 = arith.constant 0 : index
    %17 = vector.load %arg10[%c0_18, %c0_19] : memref<16x64xf32, #tpu.memory_space<vmem>>, vector<16x64xf32>
    %cst_20 = arith.constant 0.000000e+00 : f32
    %18 = vector.broadcast %cst_20 : f32 to vector<4x64xf32>
    %19 = vector.extract_strided_slice %16 {offsets = [0, 0], sizes = [12, 64], strides = [1, 1]} : vector<16x64xf32> to vector<12x64xf32>
    %20 = tpu.concatenate %18, %19 in 0 : vector<4x64xf32>, vector<12x64xf32> -> vector<16x64xf32>
    %21 = arith.addf %17, %20 : vector<16x64xf32>
    %c0_21 = arith.constant 0 : index
    %c0_22 = arith.constant 0 : index
    %22 = vector.load %arg10[%c0_21, %c0_22] : memref<16x64xf32, #tpu.memory_space<vmem>>, vector<16x64xf32>
    tpu.vector_store %arg10[%c0_21, %c0_22], %21 {strides = array<i32>} : memref<16x64xf32, #tpu.memory_space<vmem>>, vector<16x64xf32>,
    %c2 = arith.constant 2 : index
    %c0_23 = arith.constant 0 : index
    %c0_24 = arith.constant 0 : index
    %23 = vector.load %arg2[%c2, %c0_23, %c0_24] : memref<9x64x64xbf16, #tpu.memory_space<vmem>>, vector<1x64x64xbf16>
    %24 = vector.shape_cast %23 : vector<1x64x64xbf16> to vector<64x64xbf16>
    %cst_25 = arith.constant dense<0.000000e+00> : vector<16x64xf32>
    %25 = tpu.matmul %2, %24, %cst_25 {dimension_numbers = #tpu.dot_dimension_numbers<[1], [0], [0], [1], [0, 0, 1, 1], [], []>} : vector<16x64xbf16>, vector<64x64xbf16>, vector<16x64xf32> -> vector<16x64xf32>
    %c0_26 = arith.constant 0 : index
    %c0_27 = arith.constant 0 : index
    %26 = vector.load %arg10[%c0_26, %c0_27] : memref<16x64xf32, #tpu.memory_space<vmem>>, vector<16x64xf32>
    %cst_28 = arith.constant 0.000000e+00 : f32
    %27 = vector.broadcast %cst_28 : f32 to vector<3x64xf32>
    %28 = vector.extract_strided_slice %25 {offsets = [0, 0], sizes = [13, 64], strides = [1, 1]} : vector<16x64xf32> to vector<13x64xf32>
    %29 = tpu.concatenate %27, %28 in 0 : vector<3x64xf32>, vector<13x64xf32> -> vector<16x64xf32>
    %30 = arith.addf %26, %29 : vector<16x64xf32>
    %c0_29 = arith.constant 0 : index
    %c0_30 = arith.constant 0 : index
    %31 = vector.load %arg10[%c0_29, %c0_30] : memref<16x64xf32, #tpu.memory_space<vmem>>, vector<16x64xf32>
    tpu.vector_store %arg10[%c0_29, %c0_30], %30 {strides = array<i32>} : memref<16x64xf32, #tpu.memory_space<vmem>>, vector<16x64xf32>,
    %c3 = arith.constant 3 : index
    %c0_31 = arith.constant 0 : index
    %c0_32 = arith.constant 0 : index
    %32 = vector.load %arg2[%c3, %c0_31, %c0_32] : memref<9x64x64xbf16, #tpu.memory_space<vmem>>, vector<1x64x64xbf16>
    %33 = vector.shape_cast %32 : vector<1x64x64xbf16> to vector<64x64xbf16>
    %cst_33 = arith.constant dense<0.000000e+00> : vector<16x64xf32>
    %34 = tpu.matmul %2, %33, %cst_33 {dimension_numbers = #tpu.dot_dimension_numbers<[1], [0], [0], [1], [0, 0, 1, 1], [], []>} : vector<16x64xbf16>, vector<64x64xbf16>, vector<16x64xf32> -> vector<16x64xf32>
    %c0_34 = arith.constant 0 : index
    %c0_35 = arith.constant 0 : index
    %35 = vector.load %arg10[%c0_34, %c0_35] : memref<16x64xf32, #tpu.memory_space<vmem>>, vector<16x64xf32>
    %cst_36 = arith.constant 0.000000e+00 : f32
    %36 = vector.broadcast %cst_36 : f32 to vector<1x64xf32>
    %37 = vector.extract_strided_slice %34 {offsets = [0, 0], sizes = [15, 64], strides = [1, 1]} : vector<16x64xf32> to vector<15x64xf32>
    %38 = tpu.concatenate %36, %37 in 0 : vector<1x64xf32>, vector<15x64xf32> -> vector<16x64xf32>
    %39 = arith.addf %35, %38 : vector<16x64xf32>
    %c0_37 = arith.constant 0 : index
    %c0_38 = arith.constant 0 : index
    %40 = vector.load %arg10[%c0_37, %c0_38] : memref<16x64xf32, #tpu.memory_space<vmem>>, vector<16x64xf32>
    tpu.vector_store %arg10[%c0_37, %c0_38], %39 {strides = array<i32>} : memref<16x64xf32, #tpu.memory_space<vmem>>, vector<16x64xf32>,
    %c4 = arith.constant 4 : index
    %c0_39 = arith.constant 0 : index
    %c0_40 = arith.constant 0 : index
    %41 = vector.load %arg2[%c4, %c0_39, %c0_40] : memref<9x64x64xbf16, #tpu.memory_space<vmem>>, vector<1x64x64xbf16>
    %42 = vector.shape_cast %41 : vector<1x64x64xbf16> to vector<64x64xbf16>
    %cst_41 = arith.constant dense<0.000000e+00> : vector<16x64xf32>
    %43 = tpu.matmul %2, %42, %cst_41 {dimension_numbers = #tpu.dot_dimension_numbers<[1], [0], [0], [1], [0, 0, 1, 1], [], []>} : vector<16x64xbf16>, vector<64x64xbf16>, vector<16x64xf32> -> vector<16x64xf32>
    %c0_42 = arith.constant 0 : index
    %c0_43 = arith.constant 0 : index
    %44 = vector.load %arg10[%c0_42, %c0_43] : memref<16x64xf32, #tpu.memory_space<vmem>>, vector<16x64xf32>
    %45 = arith.addf %44, %43 : vector<16x64xf32>
    %c0_44 = arith.constant 0 : index
    %c0_45 = arith.constant 0 : index
    %46 = vector.load %arg10[%c0_44, %c0_45] : memref<16x64xf32, #tpu.memory_space<vmem>>, vector<16x64xf32>
    tpu.vector_store %arg10[%c0_44, %c0_45], %45 {strides = array<i32>} : memref<16x64xf32, #tpu.memory_space<vmem>>, vector<16x64xf32>,
    %c5 = arith.constant 5 : index
    %c0_46 = arith.constant 0 : index
    %c0_47 = arith.constant 0 : index
    %47 = vector.load %arg2[%c5, %c0_46, %c0_47] : memref<9x64x64xbf16, #tpu.memory_space<vmem>>, vector<1x64x64xbf16>
    %48 = vector.shape_cast %47 : vector<1x64x64xbf16> to vector<64x64xbf16>
    %cst_48 = arith.constant dense<0.000000e+00> : vector<16x64xf32>
    %49 = tpu.matmul %2, %48, %cst_48 {dimension_numbers = #tpu.dot_dimension_numbers<[1], [0], [0], [1], [0, 0, 1, 1], [], []>} : vector<16x64xbf16>, vector<64x64xbf16>, vector<16x64xf32> -> vector<16x64xf32>
    %c0_49 = arith.constant 0 : index
    %c0_50 = arith.constant 0 : index
    %50 = vector.load %arg10[%c0_49, %c0_50] : memref<16x64xf32, #tpu.memory_space<vmem>>, vector<16x64xf32>
    %cst_51 = arith.constant 0.000000e+00 : f32
    %51 = vector.broadcast %cst_51 : f32 to vector<1x64xf32>
    %52 = vector.extract_strided_slice %49 {offsets = [1, 0], sizes = [15, 64], strides = [1, 1]} : vector<16x64xf32> to vector<15x64xf32>
    %53 = tpu.concatenate %52, %51 in 0 : vector<15x64xf32>, vector<1x64xf32> -> vector<16x64xf32>
    %54 = arith.addf %50, %53 : vector<16x64xf32>
    %c0_52 = arith.constant 0 : index
    %c0_53 = arith.constant 0 : index
    %55 = vector.load %arg10[%c0_52, %c0_53] : memref<16x64xf32, #tpu.memory_space<vmem>>, vector<16x64xf32>
    tpu.vector_store %arg10[%c0_52, %c0_53], %54 {strides = array<i32>} : memref<16x64xf32, #tpu.memory_space<vmem>>, vector<16x64xf32>,
    %c6 = arith.constant 6 : index
    %c0_54 = arith.constant 0 : index
    %c0_55 = arith.constant 0 : index
    %56 = vector.load %arg2[%c6, %c0_54, %c0_55] : memref<9x64x64xbf16, #tpu.memory_space<vmem>>, vector<1x64x64xbf16>
    %57 = vector.shape_cast %56 : vector<1x64x64xbf16> to vector<64x64xbf16>
    %cst_56 = arith.constant dense<0.000000e+00> : vector<16x64xf32>
    %58 = tpu.matmul %2, %57, %cst_56 {dimension_numbers = #tpu.dot_dimension_numbers<[1], [0], [0], [1], [0, 0, 1, 1], [], []>} : vector<16x64xbf16>, vector<64x64xbf16>, vector<16x64xf32> -> vector<16x64xf32>
    %c0_57 = arith.constant 0 : index
    %c0_58 = arith.constant 0 : index
    %59 = vector.load %arg10[%c0_57, %c0_58] : memref<16x64xf32, #tpu.memory_space<vmem>>, vector<16x64xf32>
    %cst_59 = arith.constant 0.000000e+00 : f32
    %60 = vector.broadcast %cst_59 : f32 to vector<3x64xf32>
    %61 = vector.extract_strided_slice %58 {offsets = [3, 0], sizes = [13, 64], strides = [1, 1]} : vector<16x64xf32> to vector<13x64xf32>
    %62 = tpu.concatenate %61, %60 in 0 : vector<13x64xf32>, vector<3x64xf32> -> vector<16x64xf32>
    %63 = arith.addf %59, %62 : vector<16x64xf32>
    %c0_60 = arith.constant 0 : index
    %c0_61 = arith.constant 0 : index
    %64 = vector.load %arg10[%c0_60, %c0_61] : memref<16x64xf32, #tpu.memory_space<vmem>>, vector<16x64xf32>
    tpu.vector_store %arg10[%c0_60, %c0_61], %63 {strides = array<i32>} : memref<16x64xf32, #tpu.memory_space<vmem>>, vector<16x64xf32>,
    %c7 = arith.constant 7 : index
    %c0_62 = arith.constant 0 : index
    %c0_63 = arith.constant 0 : index
    %65 = vector.load %arg2[%c7, %c0_62, %c0_63] : memref<9x64x64xbf16, #tpu.memory_space<vmem>>, vector<1x64x64xbf16>
    %66 = vector.shape_cast %65 : vector<1x64x64xbf16> to vector<64x64xbf16>
    %cst_64 = arith.constant dense<0.000000e+00> : vector<16x64xf32>
    %67 = tpu.matmul %2, %66, %cst_64 {dimension_numbers = #tpu.dot_dimension_numbers<[1], [0], [0], [1], [0, 0, 1, 1], [], []>} : vector<16x64xbf16>, vector<64x64xbf16>, vector<16x64xf32> -> vector<16x64xf32>
    %c0_65 = arith.constant 0 : index
    %c0_66 = arith.constant 0 : index
    %68 = vector.load %arg10[%c0_65, %c0_66] : memref<16x64xf32, #tpu.memory_space<vmem>>, vector<16x64xf32>
    %cst_67 = arith.constant 0.000000e+00 : f32
    %69 = vector.broadcast %cst_67 : f32 to vector<4x64xf32>
    %70 = vector.extract_strided_slice %67 {offsets = [4, 0], sizes = [12, 64], strides = [1, 1]} : vector<16x64xf32> to vector<12x64xf32>
    %71 = tpu.concatenate %70, %69 in 0 : vector<12x64xf32>, vector<4x64xf32> -> vector<16x64xf32>
    %72 = arith.addf %68, %71 : vector<16x64xf32>
    %c0_68 = arith.constant 0 : index
    %c0_69 = arith.constant 0 : index
    %73 = vector.load %arg10[%c0_68, %c0_69] : memref<16x64xf32, #tpu.memory_space<vmem>>, vector<16x64xf32>
    tpu.vector_store %arg10[%c0_68, %c0_69], %72 {strides = array<i32>} : memref<16x64xf32, #tpu.memory_space<vmem>>, vector<16x64xf32>,
    %c8 = arith.constant 8 : index
    %c0_70 = arith.constant 0 : index
    %c0_71 = arith.constant 0 : index
    %74 = vector.load %arg2[%c8, %c0_70, %c0_71] : memref<9x64x64xbf16, #tpu.memory_space<vmem>>, vector<1x64x64xbf16>
    %75 = vector.shape_cast %74 : vector<1x64x64xbf16> to vector<64x64xbf16>
    %cst_72 = arith.constant dense<0.000000e+00> : vector<16x64xf32>
    %76 = tpu.matmul %2, %75, %cst_72 {dimension_numbers = #tpu.dot_dimension_numbers<[1], [0], [0], [1], [0, 0, 1, 1], [], []>} : vector<16x64xbf16>, vector<64x64xbf16>, vector<16x64xf32> -> vector<16x64xf32>
    %c0_73 = arith.constant 0 : index
    %c0_74 = arith.constant 0 : index
    %77 = vector.load %arg10[%c0_73, %c0_74] : memref<16x64xf32, #tpu.memory_space<vmem>>, vector<16x64xf32>
    %cst_75 = arith.constant 0.000000e+00 : f32
    %78 = vector.broadcast %cst_75 : f32 to vector<5x64xf32>
    %79 = vector.extract_strided_slice %76 {offsets = [5, 0], sizes = [11, 64], strides = [1, 1]} : vector<16x64xf32> to vector<11x64xf32>
    %80 = tpu.concatenate %79, %78 in 0 : vector<11x64xf32>, vector<5x64xf32> -> vector<16x64xf32>
    %81 = arith.addf %77, %80 : vector<16x64xf32>
    %c0_76 = arith.constant 0 : index
    %c0_77 = arith.constant 0 : index
    %82 = vector.load %arg10[%c0_76, %c0_77] : memref<16x64xf32, #tpu.memory_space<vmem>>, vector<16x64xf32>
    tpu.vector_store %arg10[%c0_76, %c0_77], %81 {strides = array<i32>} : memref<16x64xf32, #tpu.memory_space<vmem>>, vector<16x64xf32>,
    %c0_78 = arith.constant 0 : index
    %c0_79 = arith.constant 0 : index
    %83 = vector.load %arg10[%c0_78, %c0_79] : memref<16x64xf32, #tpu.memory_space<vmem>>, vector<16x64xf32>
    %cst_80 = arith.constant 0.000000e+00 : f32
    %84 = vector.broadcast %cst_80 : f32 to vector<16x64xf32>
    %85 = arith.maximumf %83, %84 : vector<16x64xf32>
    %86 = vector.broadcast %0 : vector<16x1xf32> to vector<16x64xf32>
    %87 = arith.mulf %85, %86 : vector<16x64xf32>
    %88 = arith.truncf %87 : vector<16x64xf32> to vector<16x64xbf16>
    %cst_81 = arith.constant 0.000000e+00 : f32
    %89 = vector.broadcast %cst_81 : f32 to vector<16x64xf32>
    %c0_82 = arith.constant 0 : index
    %c0_83 = arith.constant 0 : index
    %90 = vector.load %arg10[%c0_82, %c0_83] : memref<16x64xf32, #tpu.memory_space<vmem>>, vector<16x64xf32>
    tpu.vector_store %arg10[%c0_82, %c0_83], %89 {strides = array<i32>} : memref<16x64xf32, #tpu.memory_space<vmem>>, vector<16x64xf32>,
    %c0_84 = arith.constant 0 : index
    %c0_85 = arith.constant 0 : index
    %c0_86 = arith.constant 0 : index
    %91 = vector.load %arg3[%c0_84, %c0_85, %c0_86] : memref<9x64x64xbf16, #tpu.memory_space<vmem>>, vector<1x64x64xbf16>
    %92 = vector.shape_cast %91 : vector<1x64x64xbf16> to vector<64x64xbf16>
    %cst_87 = arith.constant dense<0.000000e+00> : vector<16x64xf32>
    %93 = tpu.matmul %88, %92, %cst_87 {dimension_numbers = #tpu.dot_dimension_numbers<[1], [0], [0], [1], [0, 0, 1, 1], [], []>} : vector<16x64xbf16>, vector<64x64xbf16>, vector<16x64xf32> -> vector<16x64xf32>
    %c0_88 = arith.constant 0 : index
    %c0_89 = arith.constant 0 : index
    %94 = vector.load %arg10[%c0_88, %c0_89] : memref<16x64xf32, #tpu.memory_space<vmem>>, vector<16x64xf32>
    %cst_90 = arith.constant 0.000000e+00 : f32
    %95 = vector.broadcast %cst_90 : f32 to vector<5x64xf32>
    %96 = vector.extract_strided_slice %93 {offsets = [0, 0], sizes = [11, 64], strides = [1, 1]} : vector<16x64xf32> to vector<11x64xf32>
    %97 = tpu.concatenate %95, %96 in 0 : vector<5x64xf32>, vector<11x64xf32> -> vector<16x64xf32>
    %98 = arith.addf %94, %97 : vector<16x64xf32>
    %c0_91 = arith.constant 0 : index
    %c0_92 = arith.constant 0 : index
    %99 = vector.load %arg10[%c0_91, %c0_92] : memref<16x64xf32, #tpu.memory_space<vmem>>, vector<16x64xf32>
    tpu.vector_store %arg10[%c0_91, %c0_92], %98 {strides = array<i32>} : memref<16x64xf32, #tpu.memory_space<vmem>>, vector<16x64xf32>,
    %c1_93 = arith.constant 1 : index
    %c0_94 = arith.constant 0 : index
    %c0_95 = arith.constant 0 : index
    %100 = vector.load %arg3[%c1_93, %c0_94, %c0_95] : memref<9x64x64xbf16, #tpu.memory_space<vmem>>, vector<1x64x64xbf16>
    %101 = vector.shape_cast %100 : vector<1x64x64xbf16> to vector<64x64xbf16>
    %cst_96 = arith.constant dense<0.000000e+00> : vector<16x64xf32>
    %102 = tpu.matmul %88, %101, %cst_96 {dimension_numbers = #tpu.dot_dimension_numbers<[1], [0], [0], [1], [0, 0, 1, 1], [], []>} : vector<16x64xbf16>, vector<64x64xbf16>, vector<16x64xf32> -> vector<16x64xf32>
    %c0_97 = arith.constant 0 : index
    %c0_98 = arith.constant 0 : index
    %103 = vector.load %arg10[%c0_97, %c0_98] : memref<16x64xf32, #tpu.memory_space<vmem>>, vector<16x64xf32>
    %cst_99 = arith.constant 0.000000e+00 : f32
    %104 = vector.broadcast %cst_99 : f32 to vector<4x64xf32>
    %105 = vector.extract_strided_slice %102 {offsets = [0, 0], sizes = [12, 64], strides = [1, 1]} : vector<16x64xf32> to vector<12x64xf32>
    %106 = tpu.concatenate %104, %105 in 0 : vector<4x64xf32>, vector<12x64xf32> -> vector<16x64xf32>
    %107 = arith.addf %103, %106 : vector<16x64xf32>
    %c0_100 = arith.constant 0 : index
    %c0_101 = arith.constant 0 : index
    %108 = vector.load %arg10[%c0_100, %c0_101] : memref<16x64xf32, #tpu.memory_space<vmem>>, vector<16x64xf32>
    tpu.vector_store %arg10[%c0_100, %c0_101], %107 {strides = array<i32>} : memref<16x64xf32, #tpu.memory_space<vmem>>, vector<16x64xf32>,
    %c2_102 = arith.constant 2 : index
    %c0_103 = arith.constant 0 : index
    %c0_104 = arith.constant 0 : index
    %109 = vector.load %arg3[%c2_102, %c0_103, %c0_104] : memref<9x64x64xbf16, #tpu.memory_space<vmem>>, vector<1x64x64xbf16>
    %110 = vector.shape_cast %109 : vector<1x64x64xbf16> to vector<64x64xbf16>
    %cst_105 = arith.constant dense<0.000000e+00> : vector<16x64xf32>
    %111 = tpu.matmul %88, %110, %cst_105 {dimension_numbers = #tpu.dot_dimension_numbers<[1], [0], [0], [1], [0, 0, 1, 1], [], []>} : vector<16x64xbf16>, vector<64x64xbf16>, vector<16x64xf32> -> vector<16x64xf32>
    %c0_106 = arith.constant 0 : index
    %c0_107 = arith.constant 0 : index
    %112 = vector.load %arg10[%c0_106, %c0_107] : memref<16x64xf32, #tpu.memory_space<vmem>>, vector<16x64xf32>
    %cst_108 = arith.constant 0.000000e+00 : f32
    %113 = vector.broadcast %cst_108 : f32 to vector<3x64xf32>
    %114 = vector.extract_strided_slice %111 {offsets = [0, 0], sizes = [13, 64], strides = [1, 1]} : vector<16x64xf32> to vector<13x64xf32>
    %115 = tpu.concatenate %113, %114 in 0 : vector<3x64xf32>, vector<13x64xf32> -> vector<16x64xf32>
    %116 = arith.addf %112, %115 : vector<16x64xf32>
    %c0_109 = arith.constant 0 : index
    %c0_110 = arith.constant 0 : index
    %117 = vector.load %arg10[%c0_109, %c0_110] : memref<16x64xf32, #tpu.memory_space<vmem>>, vector<16x64xf32>
    tpu.vector_store %arg10[%c0_109, %c0_110], %116 {strides = array<i32>} : memref<16x64xf32, #tpu.memory_space<vmem>>, vector<16x64xf32>,
    %c3_111 = arith.constant 3 : index
    %c0_112 = arith.constant 0 : index
    %c0_113 = arith.constant 0 : index
    %118 = vector.load %arg3[%c3_111, %c0_112, %c0_113] : memref<9x64x64xbf16, #tpu.memory_space<vmem>>, vector<1x64x64xbf16>
    %119 = vector.shape_cast %118 : vector<1x64x64xbf16> to vector<64x64xbf16>
    %cst_114 = arith.constant dense<0.000000e+00> : vector<16x64xf32>
    %120 = tpu.matmul %88, %119, %cst_114 {dimension_numbers = #tpu.dot_dimension_numbers<[1], [0], [0], [1], [0, 0, 1, 1], [], []>} : vector<16x64xbf16>, vector<64x64xbf16>, vector<16x64xf32> -> vector<16x64xf32>
    %c0_115 = arith.constant 0 : index
    %c0_116 = arith.constant 0 : index
    %121 = vector.load %arg10[%c0_115, %c0_116] : memref<16x64xf32, #tpu.memory_space<vmem>>, vector<16x64xf32>
    %cst_117 = arith.constant 0.000000e+00 : f32
    %122 = vector.broadcast %cst_117 : f32 to vector<1x64xf32>
    %123 = vector.extract_strided_slice %120 {offsets = [0, 0], sizes = [15, 64], strides = [1, 1]} : vector<16x64xf32> to vector<15x64xf32>
    %124 = tpu.concatenate %122, %123 in 0 : vector<1x64xf32>, vector<15x64xf32> -> vector<16x64xf32>
    %125 = arith.addf %121, %124 : vector<16x64xf32>
    %c0_118 = arith.constant 0 : index
    %c0_119 = arith.constant 0 : index
    %126 = vector.load %arg10[%c0_118, %c0_119] : memref<16x64xf32, #tpu.memory_space<vmem>>, vector<16x64xf32>
    tpu.vector_store %arg10[%c0_118, %c0_119], %125 {strides = array<i32>} : memref<16x64xf32, #tpu.memory_space<vmem>>, vector<16x64xf32>,
    %c4_120 = arith.constant 4 : index
    %c0_121 = arith.constant 0 : index
    %c0_122 = arith.constant 0 : index
    %127 = vector.load %arg3[%c4_120, %c0_121, %c0_122] : memref<9x64x64xbf16, #tpu.memory_space<vmem>>, vector<1x64x64xbf16>
    %128 = vector.shape_cast %127 : vector<1x64x64xbf16> to vector<64x64xbf16>
    %cst_123 = arith.constant dense<0.000000e+00> : vector<16x64xf32>
    %129 = tpu.matmul %88, %128, %cst_123 {dimension_numbers = #tpu.dot_dimension_numbers<[1], [0], [0], [1], [0, 0, 1, 1], [], []>} : vector<16x64xbf16>, vector<64x64xbf16>, vector<16x64xf32> -> vector<16x64xf32>
    %c0_124 = arith.constant 0 : index
    %c0_125 = arith.constant 0 : index
    %130 = vector.load %arg10[%c0_124, %c0_125] : memref<16x64xf32, #tpu.memory_space<vmem>>, vector<16x64xf32>
    %131 = arith.addf %130, %129 : vector<16x64xf32>
    %c0_126 = arith.constant 0 : index
    %c0_127 = arith.constant 0 : index
    %132 = vector.load %arg10[%c0_126, %c0_127] : memref<16x64xf32, #tpu.memory_space<vmem>>, vector<16x64xf32>
    tpu.vector_store %arg10[%c0_126, %c0_127], %131 {strides = array<i32>} : memref<16x64xf32, #tpu.memory_space<vmem>>, vector<16x64xf32>,
    %c5_128 = arith.constant 5 : index
    %c0_129 = arith.constant 0 : index
    %c0_130 = arith.constant 0 : index
    %133 = vector.load %arg3[%c5_128, %c0_129, %c0_130] : memref<9x64x64xbf16, #tpu.memory_space<vmem>>, vector<1x64x64xbf16>
    %134 = vector.shape_cast %133 : vector<1x64x64xbf16> to vector<64x64xbf16>
    %cst_131 = arith.constant dense<0.000000e+00> : vector<16x64xf32>
    %135 = tpu.matmul %88, %134, %cst_131 {dimension_numbers = #tpu.dot_dimension_numbers<[1], [0], [0], [1], [0, 0, 1, 1], [], []>} : vector<16x64xbf16>, vector<64x64xbf16>, vector<16x64xf32> -> vector<16x64xf32>
    %c0_132 = arith.constant 0 : index
    %c0_133 = arith.constant 0 : index
    %136 = vector.load %arg10[%c0_132, %c0_133] : memref<16x64xf32, #tpu.memory_space<vmem>>, vector<16x64xf32>
    %cst_134 = arith.constant 0.000000e+00 : f32
    %137 = vector.broadcast %cst_134 : f32 to vector<1x64xf32>
    %138 = vector.extract_strided_slice %135 {offsets = [1, 0], sizes = [15, 64], strides = [1, 1]} : vector<16x64xf32> to vector<15x64xf32>
    %139 = tpu.concatenate %138, %137 in 0 : vector<15x64xf32>, vector<1x64xf32> -> vector<16x64xf32>
    %140 = arith.addf %136, %139 : vector<16x64xf32>
    %c0_135 = arith.constant 0 : index
    %c0_136 = arith.constant 0 : index
    %141 = vector.load %arg10[%c0_135, %c0_136] : memref<16x64xf32, #tpu.memory_space<vmem>>, vector<16x64xf32>
    tpu.vector_store %arg10[%c0_135, %c0_136], %140 {strides = array<i32>} : memref<16x64xf32, #tpu.memory_space<vmem>>, vector<16x64xf32>,
    %c6_137 = arith.constant 6 : index
    %c0_138 = arith.constant 0 : index
    %c0_139 = arith.constant 0 : index
    %142 = vector.load %arg3[%c6_137, %c0_138, %c0_139] : memref<9x64x64xbf16, #tpu.memory_space<vmem>>, vector<1x64x64xbf16>
    %143 = vector.shape_cast %142 : vector<1x64x64xbf16> to vector<64x64xbf16>
    %cst_140 = arith.constant dense<0.000000e+00> : vector<16x64xf32>
    %144 = tpu.matmul %88, %143, %cst_140 {dimension_numbers = #tpu.dot_dimension_numbers<[1], [0], [0], [1], [0, 0, 1, 1], [], []>} : vector<16x64xbf16>, vector<64x64xbf16>, vector<16x64xf32> -> vector<16x64xf32>
    %c0_141 = arith.constant 0 : index
    %c0_142 = arith.constant 0 : index
    %145 = vector.load %arg10[%c0_141, %c0_142] : memref<16x64xf32, #tpu.memory_space<vmem>>, vector<16x64xf32>
    %cst_143 = arith.constant 0.000000e+00 : f32
    %146 = vector.broadcast %cst_143 : f32 to vector<3x64xf32>
    %147 = vector.extract_strided_slice %144 {offsets = [3, 0], sizes = [13, 64], strides = [1, 1]} : vector<16x64xf32> to vector<13x64xf32>
    %148 = tpu.concatenate %147, %146 in 0 : vector<13x64xf32>, vector<3x64xf32> -> vector<16x64xf32>
    %149 = arith.addf %145, %148 : vector<16x64xf32>
    %c0_144 = arith.constant 0 : index
    %c0_145 = arith.constant 0 : index
    %150 = vector.load %arg10[%c0_144, %c0_145] : memref<16x64xf32, #tpu.memory_space<vmem>>, vector<16x64xf32>
    tpu.vector_store %arg10[%c0_144, %c0_145], %149 {strides = array<i32>} : memref<16x64xf32, #tpu.memory_space<vmem>>, vector<16x64xf32>,
    %c7_146 = arith.constant 7 : index
    %c0_147 = arith.constant 0 : index
    %c0_148 = arith.constant 0 : index
    %151 = vector.load %arg3[%c7_146, %c0_147, %c0_148] : memref<9x64x64xbf16, #tpu.memory_space<vmem>>, vector<1x64x64xbf16>
    %152 = vector.shape_cast %151 : vector<1x64x64xbf16> to vector<64x64xbf16>
    %cst_149 = arith.constant dense<0.000000e+00> : vector<16x64xf32>
    %153 = tpu.matmul %88, %152, %cst_149 {dimension_numbers = #tpu.dot_dimension_numbers<[1], [0], [0], [1], [0, 0, 1, 1], [], []>} : vector<16x64xbf16>, vector<64x64xbf16>, vector<16x64xf32> -> vector<16x64xf32>
    %c0_150 = arith.constant 0 : index
    %c0_151 = arith.constant 0 : index
    %154 = vector.load %arg10[%c0_150, %c0_151] : memref<16x64xf32, #tpu.memory_space<vmem>>, vector<16x64xf32>
    %cst_152 = arith.constant 0.000000e+00 : f32
    %155 = vector.broadcast %cst_152 : f32 to vector<4x64xf32>
    %156 = vector.extract_strided_slice %153 {offsets = [4, 0], sizes = [12, 64], strides = [1, 1]} : vector<16x64xf32> to vector<12x64xf32>
    %157 = tpu.concatenate %156, %155 in 0 : vector<12x64xf32>, vector<4x64xf32> -> vector<16x64xf32>
    %158 = arith.addf %154, %157 : vector<16x64xf32>
    %c0_153 = arith.constant 0 : index
    %c0_154 = arith.constant 0 : index
    %159 = vector.load %arg10[%c0_153, %c0_154] : memref<16x64xf32, #tpu.memory_space<vmem>>, vector<16x64xf32>
    tpu.vector_store %arg10[%c0_153, %c0_154], %158 {strides = array<i32>} : memref<16x64xf32, #tpu.memory_space<vmem>>, vector<16x64xf32>,
    %c8_155 = arith.constant 8 : index
    %c0_156 = arith.constant 0 : index
    %c0_157 = arith.constant 0 : index
    %160 = vector.load %arg3[%c8_155, %c0_156, %c0_157] : memref<9x64x64xbf16, #tpu.memory_space<vmem>>, vector<1x64x64xbf16>
    %161 = vector.shape_cast %160 : vector<1x64x64xbf16> to vector<64x64xbf16>
    %cst_158 = arith.constant dense<0.000000e+00> : vector<16x64xf32>
    %162 = tpu.matmul %88, %161, %cst_158 {dimension_numbers = #tpu.dot_dimension_numbers<[1], [0], [0], [1], [0, 0, 1, 1], [], []>} : vector<16x64xbf16>, vector<64x64xbf16>, vector<16x64xf32> -> vector<16x64xf32>
    %c0_159 = arith.constant 0 : index
    %c0_160 = arith.constant 0 : index
    %163 = vector.load %arg10[%c0_159, %c0_160] : memref<16x64xf32, #tpu.memory_space<vmem>>, vector<16x64xf32>
    %cst_161 = arith.constant 0.000000e+00 : f32
    %164 = vector.broadcast %cst_161 : f32 to vector<5x64xf32>
    %165 = vector.extract_strided_slice %162 {offsets = [5, 0], sizes = [11, 64], strides = [1, 1]} : vector<16x64xf32> to vector<11x64xf32>
    %166 = tpu.concatenate %165, %164 in 0 : vector<11x64xf32>, vector<5x64xf32> -> vector<16x64xf32>
    %167 = arith.addf %163, %166 : vector<16x64xf32>
    %c0_162 = arith.constant 0 : index
    %c0_163 = arith.constant 0 : index
    %168 = vector.load %arg10[%c0_162, %c0_163] : memref<16x64xf32, #tpu.memory_space<vmem>>, vector<16x64xf32>
    tpu.vector_store %arg10[%c0_162, %c0_163], %167 {strides = array<i32>} : memref<16x64xf32, #tpu.memory_space<vmem>>, vector<16x64xf32>,
    %c0_164 = arith.constant 0 : index
    %c0_165 = arith.constant 0 : index
    %169 = vector.load %arg10[%c0_164, %c0_165] : memref<16x64xf32, #tpu.memory_space<vmem>>, vector<16x64xf32>
    %170 = vector.broadcast %0 : vector<16x1xf32> to vector<16x64xf32>
    %171 = arith.mulf %169, %170 : vector<16x64xf32>
    %cst_166 = arith.constant dense<0.000000e+00> : vector<64xf32>
    %172 = vector.multi_reduction <add>, %171, %cst_166 [0] : vector<16x64xf32> to vector<64xf32>
    %173 = vector.shape_cast %172 : vector<64xf32> to vector<1x64xf32>
    %c0_167 = arith.constant 0 : index
    %c0_168 = arith.constant 0 : index
    %174 = vector.load %arg6[%c0_167, %c0_168] : memref<64x32xf32, #tpu.memory_space<vmem>>, vector<64x32xf32>
    %cst_169 = arith.constant dense<0.000000e+00> : vector<1x32xf32>
    %175 = tpu.matmul %173, %174, %cst_169 {dimension_numbers = #tpu.dot_dimension_numbers<[1], [0], [0], [1], [0, 0, 1, 1], [], []>} : vector<1x64xf32>, vector<64x32xf32>, vector<1x32xf32> -> vector<1x32xf32>
    %c0_170 = arith.constant 0 : index
    %c0_171 = arith.constant 0 : index
    %176 = vector.load %arg4[%c0_170, %c0_171] : memref<32x8xf32, #tpu.memory_space<vmem>>, vector<32x8xf32>
    %cst_172 = arith.constant dense<0.000000e+00> : vector<1x8xf32>
    %177 = tpu.matmul %175, %176, %cst_172 {dimension_numbers = #tpu.dot_dimension_numbers<[1], [0], [0], [1], [0, 0, 1, 1], [], []>} : vector<1x32xf32>, vector<32x8xf32>, vector<1x8xf32> -> vector<1x8xf32>
    %cst_173 = arith.constant 0.000000e+00 : f32
    %178 = vector.broadcast %cst_173 : f32 to vector<1x8xf32>
    %179 = arith.maximumf %177, %178 : vector<1x8xf32>
    %c0_174 = arith.constant 0 : index
    %c0_175 = arith.constant 0 : index
    %180 = vector.load %arg5[%c0_174, %c0_175] : memref<8x32xf32, #tpu.memory_space<vmem>>, vector<8x32xf32>
    %cst_176 = arith.constant dense<0.000000e+00> : vector<1x32xf32>
    %181 = tpu.matmul %179, %180, %cst_176 {dimension_numbers = #tpu.dot_dimension_numbers<[1], [0], [0], [1], [0, 0, 1, 1], [], []>} : vector<1x8xf32>, vector<8x32xf32>, vector<1x32xf32> -> vector<1x32xf32>
    %182 = arith.negf %181 : vector<1x32xf32>
    %183 = math.exp %182 : vector<1x32xf32>
    %cst_177 = arith.constant 1.000000e+00 : f32
    %184 = vector.broadcast %cst_177 : f32 to vector<1x32xf32>
    %185 = arith.addf %184, %183 : vector<1x32xf32>
    %186 = arith.divf %184, %185 : vector<1x32xf32>
    %c0_178 = arith.constant 0 : index
    %c0_179 = arith.constant 0 : index
    %187 = vector.load %arg7[%c0_178, %c0_179] : memref<32x64xf32, #tpu.memory_space<vmem>>, vector<32x64xf32>
    %cst_180 = arith.constant dense<0.000000e+00> : vector<1x64xf32>
    %188 = tpu.matmul %186, %187, %cst_180 {dimension_numbers = #tpu.dot_dimension_numbers<[1], [0], [0], [1], [0, 0, 1, 1], [], []>} : vector<1x32xf32>, vector<32x64xf32>, vector<1x64xf32> -> vector<1x64xf32>
    %189 = vector.broadcast %188 : vector<1x64xf32> to vector<16x64xf32>
    %190 = arith.mulf %171, %189 : vector<16x64xf32>
    %191 = arith.extf %2 : vector<16x64xbf16> to vector<16x64xf32>
    %192 = arith.addf %190, %191 : vector<16x64xf32>
    %193 = arith.truncf %192 : vector<16x64xf32> to vector<16x64xbf16>
    %c0_181 = arith.constant 0 : index
    %c0_182 = arith.constant 0 : index
    %c0_183 = arith.constant 0 : index
    %194 = vector.load %arg9[%c0_181, %c0_182, %c0_183] : memref<1x16x64xbf16, #tpu.memory_space<vmem>>, vector<1x16x64xbf16>
    %195 = vector.shape_cast %194 : vector<1x16x64xbf16> to vector<16x64xbf16>
    %196 = vector.shape_cast %193 : vector<16x64xbf16> to vector<1x16x64xbf16>
    tpu.vector_store %arg9[%c0_181, %c0_182, %c0_183], %196 {strides = array<i32>} : memref<1x16x64xbf16, #tpu.memory_space<vmem>>, vector<1x16x64xbf16>,
    return
  }
  func.func @transform_0(%arg0: i32) -> (i32, i32, i32) {
    %c0_i32 = arith.constant 0 : i32
    %c0_i32_0 = arith.constant 0 : i32
    %c0_i32_1 = arith.constant 0 : i32
    return %arg0, %c0_i32, %c0_i32_0 : i32, i32, i32
  }
  func.func @transform_1(%arg0: i32) -> (i32, i32, i32) {
    %c0_i32 = arith.constant 0 : i32
    %c0_i32_0 = arith.constant 0 : i32
    %c0_i32_1 = arith.constant 0 : i32
    %c0_i32_2 = arith.constant 0 : i32
    return %c0_i32, %c0_i32_0, %c0_i32_1 : i32, i32, i32
  }
  func.func @transform_2(%arg0: i32) -> (i32, i32, i32) {
    %c0_i32 = arith.constant 0 : i32
    %c0_i32_0 = arith.constant 0 : i32
    %c0_i32_1 = arith.constant 0 : i32
    %c0_i32_2 = arith.constant 0 : i32
    return %c0_i32, %c0_i32_0, %c0_i32_1 : i32, i32, i32
  }
  func.func @transform_3(%arg0: i32) -> (i32, i32) {
    %c0_i32 = arith.constant 0 : i32
    %c0_i32_0 = arith.constant 0 : i32
    %c0_i32_1 = arith.constant 0 : i32
    return %c0_i32, %c0_i32_0 : i32, i32
  }
  func.func @transform_4(%arg0: i32) -> (i32, i32) {
    %c0_i32 = arith.constant 0 : i32
    %c0_i32_0 = arith.constant 0 : i32
    %c0_i32_1 = arith.constant 0 : i32
    return %c0_i32, %c0_i32_0 : i32, i32
  }
  func.func @transform_5(%arg0: i32) -> (i32, i32) {
    %c0_i32 = arith.constant 0 : i32
    %c0_i32_0 = arith.constant 0 : i32
    %c0_i32_1 = arith.constant 0 : i32
    return %c0_i32, %c0_i32_0 : i32, i32
  }
  func.func @transform_6(%arg0: i32) -> (i32, i32) {
    %c0_i32 = arith.constant 0 : i32
    %c0_i32_0 = arith.constant 0 : i32
    %c0_i32_1 = arith.constant 0 : i32
    return %c0_i32, %c0_i32_0 : i32, i32
  }
  func.func @transform_7(%arg0: i32) -> (i32, i32) {
    %c0_i32 = arith.constant 0 : i32
    %c0_i32_0 = arith.constant 0 : i32
    %c0_i32_1 = arith.constant 0 : i32
    return %c0_i32, %c0_i32_0 : i32, i32
  }
  func.func @transform_8(%arg0: i32) -> (i32, i32, i32) {
    %c0_i32 = arith.constant 0 : i32
    %c0_i32_0 = arith.constant 0 : i32
    %c0_i32_1 = arith.constant 0 : i32
    return %arg0, %c0_i32, %c0_i32_0 : i32, i32, i32
  }
}

</mosaic_0001>

<bundles_post_ra>
// kernel: tile.9
= control target key start
LH: loop header
LB: loop body
LE: loop exit
PB: predicated region body
PF: predicated region fallthrough
CT: control target
= control target key end

     0   :  { %s67_s10 = smov 112   ;;  %s68_s11 = smov 80   ;;  %vm3_vm0 = vcmask 130048   ;;  %vm9_vm1 = vcmask 1048448   ;;  %vm15_vm2 = vcmask 917248   ;;  %vm21_vm3 = vcmask 786048   ;;  %s111_s0 = inlined_call_operand.vmem [shape: f32[8,16], index: 0, kind: input, shape index: {}]   ;;  %s112_s1 = inlined_call_operand.vmem [shape: f32[1,128], index: 1, kind: output, shape index: {}]  }
   0x1   :  { %v53_v0 = vld [vmem:[%s111_s0 + $0x7] sm:$0x1]   ;;  %v55_v1 = vld [vmem:[%s111_s0 + $0x5] sm:$0x1]   ;;  %v54_v2 = vld [vmem:[%s111_s0 + $0x6] sm:$0x1]  }
   0x2   :  { %7 = vrot.lane.b32.xlu0 %v53_v0, %s67_s10  ;;  %19 = vrot.lane.b32.xlu1 %v55_v1, %s68_s11  ;;  %v56_v3 = vld [vmem:[%s111_s0 + $0x4] sm:$0x1]   ;;  %v2_v4 = vld [vmem:[%s111_s0] sm:$0x1]   ;;  %s69_s18 = smov 96   ;;  %s70_s19 = smov 64  }
   0x3   :  { %4 = vst.msk [vmem:[#allocation0] sm:$0x1] %vm3_vm0, %v2_v4   ;;  %v57_v5 = vld [vmem:[%s111_s0 + $0x3] sm:$0x1]   ;;  %v58_v6 = vld [vmem:[%s111_s0 + $0x2] sm:$0x1]  }
   0x4   :  { %s71_s24 = smov 48   ;;  %s72_s25 = smov 32   ;;  %v59_v7 = vld [vmem:[%s111_s0 + $0x1] sm:$0x1]   ;;  %vm27_vm4 = vcmask 654848   ;;  %vm33_vm5 = vcmask 523648  }
   0x5   :  { %s73_s0 = smov 16   ;;  %vm39_vm6 = vcmask 392448   ;;  %vm45_vm7 = vcmask 261248  }
   0x6   :  { %13 = vrot.lane.b32.xlu0 %v54_v2, %s69_s18  ;;  %25 = vrot.lane.b32.xlu1 %v56_v3, %s70_s19 }
   0xa   :  { %31 = vrot.lane.b32.xlu0 %v57_v5, %s71_s24  ;;  %37 = vrot.lane.b32.xlu1 %v58_v6, %s72_s25 }
   0xe   :  { %43 = vrot.lane.b32.xlu0 %v59_v7, %s73_s0 }
  0x74   :  { %v8_v8 = vpop.permute.xlu0 %7   ;;  %v20_v9 = vpop.permute.xlu1 %19  }
  0x75   :  { %10 = vst.msk [vmem:[#allocation0] sm:$0x1] %vm9_vm1, %v8_v8  }
  0x78   :  { %v14_v10 = vpop.permute.xlu0 %13   ;;  %v26_v11 = vpop.permute.xlu1 %25  }
  0x79   :  { %16 = vst.msk [vmem:[#allocation0] sm:$0x1] %vm15_vm2, %v14_v10  }
  0x7a   :  { %22 = vst.msk [vmem:[#allocation0] sm:$0x1] %vm21_vm3, %v20_v9  }
  0x7b   :  { %28 = vst.msk [vmem:[#allocation0] sm:$0x1] %vm27_vm4, %v26_v11  }
  0x7c   :  { %v32_v12 = vpop.permute.xlu0 %31   ;;  %v38_v13 = vpop.permute.xlu1 %37  }
  0x7d   :  { %34 = vst.msk [vmem:[#allocation0] sm:$0x1] %vm33_vm5, %v32_v12  }
  0x7e   :  { %40 = vst.msk [vmem:[#allocation0] sm:$0x1] %vm39_vm6, %v38_v13  }
  0x80   :  { %v44_v14 = vpop.permute.xlu0 %43  }
  0x81   :  { %46 = vst.msk [vmem:[#allocation0] sm:$0x1] %vm45_vm7, %v44_v14  }
  0x88   :  { %v50_v15 = vld [vmem:[#allocation0] sm:$0x1] }
  0x89   :  { %52 = vst [vmem:[%s112_s1] sm:$0x1] %v50_v15 }

// kernel: encoder_forward.9
= control target key start
LH: loop header
LB: loop body
LE: loop exit
PB: predicated region body
PF: predicated region fallthrough
CT: control target
= control target key end

     0   :  { %s2655_s15 = smov 0   ;;  %s3316_s0 = inlined_call_operand.vmem [shape: bf16[2,100,8], index: 0, kind: input, shape index: {}]   ;;  %s3317_s1 = inlined_call_operand.vmem [shape: bf16[9,8,128], index: 1, kind: input, shape index: {}]   ;;  %s3318_s2 = inlined_call_operand.vmem [shape: f32[1,128], index: 2, kind: input, shape index: {}]   ;;  %s3319_s3 = inlined_call_operand.vmem [shape: f32[100,1], index: 3, kind: input, shape index: {}]   ;;  %s3320_s4 = inlined_call_operand.vmem [shape: bf16[2,100,128], index: 4, kind: output, shape index: {}]  }
   0x1 LB: > { %s2105_s16 = sadd.s32 4294967295, %s2625_s15   ;;  %p2109_p0 = scmp.ge.s32.totalorder %s2625_s15, 1  ;;  %s2625_s15 = sphi %s2655_s15, %s14_s15  }
   0x2   : > { %p162_p1 = scmp.lt.s32.totalorder %s2625_s15, 3 }
   0x4   : > { %p163_p2 = pnand %p2109_p0, %p162_p1 }
   0x5   : > { %v225_v0 = vld [vmem:[%s3317_s1] sm:$0xf] (!%p163_p2)  ;;  %vm281_vm0 = vcmask (!%p163_p2), 1043456   ;;  %p188_p3 = scmp.lt.s32.totalorder (!%p163_p2), %s2105_s16, 1  ;;  %v2627_v1 = vmov (!%p163_p2), 0.0   ;;  %vm2628_vm1 = vmmov (!%p163_p2), 0  }
   0x6   : > { %166 = sbr.rel (%p163_p2) target bundleno = 490 (0x1ea), region = 36  ;;  %2596 = vmatprep.subr.bf16.mxu1 (!%p163_p2), %v2627_v1  ;;  %224 = vst [vmem:[#allocation2 + $0x60] sm:$0xf] (!%p163_p2), %v2627_v1  ;;  %2326 = vmatprep.subr.bf16.mxu0 (!%p163_p2), %v2627_v1  ;;  %v283_v2 = vsel (!%p163_p2), %vm281_vm0, %v225_v0, 0  ;;  %v2134_v3 = vld [vmem:[%s3317_s1 + $0x8] sm:$0xf] (!%p163_p2) }
   0x7   : > { %2597 = vmatpush3.bf16.msra.mxu1 (!%p163_p2), %v283_v2  ;;  %2327 = vmatpush3.bf16.msra.mxu0 (!%p163_p2), %v283_v2  ;;  %v2126_v4 = vld [vmem:[%s3317_s1 + $0x4] sm:$0xf] (!%p163_p2)  ;;  %vm259_vm2 = vcmask (!%p163_p2), 64512   ;;  %v643_v6 = vsel (!%p163_p2), %vm281_vm0, %v2134_v3, 0  ;;  %v2142_v14 = vld [vmem:[%s3317_s1 + $0xc] sm:$0xf] (!%p163_p2) }
   0x8   : > { %2328 = vmatprep.mubr.msk.bf16.mxu0 (!%p163_p2), %vm2628_vm1, %v2627_v1  ;;  %2344 = vmatprep.mubr.msk.bf16.mxu1 (!%p163_p2), %vm2628_vm1, %v2627_v1  ;;  %v463_v8 = vsel (!%p163_p2), %vm281_vm0, %v2126_v4, 0  ;;  %v823_v15 = vsel (!%p163_p2), %vm281_vm0, %v2142_v14, 0  ;;  %v2150_v16 = vld [vmem:[%s3317_s1 + $0x10] sm:$0xf] (!%p163_p2)  ;;  %v2158_v18 = vld [vmem:[%s3317_s1 + $0x14] sm:$0xf] (!%p163_p2) }
   0x9   : > { %2356 = vmatprep.subr.bf16.mxu1 (!%p163_p2), %v2627_v1  ;;  %2386 = vmatprep.subr.bf16.mxu0 (!%p163_p2), %v2627_v1  ;;  %v1007_v17 = vsel (!%p163_p2), %vm281_vm0, %v2150_v16, 0  ;;  %v1139_v19 = vsel (!%p163_p2), %vm281_vm0, %v2158_v18, 0  ;;  %v2166_v20 = vld [vmem:[%s3317_s1 + $0x18] sm:$0xf] (!%p163_p2)  ;;  %v2174_v22 = vld [vmem:[%s3317_s1 + $0x1c] sm:$0xf] (!%p163_p2) }
   0xa   : > { %v1324_v21 = vsel (!%p163_p2), %vm281_vm0, %v2166_v20, 0  ;;  %v1503_v23 = vsel (!%p163_p2), %vm281_vm0, %v2174_v22, 0  ;;  %v2182_v24 = vld [vmem:[%s3317_s1 + $0x20] sm:$0xf] (!%p163_p2)  ;;  %v2629_v26 = vmov (!%p163_p2), 0   ;;  %v1894_v28 = vld [vmem:[%s3319_s3 + $0x8] sm:$0xff] (!%p163_p2) }
   0xb   : > { %v1683_v25 = vsel (!%p163_p2), %vm281_vm0, %v2182_v24, 0  ;;  %2610 = vset.pattern.permute.xlu0 (!%p163_p2), %v2629_v26  ;;  %v1893_v27 = vld [vmem:[%s3319_s3] sm:$0xff] (!%p163_p2)  ;;  %2611 = vset.pattern.permute.xlu1 (!%p163_p2), %v2629_v26  ;;  %v1899_v30 = vld [vmem:[%s3319_s3 + $0x30] sm:$0xff] (!%p163_p2)  ;;  %v1896_v34 = vld [vmem:[%s3319_s3 + $0x18] sm:$0xff] (!%p163_p2)  ;;  %vm397_vm3 = vcmask (!%p163_p2), 1042432   ;;  %vm577_vm4 = vcmask (!%p163_p2), 1041408  }
   0xc   : > { %1908 = vperm.xlu0 (!%p163_p2), %2610, %v1893_v27   ;;  %v1897_v29 = vld [vmem:[%s3319_s3 + $0x20] sm:$0xff] (!%p163_p2)  ;;  %v1895_v32 = vld [vmem:[%s3319_s3 + $0x10] sm:$0xff] (!%p163_p2)  ;;  %v1898_v36 = vld [vmem:[%s3319_s3 + $0x28] sm:$0xff] (!%p163_p2)  ;;  %vm757_vm5 = vcmask (!%p163_p2), 1040384   ;;  %vm1255_vm6 = vcmask (!%p163_p2), 1046528   ;;  %vm1617_vm7 = vcmask (!%p163_p2), 1045504  }
   0xd   : > { %s3322_s16 = smov (!%p188_p3, %s2105_s16), 1  ;;  %v1901_v31 = vld [vmem:[%s3319_s3 + $0x40] sm:$0xff]  ;;  %1918 = vperm.xlu1 %2611, %v1895_v32   ;;  %v1903_v33 = vld [vmem:[%s3319_s3 + $0x50] sm:$0xff]  ;;  %v1900_v37 = vld [vmem:[%s3319_s3 + $0x38] sm:$0xff]  ;;  %vm1797_vm8 = vcmask 1044480  }
   0xe   : > { %s2598_s19 = smul.u32 52, %s3322_s16  ;;  %v1905_v35 = vld [vmem:[%s3319_s3 + $0x60] sm:$0xf]  ;;  %v1902_v38 = vld [vmem:[%s3319_s3 + $0x48] sm:$0xff]  ;;  %v1904_v39 = vld [vmem:[%s3319_s3 + $0x58] sm:$0xff] }
   0xf   : > { %v384_v3 = vld [vmem:[#allocation2 + $0x60] sm:$0xf] }
  0x10   : > { %s192_s26 = scalar_lea.vmem %s3316_s0, %s2598_s19  ;;  %1913 = vperm.xlu0 %2610, %v1894_v28   ;;  %s3264_s23 = scalar_lea.vmem %s3320_s4, %s2598_s19 }
  0x11   : > { %v2690_v5 = vld [vmem:[%s192_s26] sm:$0xff]   ;;  %v2705_v9 = vld [vmem:[%s192_s26 + $0x8] sm:$0xff]   ;;  %v2718_v11 = vld [vmem:[%s192_s26 + $0x10] sm:$0xff]   ;;  %1923 = vperm.xlu1 %2611, %v1896_v34  }
  0x12   : > { %v2693_v7 = vld [vmem:[%s192_s26 + $0x20] sm:$0xff]   ;;  %2329 = vmatmul.mubr.msk.bf16.vlgmr.msra.gmra.mrb[0].mxu0 %vm259_vm2, %v2690_v5  ;;  %v2708_v10 = vld [vmem:[%s192_s26 + $0x28] sm:$0xff]   ;;  %v2720_v12 = vld [vmem:[%s192_s26 + $0x30] ss:$0 sps:$4 sm:$0x33]  }
  0x13   : > { %2345 = vmatmul.mubr.msk.bf16.vlgmr.msra.gmra.mrb[0].mxu1 %vm259_vm2, %v2693_v7  ;;  %2387 = vmatpush3.bf16.msra.mxu0 %v643_v6  ;;  %v2730_v13 = vld [vmem:[%s192_s26 + $0x18] sm:$0xff]  }
  0x14   : > { %2357 = vmatpush3.bf16.msra.mxu1 %v463_v8  ;;  %2332 = vmatprep.mubr.msk.bf16.mxu0 %vm2628_vm1, %v2627_v1 }
  0x15   : > { %2348 = vmatprep.mubr.msk.bf16.mxu1 %vm2628_vm1, %v2627_v1  ;;  %2416 = vmatprep.subr.bf16.mxu1 %v2627_v1 }
  0x16   : > { %2446 = vmatprep.subr.bf16.mxu0 %v2627_v1  ;;  %1928 = vperm.xlu0 %2610, %v1897_v29  }
  0x17   : > { %1933 = vperm.xlu1 %2611, %v1898_v36  }
  0x1a   : > { %2333 = vmatmul.mubr.msk.bf16.gmra.mrb[4].mxu0 %vm259_vm2, %v2705_v9  ;;  %1938 = vperm.xlu0 %2610, %v1899_v30  }
  0x1b   : > { %2349 = vmatmul.mubr.msk.bf16.gmra.mrb[4].mxu1 %vm259_vm2, %v2708_v10  ;;  %2336 = vmatprep.mubr.msk.bf16.mxu0 %vm2628_vm1, %v2627_v1 }
  0x1c   : > { %2352 = vmatprep.mubr.msk.bf16.mxu1 %vm2628_vm1, %v2627_v1  ;;  %1943 = vperm.xlu1 %2611, %v1900_v37  }
  0x1e   : > { %1948 = vperm.xlu0 %2610, %v1901_v31  }
  0x20   : > { %1953 = vperm.xlu1 %2611, %v1902_v38  }
  0x22   : > { %2337 = vmatmul.mubr.msk.bf16.gmra.mrb[8].mxu0 %vm259_vm2, %v2718_v11  ;;  %1958 = vperm.xlu0 %2610, %v1903_v33  }
  0x23   : > { %2353 = vmatmul.mubr.msk.bf16.gmra.mrb[8].mxu1 %vm259_vm2, %v2720_v12  ;;  %2340 = vmatprep.mubr.msk.bf16.mxu0 %vm2628_vm1, %v2627_v1 }
  0x24   : > { %2358 = vmatprep.mubr.msk.bf16.mxu1 %vm2628_vm1, %v2627_v1  ;;  %1963 = vperm.xlu1 %2611, %v1904_v39  }
  0x26   : > { %1968 = vperm.xlu0 %2610, %v1905_v35  }
  0x2a   : > { %2341 = vmatmul.mubr.msk.bf16.gmra.mrb[12].mxu0 %vm259_vm2, %v2730_v13 }
  0x2b   : > { %2359 = vmatmul.mubr.msk.bf16.vlgmr.msra.gmra.mrb[12].mxu1 %vm259_vm2, %v2690_v5  ;;  %2388 = vmatprep.mubr.msk.bf16.mxu0 %vm2628_vm1, %v2627_v1 }
  0x2c   : > { %2417 = vmatpush3.bf16.msra.mxu1 %v823_v15  ;;  %2362 = vmatprep.mubr.msk.bf16.mxu1 %vm2628_vm1, %v2627_v1 }
  0x2d   : > { %2476 = vmatprep.subr.bf16.mxu1 %v2627_v1 }
  0x32   : > { %2389 = vmatmul.mubr.msk.bf16.vlgmr.msra.gmra.mrb[16].mxu0 %vm259_vm2, %v2690_v5 }
  0x33   : > { %2363 = vmatmul.mubr.msk.bf16.gmra.mrb[16].mxu1 %vm259_vm2, %v2705_v9  ;;  %2447 = vmatpush3.bf16.msra.mxu0 %v1007_v17 }
  0x34   : > { %2366 = vmatprep.mubr.msk.bf16.mxu1 %vm2628_vm1, %v2627_v1  ;;  %2392 = vmatprep.mubr.msk.bf16.mxu0 %vm2628_vm1, %v2627_v1 }
  0x35   : > { %2506 = vmatprep.subr.bf16.mxu0 %v2627_v1 }
  0x3a   : > { %2393 = vmatmul.mubr.msk.bf16.gmra.mrb[20].mxu0 %vm259_vm2, %v2705_v9 }
  0x3b   : > { %2367 = vmatmul.mubr.msk.bf16.gmra.mrb[20].mxu1 %vm259_vm2, %v2718_v11  ;;  %2396 = vmatprep.mubr.msk.bf16.mxu0 %vm2628_vm1, %v2627_v1 }
  0x3c   : > { %2370 = vmatprep.mubr.msk.bf16.mxu1 %vm2628_vm1, %v2627_v1 }
  0x42   : > { %2397 = vmatmul.mubr.msk.bf16.gmra.mrb[24].mxu0 %vm259_vm2, %v2718_v11 }
  0x43   : > { %2371 = vmatmul.mubr.msk.bf16.gmra.mrb[24].mxu1 %vm259_vm2, %v2730_v13  ;;  %2400 = vmatprep.mubr.msk.bf16.mxu0 %vm2628_vm1, %v2627_v1 }
  0x44   : > { %2374 = vmatprep.mubr.msk.bf16.mxu1 %vm2628_vm1, %v2627_v1 }
  0x4a   : > { %2401 = vmatmul.mubr.msk.bf16.gmra.mrb[28].mxu0 %vm259_vm2, %v2730_v13 }
  0x4b   : > { %2375 = vmatmul.mubr.msk.bf16.gmra.mrb[28].mxu1 %vm259_vm2, %v2693_v7  ;;  %2404 = vmatprep.mubr.msk.bf16.mxu0 %vm2628_vm1, %v2627_v1 }
  0x4c   : > { %2378 = vmatprep.mubr.msk.bf16.mxu1 %vm2628_vm1, %v2627_v1 }
  0x52   : > { %2405 = vmatmul.mubr.msk.bf16.gmra.mrb[32].mxu0 %vm259_vm2, %v2693_v7 }
  0x53   : > { %2379 = vmatmul.mubr.msk.bf16.gmra.mrb[32].mxu1 %vm259_vm2, %v2708_v10  ;;  %2408 = vmatprep.mubr.msk.bf16.mxu0 %vm2628_vm1, %v2627_v1 }
  0x54   : > { %2382 = vmatprep.mubr.msk.bf16.mxu1 %vm2628_vm1, %v2627_v1 }
  0x5a   : > { %2409 = vmatmul.mubr.msk.bf16.gmra.mrb[36].mxu0 %vm259_vm2, %v2708_v10 }
  0x5b   : > { %2383 = vmatmul.mubr.msk.bf16.gmra.mrb[36].mxu1 %vm259_vm2, %v2720_v12  ;;  %2412 = vmatprep.mubr.msk.bf16.mxu0 %vm2628_vm1, %v2627_v1 }
  0x5c   : > { %2418 = vmatprep.mubr.msk.bf16.mxu1 %vm2628_vm1, %v2627_v1 }
  0x62   : > { %2413 = vmatmul.mubr.msk.bf16.gmra.mrb[40].mxu0 %vm259_vm2, %v2720_v12 }
  0x63   : > { %2419 = vmatmul.mubr.msk.bf16.vlgmr.msra.gmra.mrb[40].mxu1 %vm259_vm2, %v2690_v5  ;;  %2448 = vmatprep.mubr.msk.bf16.mxu0 %vm2628_vm1, %v2627_v1 }
  0x64   : > { %2477 = vmatpush3.bf16.msra.mxu1 %v1139_v19  ;;  %2422 = vmatprep.mubr.msk.bf16.mxu1 %vm2628_vm1, %v2627_v1 }
  0x65   : > { %2536 = vmatprep.subr.bf16.mxu1 %v2627_v1 }
  0x6a   : > { %2449 = vmatmul.mubr.msk.bf16.vlgmr.msra.gmra.mrb[44].mxu0 %vm259_vm2, %v2690_v5 }
  0x6b   : > { %2423 = vmatmul.mubr.msk.bf16.gmra.mrb[44].mxu1 %vm259_vm2, %v2705_v9  ;;  %2507 = vmatpush3.bf16.msra.mxu0 %v1324_v21 }
  0x6c   : > { %2426 = vmatprep.mubr.msk.bf16.mxu1 %vm2628_vm1, %v2627_v1  ;;  %2452 = vmatprep.mubr.msk.bf16.mxu0 %vm2628_vm1, %v2627_v1 }
  0x6d   : > { %2566 = vmatprep.subr.bf16.mxu0 %v2627_v1 }
  0x72   : > { %2453 = vmatmul.mubr.msk.bf16.gmra.mrb[48].mxu0 %vm259_vm2, %v2705_v9 }
  0x73   : > { %2427 = vmatmul.mubr.msk.bf16.gmra.mrb[48].mxu1 %vm259_vm2, %v2718_v11  ;;  %2456 = vmatprep.mubr.msk.bf16.mxu0 %vm2628_vm1, %v2627_v1 }
  0x74   : > { %2430 = vmatprep.mubr.msk.bf16.mxu1 %vm2628_vm1, %v2627_v1 }
  0x7a   : > { %2457 = vmatmul.mubr.msk.bf16.gmra.mrb[52].mxu0 %vm259_vm2, %v2718_v11 }
  0x7b   : > { %2431 = vmatmul.mubr.msk.bf16.gmra.mrb[52].mxu1 %vm259_vm2, %v2730_v13  ;;  %2460 = vmatprep.mubr.msk.bf16.mxu0 %vm2628_vm1, %v2627_v1 }
  0x7c   : > { %2434 = vmatprep.mubr.msk.bf16.mxu1 %vm2628_vm1, %v2627_v1 }
  0x82   : > { %2461 = vmatmul.mubr.msk.bf16.gmra.mrb[56].mxu0 %vm259_vm2, %v2730_v13 }
  0x83   : > { %2435 = vmatmul.mubr.msk.bf16.gmra.mrb[56].mxu1 %vm259_vm2, %v2693_v7  ;;  %2464 = vmatprep.mubr.msk.bf16.mxu0 %vm2628_vm1, %v2627_v1 }
  0x84   : > { %2438 = vmatprep.mubr.msk.bf16.mxu1 %vm2628_vm1, %v2627_v1 }
  0x8a   : > { %2465 = vmatmul.mubr.msk.bf16.gmra.mrb[60].mxu0 %vm259_vm2, %v2693_v7 }
  0x8b   : > { %2439 = vmatmul.mubr.msk.bf16.gmra.mrb[60].mxu1 %vm259_vm2, %v2708_v10  ;;  %2468 = vmatprep.mubr.msk.bf16.mxu0 %vm2628_vm1, %v2627_v1 }
  0x8c   : > { %2442 = vmatprep.mubr.msk.bf16.mxu1 %vm2628_vm1, %v2627_v1 }
  0x92   : > { %2469 = vmatmul.mubr.msk.bf16.gmra.mrb[64].mxu0 %vm259_vm2, %v2708_v10 }
  0x93   : > { %2443 = vmatmul.mubr.msk.bf16.gmra.mrb[64].mxu1 %vm259_vm2, %v2720_v12  ;;  %2472 = vmatprep.mubr.msk.bf16.mxu0 %vm2628_vm1, %v2627_v1 }
  0x94   : > { %2478 = vmatprep.mubr.msk.bf16.mxu1 %vm2628_vm1, %v2627_v1 }
  0x9a   : > { %2473 = vmatmul.mubr.msk.bf16.gmra.mrb[68].mxu0 %vm259_vm2, %v2720_v12 }
  0x9b   : > { %2479 = vmatmul.mubr.msk.bf16.vlgmr.msra.gmra.mrb[68].mxu1 %vm259_vm2, %v2690_v5  ;;  %2508 = vmatprep.mubr.msk.bf16.mxu0 %vm2628_vm1, %v2627_v1 }
  0x9c   : > { %2537 = vmatpush3.bf16.msra.mxu1 %v1503_v23  ;;  %2482 = vmatprep.mubr.msk.bf16.mxu1 %vm2628_vm1, %v2627_v1 }
  0xa2   : > { %2509 = vmatmul.mubr.msk.bf16.vlgmr.msra.gmra.mrb[72].mxu0 %vm259_vm2, %v2690_v5 }
  0xa3   : > { %2483 = vmatmul.mubr.msk.bf16.gmra.mrb[72].mxu1 %vm259_vm2, %v2705_v9  ;;  %2567 = vmatpush3.bf16.msra.mxu0 %v1683_v25 }
  0xa4   : > { %2486 = vmatprep.mubr.msk.bf16.mxu1 %vm2628_vm1, %v2627_v1  ;;  %2512 = vmatprep.mubr.msk.bf16.mxu0 %vm2628_vm1, %v2627_v1 }
  0xaa   : > { %2513 = vmatmul.mubr.msk.bf16.gmra.mrb[76].mxu0 %vm259_vm2, %v2705_v9 }
  0xab   : > { %2487 = vmatmul.mubr.msk.bf16.gmra.mrb[76].mxu1 %vm259_vm2, %v2718_v11  ;;  %2516 = vmatprep.mubr.msk.bf16.mxu0 %vm2628_vm1, %v2627_v1 }
  0xac   : > { %2490 = vmatprep.mubr.msk.bf16.mxu1 %vm2628_vm1, %v2627_v1 }
  0xb2   : > { %2517 = vmatmul.mubr.msk.bf16.gmra.mrb[80].mxu0 %vm259_vm2, %v2718_v11 }
  0xb3   : > { %2491 = vmatmul.mubr.msk.bf16.gmra.mrb[80].mxu1 %vm259_vm2, %v2730_v13  ;;  %2520 = vmatprep.mubr.msk.bf16.mxu0 %vm2628_vm1, %v2627_v1 }
  0xb4   : > { %2494 = vmatprep.mubr.msk.bf16.mxu1 %vm2628_vm1, %v2627_v1 }
  0xba   : > { %2521 = vmatmul.mubr.msk.bf16.gmra.mrb[84].mxu0 %vm259_vm2, %v2730_v13 }
  0xbb   : > { %2495 = vmatmul.mubr.msk.bf16.gmra.mrb[84].mxu1 %vm259_vm2, %v2693_v7  ;;  %2524 = vmatprep.mubr.msk.bf16.mxu0 %vm2628_vm1, %v2627_v1 }
  0xbc   : > { %2498 = vmatprep.mubr.msk.bf16.mxu1 %vm2628_vm1, %v2627_v1 }
  0xc2   : > { %2525 = vmatmul.mubr.msk.bf16.gmra.mrb[88].mxu0 %vm259_vm2, %v2693_v7 }
  0xc3   : > { %2499 = vmatmul.mubr.msk.bf16.gmra.mrb[88].mxu1 %vm259_vm2, %v2708_v10  ;;  %2528 = vmatprep.mubr.msk.bf16.mxu0 %vm2628_vm1, %v2627_v1 }
  0xc4   : > { %2502 = vmatprep.mubr.msk.bf16.mxu1 %vm2628_vm1, %v2627_v1 }
  0xca   : > { %2529 = vmatmul.mubr.msk.bf16.gmra.mrb[92].mxu0 %vm259_vm2, %v2708_v10 }
  0xcb   : > { %2503 = vmatmul.mubr.msk.bf16.gmra.mrb[92].mxu1 %vm259_vm2, %v2720_v12  ;;  %2532 = vmatprep.mubr.msk.bf16.mxu0 %vm2628_vm1, %v2627_v1 }
  0xcc   : > { %2538 = vmatprep.mubr.msk.bf16.mxu1 %vm2628_vm1, %v2627_v1 }
  0xd2   : > { %2533 = vmatmul.mubr.msk.bf16.gmra.mrb[96].mxu0 %vm259_vm2, %v2720_v12 }
  0xd3   : > { %2539 = vmatmul.mubr.msk.bf16.vlgmr.msra.gmra.mrb[96].mxu1 %vm259_vm2, %v2690_v5  ;;  %2568 = vmatprep.mubr.msk.bf16.mxu0 %vm2628_vm1, %v2627_v1 }
  0xd4   : > { %2542 = vmatprep.mubr.msk.bf16.mxu1 %vm2628_vm1, %v2627_v1 }
  0xda   : > { %2569 = vmatmul.mubr.msk.bf16.vlgmr.msra.gmra.mrb[100].mxu0 %vm259_vm2, %v2690_v5 }
  0xdb   : > { %2543 = vmatmul.mubr.msk.bf16.gmra.mrb[100].mxu1 %vm259_vm2, %v2705_v9  ;;  %2572 = vmatprep.mubr.msk.bf16.mxu0 %vm2628_vm1, %v2627_v1 }
  0xdc   : > { %2546 = vmatprep.mubr.msk.bf16.mxu1 %vm2628_vm1, %v2627_v1 }
  0xe2   : > { %2573 = vmatmul.mubr.msk.bf16.gmra.mrb[104].mxu0 %vm259_vm2, %v2705_v9 }
  0xe3   : > { %2547 = vmatmul.mubr.msk.bf16.gmra.mrb[104].mxu1 %vm259_vm2, %v2718_v11  ;;  %2576 = vmatprep.mubr.msk.bf16.mxu0 %vm2628_vm1, %v2627_v1 }
  0xe4   : > { %2550 = vmatprep.mubr.msk.bf16.mxu1 %vm2628_vm1, %v2627_v1 }
  0xe5   : > { %v319_v40 = vpop.f32.mrb[0].mxu0 }
  0xe6   : > { %v2991_v41 = vpop.f32.mrb[0].mxu1  ;;  %v2330_v42 = vpop.f32.mrb[1].mxu0  ;;  %v398_v46 = vrot.slane %v319_v40, 5 }
  0xe7   : > { %v413_v43 = vrot.slane %v2991_v41, 5  ;;  %v2346_v44 = vpop.f32.mrb[1].mxu1  ;;  %v322_v45 = vpop.f32.mrb[2].mxu0 }
  0xe8   : > { %v399_v47 = vrot.slane %v322_v45, 5  ;;  %v354_v48 = vpop.f32.mrb[2].mxu1  ;;  %v2331_v49 = vpop.f32.mrb[3].mxu0  ;;  %v433_v24 = vsel %vm397_vm3, 0.0, %v398_v46 }
  0xe9   : > { %v415_v50 = vrot.slane %v354_v48, 5  ;;  %v2347_v51 = vpop.f32.mrb[3].mxu1 }
  0xea   : > { %v2995_v52 = vsel %vm397_vm3, %v398_v46, %v399_v47  ;;  %2577 = vmatmul.mubr.msk.bf16.gmra.mrb[108].mxu0 %vm259_vm2, %v2718_v11 }
  0xeb   : > { %v3002_v53 = vsel %vm397_vm3, %v413_v43, %v415_v50  ;;  %2551 = vmatmul.mubr.msk.bf16.gmra.mrb[108].mxu1 %vm259_vm2, %v2730_v13  ;;  %2580 = vmatprep.mubr.msk.bf16.mxu0 %vm2628_vm1, %v2627_v1 }
  0xec   : > { %2554 = vmatprep.mubr.msk.bf16.mxu1 %vm2628_vm1, %v2627_v1 }
  0xed   : > { %v327_v54 = vpop.f32.mrb[4].mxu0 }
  0xee   : > { %v401_v55 = vrot.slane %v327_v54, 5  ;;  %v359_v56 = vpop.f32.mrb[4].mxu1  ;;  %v2334_v57 = vpop.f32.mrb[5].mxu0 }
  0xef   : > { %v417_v58 = vrot.slane %v359_v56, 5  ;;  %v2350_v59 = vpop.f32.mrb[5].mxu1  ;;  %v330_v60 = vpop.f32.mrb[6].mxu0 }
  0xf0   : > { %v3011_v61 = vsel %vm397_vm3, %v399_v47, %v401_v55  ;;  %v403_v62 = vrot.slane %v330_v60, 5  ;;  %v362_v63 = vpop.f32.mrb[6].mxu1  ;;  %v2335_v0 = vpop.f32.mrb[7].mxu0 }
  0xf1   : > { %v3014_v2 = vsel %vm397_vm3, %v415_v50, %v417_v58  ;;  %v419_v4 = vrot.slane %v362_v63, 5  ;;  %v2351_v5 = vpop.f32.mrb[7].mxu1 }
  0xf2   : > { %v3017_v6 = vsel %vm397_vm3, %v401_v55, %v403_v62  ;;  %2581 = vmatmul.mubr.msk.bf16.gmra.mrb[112].mxu0 %vm259_vm2, %v2730_v13 }
  0xf3   : > { %v420_v8 = vsel %vm397_vm3, %v417_v58, %v419_v4  ;;  %2555 = vmatmul.mubr.msk.bf16.gmra.mrb[112].mxu1 %vm259_vm2, %v2693_v7  ;;  %2584 = vmatprep.mubr.msk.bf16.mxu0 %vm2628_vm1, %v2627_v1 }
  0xf4   : > { %v446_v9 = vadd.f32 %v420_v8, %v384_v3  ;;  %2558 = vmatprep.mubr.msk.bf16.mxu1 %vm2628_vm1, %v2627_v1 }
  0xf5   : > { %v335_v11 = vpop.f32.mrb[8].mxu0 }
  0xf6   : > { %459 = vst [vmem:[#allocation2 + $0x60] sm:$0xf] %v446_v9  ;;  %v405_v14 = vrot.slane %v335_v11, 5  ;;  %v367_v15 = vpop.f32.mrb[8].mxu1  ;;  %v2338_v16 = vpop.f32.mrb[9].mxu0 }
  0xf7   : > { %v2354_v17 = vpop.f32.mrb[9].mxu1  ;;  %v338_v18 = vpop.f32.mrb[10].mxu0 }
  0xf8   : > { %v3029_v13 = vsel %vm397_vm3, %v403_v62, %v405_v14  ;;  %v407_v19 = vrot.slane %v338_v18, 5  ;;  %v369_v20 = vpop.f32.mrb[10].mxu1  ;;  %v2339_v21 = vpop.f32.mrb[11].mxu0 }
  0xf9   : > { %v2355_v22 = vpop.f32.mrb[11].mxu1 }
  0xfa   : > { %v3032_v23 = vsel %vm397_vm3, %v405_v14, %v407_v19  ;;  %2585 = vmatmul.mubr.msk.bf16.gmra.mrb[116].mxu0 %vm259_vm2, %v2693_v7 }
  0xfb   : > { %2559 = vmatmul.mubr.msk.bf16.gmra.mrb[116].mxu1 %vm259_vm2, %v2708_v10  ;;  %2588 = vmatprep.mubr.msk.bf16.mxu0 %vm2628_vm1, %v2627_v1 }
  0xfc   : > { %2562 = vmatprep.mubr.msk.bf16.mxu1 %vm2628_vm1, %v2627_v1 }
  0xfd   : > { %v343_v25 = vpop.f32.mrb[12].mxu0 }
  0xfe   : > { %v409_v26 = vrot.slane %v343_v25, 5  ;;  %v499_v27 = vpop.f32.mrb[12].mxu1  ;;  %v2342_v28 = vpop.f32.mrb[13].mxu0 }
  0xff   : > { %v578_v29 = vrot.slane %v499_v27, 6  ;;  %v2360_v30 = vpop.f32.mrb[13].mxu1  ;;  %v346_v31 = vpop.f32.mrb[14].mxu0 }
 0x100   : > { %v3044_v7 = vsel %vm397_vm3, %v407_v19, %v409_v26  ;;  %v411_v32 = vrot.slane %v346_v31, 5  ;;  %v502_v33 = vpop.f32.mrb[14].mxu1  ;;  %v2343_v34 = vpop.f32.mrb[15].mxu0 }
 0x101   : > { %v613_v35 = vsel %vm577_vm4, 0.0, %v578_v29  ;;  %v579_v36 = vrot.slane %v502_v33, 6  ;;  %v2361_v37 = vpop.f32.mrb[15].mxu1 }
 0x102   : > { %v615_v38 = vadd.f32 %v613_v35, %v433_v24  ;;  %v3048_v39 = vsel %vm397_vm3, %v409_v26, %v411_v32  ;;  %v3053_v40 = vsel %vm397_vm3, %v411_v32, %v413_v43  ;;  %2589 = vmatmul.mubr.msk.bf16.gmra.mrb[120].mxu0 %vm259_vm2, %v2708_v10 }
 0x103   : > { %v580_v42 = vsel %vm577_vm4, %v578_v29, %v579_v36  ;;  %2563 = vmatmul.mubr.msk.bf16.gmra.mrb[120].mxu1 %vm259_vm2, %v2720_v12  ;;  %2592 = vmatprep.mubr.msk.bf16.mxu0 %vm2628_vm1, %v2627_v1 }
 0x104   : > { %v616_v44 = vadd.f32 %v580_v42, %v2995_v52 }
 0x105   : > { %v679_v45 = vpop.f32.mrb[16].mxu0 }
 0x106   : > { %v507_v46 = vpop.f32.mrb[16].mxu1  ;;  %v758_v41 = vrot.slane %v679_v45, 7  ;;  %v2390_v47 = vpop.f32.mrb[17].mxu0 }
 0x107   : > { %v581_v43 = vrot.slane %v507_v46, 6  ;;  %v2364_v48 = vpop.f32.mrb[17].mxu1  ;;  %v682_v49 = vpop.f32.mrb[18].mxu0 }
 0x108   : > { %v793_v10 = vsel %vm757_vm5, 0.0, %v758_v41  ;;  %v510_v50 = vpop.f32.mrb[18].mxu1  ;;  %v759_v51 = vrot.slane %v682_v49, 7  ;;  %v2391_v54 = vpop.f32.mrb[19].mxu0 }
 0x109   : > { %v582_v55 = vsel %vm577_vm4, %v579_v36, %v581_v43  ;;  %v3065_v56 = vadd.f32 %v793_v10, %v615_v38  ;;  %v583_v1 = vrot.slane %v510_v50, 6  ;;  %v2365_v57 = vpop.f32.mrb[19].mxu1 }
 0x10a   : > { %v617_v52 = vadd.f32 %v582_v55, %v3011_v61  ;;  %v760_v58 = vsel %vm757_vm5, %v758_v41, %v759_v51  ;;  %2593 = vmatmul.mubr.msk.bf16.gmra.mrb[124].mxu0 %vm259_vm2, %v2720_v12 }
 0x10b   : > { %v584_v59 = vsel %vm577_vm4, %v581_v43, %v583_v1  ;;  %v3072_v60 = vadd.f32 %v760_v58, %v616_v44 }
 0x10c   : > { %v618_v62 = vadd.f32 %v584_v59, %v3017_v6 }
 0x10d   : > { %v687_v63 = vpop.f32.mrb[20].mxu0 }
 0x10e   : > { %v515_v0 = vpop.f32.mrb[20].mxu1  ;;  %v761_v3 = vrot.slane %v687_v63, 7  ;;  %v2394_v4 = vpop.f32.mrb[21].mxu0 }
 0x10f   : > { %v585_v5 = vrot.slane %v515_v0, 6  ;;  %v2368_v8 = vpop.f32.mrb[21].mxu1  ;;  %v690_v9 = vpop.f32.mrb[22].mxu0 }
 0x110   : > { %v762_v61 = vsel %vm757_vm5, %v759_v51, %v761_v3  ;;  %v518_v11 = vpop.f32.mrb[22].mxu1  ;;  %v763_v14 = vrot.slane %v690_v9, 7  ;;  %v2395_v15 = vpop.f32.mrb[23].mxu0 }
 0x111   : > { %v586_v12 = vsel %vm577_vm4, %v583_v1, %v585_v5  ;;  %v3077_v16 = vadd.f32 %v762_v61, %v617_v52  ;;  %v587_v17 = vrot.slane %v518_v11, 6  ;;  %v2369_v18 = vpop.f32.mrb[23].mxu1 }
 0x112   : > { %v619_v6 = vadd.f32 %v586_v12, %v3029_v13  ;;  %v764_v19 = vsel %vm757_vm5, %v761_v3, %v763_v14 }
 0x113   : > { %v588_v20 = vsel %vm577_vm4, %v585_v5, %v587_v17  ;;  %v3082_v21 = vadd.f32 %v764_v19, %v618_v62 }
 0x114   : > { %v620_v22 = vadd.f32 %v588_v20, %v3032_v23  ;;  %v564_v20 = vld [vmem:[#allocation2 + $0x60] sm:$0xf] }
 0x115   : > { %v695_v24 = vpop.f32.mrb[24].mxu0 }
 0x116   : > { %v523_v25 = vpop.f32.mrb[24].mxu1  ;;  %v765_v26 = vrot.slane %v695_v24, 7  ;;  %v2398_v27 = vpop.f32.mrb[25].mxu0 }
 0x117   : > { %v589_v28 = vrot.slane %v523_v25, 6  ;;  %v2372_v29 = vpop.f32.mrb[25].mxu1  ;;  %v698_v30 = vpop.f32.mrb[26].mxu0 }
 0x118   : > { %v766_v31 = vsel %vm757_vm5, %v763_v14, %v765_v26  ;;  %v526_v32 = vpop.f32.mrb[26].mxu1  ;;  %v767_v33 = vrot.slane %v698_v30, 7  ;;  %v2399_v13 = vpop.f32.mrb[27].mxu0 }
 0x119   : > { %v590_v34 = vsel %vm577_vm4, %v587_v17, %v589_v28  ;;  %v3087_v35 = vadd.f32 %v766_v31, %v619_v6  ;;  %v591_v36 = vrot.slane %v526_v32, 6  ;;  %v2373_v37 = vpop.f32.mrb[27].mxu1 }
 0x11a   : > { %v621_v23 = vadd.f32 %v590_v34, %v3044_v7  ;;  %v768_v38 = vsel %vm757_vm5, %v765_v26, %v767_v33 }
 0x11b   : > { %v592_v42 = vsel %vm577_vm4, %v589_v28, %v591_v36  ;;  %v3092_v44 = vadd.f32 %v768_v38, %v620_v22 }
 0x11c   : > { %v622_v45 = vadd.f32 %v592_v42, %v3048_v39 }
 0x11d   : > { %v703_v46 = vpop.f32.mrb[28].mxu0 }
 0x11e   : > { %v531_v41 = vpop.f32.mrb[28].mxu1  ;;  %v769_v47 = vrot.slane %v703_v46, 7  ;;  %v2402_v43 = vpop.f32.mrb[29].mxu0 }
 0x11f   : > { %v593_v48 = vrot.slane %v531_v41, 6  ;;  %v2376_v49 = vpop.f32.mrb[29].mxu1  ;;  %v706_v10 = vpop.f32.mrb[30].mxu0 }
 0x120   : > { %v770_v50 = vsel %vm757_vm5, %v767_v33, %v769_v47  ;;  %v534_v51 = vpop.f32.mrb[30].mxu1  ;;  %v771_v54 = vrot.slane %v706_v10, 7  ;;  %v2403_v7 = vpop.f32.mrb[31].mxu0 }
 0x121   : > { %v594_v55 = vsel %vm577_vm4, %v591_v36, %v593_v48  ;;  %v3097_v1 = vadd.f32 %v770_v50, %v621_v23  ;;  %v595_v57 = vrot.slane %v534_v51, 6  ;;  %v2377_v52 = vpop.f32.mrb[31].mxu1 }
 0x122   : > { %v623_v39 = vadd.f32 %v594_v55, %v3053_v40  ;;  %v772_v58 = vsel %vm757_vm5, %v769_v47, %v771_v54 }
 0x123   : > { %v596_v59 = vsel %vm577_vm4, %v593_v48, %v595_v57  ;;  %v3102_v62 = vadd.f32 %v772_v58, %v622_v45 }
 0x124   : > { %v624_v63 = vadd.f32 %v596_v59, %v3002_v53 }
 0x125   : > { %v711_v0 = vpop.f32.mrb[32].mxu0 }
 0x126   : > { %v539_v3 = vpop.f32.mrb[32].mxu1  ;;  %v773_v4 = vrot.slane %v711_v0, 7  ;;  %v2406_v5 = vpop.f32.mrb[33].mxu0 }
 0x127   : > { %v597_v8 = vrot.slane %v539_v3, 6  ;;  %v2380_v9 = vpop.f32.mrb[33].mxu1  ;;  %v714_v61 = vpop.f32.mrb[34].mxu0 }
 0x128   : > { %v774_v11 = vsel %vm757_vm5, %v771_v54, %v773_v4  ;;  %v542_v14 = vpop.f32.mrb[34].mxu1  ;;  %v775_v15 = vrot.slane %v714_v61, 7  ;;  %v2407_v40 = vpop.f32.mrb[35].mxu0 }
 0x129   : > { %v598_v12 = vsel %vm577_vm4, %v595_v57, %v597_v8  ;;  %v3107_v17 = vadd.f32 %v774_v11, %v623_v39  ;;  %v599_v18 = vrot.slane %v542_v14, 6  ;;  %v2381_v6 = vpop.f32.mrb[35].mxu1 }
 0x12a   : > { %v625_v53 = vadd.f32 %v598_v12, %v3014_v2  ;;  %v776_v19 = vsel %vm757_vm5, %v773_v4, %v775_v15 }
 0x12b   : > { %v600_v22 = vsel %vm577_vm4, %v597_v8, %v599_v18  ;;  %v3112_v24 = vadd.f32 %v776_v19, %v624_v63 }
 0x12c   : > { %v626_v25 = vadd.f32 %v600_v22, %v564_v20 }
 0x12d   : > { %v719_v26 = vpop.f32.mrb[36].mxu0 }
 0x12e   : > { %639 = vst [vmem:[#allocation2 + $0x60] sm:$0xf] %v626_v25  ;;  %v547_v27 = vpop.f32.mrb[36].mxu1  ;;  %v777_v28 = vrot.slane %v719_v26, 7  ;;  %v2410_v29 = vpop.f32.mrb[37].mxu0 }
 0x12f   : > { %v2384_v30 = vpop.f32.mrb[37].mxu1  ;;  %v722_v31 = vpop.f32.mrb[38].mxu0 }
 0x130   : > { %v778_v32 = vsel %vm757_vm5, %v775_v15, %v777_v28  ;;  %v549_v33 = vpop.f32.mrb[38].mxu1  ;;  %v779_v13 = vrot.slane %v722_v31, 7  ;;  %v2411_v2 = vpop.f32.mrb[39].mxu0 }
 0x131   : > { %v3115_v34 = vadd.f32 %v778_v32, %v625_v53  ;;  %v2385_v36 = vpop.f32.mrb[39].mxu1 }
 0x132   : > { %v780_v37 = vsel %vm757_vm5, %v777_v28, %v779_v13 }
 0x135   : > { %v744_v23 = vld [vmem:[#allocation2 + $0x60] sm:$0xf]  ;;  %v727_v38 = vpop.f32.mrb[40].mxu0 }
 0x136   : > { %v806_v42 = vadd.f32 %v780_v37, %v744_v23  ;;  %v859_v45 = vpop.f32.mrb[40].mxu1  ;;  %v2414_v46 = vpop.f32.mrb[41].mxu0 }
 0x137   : > { %v939_v41 = vrot.slane %v859_v45, 7  ;;  %v2420_v47 = vpop.f32.mrb[41].mxu1  ;;  %v729_v43 = vpop.f32.mrb[42].mxu0 }
 0x138   : > { %819 = vst [vmem:[#allocation2 + $0x60] sm:$0xf] %v806_v42  ;;  %v862_v48 = vpop.f32.mrb[42].mxu1  ;;  %v2415_v49 = vpop.f32.mrb[43].mxu0 }
 0x139   : > { %v977_v10 = vsel %vm757_vm5, 0.0, %v939_v41  ;;  %v940_v50 = vrot.slane %v862_v48, 7  ;;  %v2421_v51 = vpop.f32.mrb[43].mxu1 }
 0x13b   : > { %v941_v54 = vsel %vm757_vm5, %v939_v41, %v940_v50 }
 0x13c   : > { %v979_v7 = vadd.f32 %v941_v54, %v3065_v56 }
 0x13d   : > { %v1043_v55 = vpop.f32.mrb[44].mxu0 }
 0x13e   : > { %v867_v57 = vpop.f32.mrb[44].mxu1  ;;  %v3121_v52 = vadd.f32 %v1043_v55, %v977_v10  ;;  %v2450_v39 = vpop.f32.mrb[45].mxu0 }
 0x13f   : > { %v942_v58 = vrot.slane %v867_v57, 7  ;;  %v2424_v59 = vpop.f32.mrb[45].mxu1  ;;  %v1046_v63 = vpop.f32.mrb[46].mxu0 }
 0x140   : > { %v870_v0 = vpop.f32.mrb[46].mxu1  ;;  %v3123_v3 = vadd.f32 %v1046_v63, %v979_v7  ;;  %v2451_v4 = vpop.f32.mrb[47].mxu0 }
 0x141   : > { %v943_v5 = vsel %vm757_vm5, %v940_v50, %v942_v58  ;;  %v944_v8 = vrot.slane %v870_v0, 7  ;;  %v2425_v9 = vpop.f32.mrb[47].mxu1 }
 0x142   : > { %v980_v61 = vadd.f32 %v943_v5, %v3072_v60 }
 0x143   : > { %v945_v56 = vsel %vm757_vm5, %v942_v58, %v944_v8 }
 0x144   : > { %v981_v11 = vadd.f32 %v945_v56, %v3077_v16 }
 0x145   : > { %v1051_v14 = vpop.f32.mrb[48].mxu0 }
 0x146   : > { %v875_v15 = vpop.f32.mrb[48].mxu1  ;;  %v3129_v40 = vadd.f32 %v1051_v14, %v980_v61  ;;  %v2454_v12 = vpop.f32.mrb[49].mxu0 }
 0x147   : > { %v946_v18 = vrot.slane %v875_v15, 7  ;;  %v2428_v6 = vpop.f32.mrb[49].mxu1  ;;  %v1054_v53 = vpop.f32.mrb[50].mxu0 }
 0x148   : > { %v878_v19 = vpop.f32.mrb[50].mxu1  ;;  %v3131_v20 = vadd.f32 %v1054_v53, %v981_v11  ;;  %v2455_v22 = vpop.f32.mrb[51].mxu0 }
 0x149   : > { %v947_v25 = vsel %vm757_vm5, %v944_v8, %v946_v18  ;;  %v948_v26 = vrot.slane %v878_v19, 7  ;;  %v2429_v60 = vpop.f32.mrb[51].mxu1 }
 0x14a   : > { %v982_v27 = vadd.f32 %v947_v25, %v3082_v21 }
 0x14b   : > { %v949_v16 = vsel %vm757_vm5, %v946_v18, %v948_v26 }
 0x14c   : > { %v983_v28 = vadd.f32 %v949_v16, %v3087_v35 }
 0x14d   : > { %v1059_v29 = vpop.f32.mrb[52].mxu0 }
 0x14e   : > { %v883_v30 = vpop.f32.mrb[52].mxu1  ;;  %v3137_v31 = vadd.f32 %v1059_v29, %v982_v27  ;;  %v2458_v32 = vpop.f32.mrb[53].mxu0  ;;  %v925_v29 = vld [vmem:[#allocation2 + $0x60] sm:$0xf] }
 0x14f   : > { %v950_v33 = vrot.slane %v883_v30, 7  ;;  %v2432_v13 = vpop.f32.mrb[53].mxu1  ;;  %v1062_v2 = vpop.f32.mrb[54].mxu0 }
 0x150   : > { %v886_v36 = vpop.f32.mrb[54].mxu1  ;;  %v3139_v37 = vadd.f32 %v1062_v2, %v983_v28  ;;  %v2459_v23 = vpop.f32.mrb[55].mxu0 }
 0x151   : > { %v951_v38 = vsel %vm757_vm5, %v948_v26, %v950_v33  ;;  %v952_v42 = vrot.slane %v886_v36, 7  ;;  %v2433_v21 = vpop.f32.mrb[55].mxu1 }
 0x152   : > { %v984_v45 = vadd.f32 %v951_v38, %v3092_v44 }
 0x153   : > { %v953_v35 = vsel %vm757_vm5, %v950_v33, %v952_v42 }
 0x154   : > { %v985_v46 = vadd.f32 %v953_v35, %v3097_v1 }
 0x155   : > { %v1067_v41 = vpop.f32.mrb[56].mxu0 }
 0x156   : > { %v891_v47 = vpop.f32.mrb[56].mxu1  ;;  %v3145_v43 = vadd.f32 %v1067_v41, %v984_v45  ;;  %v2462_v48 = vpop.f32.mrb[57].mxu0 }
 0x157   : > { %v954_v49 = vrot.slane %v891_v47, 7  ;;  %v2436_v10 = vpop.f32.mrb[57].mxu1  ;;  %v1070_v50 = vpop.f32.mrb[58].mxu0 }
 0x158   : > { %v894_v51 = vpop.f32.mrb[58].mxu1  ;;  %v3147_v54 = vadd.f32 %v1070_v50, %v985_v46  ;;  %v2463_v7 = vpop.f32.mrb[59].mxu0 }
 0x159   : > { %v955_v55 = vsel %vm757_vm5, %v952_v42, %v954_v49  ;;  %v956_v57 = vrot.slane %v894_v51, 7  ;;  %v2437_v44 = vpop.f32.mrb[59].mxu1 }
 0x15a   : > { %v986_v39 = vadd.f32 %v955_v55, %v3102_v62 }
 0x15b   : > { %v957_v1 = vsel %vm757_vm5, %v954_v49, %v956_v57 }
 0x15c   : > { %v987_v58 = vadd.f32 %v957_v1, %v3107_v17 }
 0x15d   : > { %v1075_v59 = vpop.f32.mrb[60].mxu0 }
 0x15e   : > { %v899_v63 = vpop.f32.mrb[60].mxu1  ;;  %v3153_v0 = vadd.f32 %v1075_v59, %v986_v39  ;;  %v2466_v4 = vpop.f32.mrb[61].mxu0 }
 0x15f   : > { %v958_v5 = vrot.slane %v899_v63, 7  ;;  %v2440_v8 = vpop.f32.mrb[61].mxu1  ;;  %v1078_v9 = vpop.f32.mrb[62].mxu0 }
 0x160   : > { %v902_v61 = vpop.f32.mrb[62].mxu1  ;;  %v3155_v56 = vadd.f32 %v1078_v9, %v987_v58  ;;  %v2467_v11 = vpop.f32.mrb[63].mxu0 }
 0x161   : > { %v959_v14 = vsel %vm757_vm5, %v956_v57, %v958_v5  ;;  %v960_v15 = vrot.slane %v902_v61, 7  ;;  %v2441_v62 = vpop.f32.mrb[63].mxu1 }
 0x162   : > { %v988_v12 = vadd.f32 %v959_v14, %v3112_v24 }
 0x163   : > { %v961_v17 = vsel %vm757_vm5, %v958_v5, %v960_v15 }
 0x164   : > { %v989_v18 = vadd.f32 %v961_v17, %v3115_v34 }
 0x165   : > { %v1083_v6 = vpop.f32.mrb[64].mxu0 }
 0x166   : > { %v907_v53 = vpop.f32.mrb[64].mxu1  ;;  %v3161_v19 = vadd.f32 %v1083_v6, %v988_v12  ;;  %v2470_v22 = vpop.f32.mrb[65].mxu0 }
 0x167   : > { %v962_v25 = vrot.slane %v907_v53, 7  ;;  %v2444_v26 = vpop.f32.mrb[65].mxu1  ;;  %v1086_v60 = vpop.f32.mrb[66].mxu0 }
 0x168   : > { %v910_v27 = vpop.f32.mrb[66].mxu1  ;;  %v3163_v16 = vadd.f32 %v1086_v60, %v989_v18  ;;  %v2471_v28 = vpop.f32.mrb[67].mxu0 }
 0x169   : > { %v963_v30 = vsel %vm757_vm5, %v960_v15, %v962_v25  ;;  %v2445_v24 = vpop.f32.mrb[67].mxu1 }
 0x16a   : > { %v990_v32 = vadd.f32 %v963_v30, %v925_v29 }
 0x16c   : > { %1003 = vst [vmem:[#allocation2 + $0x60] sm:$0xf] %v990_v32 }
 0x16d   : > { %v1091_v33 = vpop.f32.mrb[68].mxu0 }
 0x16e   : > { %v1175_v34 = vpop.f32.mrb[68].mxu1  ;;  %v2474_v13 = vpop.f32.mrb[69].mxu0 }
 0x16f   : > { %v1256_v2 = vrot.slane %v1175_v34, 1  ;;  %v2480_v36 = vpop.f32.mrb[69].mxu1  ;;  %v1094_v23 = vpop.f32.mrb[70].mxu0 }
 0x170   : > { %v1178_v38 = vpop.f32.mrb[70].mxu1  ;;  %v2475_v42 = vpop.f32.mrb[71].mxu0 }
 0x171   : > { %v1257_v21 = vrot.slane %v1178_v38, 1  ;;  %v2481_v45 = vpop.f32.mrb[71].mxu1 }
 0x173   : > { %v1109_v35 = vld [vmem:[#allocation2 + $0x60] sm:$0xf]  ;;  %v1258_v46 = vsel %vm1255_vm6, %v1256_v2, %v1257_v21 }
 0x174   : > { %v1122_v41 = vadd.f32 %v1109_v35, %v1091_v33  ;;  %v1295_v47 = vadd.f32 %v1258_v46, %v3121_v52 }
 0x175   : > { %v1360_v48 = vpop.f32.mrb[72].mxu0 }
 0x176   : > { %1135 = vst [vmem:[#allocation2 + $0x60] sm:$0xf] %v1122_v41  ;;  %v1183_v49 = vpop.f32.mrb[72].mxu1  ;;  %v2510_v10 = vpop.f32.mrb[73].mxu0 }
 0x177   : > { %v1259_v50 = vrot.slane %v1183_v49, 1  ;;  %v2484_v51 = vpop.f32.mrb[73].mxu1  ;;  %v1362_v7 = vpop.f32.mrb[74].mxu0 }
 0x178   : > { %v1186_v55 = vpop.f32.mrb[74].mxu1  ;;  %v2511_v57 = vpop.f32.mrb[75].mxu0  ;;  %v1438_v4 = vrot.slane %v1362_v7, 1 }
 0x179   : > { %v1260_v44 = vsel %vm1255_vm6, %v1257_v21, %v1259_v50  ;;  %v1261_v39 = vrot.slane %v1186_v55, 1  ;;  %v2485_v1 = vpop.f32.mrb[75].mxu1 }
 0x17a   : > { %v1296_v58 = vadd.f32 %v1260_v44, %v3123_v3 }
 0x17b   : > { %v1262_v59 = vsel %vm1255_vm6, %v1259_v50, %v1261_v39 }
 0x17c   : > { %v1297_v63 = vadd.f32 %v1262_v59, %v3129_v40 }
 0x17d   : > { %v1367_v52 = vpop.f32.mrb[76].mxu0 }
 0x17e   : > { %v1191_v5 = vpop.f32.mrb[76].mxu1  ;;  %v1439_v8 = vrot.slane %v1367_v52, 1  ;;  %v2514_v9 = vpop.f32.mrb[77].mxu0 }
 0x17f   : > { %v1263_v61 = vrot.slane %v1191_v5, 1  ;;  %v2488_v11 = vpop.f32.mrb[77].mxu1  ;;  %v1370_v14 = vpop.f32.mrb[78].mxu0 }
 0x180   : > { %v1440_v15 = vsel %vm1255_vm6, %v1438_v4, %v1439_v8  ;;  %v1194_v62 = vpop.f32.mrb[78].mxu1  ;;  %v1441_v12 = vrot.slane %v1370_v14, 1  ;;  %v2515_v17 = vpop.f32.mrb[79].mxu0 }
 0x181   : > { %v1264_v18 = vsel %vm1255_vm6, %v1261_v39, %v1263_v61  ;;  %v3174_v3 = vadd.f32 %v1440_v15, %v1295_v47  ;;  %v1265_v6 = vrot.slane %v1194_v62, 1  ;;  %v2489_v53 = vpop.f32.mrb[79].mxu1 }
 0x182   : > { %v1298_v40 = vadd.f32 %v1264_v18, %v3131_v20  ;;  %v1442_v22 = vsel %vm1255_vm6, %v1439_v8, %v1441_v12  ;;  %v3202_v8 = vpop.permute.xlu0 %1908 }
 0x183   : > { %v1266_v25 = vsel %vm1255_vm6, %v1263_v61, %v1265_v6  ;;  %v3179_v26 = vadd.f32 %v1442_v22, %v1296_v58 }
 0x184   : > { %v1299_v60 = vadd.f32 %v1266_v25, %v3137_v31 }
 0x185   : > { %v1375_v27 = vpop.f32.mrb[80].mxu0 }
 0x186   : > { %v1199_v28 = vpop.f32.mrb[80].mxu1  ;;  %v1443_v29 = vrot.slane %v1375_v27, 1  ;;  %v2518_v30 = vpop.f32.mrb[81].mxu0 }
 0x187   : > { %v1267_v24 = vrot.slane %v1199_v28, 1  ;;  %v2492_v32 = vpop.f32.mrb[81].mxu1  ;;  %v1378_v33 = vpop.f32.mrb[82].mxu0 }
 0x188   : > { %v1444_v34 = vsel %vm1255_vm6, %v1441_v12, %v1443_v29  ;;  %v1202_v13 = vpop.f32.mrb[82].mxu1  ;;  %v1445_v2 = vrot.slane %v1378_v33, 1  ;;  %v2519_v20 = vpop.f32.mrb[83].mxu0 }
 0x189   : > { %v1268_v36 = vsel %vm1255_vm6, %v1265_v6, %v1267_v24  ;;  %v3184_v23 = vadd.f32 %v1444_v34, %v1297_v63  ;;  %v1269_v38 = vrot.slane %v1202_v13, 1  ;;  %v2493_v42 = vpop.f32.mrb[83].mxu1  ;;  %v3214_v30 = vpop.permute.xlu0 %1913 }
 0x18a   : > { %v1300_v31 = vadd.f32 %v1268_v36, %v3139_v37  ;;  %v1446_v21 = vsel %vm1255_vm6, %v1443_v29, %v1445_v2  ;;  %v1241_v42 = vld [vmem:[#allocation2 + $0x60] sm:$0xf] }
 0x18b   : > { %v1270_v45 = vsel %vm1255_vm6, %v1267_v24, %v1269_v38  ;;  %v3189_v35 = vadd.f32 %v1446_v21, %v1298_v40 }
 0x18c   : > { %v1301_v46 = vadd.f32 %v1270_v45, %v3145_v43 }
 0x18d   : > { %v1383_v41 = vpop.f32.mrb[84].mxu0 }
 0x18e   : > { %v1207_v47 = vpop.f32.mrb[84].mxu1  ;;  %v1447_v48 = vrot.slane %v1383_v41, 1  ;;  %v2522_v49 = vpop.f32.mrb[85].mxu0 }
 0x18f   : > { %v1271_v10 = vrot.slane %v1207_v47, 1  ;;  %v2496_v50 = vpop.f32.mrb[85].mxu1  ;;  %v1386_v51 = vpop.f32.mrb[86].mxu0 }
 0x190   : > { %v1448_v7 = vsel %vm1255_vm6, %v1445_v2, %v1447_v48  ;;  %v1210_v55 = vpop.f32.mrb[86].mxu1  ;;  %v1449_v57 = vrot.slane %v1386_v51, 1  ;;  %v2523_v37 = vpop.f32.mrb[87].mxu0 }
 0x191   : > { %v1272_v44 = vsel %vm1255_vm6, %v1269_v38, %v1271_v10  ;;  %v3194_v39 = vadd.f32 %v1448_v7, %v1299_v60  ;;  %v1273_v1 = vrot.slane %v1210_v55, 1  ;;  %v2497_v58 = vpop.f32.mrb[87].mxu1 }
 0x192   : > { %v1302_v43 = vadd.f32 %v1272_v44, %v3147_v54  ;;  %v1450_v59 = vsel %vm1255_vm6, %v1447_v48, %v1449_v57 }
 0x193   : > { %v1274_v63 = vsel %vm1255_vm6, %v1271_v10, %v1273_v1  ;;  %v3199_v52 = vadd.f32 %v1450_v59, %v1300_v31  ;;  %v3225_v10 = vpop.permute.xlu0 %1928 }
 0x194   : > { %v1303_v4 = vadd.f32 %v1274_v63, %v3153_v0 }
 0x195   : > { %v1391_v5 = vpop.f32.mrb[88].mxu0 }
 0x196   : > { %v1215_v9 = vpop.f32.mrb[88].mxu1  ;;  %v1451_v61 = vrot.slane %v1391_v5, 1  ;;  %v2526_v11 = vpop.f32.mrb[89].mxu0 }
 0x197   : > { %v1275_v14 = vrot.slane %v1215_v9, 1  ;;  %v2500_v15 = vpop.f32.mrb[89].mxu1  ;;  %v1394_v62 = vpop.f32.mrb[90].mxu0 }
 0x198   : > { %v1452_v12 = vsel %vm1255_vm6, %v1449_v57, %v1451_v61  ;;  %v1218_v54 = vpop.f32.mrb[90].mxu1  ;;  %v1453_v17 = vrot.slane %v1394_v62, 1  ;;  %v2527_v18 = vpop.f32.mrb[91].mxu0 }
 0x199   : > { %v1276_v6 = vsel %vm1255_vm6, %v1273_v1, %v1275_v14  ;;  %v3206_v53 = vadd.f32 %v1452_v12, %v1301_v46  ;;  %v1277_v40 = vrot.slane %v1218_v54, 1  ;;  %v2501_v0 = vpop.f32.mrb[91].mxu1  ;;  %v3233_v5 = vpop.permute.xlu0 %1938 }
 0x19a   : > { %v1304_v22 = vadd.f32 %v1276_v6, %v3155_v56  ;;  %v1454_v25 = vsel %vm1255_vm6, %v1451_v61, %v1453_v17 }
 0x19b   : > { %v1278_v60 = vsel %vm1255_vm6, %v1275_v14, %v1277_v40  ;;  %v3211_v27 = vadd.f32 %v1454_v25, %v1302_v43 }
 0x19c   : > { %v1305_v28 = vadd.f32 %v1278_v60, %v3161_v19 }
 0x19d   : > { %v1399_v29 = vpop.f32.mrb[92].mxu0 }
 0x19e   : > { %v1223_v24 = vpop.f32.mrb[92].mxu1  ;;  %v1455_v32 = vrot.slane %v1399_v29, 1  ;;  %v2530_v33 = vpop.f32.mrb[93].mxu0 }
 0x19f   : > { %v1279_v34 = vrot.slane %v1223_v24, 1  ;;  %v2504_v13 = vpop.f32.mrb[93].mxu1  ;;  %v1402_v2 = vpop.f32.mrb[94].mxu0 }
 0x1a0   : > { %v1456_v20 = vsel %vm1255_vm6, %v1453_v17, %v1455_v32  ;;  %v1226_v56 = vpop.f32.mrb[94].mxu1  ;;  %v1457_v36 = vrot.slane %v1402_v2, 1  ;;  %v2531_v38 = vpop.f32.mrb[95].mxu0 }
 0x1a1   : > { %v1280_v31 = vsel %vm1255_vm6, %v1277_v40, %v1279_v34  ;;  %v1294_v21 = vsel %vm397_vm3, %v1279_v34, 0.0  ;;  %v3219_v19 = vadd.f32 %v1456_v20, %v1303_v4  ;;  %v2505_v45 = vpop.f32.mrb[95].mxu1 }
 0x1a2   : > { %v1306_v46 = vadd.f32 %v1280_v31, %v3163_v16  ;;  %v1307_v41 = vadd.f32 %v1294_v21, %v1241_v42  ;;  %v1458_v47 = vsel %vm1255_vm6, %v1455_v32, %v1457_v36 }
 0x1a3   : > { %v3223_v48 = vadd.f32 %v1458_v47, %v1304_v22 }
 0x1a4   : > { %1320 = vst [vmem:[#allocation2 + $0x60] sm:$0xf] %v1307_v41 }
 0x1a5   : > { %v1407_v49 = vpop.f32.mrb[96].mxu0 }
 0x1a6   : > { %v1459_v50 = vrot.slane %v1407_v49, 1  ;;  %v1539_v51 = vpop.f32.mrb[96].mxu1  ;;  %v2534_v7 = vpop.f32.mrb[97].mxu0 }
 0x1a7   : > { %v2540_v55 = vpop.f32.mrb[97].mxu1  ;;  %v1410_v57 = vpop.f32.mrb[98].mxu0 }
 0x1a8   : > { %v1460_v37 = vsel %vm1255_vm6, %v1457_v36, %v1459_v50  ;;  %v1473_v44 = vsel %vm397_vm3, %v1459_v50, 0.0  ;;  %v1541_v1 = vpop.f32.mrb[98].mxu1  ;;  %v2535_v16 = vpop.f32.mrb[99].mxu0 }
 0x1a9   : > { %v3229_v58 = vadd.f32 %v1460_v37, %v1305_v28  ;;  %v3231_v43 = vadd.f32 %v1473_v44, %v1306_v46  ;;  %v2541_v59 = vpop.f32.mrb[99].mxu1  ;;  %v1618_v11 = vrot.slane %v1541_v1, 2  ;;  %v3239_v28 = vpop.permute.xlu0 %1948 }
 0x1aa   : > { %v1919_v37 = vpop.permute.xlu1 %1918 }
 0x1ab   : > { %v1425_v63 = vld [vmem:[#allocation2 + $0x60] sm:$0xf] }
 0x1ac   : > { %1499 = vst [vmem:[#allocation2 + $0x60] sm:$0xf] %v1425_v63 }
 0x1ad   : > { %v1719_v4 = vpop.f32.mrb[100].mxu0  ;;  %v3253_v7 = vpop.permute.xlu0 %1958 }
 0x1ae   : > { %v1546_v9 = vpop.f32.mrb[100].mxu1  ;;  %v2570_v61 = vpop.f32.mrb[101].mxu0 }
 0x1af   : > { %v1619_v14 = vrot.slane %v1546_v9, 2  ;;  %v2544_v15 = vpop.f32.mrb[101].mxu1  ;;  %v1721_v62 = vpop.f32.mrb[102].mxu0 }
 0x1b0   : > { %v1549_v12 = vpop.f32.mrb[102].mxu1  ;;  %v2571_v54 = vpop.f32.mrb[103].mxu0  ;;  %v1798_v29 = vrot.slane %v1721_v62, 3 }
 0x1b1   : > { %v1620_v17 = vsel %vm1617_vm7, %v1618_v11, %v1619_v14  ;;  %v1621_v18 = vrot.slane %v1549_v12, 2  ;;  %v2545_v6 = vpop.f32.mrb[103].mxu1 }
 0x1b2   : > { %v1654_v40 = vadd.f32 %v1620_v17, %v3174_v3 }
 0x1b3   : > { %v1604_v0 = vld [vmem:[#allocation2 + $0x60] sm:$0xf]  ;;  %v1622_v22 = vsel %vm1617_vm7, %v1619_v14, %v1621_v18 }
 0x1b4   : > { %1679 = vst [vmem:[#allocation2 + $0x60] sm:$0xf] %v1604_v0  ;;  %v1655_v25 = vadd.f32 %v1622_v22, %v3179_v26  ;;  %v3245_v26 = vld [vmem:[%s3318_s2] ss:$0 sm:$0xff] }
 0x1b5   : > { %v1726_v60 = vpop.f32.mrb[104].mxu0 }
 0x1b6   : > { %v1554_v24 = vpop.f32.mrb[104].mxu1  ;;  %v1799_v32 = vrot.slane %v1726_v60, 3  ;;  %v2574_v33 = vpop.f32.mrb[105].mxu0 }
 0x1b7   : > { %v1623_v34 = vrot.slane %v1554_v24, 2  ;;  %v2548_v13 = vpop.f32.mrb[105].mxu1  ;;  %v1729_v2 = vpop.f32.mrb[106].mxu0 }
 0x1b8   : > { %v1800_v20 = vsel %vm1797_vm8, %v1798_v29, %v1799_v32  ;;  %v1557_v3 = vpop.f32.mrb[106].mxu1  ;;  %v1801_v56 = vrot.slane %v1729_v2, 3  ;;  %v2575_v36 = vpop.f32.mrb[107].mxu0 }
 0x1b9   : > { %v1624_v38 = vsel %vm1617_vm7, %v1621_v18, %v1623_v34  ;;  %v1834_v42 = vadd.f32 %v1800_v20, %v1654_v40  ;;  %v1625_v31 = vrot.slane %v1557_v3, 2  ;;  %v2549_v21 = vpop.f32.mrb[107].mxu1  ;;  %v1969_v40 = vpop.permute.xlu0 %1968 }
 0x1ba   : > { %v1656_v45 = vadd.f32 %v1624_v38, %v3184_v23  ;;  %v1802_v46 = vsel %vm1797_vm8, %v1799_v32, %v1801_v56  ;;  %v1924_v24 = vpop.permute.xlu1 %1923 }
 0x1bb   : > { %v1784_v41 = vld [vmem:[#allocation2 + $0x60] sm:$0xf]  ;;  %v1626_v47 = vsel %vm1617_vm7, %v1623_v34, %v1625_v31  ;;  %v1835_v49 = vadd.f32 %v1802_v46, %v1655_v25  ;;  %v1880_v50 = vadd.f32 %v3245_v26, %v1834_v42 }
 0x1bc   : > { %1859 = vst [vmem:[#allocation2 + $0x60] sm:$0xf] %v1784_v41  ;;  %v1657_v51 = vadd.f32 %v1626_v47, %v3189_v35 }
 0x1bd   : > { %v1734_v55 = vpop.f32.mrb[108].mxu0  ;;  %v1881_v57 = vadd.f32 %v3245_v26, %v1835_v49  ;;  %v1971_v4 = vmul.f32 %v3202_v8, %v1880_v50 }
 0x1be   : > { %v1562_v44 = vpop.f32.mrb[108].mxu1  ;;  %v1803_v23 = vrot.slane %v1734_v55, 3  ;;  %v2578_v1 = vpop.f32.mrb[109].mxu0 }
 0x1bf   : > { %v1627_v16 = vrot.slane %v1562_v44, 2  ;;  %v2552_v59 = vpop.f32.mrb[109].mxu1  ;;  %v1737_v63 = vpop.f32.mrb[110].mxu0  ;;  %v1972_v9 = vmul.f32 %v3214_v30, %v1881_v57 }
 0x1c0   : > { %v1804_v61 = vsel %vm1797_vm8, %v1801_v56, %v1803_v23  ;;  %v1565_v35 = vpop.f32.mrb[110].mxu1  ;;  %v1805_v11 = vrot.slane %v1737_v63, 3  ;;  %v2579_v14 = vpop.f32.mrb[111].mxu0 }
 0x1c1   : > { %v1628_v15 = vsel %vm1617_vm7, %v1625_v31, %v1627_v16  ;;  %v1836_v62 = vadd.f32 %v1804_v61, %v1656_v45  ;;  %v1629_v12 = vrot.slane %v1565_v35, 2  ;;  %v2553_v54 = vpop.f32.mrb[111].mxu1  ;;  %v2222_v8 = vpack.c.bf16 %v1972_v9, %v1971_v4  ;;  %v1934_v1 = vpop.permute.xlu1 %1933 }
 0x1c2   : > { %v1658_v30 = vadd.f32 %v1628_v15, %v3194_v39  ;;  %v1806_v17 = vsel %vm1797_vm8, %v1803_v23, %v1805_v11 }
 0x1c3   : > { %v1630_v18 = vsel %vm1617_vm7, %v1627_v16, %v1629_v12  ;;  %v1837_v6 = vadd.f32 %v1806_v17, %v1657_v51  ;;  %v1872_v0 = vld [vmem:[#allocation2 + $0x60] sm:$0xf]  ;;  %2223 = vst [vmem:[%s3264_s23] sm:$0xff] %v2222_v8   ;;  %v1882_v22 = vadd.f32 %v3245_v26, %v1836_v62 }
 0x1c4   : > { %v1659_v25 = vadd.f32 %v1630_v18, %v3199_v52  ;;  %v1892_v60 = vadd.f32 %v3245_v26, %v1872_v0 }
 0x1c5   : > { %v1742_v29 = vpop.f32.mrb[112].mxu0  ;;  %v1883_v32 = vadd.f32 %v3245_v26, %v1837_v6  ;;  %v1973_v20 = vmul.f32 %v1919_v37, %v1882_v22 }
 0x1c6   : > { %v1983_v33 = vmul.f32 %v1969_v40, %v1892_v60  ;;  %v1570_v39 = vpop.f32.mrb[112].mxu1  ;;  %v1807_v34 = vrot.slane %v1742_v29, 3  ;;  %v2582_v13 = vpop.f32.mrb[113].mxu0 }
 0x1c7   : > { %v1631_v2 = vrot.slane %v1570_v39, 2  ;;  %v2556_v3 = vpop.f32.mrb[113].mxu1  ;;  %v1745_v56 = vpop.f32.mrb[114].mxu0  ;;  %v1974_v36 = vmul.f32 %v1924_v24, %v1883_v32 }
 0x1c8   : > { %v2218_v38 = vpack.c.bf16 %v1983_v33, %v1983_v33  ;;  %v1808_v52 = vsel %vm1797_vm8, %v1805_v11, %v1807_v34  ;;  %v1573_v42 = vpop.f32.mrb[114].mxu1  ;;  %v1809_v31 = vrot.slane %v1745_v56, 3  ;;  %v2583_v21 = vpop.f32.mrb[115].mxu0 }
 0x1c9   : > { %v1632_v45 = vsel %vm1617_vm7, %v1629_v12, %v1631_v2  ;;  %v1838_v46 = vadd.f32 %v1808_v52, %v1658_v30  ;;  %v1633_v41 = vrot.slane %v1573_v42, 2  ;;  %v2557_v47 = vpop.f32.mrb[115].mxu1  ;;  %v2227_v49 = vpack.c.bf16 %v1974_v36, %v1973_v20 }
 0x1ca   : > { %2049 = vst [vmem:[%s3264_s23 + $0x30] sm:$0x3] %v2218_v38  ;;  %v1660_v50 = vadd.f32 %v1632_v45, %v3206_v53  ;;  %v1810_v51 = vsel %vm1797_vm8, %v1807_v34, %v1809_v31 }
 0x1cb   : > { %v1634_v55 = vsel %vm1617_vm7, %v1631_v2, %v1633_v41  ;;  %v1839_v57 = vadd.f32 %v1810_v51, %v1659_v25  ;;  %2249 = vst [vmem:[%s3264_s23 + $0x8] sm:$0xff] %v2227_v49   ;;  %v1884_v37 = vadd.f32 %v3245_v26, %v1838_v46  ;;  %v1944_v25 = vpop.permute.xlu1 %1943 }
 0x1cc   : > { %v1661_v44 = vadd.f32 %v1634_v55, %v3211_v27 }
 0x1cd   : > { %v1750_v23 = vpop.f32.mrb[116].mxu0  ;;  %v1885_v16 = vadd.f32 %v3245_v26, %v1839_v57  ;;  %v1975_v53 = vmul.f32 %v3225_v10, %v1884_v37 }
 0x1ce   : > { %v1578_v59 = vpop.f32.mrb[116].mxu1  ;;  %v1811_v63 = vrot.slane %v1750_v23, 3  ;;  %v2586_v4 = vpop.f32.mrb[117].mxu0 }
 0x1cf   : > { %v1635_v9 = vrot.slane %v1578_v59, 2  ;;  %v1976_v61 = vmul.f32 %v1934_v1, %v1885_v16  ;;  %v2560_v35 = vpop.f32.mrb[117].mxu1  ;;  %v1753_v11 = vpop.f32.mrb[118].mxu0 }
 0x1d0   : > { %v1812_v14 = vsel %vm1797_vm8, %v1809_v31, %v1811_v63  ;;  %v1581_v15 = vpop.f32.mrb[118].mxu1  ;;  %v1813_v62 = vrot.slane %v1753_v11, 3  ;;  %v2587_v12 = vpop.f32.mrb[119].mxu0 }
 0x1d1   : > { %v1636_v27 = vsel %vm1617_vm7, %v1633_v41, %v1635_v9  ;;  %v1840_v54 = vadd.f32 %v1812_v14, %v1660_v50  ;;  %v2232_v8 = vpack.c.bf16 %v1976_v61, %v1975_v53  ;;  %v1637_v30 = vrot.slane %v1581_v15, 2  ;;  %v2561_v17 = vpop.f32.mrb[119].mxu1  ;;  %v1954_v50 = vpop.permute.xlu1 %1953 }
 0x1d2   : > { %v1662_v18 = vadd.f32 %v1636_v27, %v3219_v19  ;;  %v1814_v6 = vsel %vm1797_vm8, %v1811_v63, %v1813_v62 }
 0x1d3   : > { %2250 = vst [vmem:[%s3264_s23 + $0x10] sm:$0xff] %v2232_v8   ;;  %v1638_v10 = vsel %vm1617_vm7, %v1635_v9, %v1637_v30  ;;  %v1841_v40 = vadd.f32 %v1814_v6, %v1661_v44  ;;  %v1886_v0 = vadd.f32 %v3245_v26, %v1840_v54 }
 0x1d4   : > { %v1663_v22 = vadd.f32 %v1638_v10, %v3223_v48 }
 0x1d5   : > { %v1887_v60 = vadd.f32 %v3245_v26, %v1841_v40  ;;  %v1758_v29 = vpop.f32.mrb[120].mxu0  ;;  %v1977_v39 = vmul.f32 %v3233_v5, %v1886_v0  ;;  %v1964_v9 = vpop.permute.xlu1 %1963 }
 0x1d6   : > { %v1586_v24 = vpop.f32.mrb[120].mxu1  ;;  %v1815_v32 = vrot.slane %v1758_v29, 3  ;;  %v2590_v33 = vpop.f32.mrb[121].mxu0 }
 0x1d7   : > { %v1978_v19 = vmul.f32 %v1944_v25, %v1887_v60  ;;  %v1639_v34 = vrot.slane %v1586_v24, 2  ;;  %v2564_v13 = vpop.f32.mrb[121].mxu1  ;;  %v1761_v2 = vpop.f32.mrb[122].mxu0 }
 0x1d8   : > { %v1816_v20 = vsel %vm1797_vm8, %v1813_v62, %v1815_v32  ;;  %v1589_v3 = vpop.f32.mrb[122].mxu1  ;;  %v1817_v56 = vrot.slane %v1761_v2, 3  ;;  %v2591_v36 = vpop.f32.mrb[123].mxu0 }
 0x1d9   : > { %v2237_v48 = vpack.c.bf16 %v1978_v19, %v1977_v39  ;;  %v1640_v38 = vsel %vm1617_vm7, %v1637_v30, %v1639_v34  ;;  %v1653_v52 = vsel %vm577_vm4, %v1639_v34, 0.0  ;;  %v1842_v42 = vadd.f32 %v1816_v20, %v1662_v18  ;;  %v2565_v31 = vpop.f32.mrb[123].mxu1 }
 0x1da   : > { %v1664_v21 = vadd.f32 %v1640_v38, %v3229_v58  ;;  %v1665_v5 = vadd.f32 %v1653_v52, %v3231_v43  ;;  %v1818_v45 = vsel %vm1797_vm8, %v1815_v32, %v1817_v56 }
 0x1db   : > { %2251 = vst [vmem:[%s3264_s23 + $0x18] sm:$0xff] %v2237_v48   ;;  %v1888_v46 = vadd.f32 %v3245_v26, %v1842_v42  ;;  %v1843_v41 = vadd.f32 %v1818_v45, %v1663_v22 }
 0x1dd   : > { %v1889_v47 = vadd.f32 %v3245_v26, %v1843_v41  ;;  %v1766_v49 = vpop.f32.mrb[124].mxu0  ;;  %v1979_v57 = vmul.f32 %v3239_v28, %v1888_v46 }
 0x1de   : > { %v1819_v51 = vrot.slane %v1766_v49, 3  ;;  %v2594_v55 = vpop.f32.mrb[125].mxu0 }
 0x1df   : > { %v1980_v37 = vmul.f32 %v1954_v50, %v1889_v47  ;;  %v1769_v58 = vpop.f32.mrb[126].mxu0 }
 0x1e0   : > { %v1820_v43 = vsel %vm1797_vm8, %v1817_v56, %v1819_v51  ;;  %v1833_v44 = vsel %vm757_vm5, %v1819_v51, 0.0  ;;  %v2595_v23 = vpop.f32.mrb[127].mxu0 }
 0x1e1   : > { %v2242_v1 = vpack.c.bf16 %v1980_v37, %v1979_v57  ;;  %v1844_v16 = vadd.f32 %v1820_v43, %v1664_v21  ;;  %v1845_v59 = vadd.f32 %v1833_v44, %v1665_v5 }
 0x1e3   : > { %2252 = vst [vmem:[%s3264_s23 + $0x20] sm:$0xff] %v2242_v1   ;;  %v1890_v63 = vadd.f32 %v3245_v26, %v1844_v16  ;;  %v1891_v4 = vadd.f32 %v3245_v26, %v1845_v59 }
 0x1e5   : > { %v1981_v53 = vmul.f32 %v3253_v7, %v1890_v63  ;;  %v1982_v28 = vmul.f32 %v1964_v9, %v1891_v4 }
 0x1e7   : > { %v2247_v61 = vpack.c.bf16 %v1982_v28, %v1981_v53 }
 0x1e9   : > { %2253 = vst [vmem:[%s3264_s23 + $0x28] sm:$0xff] %v2247_v61  }
 0x1ea PF: > { %s14_s15 = sadd.s32 1, %s2625_s15  }
 0x1eb   : > { %p11_p4 = scmp.ge.s32.totalorder %s14_s15, 4  }
 0x1ed   :  { %13 = sbr.rel (!%p11_p4) target bundleno = 1 (0x1), region = 74 }

// kernel: encoder_forward.12
= control target key start
LH: loop header
LB: loop body
LE: loop exit
PB: predicated region body
PF: predicated region fallthrough
CT: control target
= control target key end

     0   :  { %s451_s9 = smov 0   ;;  %s483_s0 = inlined_call_operand.vmem [shape: bf16[2,36,64], index: 0, kind: input, shape index: {}]   ;;  %s484_s1 = inlined_call_operand.vmem [shape: bf16[64,96], index: 1, kind: input, shape index: {}]   ;;  %s485_s2 = inlined_call_operand.vmem [shape: bf16[2,36,96], index: 2, kind: output, shape index: {}]  }
   0x1 LB: > { %s344_s10 = sadd.s32 4294967295, %s432_s9   ;;  %p348_p0 = scmp.ge.s32.totalorder %s432_s9, 1  ;;  %s432_s9 = sphi %s451_s9, %s12_s9  }
   0x2   : > { %p112_p1 = scmp.lt.s32.totalorder %s432_s9, 3 }
   0x4   : > { %p113_p2 = pnand %p348_p0, %p112_p1 }
   0x5   : > { %v419_v0 = vld [vmem:[%s484_s1] sm:$0xff] (!%p113_p2)   ;;  %v434_v1 = vmov (!%p113_p2), 0.0   ;;  %v420_v2 = vld [vmem:[%s484_s1 + $0x8] sm:$0xff] (!%p113_p2)   ;;  %p134_p3 = scmp.lt.s32.totalorder (!%p113_p2), %s344_s10, 1  ;;  %vm435_vm0 = vmmov (!%p113_p2), 0   ;;  %v421_v3 = vld [vmem:[%s484_s1 + $0x10] sm:$0xff] (!%p113_p2)  }
   0x6   : > { %116 = sbr.rel (%p113_p2) target bundleno = 245 (0xf5), region = 28  ;;  %400 = vmatprep.subr.bf16.mxu1 (!%p113_p2), %v434_v1  ;;  %380 = vmatprep.subr.bf16.mxu0 (!%p113_p2), %v434_v1  ;;  %v422_v4 = vld [vmem:[%s484_s1 + $0x18] sm:$0xff] (!%p113_p2)   ;;  %vm195_vm1 = vcmask (!%p113_p2), 523264   ;;  %vm282_vm2 = vcmask (!%p113_p2), 781312   ;;  %vm287_vm3 = vcmask (!%p113_p2), 779264  }
   0x7   : > { %404 = vmatpush3.bf16.msra.mxu1 (!%p113_p2), %v419_v0  ;;  %381 = vmatpush3.bf16.msra.mxu0 (!%p113_p2), %v419_v0 }
   0x8   : > { %401 = vmatprep.subr.bf16.mxu1 (!%p113_p2), %v434_v1  ;;  %382 = vmatprep.subr.bf16.mxu0 (!%p113_p2), %v434_v1 }
   0x9   : > { %392 = vmatprep.mubr.msk.bf16.mxu1 (!%p113_p2), %vm435_vm0, %v434_v1  ;;  %388 = vmatprep.mubr.msk.bf16.mxu0 (!%p113_p2), %vm435_vm0, %v434_v1 }
   0xb   : > { %405 = vmatpush3.bf16.msra.mxu1 (!%p113_p2), %v420_v2  ;;  %383 = vmatpush3.bf16.msra.mxu0 (!%p113_p2), %v420_v2 }
   0xc   : > { %402 = vmatprep.subr.bf16.mxu1 (!%p113_p2), %v434_v1  ;;  %384 = vmatprep.subr.bf16.mxu0 (!%p113_p2), %v434_v1 }
   0xd   : > { %s487_s10 = smov (!%p134_p3, %s344_s10), 1 }
   0xe   : > { %s408_s17 = smul.u32 20, %s487_s10 }
   0xf   : > { %406 = vmatpush3.bf16.msra.mxu1 %v421_v3  ;;  %385 = vmatpush3.bf16.msra.mxu0 %v421_v3 }
  0x10   : > { %s138_s20 = scalar_lea.vmem %s483_s0, %s408_s17  ;;  %403 = vmatprep.subr.bf16.mxu1 %v434_v1  ;;  %386 = vmatprep.subr.bf16.mxu0 %v434_v1  ;;  %s143_s25 = scalar_lea.vmem %s485_s2, %s408_s17 }
  0x11   : > { %v423_v5 = vld [vmem:[%s138_s20 + $0x8] sm:$0xff]   ;;  %v424_v6 = vld [vmem:[%s138_s20] sm:$0xff]   ;;  %v425_v7 = vld [vmem:[%s138_s20 + $0x10] ss:$0 sps:$4 sm:$0x33]  }
  0x13   : > { %407 = vmatpush3.bf16.msra.mxu1 %v422_v4  ;;  %387 = vmatpush3.bf16.msra.mxu0 %v422_v4 }
  0x16   : > { %393 = vmatmul.mubr.msk.bf16.vlgmr.msra.gmra.mrb[0].mxu1 %vm195_vm1, %v423_v5  ;;  %389 = vmatmul.mubr.msk.bf16.vlgmr.msra.gmra.mrb[0].mxu0 %vm195_vm1, %v424_v6 }
  0x17   : > { %396 = vmatprep.mubr.msk.bf16.mxu1 %vm435_vm0, %v434_v1 }
  0x1e   : > { %397 = vmatmul.mubr.msk.bf16.gmra.mrb[4].mxu1 %vm195_vm1, %v425_v7 }
  0xe9   : > { %v247_v8 = vpop.f32.mrb[0].mxu1  ;;  %v239_v9 = vpop.f32.mrb[0].mxu0 }
  0xea   : > { %v370_v10 = vpack.c.bf16 %v247_v8, %v247_v8  ;;  %v394_v11 = vpop.f32.mrb[1].mxu1  ;;  %v368_v12 = vpack.c.bf16 %v239_v9, %v239_v9  ;;  %v390_v13 = vpop.f32.mrb[1].mxu0 }
  0xeb   : > { %v250_v14 = vpop.f32.mrb[2].mxu1  ;;  %v242_v15 = vpop.f32.mrb[2].mxu0 }
  0xec   : > { %285 = vst.msk [vmem:[%s143_s25 + $0x8] sm:$0xf] %vm282_vm2, %v370_v10  ;;  %v371_v16 = vpack.c.bf16 %v250_v14, %v250_v14  ;;  %283 = vst.msk [vmem:[%s143_s25] sm:$0xf] %vm282_vm2, %v368_v12  ;;  %v395_v17 = vpop.f32.mrb[3].mxu1  ;;  %v369_v18 = vpack.c.bf16 %v242_v15, %v242_v15  ;;  %v391_v19 = vpop.f32.mrb[3].mxu0 }
  0xee   : > { %286 = vst.msk [vmem:[%s143_s25 + $0xc] sm:$0xf] %vm282_vm2, %v371_v16  ;;  %284 = vst.msk [vmem:[%s143_s25 + $0x4] sm:$0xf] %vm282_vm2, %v369_v18 }
  0xf1   : > { %v255_v20 = vpop.f32.mrb[4].mxu1 }
  0xf2   : > { %v372_v21 = vpack.c.bf16 %v255_v20, %v255_v20  ;;  %v398_v22 = vpop.f32.mrb[5].mxu1 }
  0xf3   : > { %v258_v23 = vpop.f32.mrb[6].mxu1 }
  0xf4   : > { %288 = vst.msk [vmem:[%s143_s25 + $0x10] sm:$0x3] %vm287_vm3, %v372_v21  ;;  %v399_v24 = vpop.f32.mrb[7].mxu1 }
  0xf5 PF: > { %s12_s9 = sadd.s32 1, %s432_s9  }
  0xf6   : > { %p9_p4 = scmp.ge.s32.totalorder %s12_s9, 4  }
  0xf8   :  { %11 = sbr.rel (!%p9_p4) target bundleno = 1 (0x1), region = 58 }

// kernel: encoder_forward.10
= control target key start
LH: loop header
LB: loop body
LE: loop exit
PB: predicated region body
PF: predicated region fallthrough
CT: control target
= control target key end

     0   :  { %s7167_s27 = smov 0   ;;  %s8913_s0 = inlined_call_operand.vmem [shape: bf16[2,100,128], index: 0, kind: input, shape index: {}]   ;;  %s8914_s1 = inlined_call_operand.vmem [shape: bf16[9,128,128], index: 1, kind: input, shape index: {}]   ;;  %s8915_s2 = inlined_call_operand.vmem [shape: bf16[9,128,128], index: 2, kind: input, shape index: {}]   ;;  %s8916_s3 = inlined_call_operand.vmem [shape: f32[16,4], index: 3, kind: input, shape index: {}]   ;;  %s8917_s4 = inlined_call_operand.vmem [shape: f32[4,16], index: 4, kind: input, shape index: {}]   ;;  %s8918_s5 = inlined_call_operand.vmem [shape: f32[128,16], index: 5, kind: input, shape index: {}]   ;;  %s8919_s6 = inlined_call_operand.vmem [shape: f32[16,128], index: 6, kind: input, shape index: {}]   ;;  %s8920_s7 = inlined_call_operand.vmem [shape: f32[100,1], index: 7, kind: input, shape index: {}]   ;;  %s8921_s8 = inlined_call_operand.vmem [shape: bf16[2,100,128], index: 8, kind: output, shape index: {}]  }
   0x1 LB: > { %s5274_s28 = sadd.s32 4294967295, %s7116_s27   ;;  %p5278_p0 = scmp.ge.s32.totalorder %s7116_s27, 1  ;;  %s7116_s27 = sphi %s7167_s27, %s18_s27  }
   0x2   : > { %p262_p1 = scmp.lt.s32.totalorder %s7116_s27, 3 }
   0x4   : > { %p263_p2 = pnand %p5278_p0, %p262_p1 }
   0x5   : > { %v6942_v0 = vld [vmem:[%s8914_s1] sm:$0xff] (!%p263_p2)   ;;  %v7118_v1 = vmov (!%p263_p2), 0.0   ;;  %v6944_v3 = vld [vmem:[%s8914_s1 + $0x8] sm:$0xff] (!%p263_p2)   ;;  %vm7119_vm0 = vmmov (!%p263_p2), 0   ;;  %v6946_v5 = vld [vmem:[%s8914_s1 + $0x10] sm:$0xff] (!%p263_p2)   ;;  %p296_p3 = scmp.lt.s32.totalorder (!%p263_p2), %s5274_s28, 1 }
   0x6   : > { %266 = sbr.rel (%p263_p2) target bundleno = 1894 (0x766), region = 52  ;;  %6051 = vmatprep.subr.bf16.mxu0 (!%p263_p2), %v7118_v1  ;;  %345 = vst [vmem:[#allocation2 + $0x60] sm:$0xf] (!%p263_p2), %v7118_v1  ;;  %6095 = vmatprep.subr.bf16.mxu1 (!%p263_p2), %v7118_v1  ;;  %v6943_v2 = vld [vmem:[%s8914_s1 + $0x40] sm:$0xff] (!%p263_p2)   ;;  %v6945_v4 = vld [vmem:[%s8914_s1 + $0x48] sm:$0xff] (!%p263_p2)   ;;  %v6947_v6 = vld [vmem:[%s8914_s1 + $0x50] sm:$0xff] (!%p263_p2)  }
   0x7   : > { %6052 = vmatpush3.bf16.msra.mxu0 (!%p263_p2), %v6942_v0  ;;  %6067 = vmatprep.mubr.msk.bf16.mxu0 (!%p263_p2), %vm7119_vm0, %v7118_v1  ;;  %v6948_v7 = vld [vmem:[%s8914_s1 + $0x18] sm:$0xff] (!%p263_p2)   ;;  %v6950_v9 = vld [vmem:[%s8914_s1 + $0x20] sm:$0xff] (!%p263_p2)   ;;  %v6952_v11 = vld [vmem:[%s8914_s1 + $0x28] sm:$0xff] (!%p263_p2)   ;;  %vm562_vm1 = vcmask (!%p263_p2), 1042432   ;;  %vm802_vm2 = vcmask (!%p263_p2), 1041408   ;;  %vm1042_vm3 = vcmask (!%p263_p2), 1040384  }
   0x8   : > { %6096 = vmatpush3.bf16.msra.mxu1 (!%p263_p2), %v6943_v2  ;;  %6053 = vmatprep.subr.bf16.mxu0 (!%p263_p2), %v7118_v1  ;;  %v6949_v8 = vld [vmem:[%s8914_s1 + $0x58] sm:$0xff] (!%p263_p2)   ;;  %v6951_v10 = vld [vmem:[%s8914_s1 + $0x60] sm:$0xff] (!%p263_p2)   ;;  %v6953_v12 = vld [vmem:[%s8914_s1 + $0x68] sm:$0xff] (!%p263_p2)   ;;  %vm1720_vm4 = vcmask (!%p263_p2), 1046528   ;;  %vm2202_vm5 = vcmask (!%p263_p2), 1045504   ;;  %vm2442_vm6 = vcmask (!%p263_p2), 1044480  }
   0x9   : > { %6097 = vmatprep.subr.bf16.mxu1 (!%p263_p2), %v7118_v1  ;;  %6111 = vmatprep.mubr.msk.bf16.mxu1 (!%p263_p2), %vm7119_vm0, %v7118_v1  ;;  %v6954_v13 = vld [vmem:[%s8914_s1 + $0x30] sm:$0xff] (!%p263_p2)   ;;  %v6956_v15 = vld [vmem:[%s8914_s1 + $0x38] sm:$0xff] (!%p263_p2)   ;;  %v6959_v18 = vld [vmem:[%s8914_s1 + $0x80] sm:$0xff] (!%p263_p2)   ;;  %vm4779_vm7 = vcmask (!%p263_p2), 1043456   ;;  %vm4876_vm8 = vcmask (!%p263_p2), 130048   ;;  %vm4952_vm9 = vcmask (!%p263_p2), 31744  }
   0xa   : > { %v6955_v14 = vld [vmem:[%s8914_s1 + $0x70] sm:$0xff] (!%p263_p2)   ;;  %v6957_v17 = vld [vmem:[%s8914_s1 + $0x78] sm:$0xff] (!%p263_p2)   ;;  %v6966_v19 = vld [vmem:[%s8914_s1 + $0xc0] sm:$0xff] (!%p263_p2)  }
   0xb   : > { %6054 = vmatpush3.bf16.msra.mxu0 (!%p263_p2), %v6944_v3  ;;  %v6961_v21 = vld [vmem:[%s8914_s1 + $0x88] sm:$0xff] (!%p263_p2)   ;;  %v6962_v23 = vld [vmem:[%s8914_s1 + $0x90] sm:$0xff] (!%p263_p2)   ;;  %v6964_v26 = vld [vmem:[%s8914_s1 + $0x98] sm:$0xff] (!%p263_p2)  }
   0xc   : > { %6098 = vmatpush3.bf16.msra.mxu1 (!%p263_p2), %v6945_v4  ;;  %6055 = vmatprep.subr.bf16.mxu0 (!%p263_p2), %v7118_v1  ;;  %v6968_v22 = vld [vmem:[%s8914_s1 + $0xc8] sm:$0xff] (!%p263_p2)   ;;  %v6970_v24 = vld [vmem:[%s8914_s1 + $0xd0] sm:$0xff] (!%p263_p2)   ;;  %v6972_v27 = vld [vmem:[%s8914_s1 + $0xd8] sm:$0xff] (!%p263_p2)  }
   0xd   : > { %6099 = vmatprep.subr.bf16.mxu1 %v7118_v1  ;;  %s8923_s28 = smov (!%p296_p3, %s5274_s28), 1  ;;  %v6967_v28 = vld [vmem:[%s8914_s1 + $0xa0] sm:$0xff]   ;;  %v6971_v31 = vld [vmem:[%s8914_s1 + $0xa8] sm:$0xff]   ;;  %v6975_v33 = vld [vmem:[%s8914_s1 + $0xb0] sm:$0xff]  }
   0xe   : > { %s6927_s11 = smul.u32 52, %s8923_s28  ;;  %v6974_v29 = vld [vmem:[%s8914_s1 + $0xe0] sm:$0xff]   ;;  %v6976_v32 = vld [vmem:[%s8914_s1 + $0xe8] sm:$0xff]   ;;  %v6979_v34 = vld [vmem:[%s8914_s1 + $0xf0] sm:$0xff]  }
   0xf   : > { %6056 = vmatpush3.bf16.msra.mxu0 %v6946_v5  ;;  %v6978_v36 = vld [vmem:[%s8914_s1 + $0xb8] sm:$0xff]   ;;  %v6981_v41 = vld [vmem:[%s8914_s1 + $0x100] sm:$0xff]   ;;  %v6982_v43 = vld [vmem:[%s8914_s1 + $0x108] sm:$0xff]  }
  0x10   : > { %6100 = vmatpush3.bf16.msra.mxu1 %v6947_v6  ;;  %6057 = vmatprep.subr.bf16.mxu0 %v7118_v1  ;;  %s7247_s18 = scalar_lea.vmem %s8913_s0, %s6927_s11  ;;  %v6980_v37 = vld [vmem:[%s8914_s1 + $0xf8] sm:$0xff]   ;;  %v6985_v42 = vld [vmem:[%s8914_s1 + $0x140] sm:$0xff]   ;;  %v6987_v44 = vld [vmem:[%s8914_s1 + $0x148] sm:$0xff]   ;;  %s305_s24 = scalar_lea.vmem %s8921_s8, %s6927_s11 }
  0x11   : > { %6101 = vmatprep.subr.bf16.mxu1 %v7118_v1  ;;  %v7254_v16 = vld [vmem:[%s7247_s18] sm:$0xff]   ;;  %v7271_v20 = vld [vmem:[%s7247_s18 + $0x8] sm:$0xff]   ;;  %v7299_v25 = vld [vmem:[%s7247_s18 + $0x10] sm:$0xff]  }
  0x12   : > { %v7324_v30 = vld [vmem:[%s7247_s18 + $0x18] sm:$0xff]   ;;  %v7349_v35 = vld [vmem:[%s7247_s18 + $0x20] sm:$0xff]   ;;  %v7368_v38 = vld [vmem:[%s7247_s18 + $0x28] sm:$0xff]  }
  0x13   : > { %6058 = vmatpush3.bf16.msra.mxu0 %v6948_v7  ;;  %v332_v39 = vld [vmem:[%s7247_s18 + $0x30] sm:$0x3]  ;;  %v6984_v47 = vld [vmem:[%s8914_s1 + $0x118] sm:$0xff]   ;;  %v6986_v49 = vld [vmem:[%s8914_s1 + $0x120] sm:$0xff]  }
  0x14   : > { %6102 = vmatpush3.bf16.msra.mxu1 %v6949_v8  ;;  %6059 = vmatprep.subr.bf16.mxu0 %v7118_v1  ;;  %v7379_v40 = vcombine.low %v332_v39, %v332_v39  ;;  %v6983_v45 = vld [vmem:[%s8914_s1 + $0x110] sm:$0xff]   ;;  %v6990_v48 = vld [vmem:[%s8914_s1 + $0x158] sm:$0xff]   ;;  %v6991_v50 = vld [vmem:[%s8914_s1 + $0x160] sm:$0xff]  }
  0x15   : > { %6103 = vmatprep.subr.bf16.mxu1 %v7118_v1  ;;  %v6988_v46 = vld [vmem:[%s8914_s1 + $0x150] sm:$0xff]   ;;  %v6989_v51 = vld [vmem:[%s8914_s1 + $0x128] sm:$0xff]   ;;  %v6994_v55 = vld [vmem:[%s8914_s1 + $0x138] sm:$0xff]  }
  0x16   : > { %v6993_v52 = vld [vmem:[%s8914_s1 + $0x168] sm:$0xff]   ;;  %v6992_v53 = vld [vmem:[%s8914_s1 + $0x130] sm:$0xff]   ;;  %v6996_v56 = vld [vmem:[%s8914_s1 + $0x178] sm:$0xff]  }
  0x17   : > { %6060 = vmatpush3.bf16.msra.mxu0 %v6950_v9  ;;  %v6995_v54 = vld [vmem:[%s8914_s1 + $0x170] sm:$0xff]   ;;  %v6997_v57 = vld [vmem:[%s8914_s1 + $0x180] sm:$0xff]   ;;  %v6998_v59 = vld [vmem:[%s8914_s1 + $0x188] sm:$0xff]  }
  0x18   : > { %6104 = vmatpush3.bf16.msra.mxu1 %v6951_v10  ;;  %6061 = vmatprep.subr.bf16.mxu0 %v7118_v1  ;;  %v7002_v58 = vld [vmem:[%s8914_s1 + $0x1c0] sm:$0xff]   ;;  %v7004_v60 = vld [vmem:[%s8914_s1 + $0x1c8] sm:$0xff]   ;;  %v6999_v61 = vld [vmem:[%s8914_s1 + $0x190] sm:$0xff]  }
  0x19   : > { %6105 = vmatprep.subr.bf16.mxu1 %v7118_v1  ;;  %v7006_v62 = vld [vmem:[%s8914_s1 + $0x1d0] sm:$0xff]   ;;  %v7000_v63 = vld [vmem:[%s8914_s1 + $0x198] sm:$0xff]   ;;  %v7001_v2 = vld [vmem:[%s8914_s1 + $0x1a0] sm:$0xff]  }
  0x1a   : > { %v7007_v0 = vld [vmem:[%s8914_s1 + $0x1d8] sm:$0xff]   ;;  %v7009_v3 = vld [vmem:[%s8914_s1 + $0x1e0] sm:$0xff]   ;;  %v7003_v4 = vld [vmem:[%s8914_s1 + $0x1a8] sm:$0xff]  }
  0x1b   : > { %6062 = vmatpush3.bf16.msra.mxu0 %v6952_v11  ;;  %v7010_v5 = vld [vmem:[%s8914_s1 + $0x1e8] sm:$0xff]   ;;  %v7005_v6 = vld [vmem:[%s8914_s1 + $0x1b0] sm:$0xff]   ;;  %v7008_v8 = vld [vmem:[%s8914_s1 + $0x1b8] sm:$0xff]   ;;  %v7120_v11 = vmov 0  }
  0x1c   : > { %6106 = vmatpush3.bf16.msra.mxu1 %v6953_v12  ;;  %6063 = vmatprep.subr.bf16.mxu0 %v7118_v1  ;;  %v7012_v7 = vld [vmem:[%s8914_s1 + $0x1f0] sm:$0xff]   ;;  %v307_v9 = vld [vmem:[%s8920_s7] sm:$0xff]  ;;  %v7013_v10 = vld [vmem:[%s8914_s1 + $0x1f8] sm:$0xff]  }
  0x1d   : > { %6107 = vmatprep.subr.bf16.mxu1 %v7118_v1  ;;  %6940 = vset.pattern.permute.xlu0 %v7120_v11  ;;  %v308_v12 = vld [vmem:[%s8920_s7 + $0x8] sm:$0xff] }
  0x1e   : > { %2533 = vperm.xlu0 %6940, %v307_v9   ;;  %6941 = vset.pattern.permute.xlu1 %v7120_v11 }
  0x1f   : > { %6064 = vmatpush3.bf16.msra.mxu0 %v6954_v13  ;;  %v311_v13 = vld [vmem:[%s8920_s7 + $0x20] sm:$0xff] }
  0x20   : > { %6108 = vmatpush3.bf16.msra.mxu1 %v6955_v14  ;;  %6065 = vmatprep.subr.bf16.mxu0 %v7118_v1  ;;  %v313_v14 = vld [vmem:[%s8920_s7 + $0x30] sm:$0xff] }
  0x21   : > { %6109 = vmatprep.subr.bf16.mxu1 %v7118_v1 }
  0x22   : > { %2538 = vperm.xlu0 %6940, %v308_v12  }
  0x23   : > { %6066 = vmatpush3.bf16.msra.mxu0 %v6956_v15  ;;  %v315_v15 = vld [vmem:[%s8920_s7 + $0x40] sm:$0xff] }
  0x24   : > { %6110 = vmatpush3.bf16.msra.mxu1 %v6957_v17  ;;  %6139 = vmatprep.subr.bf16.mxu0 %v7118_v1  ;;  %v317_v17 = vld [vmem:[%s8920_s7 + $0x50] sm:$0xff] }
  0x25   : > { %6183 = vmatprep.subr.bf16.mxu1 %v7118_v1 }
  0x26   : > { %6068 = vmatmul.mubr.bf16.vlgmr.msra.gmra.mrb[0].mxu0 %v7254_v16  ;;  %2553 = vperm.xlu0 %6940, %v311_v13  }
  0x27   : > { %6112 = vmatmul.mubr.bf16.vlgmr.msra.gmra.mrb[0].mxu1 %v7254_v16  ;;  %6140 = vmatpush3.bf16.msra.mxu0 %v6959_v18  ;;  %v319_v18 = vld [vmem:[%s8920_s7 + $0x60] sm:$0xf] }
  0x28   : > { %6071 = vmatprep.mubr.msk.bf16.mxu0 %vm7119_vm0, %v7118_v1  ;;  %6141 = vmatprep.subr.bf16.mxu0 %v7118_v1 }
  0x29   : > { %6115 = vmatprep.mubr.msk.bf16.mxu1 %vm7119_vm0, %v7118_v1  ;;  %6184 = vmatpush3.bf16.msra.mxu1 %v6966_v19  ;;  %v7011_v19 = vld [vmem:[%s8914_s1 + $0x200] sm:$0xff]  }
  0x2a   : > { %6185 = vmatprep.subr.bf16.mxu1 %v7118_v1  ;;  %2563 = vperm.xlu0 %6940, %v313_v14  }
  0x2b   : > { %6142 = vmatpush3.bf16.msra.mxu0 %v6961_v21  ;;  %v7014_v21 = vld [vmem:[%s8914_s1 + $0x208] sm:$0xff]  }
  0x2c   : > { %6143 = vmatprep.subr.bf16.mxu0 %v7118_v1 }
  0x2d   : > { %6186 = vmatpush3.bf16.msra.mxu1 %v6968_v22  ;;  %v7015_v22 = vld [vmem:[%s8914_s1 + $0x210] sm:$0xff]  }
  0x2e   : > { %6072 = vmatmul.mubr.bf16.gmra.mrb[4].mxu0 %v7271_v20  ;;  %6187 = vmatprep.subr.bf16.mxu1 %v7118_v1 }
  0x2f   : > { %6116 = vmatmul.mubr.bf16.gmra.mrb[4].mxu1 %v7271_v20  ;;  %6075 = vmatprep.mubr.msk.bf16.mxu0 %vm7119_vm0, %v7118_v1 }
  0x30   : > { %6144 = vmatpush3.bf16.msra.mxu0 %v6962_v23  ;;  %6119 = vmatprep.mubr.msk.bf16.mxu1 %vm7119_vm0, %v7118_v1  ;;  %v7016_v23 = vld [vmem:[%s8914_s1 + $0x218] sm:$0xff]  }
  0x31   : > { %6145 = vmatprep.subr.bf16.mxu0 %v7118_v1  ;;  %6188 = vmatpush3.bf16.msra.mxu1 %v6970_v24  ;;  %v7017_v24 = vld [vmem:[%s8914_s1 + $0x220] sm:$0xff]  }
  0x32   : > { %6189 = vmatprep.subr.bf16.mxu1 %v7118_v1  ;;  %2573 = vperm.xlu0 %6940, %v315_v15  }
  0x34   : > { %6146 = vmatpush3.bf16.msra.mxu0 %v6964_v26  ;;  %v309_v26 = vld [vmem:[%s8920_s7 + $0x10] sm:$0xff] }
  0x35   : > { %6147 = vmatprep.subr.bf16.mxu0 %v7118_v1  ;;  %6190 = vmatpush3.bf16.msra.mxu1 %v6972_v27  ;;  %v7018_v27 = vld [vmem:[%s8914_s1 + $0x228] sm:$0xff]  }
  0x36   : > { %6076 = vmatmul.mubr.bf16.gmra.mrb[8].mxu0 %v7299_v25  ;;  %6191 = vmatprep.subr.bf16.mxu1 %v7118_v1 }
  0x37   : > { %6120 = vmatmul.mubr.bf16.gmra.mrb[8].mxu1 %v7299_v25  ;;  %6079 = vmatprep.mubr.msk.bf16.mxu0 %vm7119_vm0, %v7118_v1 }
  0x38   : > { %6123 = vmatprep.mubr.msk.bf16.mxu1 %vm7119_vm0, %v7118_v1  ;;  %6148 = vmatpush3.bf16.msra.mxu0 %v6967_v28  ;;  %v310_v28 = vld [vmem:[%s8920_s7 + $0x18] sm:$0xff] }
  0x39   : > { %6149 = vmatprep.subr.bf16.mxu0 %v7118_v1  ;;  %6192 = vmatpush3.bf16.msra.mxu1 %v6974_v29  ;;  %v7019_v29 = vld [vmem:[%s8914_s1 + $0x230] sm:$0xff]  }
  0x3a   : > { %6193 = vmatprep.subr.bf16.mxu1 %v7118_v1  ;;  %2583 = vperm.xlu0 %6940, %v317_v17  }
  0x3b   : > { %2543 = vperm.xlu1 %6941, %v309_v26  }
  0x3c   : > { %6150 = vmatpush3.bf16.msra.mxu0 %v6971_v31  ;;  %v312_v31 = vld [vmem:[%s8920_s7 + $0x28] sm:$0xff] }
  0x3d   : > { %6151 = vmatprep.subr.bf16.mxu0 %v7118_v1  ;;  %6194 = vmatpush3.bf16.msra.mxu1 %v6976_v32  ;;  %v7020_v32 = vld [vmem:[%s8914_s1 + $0x238] sm:$0xff]  }
  0x3e   : > { %6080 = vmatmul.mubr.bf16.gmra.mrb[12].mxu0 %v7324_v30  ;;  %6195 = vmatprep.subr.bf16.mxu1 %v7118_v1 }
  0x3f   : > { %6124 = vmatmul.mubr.bf16.gmra.mrb[12].mxu1 %v7324_v30  ;;  %6083 = vmatprep.mubr.msk.bf16.mxu0 %vm7119_vm0, %v7118_v1 }
  0x40   : > { %6127 = vmatprep.mubr.msk.bf16.mxu1 %vm7119_vm0, %v7118_v1  ;;  %6152 = vmatpush3.bf16.msra.mxu0 %v6975_v33  ;;  %v314_v33 = vld [vmem:[%s8920_s7 + $0x38] sm:$0xff] }
  0x41   : > { %6153 = vmatprep.subr.bf16.mxu0 %v7118_v1  ;;  %6196 = vmatpush3.bf16.msra.mxu1 %v6979_v34  ;;  %v316_v34 = vld [vmem:[%s8920_s7 + $0x48] sm:$0xff] }
  0x42   : > { %6197 = vmatprep.subr.bf16.mxu1 %v7118_v1  ;;  %2593 = vperm.xlu0 %6940, %v319_v18  }
  0x43   : > { %2548 = vperm.xlu1 %6941, %v310_v28  }
  0x44   : > { %6154 = vmatpush3.bf16.msra.mxu0 %v6978_v36  ;;  %v318_v36 = vld [vmem:[%s8920_s7 + $0x58] sm:$0xff] }
  0x45   : > { %6198 = vmatpush3.bf16.msra.mxu1 %v6980_v37  ;;  %6227 = vmatprep.subr.bf16.mxu0 %v7118_v1 }
  0x46   : > { %6084 = vmatmul.mubr.bf16.gmra.mrb[16].mxu0 %v7349_v35  ;;  %6271 = vmatprep.subr.bf16.mxu1 %v7118_v1 }
  0x47   : > { %6128 = vmatmul.mubr.bf16.gmra.mrb[16].mxu1 %v7349_v35  ;;  %6087 = vmatprep.mubr.msk.bf16.mxu0 %vm7119_vm0, %v7118_v1 }
  0x48   : > { %6131 = vmatprep.mubr.msk.bf16.mxu1 %vm7119_vm0, %v7118_v1  ;;  %2558 = vperm.xlu1 %6941, %v312_v31  }
  0x4c   : > { %2568 = vperm.xlu1 %6941, %v314_v33  }
  0x4e   : > { %6088 = vmatmul.mubr.bf16.gmra.mrb[20].mxu0 %v7368_v38 }
  0x4f   : > { %6132 = vmatmul.mubr.bf16.gmra.mrb[20].mxu1 %v7368_v38  ;;  %6091 = vmatprep.mubr.msk.bf16.mxu0 %vm7119_vm0, %v7118_v1 }
  0x50   : > { %6135 = vmatprep.mubr.msk.bf16.mxu1 %vm7119_vm0, %v7118_v1  ;;  %2578 = vperm.xlu1 %6941, %v316_v34  }
  0x54   : > { %2588 = vperm.xlu1 %6941, %v318_v36  }
  0x56   : > { %6092 = vmatmul.mubr.bf16.gmra.mrb[24].mxu0 %v7379_v40 }
  0x57   : > { %6136 = vmatmul.mubr.bf16.gmra.mrb[24].mxu1 %v7379_v40  ;;  %6155 = vmatprep.mubr.msk.bf16.mxu0 %vm7119_vm0, %v7118_v1 }
  0x58   : > { %6199 = vmatprep.mubr.msk.bf16.mxu1 %vm7119_vm0, %v7118_v1 }
  0x5e   : > { %6156 = vmatmul.mubr.bf16.vlgmr.msra.gmra.mrb[28].mxu0 %v7254_v16 }
  0x5f   : > { %6200 = vmatmul.mubr.bf16.vlgmr.msra.gmra.mrb[28].mxu1 %v7254_v16  ;;  %6228 = vmatpush3.bf16.msra.mxu0 %v6981_v41 }
  0x60   : > { %6159 = vmatprep.mubr.msk.bf16.mxu0 %vm7119_vm0, %v7118_v1  ;;  %6229 = vmatprep.subr.bf16.mxu0 %v7118_v1 }
  0x61   : > { %6203 = vmatprep.mubr.msk.bf16.mxu1 %vm7119_vm0, %v7118_v1  ;;  %6272 = vmatpush3.bf16.msra.mxu1 %v6985_v42 }
  0x62   : > { %6273 = vmatprep.subr.bf16.mxu1 %v7118_v1 }
  0x63   : > { %6230 = vmatpush3.bf16.msra.mxu0 %v6982_v43 }
  0x64   : > { %6231 = vmatprep.subr.bf16.mxu0 %v7118_v1 }
  0x65   : > { %6274 = vmatpush3.bf16.msra.mxu1 %v6987_v44 }
  0x66   : > { %6160 = vmatmul.mubr.bf16.gmra.mrb[32].mxu0 %v7271_v20  ;;  %6275 = vmatprep.subr.bf16.mxu1 %v7118_v1 }
  0x67   : > { %6204 = vmatmul.mubr.bf16.gmra.mrb[32].mxu1 %v7271_v20  ;;  %6163 = vmatprep.mubr.msk.bf16.mxu0 %vm7119_vm0, %v7118_v1 }
  0x68   : > { %6232 = vmatpush3.bf16.msra.mxu0 %v6983_v45  ;;  %6207 = vmatprep.mubr.msk.bf16.mxu1 %vm7119_vm0, %v7118_v1 }
  0x69   : > { %6233 = vmatprep.subr.bf16.mxu0 %v7118_v1  ;;  %6276 = vmatpush3.bf16.msra.mxu1 %v6988_v46 }
  0x6a   : > { %6277 = vmatprep.subr.bf16.mxu1 %v7118_v1 }
  0x6c   : > { %6234 = vmatpush3.bf16.msra.mxu0 %v6984_v47 }
  0x6d   : > { %6235 = vmatprep.subr.bf16.mxu0 %v7118_v1  ;;  %6278 = vmatpush3.bf16.msra.mxu1 %v6990_v48 }
  0x6e   : > { %6164 = vmatmul.mubr.bf16.gmra.mrb[36].mxu0 %v7299_v25  ;;  %6279 = vmatprep.subr.bf16.mxu1 %v7118_v1 }
  0x6f   : > { %6208 = vmatmul.mubr.bf16.gmra.mrb[36].mxu1 %v7299_v25  ;;  %6167 = vmatprep.mubr.msk.bf16.mxu0 %vm7119_vm0, %v7118_v1 }
  0x70   : > { %6211 = vmatprep.mubr.msk.bf16.mxu1 %vm7119_vm0, %v7118_v1  ;;  %6236 = vmatpush3.bf16.msra.mxu0 %v6986_v49 }
  0x71   : > { %6237 = vmatprep.subr.bf16.mxu0 %v7118_v1  ;;  %6280 = vmatpush3.bf16.msra.mxu1 %v6991_v50 }
  0x72   : > { %6281 = vmatprep.subr.bf16.mxu1 %v7118_v1 }
  0x74   : > { %6238 = vmatpush3.bf16.msra.mxu0 %v6989_v51 }
  0x75   : > { %6239 = vmatprep.subr.bf16.mxu0 %v7118_v1  ;;  %6282 = vmatpush3.bf16.msra.mxu1 %v6993_v52 }
  0x76   : > { %6168 = vmatmul.mubr.bf16.gmra.mrb[40].mxu0 %v7324_v30  ;;  %6283 = vmatprep.subr.bf16.mxu1 %v7118_v1 }
  0x77   : > { %6212 = vmatmul.mubr.bf16.gmra.mrb[40].mxu1 %v7324_v30  ;;  %6171 = vmatprep.mubr.msk.bf16.mxu0 %vm7119_vm0, %v7118_v1 }
  0x78   : > { %6215 = vmatprep.mubr.msk.bf16.mxu1 %vm7119_vm0, %v7118_v1  ;;  %6240 = vmatpush3.bf16.msra.mxu0 %v6992_v53 }
  0x79   : > { %6241 = vmatprep.subr.bf16.mxu0 %v7118_v1  ;;  %6284 = vmatpush3.bf16.msra.mxu1 %v6995_v54 }
  0x7a   : > { %6285 = vmatprep.subr.bf16.mxu1 %v7118_v1 }
  0x7c   : > { %6242 = vmatpush3.bf16.msra.mxu0 %v6994_v55 }
  0x7d   : > { %6286 = vmatpush3.bf16.msra.mxu1 %v6996_v56  ;;  %6315 = vmatprep.subr.bf16.mxu0 %v7118_v1 }
  0x7e   : > { %6172 = vmatmul.mubr.bf16.gmra.mrb[44].mxu0 %v7349_v35  ;;  %6359 = vmatprep.subr.bf16.mxu1 %v7118_v1 }
  0x7f   : > { %6216 = vmatmul.mubr.bf16.gmra.mrb[44].mxu1 %v7349_v35  ;;  %6175 = vmatprep.mubr.msk.bf16.mxu0 %vm7119_vm0, %v7118_v1 }
  0x80   : > { %6219 = vmatprep.mubr.msk.bf16.mxu1 %vm7119_vm0, %v7118_v1 }
  0x86   : > { %6176 = vmatmul.mubr.bf16.gmra.mrb[48].mxu0 %v7368_v38 }
  0x87   : > { %6220 = vmatmul.mubr.bf16.gmra.mrb[48].mxu1 %v7368_v38  ;;  %6179 = vmatprep.mubr.msk.bf16.mxu0 %vm7119_vm0, %v7118_v1 }
  0x88   : > { %6223 = vmatprep.mubr.msk.bf16.mxu1 %vm7119_vm0, %v7118_v1 }
  0x8e   : > { %6180 = vmatmul.mubr.bf16.gmra.mrb[52].mxu0 %v7379_v40 }
  0x8f   : > { %6224 = vmatmul.mubr.bf16.gmra.mrb[52].mxu1 %v7379_v40  ;;  %6243 = vmatprep.mubr.msk.bf16.mxu0 %vm7119_vm0, %v7118_v1 }
  0x90   : > { %6287 = vmatprep.mubr.msk.bf16.mxu1 %vm7119_vm0, %v7118_v1 }
  0x96   : > { %6244 = vmatmul.mubr.bf16.vlgmr.msra.gmra.mrb[56].mxu0 %v7254_v16 }
  0x97   : > { %6288 = vmatmul.mubr.bf16.vlgmr.msra.gmra.mrb[56].mxu1 %v7254_v16  ;;  %6316 = vmatpush3.bf16.msra.mxu0 %v6997_v57 }
  0x98   : > { %6247 = vmatprep.mubr.msk.bf16.mxu0 %vm7119_vm0, %v7118_v1  ;;  %6317 = vmatprep.subr.bf16.mxu0 %v7118_v1 }
  0x99   : > { %6291 = vmatprep.mubr.msk.bf16.mxu1 %vm7119_vm0, %v7118_v1  ;;  %6360 = vmatpush3.bf16.msra.mxu1 %v7002_v58 }
  0x9a   : > { %6361 = vmatprep.subr.bf16.mxu1 %v7118_v1 }
  0x9b   : > { %6318 = vmatpush3.bf16.msra.mxu0 %v6998_v59 }
  0x9c   : > { %6319 = vmatprep.subr.bf16.mxu0 %v7118_v1 }
  0x9d   : > { %6362 = vmatpush3.bf16.msra.mxu1 %v7004_v60 }
  0x9e   : > { %6248 = vmatmul.mubr.bf16.gmra.mrb[60].mxu0 %v7271_v20  ;;  %6363 = vmatprep.subr.bf16.mxu1 %v7118_v1 }
  0x9f   : > { %6292 = vmatmul.mubr.bf16.gmra.mrb[60].mxu1 %v7271_v20  ;;  %6251 = vmatprep.mubr.msk.bf16.mxu0 %vm7119_vm0, %v7118_v1 }
  0xa0   : > { %6320 = vmatpush3.bf16.msra.mxu0 %v6999_v61  ;;  %6295 = vmatprep.mubr.msk.bf16.mxu1 %vm7119_vm0, %v7118_v1 }
  0xa1   : > { %6321 = vmatprep.subr.bf16.mxu0 %v7118_v1  ;;  %6364 = vmatpush3.bf16.msra.mxu1 %v7006_v62 }
  0xa2   : > { %6365 = vmatprep.subr.bf16.mxu1 %v7118_v1 }
  0xa4   : > { %6322 = vmatpush3.bf16.msra.mxu0 %v7000_v63 }
  0xa5   : > { %6323 = vmatprep.subr.bf16.mxu0 %v7118_v1  ;;  %6366 = vmatpush3.bf16.msra.mxu1 %v7007_v0 }
  0xa6   : > { %6252 = vmatmul.mubr.bf16.gmra.mrb[64].mxu0 %v7299_v25  ;;  %6367 = vmatprep.subr.bf16.mxu1 %v7118_v1 }
  0xa7   : > { %6296 = vmatmul.mubr.bf16.gmra.mrb[64].mxu1 %v7299_v25  ;;  %6255 = vmatprep.mubr.msk.bf16.mxu0 %vm7119_vm0, %v7118_v1 }
  0xa8   : > { %6299 = vmatprep.mubr.msk.bf16.mxu1 %vm7119_vm0, %v7118_v1  ;;  %6324 = vmatpush3.bf16.msra.mxu0 %v7001_v2 }
  0xa9   : > { %6325 = vmatprep.subr.bf16.mxu0 %v7118_v1  ;;  %6368 = vmatpush3.bf16.msra.mxu1 %v7009_v3 }
  0xaa   : > { %6369 = vmatprep.subr.bf16.mxu1 %v7118_v1 }
  0xac   : > { %6326 = vmatpush3.bf16.msra.mxu0 %v7003_v4 }
  0xad   : > { %6327 = vmatprep.subr.bf16.mxu0 %v7118_v1  ;;  %6370 = vmatpush3.bf16.msra.mxu1 %v7010_v5 }
  0xae   : > { %6256 = vmatmul.mubr.bf16.gmra.mrb[68].mxu0 %v7324_v30  ;;  %6371 = vmatprep.subr.bf16.mxu1 %v7118_v1 }
  0xaf   : > { %6300 = vmatmul.mubr.bf16.gmra.mrb[68].mxu1 %v7324_v30  ;;  %6259 = vmatprep.mubr.msk.bf16.mxu0 %vm7119_vm0, %v7118_v1 }
  0xb0   : > { %6303 = vmatprep.mubr.msk.bf16.mxu1 %vm7119_vm0, %v7118_v1  ;;  %6328 = vmatpush3.bf16.msra.mxu0 %v7005_v6 }
  0xb1   : > { %6329 = vmatprep.subr.bf16.mxu0 %v7118_v1  ;;  %6372 = vmatpush3.bf16.msra.mxu1 %v7012_v7 }
  0xb2   : > { %6373 = vmatprep.subr.bf16.mxu1 %v7118_v1 }
  0xb4   : > { %6330 = vmatpush3.bf16.msra.mxu0 %v7008_v8 }
  0xb5   : > { %6403 = vmatprep.subr.bf16.mxu0 %v7118_v1  ;;  %6374 = vmatpush3.bf16.msra.mxu1 %v7013_v10 }
  0xb6   : > { %6260 = vmatmul.mubr.bf16.gmra.mrb[72].mxu0 %v7349_v35  ;;  %6447 = vmatprep.subr.bf16.mxu1 %v7118_v1 }
  0xb7   : > { %6304 = vmatmul.mubr.bf16.gmra.mrb[72].mxu1 %v7349_v35  ;;  %6263 = vmatprep.mubr.msk.bf16.mxu0 %vm7119_vm0, %v7118_v1 }
  0xb8   : > { %6307 = vmatprep.mubr.msk.bf16.mxu1 %vm7119_vm0, %v7118_v1 }
  0xbe   : > { %6264 = vmatmul.mubr.bf16.gmra.mrb[76].mxu0 %v7368_v38 }
  0xbf   : > { %6308 = vmatmul.mubr.bf16.gmra.mrb[76].mxu1 %v7368_v38  ;;  %6267 = vmatprep.mubr.msk.bf16.mxu0 %vm7119_vm0, %v7118_v1 }
  0xc0   : > { %6311 = vmatprep.mubr.msk.bf16.mxu1 %vm7119_vm0, %v7118_v1 }
  0xc6   : > { %6268 = vmatmul.mubr.bf16.gmra.mrb[80].mxu0 %v7379_v40 }
  0xc7   : > { %6312 = vmatmul.mubr.bf16.gmra.mrb[80].mxu1 %v7379_v40  ;;  %6331 = vmatprep.mubr.msk.bf16.mxu0 %vm7119_vm0, %v7118_v1 }
  0xc8   : > { %6375 = vmatprep.mubr.msk.bf16.mxu1 %vm7119_vm0, %v7118_v1 }
  0xce   : > { %6332 = vmatmul.mubr.bf16.vlgmr.msra.gmra.mrb[84].mxu0 %v7254_v16 }
  0xcf   : > { %6404 = vmatpush3.bf16.msra.mxu0 %v7011_v19  ;;  %6335 = vmatprep.mubr.msk.bf16.mxu0 %vm7119_vm0, %v7118_v1 }
  0xd0   : > { %6405 = vmatprep.subr.bf16.mxu0 %v7118_v1  ;;  %6376 = vmatmul.mubr.bf16.vlgmr.msra.gmra.mrb[84].mxu1 %v7254_v16 }
  0xd1   : > { %6379 = vmatprep.mubr.msk.bf16.mxu1 %vm7119_vm0, %v7118_v1 }
  0xd3   : > { %6406 = vmatpush3.bf16.msra.mxu0 %v7014_v21 }
  0xd4   : > { %6407 = vmatprep.subr.bf16.mxu0 %v7118_v1 }
  0xd6   : > { %6336 = vmatmul.mubr.bf16.gmra.mrb[88].mxu0 %v7271_v20 }
  0xd7   : > { %6339 = vmatprep.mubr.msk.bf16.mxu0 %vm7119_vm0, %v7118_v1  ;;  %6408 = vmatpush3.bf16.msra.mxu0 %v7015_v22 }
  0xd8   : > { %6380 = vmatmul.mubr.bf16.gmra.mrb[88].mxu1 %v7271_v20  ;;  %6409 = vmatprep.subr.bf16.mxu0 %v7118_v1 }
  0xd9   : > { %6383 = vmatprep.mubr.msk.bf16.mxu1 %vm7119_vm0, %v7118_v1 }
  0xdb   : > { %6410 = vmatpush3.bf16.msra.mxu0 %v7016_v23 }
  0xdc   : > { %6411 = vmatprep.subr.bf16.mxu0 %v7118_v1 }
  0xde   : > { %6340 = vmatmul.mubr.bf16.gmra.mrb[92].mxu0 %v7299_v25 }
  0xdf   : > { %6343 = vmatprep.mubr.msk.bf16.mxu0 %vm7119_vm0, %v7118_v1  ;;  %6412 = vmatpush3.bf16.msra.mxu0 %v7017_v24 }
  0xe0   : > { %6384 = vmatmul.mubr.bf16.gmra.mrb[92].mxu1 %v7299_v25  ;;  %6413 = vmatprep.subr.bf16.mxu0 %v7118_v1 }
  0xe1   : > { %6387 = vmatprep.mubr.msk.bf16.mxu1 %vm7119_vm0, %v7118_v1 }
  0xe3   : > { %6414 = vmatpush3.bf16.msra.mxu0 %v7018_v27 }
  0xe4   : > { %6415 = vmatprep.subr.bf16.mxu0 %v7118_v1 }
  0xe6   : > { %6344 = vmatmul.mubr.bf16.gmra.mrb[96].mxu0 %v7324_v30 }
  0xe7   : > { %6347 = vmatprep.mubr.msk.bf16.mxu0 %vm7119_vm0, %v7118_v1  ;;  %6416 = vmatpush3.bf16.msra.mxu0 %v7019_v29 }
  0xe8   : > { %6388 = vmatmul.mubr.bf16.gmra.mrb[96].mxu1 %v7324_v30  ;;  %6417 = vmatprep.subr.bf16.mxu0 %v7118_v1 }
  0xe9   : > { %6391 = vmatprep.mubr.msk.bf16.mxu1 %vm7119_vm0, %v7118_v1 }
  0xeb   : > { %6418 = vmatpush3.bf16.msra.mxu0 %v7020_v32 }
  0xec   : > { %6491 = vmatprep.subr.bf16.mxu0 %v7118_v1 }
  0xee   : > { %6348 = vmatmul.mubr.bf16.gmra.mrb[100].mxu0 %v7349_v35 }
  0xef   : > { %6351 = vmatprep.mubr.msk.bf16.mxu0 %vm7119_vm0, %v7118_v1 }
  0xf0   : > { %6392 = vmatmul.mubr.bf16.gmra.mrb[100].mxu1 %v7349_v35 }
  0xf1   : > { %6395 = vmatprep.mubr.msk.bf16.mxu1 %vm7119_vm0, %v7118_v1 }
  0xf6   : > { %6352 = vmatmul.mubr.bf16.gmra.mrb[104].mxu0 %v7368_v38 }
  0xf7   : > { %6355 = vmatprep.mubr.msk.bf16.mxu0 %vm7119_vm0, %v7118_v1 }
  0xf8   : > { %6396 = vmatmul.mubr.bf16.gmra.mrb[104].mxu1 %v7368_v38 }
  0xf9   : > { %v484_v37 = vpop.f32.mrb[0].mxu0  ;;  %6399 = vmatprep.mubr.msk.bf16.mxu1 %vm7119_vm0, %v7118_v1 }
  0xfa   : > { %v563_v39 = vrot.slane %v484_v37, 5  ;;  %v6069_v41 = vpop.f32.mrb[1].mxu0  ;;  %v724_v42 = vpop.f32.mrb[0].mxu1 }
  0xfb   : > { %v487_v43 = vpop.f32.mrb[2].mxu0  ;;  %v803_v44 = vrot.slane %v724_v42, 6  ;;  %v6113_v45 = vpop.f32.mrb[1].mxu1 }
  0xfc   : > { %v598_v46 = vsel %vm562_vm1, 0.0, %v563_v39  ;;  %v564_v47 = vrot.slane %v487_v43, 5  ;;  %v6070_v48 = vpop.f32.mrb[3].mxu0  ;;  %v727_v49 = vpop.f32.mrb[2].mxu1 }
  0xfd   : > { %v838_v50 = vsel %vm802_vm2, 0.0, %v803_v44  ;;  %v804_v51 = vrot.slane %v727_v49, 6  ;;  %v6114_v52 = vpop.f32.mrb[3].mxu1 }
  0xfe   : > { %v565_v53 = vsel %vm562_vm1, %v563_v39, %v564_v47  ;;  %6356 = vmatmul.mubr.bf16.gmra.mrb[108].mxu0 %v7379_v40  ;;  %v7710_v54 = vadd.f32 %v838_v50, %v598_v46 }
  0xff   : > { %v805_v55 = vsel %vm802_vm2, %v803_v44, %v804_v51  ;;  %6419 = vmatprep.mubr.msk.bf16.mxu0 %vm7119_vm0, %v7118_v1 }
 0x100   : > { %6400 = vmatmul.mubr.bf16.gmra.mrb[108].mxu1 %v7379_v40  ;;  %v7716_v57 = vadd.f32 %v805_v55, %v565_v53 }
 0x101   : > { %v492_v56 = vpop.f32.mrb[4].mxu0  ;;  %6463 = vmatprep.mubr.msk.bf16.mxu1 %vm7119_vm0, %v7118_v1 }
 0x102   : > { %v566_v58 = vrot.slane %v492_v56, 5  ;;  %v6073_v59 = vpop.f32.mrb[5].mxu0  ;;  %v732_v60 = vpop.f32.mrb[4].mxu1 }
 0x103   : > { %v495_v61 = vpop.f32.mrb[6].mxu0  ;;  %v806_v62 = vrot.slane %v732_v60, 6  ;;  %v6117_v63 = vpop.f32.mrb[5].mxu1 }
 0x104   : > { %v567_v0 = vsel %vm562_vm1, %v564_v47, %v566_v58  ;;  %v568_v2 = vrot.slane %v495_v61, 5  ;;  %v6074_v3 = vpop.f32.mrb[7].mxu0  ;;  %v735_v4 = vpop.f32.mrb[6].mxu1 }
 0x105   : > { %v807_v5 = vsel %vm802_vm2, %v804_v51, %v806_v62  ;;  %v808_v6 = vrot.slane %v735_v4, 6  ;;  %v6118_v7 = vpop.f32.mrb[7].mxu1 }
 0x106   : > { %v569_v8 = vsel %vm562_vm1, %v566_v58, %v568_v2  ;;  %6420 = vmatmul.mubr.bf16.vlgmr.msra.gmra.mrb[112].mxu0 %v7254_v16  ;;  %v7724_v9 = vadd.f32 %v807_v5, %v567_v0 }
 0x107   : > { %v809_v10 = vsel %vm802_vm2, %v806_v62, %v808_v6  ;;  %6423 = vmatprep.mubr.msk.bf16.mxu0 %vm7119_vm0, %v7118_v1 }
 0x108   : > { %v7729_v12 = vadd.f32 %v809_v10, %v569_v8 }
 0x109   : > { %v500_v11 = vpop.f32.mrb[8].mxu0 }
 0x10a   : > { %v570_v13 = vrot.slane %v500_v11, 5  ;;  %v6077_v14 = vpop.f32.mrb[9].mxu0  ;;  %v740_v15 = vpop.f32.mrb[8].mxu1 }
 0x10b   : > { %v503_v17 = vpop.f32.mrb[10].mxu0  ;;  %v810_v18 = vrot.slane %v740_v15, 6  ;;  %v6121_v19 = vpop.f32.mrb[9].mxu1 }
 0x10c   : > { %v571_v21 = vsel %vm562_vm1, %v568_v2, %v570_v13  ;;  %v572_v22 = vrot.slane %v503_v17, 5  ;;  %v6078_v16 = vpop.f32.mrb[11].mxu0  ;;  %v743_v23 = vpop.f32.mrb[10].mxu1 }
 0x10d   : > { %v811_v24 = vsel %vm802_vm2, %v808_v6, %v810_v18  ;;  %v812_v26 = vrot.slane %v743_v23, 6  ;;  %v6122_v27 = vpop.f32.mrb[11].mxu1 }
 0x10e   : > { %v573_v28 = vsel %vm562_vm1, %v570_v13, %v572_v22  ;;  %6424 = vmatmul.mubr.bf16.gmra.mrb[116].mxu0 %v7271_v20  ;;  %v7735_v29 = vadd.f32 %v811_v24, %v571_v21  ;;  %v549_v21 = vld [vmem:[#allocation2 + $0x60] sm:$0xf] }
 0x10f   : > { %v813_v31 = vsel %vm802_vm2, %v810_v18, %v812_v26  ;;  %6427 = vmatprep.mubr.msk.bf16.mxu0 %vm7119_vm0, %v7118_v1 }
 0x110   : > { %v7740_v33 = vadd.f32 %v813_v31, %v573_v28 }
 0x111   : > { %v508_v32 = vpop.f32.mrb[12].mxu0 }
 0x112   : > { %v574_v34 = vrot.slane %v508_v32, 5  ;;  %v6081_v36 = vpop.f32.mrb[13].mxu0  ;;  %v748_v37 = vpop.f32.mrb[12].mxu1 }
 0x113   : > { %v511_v39 = vpop.f32.mrb[14].mxu0  ;;  %v814_v41 = vrot.slane %v748_v37, 6  ;;  %v6125_v42 = vpop.f32.mrb[13].mxu1 }
 0x114   : > { %v575_v43 = vsel %vm562_vm1, %v572_v22, %v574_v34  ;;  %v576_v44 = vrot.slane %v511_v39, 5  ;;  %v6082_v20 = vpop.f32.mrb[15].mxu0  ;;  %v751_v45 = vpop.f32.mrb[14].mxu1 }
 0x115   : > { %v815_v46 = vsel %vm802_vm2, %v812_v26, %v814_v41  ;;  %v816_v47 = vrot.slane %v751_v45, 6  ;;  %v6126_v48 = vpop.f32.mrb[15].mxu1 }
 0x116   : > { %v577_v49 = vsel %vm562_vm1, %v574_v34, %v576_v44  ;;  %6428 = vmatmul.mubr.bf16.gmra.mrb[120].mxu0 %v7299_v25  ;;  %v7746_v50 = vadd.f32 %v815_v46, %v575_v43 }
 0x117   : > { %v817_v51 = vsel %vm802_vm2, %v814_v41, %v816_v47  ;;  %6431 = vmatprep.mubr.msk.bf16.mxu0 %vm7119_vm0, %v7118_v1 }
 0x118   : > { %v7751_v53 = vadd.f32 %v817_v51, %v577_v49 }
 0x119   : > { %v516_v52 = vpop.f32.mrb[16].mxu0 }
 0x11a   : > { %v578_v55 = vrot.slane %v516_v52, 5  ;;  %v6085_v56 = vpop.f32.mrb[17].mxu0  ;;  %v756_v58 = vpop.f32.mrb[16].mxu1 }
 0x11b   : > { %v519_v59 = vpop.f32.mrb[18].mxu0  ;;  %v818_v60 = vrot.slane %v756_v58, 6  ;;  %v6129_v61 = vpop.f32.mrb[17].mxu1 }
 0x11c   : > { %v579_v62 = vsel %vm562_vm1, %v576_v44, %v578_v55  ;;  %v580_v63 = vrot.slane %v519_v59, 5  ;;  %v6086_v25 = vpop.f32.mrb[19].mxu0  ;;  %v759_v0 = vpop.f32.mrb[18].mxu1 }
 0x11d   : > { %v819_v2 = vsel %vm802_vm2, %v816_v47, %v818_v60  ;;  %v820_v3 = vrot.slane %v759_v0, 6  ;;  %v6130_v4 = vpop.f32.mrb[19].mxu1 }
 0x11e   : > { %v581_v5 = vsel %vm562_vm1, %v578_v55, %v580_v63  ;;  %6432 = vmatmul.mubr.bf16.gmra.mrb[124].mxu0 %v7324_v30  ;;  %v7757_v6 = vadd.f32 %v819_v2, %v579_v62 }
 0x11f   : > { %v821_v7 = vsel %vm802_vm2, %v818_v60, %v820_v3  ;;  %6435 = vmatprep.mubr.msk.bf16.mxu0 %vm7119_vm0, %v7118_v1 }
 0x120   : > { %v7762_v10 = vadd.f32 %v821_v7, %v581_v5 }
 0x121   : > { %v524_v8 = vpop.f32.mrb[20].mxu0 }
 0x122   : > { %v582_v11 = vrot.slane %v524_v8, 5  ;;  %v6089_v13 = vpop.f32.mrb[21].mxu0  ;;  %v764_v14 = vpop.f32.mrb[20].mxu1 }
 0x123   : > { %v527_v15 = vpop.f32.mrb[22].mxu0  ;;  %v822_v17 = vrot.slane %v764_v14, 6  ;;  %v6133_v18 = vpop.f32.mrb[21].mxu1 }
 0x124   : > { %v583_v19 = vsel %vm562_vm1, %v580_v63, %v582_v11  ;;  %v584_v30 = vrot.slane %v527_v15, 5  ;;  %v6090_v22 = vpop.f32.mrb[23].mxu0  ;;  %v767_v16 = vpop.f32.mrb[22].mxu1 }
 0x125   : > { %v823_v23 = vsel %vm802_vm2, %v820_v3, %v822_v17  ;;  %v824_v24 = vrot.slane %v767_v16, 6  ;;  %v6134_v26 = vpop.f32.mrb[23].mxu1  ;;  %v7021_v16 = vld [vmem:[%s8915_s2] sm:$0xff]  }
 0x126   : > { %v585_v27 = vsel %vm562_vm1, %v582_v11, %v584_v30  ;;  %6436 = vmatmul.mubr.bf16.gmra.mrb[128].mxu0 %v7349_v35  ;;  %v7768_v31 = vadd.f32 %v823_v23, %v583_v19  ;;  %6448 = vmatpush3.bf16.msra.mxu1 %v7021_v16 }
 0x127   : > { %v611_v28 = vadd.f32 %v585_v27, %v549_v21  ;;  %v825_v32 = vsel %vm802_vm2, %v822_v17, %v824_v24  ;;  %6439 = vmatprep.mubr.msk.bf16.mxu0 %vm7119_vm0, %v7118_v1  ;;  %6449 = vmatprep.subr.bf16.mxu1 %v7118_v1 }
 0x129   : > { %624 = vst [vmem:[#allocation2 + $0x60] sm:$0xf] %v611_v28  ;;  %v532_v34 = vpop.f32.mrb[24].mxu0 }
 0x12a   : > { %v6093_v36 = vpop.f32.mrb[25].mxu0  ;;  %v772_v37 = vpop.f32.mrb[24].mxu1 }
 0x12b   : > { %v534_v39 = vpop.f32.mrb[26].mxu0  ;;  %v6137_v41 = vpop.f32.mrb[25].mxu1 }
 0x12c   : > { %v6094_v42 = vpop.f32.mrb[27].mxu0  ;;  %v774_v43 = vpop.f32.mrb[26].mxu1 }
 0x12d   : > { %v6138_v44 = vpop.f32.mrb[27].mxu1 }
 0x12e   : > { %6440 = vmatmul.mubr.bf16.gmra.mrb[132].mxu0 %v7368_v38 }
 0x12f   : > { %6443 = vmatprep.mubr.msk.bf16.mxu0 %vm7119_vm0, %v7118_v1 }
 0x130   : > { %v789_v35 = vld [vmem:[#allocation2 + $0x60] sm:$0xf] }
 0x131   : > { %v851_v20 = vadd.f32 %v825_v32, %v789_v35  ;;  %v964_v45 = vpop.f32.mrb[28].mxu0 }
 0x132   : > { %v1043_v46 = vrot.slane %v964_v45, 7  ;;  %v6157_v47 = vpop.f32.mrb[29].mxu0  ;;  %v7776_v48 = vpop.f32.mrb[28].mxu1 }
 0x133   : > { %864 = vst [vmem:[#allocation2 + $0x60] sm:$0xf] %v851_v20  ;;  %v967_v49 = vpop.f32.mrb[30].mxu0  ;;  %v1284_v51 = vrot.slane %v7776_v48, 7  ;;  %v6201_v52 = vpop.f32.mrb[29].mxu1  ;;  %v7032_v48 = vld [vmem:[%s8915_s2 + $0x30] sm:$0xff]  }
 0x134   : > { %v1078_v55 = vsel %vm1042_vm3, 0.0, %v1043_v46  ;;  %v1044_v56 = vrot.slane %v967_v49, 7  ;;  %v6158_v38 = vpop.f32.mrb[31].mxu0  ;;  %v1207_v58 = vpop.f32.mrb[30].mxu1 }
 0x135   : > { %v1080_v59 = vadd.f32 %v1078_v55, %v7710_v54  ;;  %v1285_v60 = vrot.slane %v1207_v58, 7  ;;  %v6202_v61 = vpop.f32.mrb[31].mxu1 }
 0x136   : > { %v1045_v62 = vsel %vm1042_vm3, %v1043_v46, %v1044_v56  ;;  %6444 = vmatmul.mubr.bf16.gmra.mrb[136].mxu0 %v7379_v40 }
 0x137   : > { %v1081_v63 = vadd.f32 %v1045_v62, %v7716_v57  ;;  %v1286_v25 = vsel %vm1042_vm3, %v1284_v51, %v1285_v60  ;;  %6507 = vmatprep.mubr.msk.bf16.mxu0 %vm7119_vm0, %v7118_v1 }
 0x138   : > { %v7789_v0 = vadd.f32 %v1286_v25, %v1080_v59 }
 0x139   : > { %v972_v2 = vpop.f32.mrb[32].mxu0 }
 0x13a   : > { %v1046_v3 = vrot.slane %v972_v2, 7  ;;  %v6161_v54 = vpop.f32.mrb[33].mxu0  ;;  %v1212_v4 = vpop.f32.mrb[32].mxu1 }
 0x13b   : > { %v975_v5 = vpop.f32.mrb[34].mxu0  ;;  %v1287_v7 = vrot.slane %v1212_v4, 7  ;;  %v6205_v8 = vpop.f32.mrb[33].mxu1 }
 0x13c   : > { %v1047_v40 = vsel %vm1042_vm3, %v1044_v56, %v1046_v3  ;;  %v1048_v11 = vrot.slane %v975_v5, 7  ;;  %v6162_v57 = vpop.f32.mrb[35].mxu0  ;;  %v1215_v13 = vpop.f32.mrb[34].mxu1  ;;  %v7023_v8 = vld [vmem:[%s8915_s2 + $0x10] sm:$0xff]  }
 0x13d   : > { %v1082_v14 = vadd.f32 %v1047_v40, %v7724_v9  ;;  %v1288_v15 = vsel %vm1042_vm3, %v1285_v60, %v1287_v7  ;;  %v1289_v17 = vrot.slane %v1215_v13, 7  ;;  %v6206_v18 = vpop.f32.mrb[35].mxu1 }
 0x13e   : > { %v1049_v19 = vsel %vm1042_vm3, %v1046_v3, %v1048_v11  ;;  %v7795_v21 = vadd.f32 %v1288_v15, %v1081_v63  ;;  %v7027_v18 = vld [vmem:[%s8915_s2 + $0x48] sm:$0xff]  }
 0x13f   : > { %v1083_v30 = vadd.f32 %v1049_v19, %v7729_v12  ;;  %v1290_v22 = vsel %vm1042_vm3, %v1287_v7, %v1289_v17 }
 0x140   : > { %v7802_v23 = vadd.f32 %v1290_v22, %v1082_v14 }
 0x141   : > { %v980_v24 = vpop.f32.mrb[36].mxu0 }
 0x142   : > { %v1050_v9 = vrot.slane %v980_v24, 7  ;;  %v6165_v26 = vpop.f32.mrb[37].mxu0  ;;  %v1220_v27 = vpop.f32.mrb[36].mxu1 }
 0x143   : > { %v983_v28 = vpop.f32.mrb[38].mxu0  ;;  %v1291_v32 = vrot.slane %v1220_v27, 7  ;;  %v6209_v34 = vpop.f32.mrb[37].mxu1 }
 0x144   : > { %v1051_v12 = vsel %vm1042_vm3, %v1048_v11, %v1050_v9  ;;  %v1052_v36 = vrot.slane %v983_v28, 7  ;;  %v6166_v37 = vpop.f32.mrb[39].mxu0  ;;  %v1223_v39 = vpop.f32.mrb[38].mxu1  ;;  %v7024_v28 = vld [vmem:[%s8915_s2 + $0x18] sm:$0xff]  }
 0x145   : > { %v1084_v41 = vadd.f32 %v1051_v12, %v7735_v29  ;;  %v1292_v42 = vsel %vm1042_vm3, %v1289_v17, %v1291_v32  ;;  %v1293_v43 = vrot.slane %v1223_v39, 7  ;;  %v6210_v44 = vpop.f32.mrb[39].mxu1  ;;  %v7022_v29 = vld [vmem:[%s8915_s2 + $0x8] sm:$0xff]  }
 0x146   : > { %v1053_v35 = vsel %vm1042_vm3, %v1050_v9, %v1052_v36  ;;  %v7809_v20 = vadd.f32 %v1292_v42, %v1083_v30  ;;  %6450 = vmatpush3.bf16.msra.mxu1 %v7022_v29 }
 0x147   : > { %v1085_v45 = vadd.f32 %v1053_v35, %v7740_v33  ;;  %v1294_v46 = vsel %vm1042_vm3, %v1291_v32, %v1293_v43  ;;  %6451 = vmatprep.subr.bf16.mxu1 %v7118_v1 }
 0x148   : > { %v7813_v47 = vadd.f32 %v1294_v46, %v1084_v41 }
 0x149   : > { %v988_v49 = vpop.f32.mrb[40].mxu0 }
 0x14a   : > { %v1054_v52 = vrot.slane %v988_v49, 7  ;;  %v6169_v55 = vpop.f32.mrb[41].mxu0  ;;  %v1228_v56 = vpop.f32.mrb[40].mxu1  ;;  %6452 = vmatpush3.bf16.msra.mxu1 %v7023_v8 }
 0x14b   : > { %v991_v38 = vpop.f32.mrb[42].mxu0  ;;  %v1295_v58 = vrot.slane %v1228_v56, 7  ;;  %v6213_v59 = vpop.f32.mrb[41].mxu1  ;;  %6453 = vmatprep.subr.bf16.mxu1 %v7118_v1  ;;  %v7026_v56 = vld [vmem:[%s8915_s2 + $0x20] sm:$0xff]  }
 0x14c   : > { %v1055_v60 = vsel %vm1042_vm3, %v1052_v36, %v1054_v52  ;;  %v1056_v61 = vrot.slane %v991_v38, 7  ;;  %v6170_v62 = vpop.f32.mrb[43].mxu0  ;;  %v1231_v33 = vpop.f32.mrb[42].mxu1 }
 0x14d   : > { %v1086_v63 = vadd.f32 %v1055_v60, %v7746_v50  ;;  %v1296_v25 = vsel %vm1042_vm3, %v1293_v43, %v1295_v58  ;;  %v1297_v2 = vrot.slane %v1231_v33, 7  ;;  %v6214_v3 = vpop.f32.mrb[43].mxu1  ;;  %v7025_v50 = vld [vmem:[%s8915_s2 + $0x40] sm:$0xff]  }
 0x14e   : > { %v1057_v54 = vsel %vm1042_vm3, %v1054_v52, %v1056_v61  ;;  %v7823_v4 = vadd.f32 %v1296_v25, %v1085_v45  ;;  %6492 = vmatpush3.bf16.msra.mxu0 %v7025_v50  ;;  %6454 = vmatpush3.bf16.msra.mxu1 %v7024_v28  ;;  %v7030_v45 = vld [vmem:[%s8915_s2 + $0x58] sm:$0xff]   ;;  %v1029_v60 = vld [vmem:[#allocation2 + $0x60] sm:$0xf] }
 0x14f   : > { %v1087_v5 = vadd.f32 %v1057_v54, %v7751_v53  ;;  %v1298_v7 = vsel %vm1042_vm3, %v1295_v58, %v1297_v2  ;;  %6493 = vmatprep.subr.bf16.mxu0 %v7118_v1  ;;  %6455 = vmatprep.subr.bf16.mxu1 %v7118_v1  ;;  %v7036_v28 = vld [vmem:[%s8915_s2 + $0x78] sm:$0xff]  }
 0x150   : > { %v7833_v40 = vadd.f32 %v1298_v7, %v1086_v63 }
 0x151   : > { %v996_v11 = vpop.f32.mrb[44].mxu0 }
 0x152   : > { %v1058_v57 = vrot.slane %v996_v11, 7  ;;  %v6173_v13 = vpop.f32.mrb[45].mxu0  ;;  %v1236_v14 = vpop.f32.mrb[44].mxu1  ;;  %6494 = vmatpush3.bf16.msra.mxu0 %v7027_v18  ;;  %6456 = vmatpush3.bf16.msra.mxu1 %v7026_v56  ;;  %v7029_v11 = vld [vmem:[%s8915_s2 + $0x28] sm:$0xff]  }
 0x153   : > { %v999_v53 = vpop.f32.mrb[46].mxu0  ;;  %v1299_v15 = vrot.slane %v1236_v14, 7  ;;  %v6217_v17 = vpop.f32.mrb[45].mxu1  ;;  %6495 = vmatprep.subr.bf16.mxu0 %v7118_v1  ;;  %6457 = vmatprep.subr.bf16.mxu1 %v7118_v1 }
 0x154   : > { %v1059_v19 = vsel %vm1042_vm3, %v1056_v61, %v1058_v57  ;;  %v1060_v30 = vrot.slane %v999_v53, 7  ;;  %v6174_v22 = vpop.f32.mrb[47].mxu0  ;;  %v1239_v16 = vpop.f32.mrb[46].mxu1 }
 0x155   : > { %v1088_v24 = vadd.f32 %v1059_v19, %v7757_v6  ;;  %v1300_v9 = vsel %vm1042_vm3, %v1297_v2, %v1299_v15  ;;  %v1301_v26 = vrot.slane %v1239_v16, 7  ;;  %v6218_v27 = vpop.f32.mrb[47].mxu1  ;;  %v7028_v6 = vld [vmem:[%s8915_s2 + $0x50] sm:$0xff]  }
 0x156   : > { %v1061_v32 = vsel %vm1042_vm3, %v1058_v57, %v1060_v30  ;;  %v7847_v34 = vadd.f32 %v1300_v9, %v1087_v5  ;;  %6496 = vmatpush3.bf16.msra.mxu0 %v7028_v6  ;;  %v1322_v5 = vsel %vm1042_vm3, 0.0, %v1284_v51  ;;  %v7033_v57 = vld [vmem:[%s8915_s2 + $0x68] sm:$0xff]   ;;  %6458 = vmatpush3.bf16.msra.mxu1 %v7029_v11  ;;  %v7034_v51 = vld [vmem:[%s8915_s2 + $0x70] sm:$0xff]   ;;  %v7035_v27 = vld [vmem:[%s8915_s2 + $0x38] sm:$0xff]  }
 0x157   : > { %v1089_v12 = vadd.f32 %v1061_v32, %v7762_v10  ;;  %v1302_v36 = vsel %vm1042_vm3, %v1299_v15, %v1301_v26  ;;  %6497 = vmatprep.subr.bf16.mxu0 %v7118_v1  ;;  %6459 = vmatprep.subr.bf16.mxu1 %v7118_v1 }
 0x158   : > { %v7855_v37 = vadd.f32 %v1302_v36, %v1088_v24 }
 0x159   : > { %v1004_v39 = vpop.f32.mrb[48].mxu0 }
 0x15a   : > { %v1062_v41 = vrot.slane %v1004_v39, 7  ;;  %v6177_v42 = vpop.f32.mrb[49].mxu0  ;;  %v1244_v43 = vpop.f32.mrb[48].mxu1  ;;  %6498 = vmatpush3.bf16.msra.mxu0 %v7030_v45  ;;  %6460 = vmatpush3.bf16.msra.mxu1 %v7032_v48 }
 0x15b   : > { %v1007_v44 = vpop.f32.mrb[50].mxu0  ;;  %v1303_v10 = vrot.slane %v1244_v43, 7  ;;  %v6221_v35 = vpop.f32.mrb[49].mxu1  ;;  %6499 = vmatprep.subr.bf16.mxu0 %v7118_v1  ;;  %6461 = vmatprep.subr.bf16.mxu1 %v7118_v1 }
 0x15c   : > { %v1063_v46 = vsel %vm1042_vm3, %v1060_v30, %v1062_v41  ;;  %v1064_v49 = vrot.slane %v1007_v44, 7  ;;  %v6178_v52 = vpop.f32.mrb[51].mxu0  ;;  %v1247_v55 = vpop.f32.mrb[50].mxu1 }
 0x15d   : > { %v1090_v29 = vadd.f32 %v1063_v46, %v7768_v31  ;;  %v1304_v38 = vsel %vm1042_vm3, %v1301_v26, %v1303_v10  ;;  %v1305_v58 = vrot.slane %v1247_v55, 7  ;;  %v6222_v59 = vpop.f32.mrb[51].mxu1  ;;  %v7031_v31 = vld [vmem:[%s8915_s2 + $0x60] sm:$0xff]  }
 0x15e   : > { %v1065_v61 = vsel %vm1042_vm3, %v1062_v41, %v1064_v49  ;;  %v7869_v62 = vadd.f32 %v1304_v38, %v1089_v12  ;;  %6500 = vmatpush3.bf16.msra.mxu0 %v7031_v31  ;;  %6462 = vmatpush3.bf16.msra.mxu1 %v7035_v27 }
 0x15f   : > { %v1091_v33 = vadd.f32 %v1065_v61, %v1029_v60  ;;  %v1306_v63 = vsel %vm1042_vm3, %v1303_v10, %v1305_v58  ;;  %6501 = vmatprep.subr.bf16.mxu0 %v7118_v1  ;;  %6535 = vmatprep.subr.bf16.mxu1 %v7118_v1 }
 0x160   : > { %v7877_v25 = vadd.f32 %v1306_v63, %v1090_v29 }
 0x161   : > { %1104 = vst [vmem:[#allocation2 + $0x60] sm:$0xf] %v1091_v33  ;;  %v1012_v2 = vpop.f32.mrb[52].mxu0 }
 0x162   : > { %v6181_v3 = vpop.f32.mrb[53].mxu0  ;;  %v1252_v54 = vpop.f32.mrb[52].mxu1  ;;  %6502 = vmatpush3.bf16.msra.mxu0 %v7033_v57 }
 0x163   : > { %v1014_v7 = vpop.f32.mrb[54].mxu0  ;;  %v1307_v8 = vrot.slane %v1252_v54, 7  ;;  %v6225_v50 = vpop.f32.mrb[53].mxu1  ;;  %6503 = vmatprep.subr.bf16.mxu0 %v7118_v1 }
 0x164   : > { %v6182_v13 = vpop.f32.mrb[55].mxu0  ;;  %v1255_v14 = vpop.f32.mrb[54].mxu1 }
 0x165   : > { %v1308_v53 = vsel %vm1042_vm3, %v1305_v58, %v1307_v8  ;;  %v6226_v15 = vpop.f32.mrb[55].mxu1 }
 0x166   : > { %6504 = vmatpush3.bf16.msra.mxu0 %v7034_v51 }
 0x167   : > { %6505 = vmatprep.subr.bf16.mxu0 %v7118_v1 }
 0x168   : > { %v1270_v17 = vld [vmem:[#allocation2 + $0x60] sm:$0xf] }
 0x169   : > { %v1335_v18 = vadd.f32 %v1308_v53, %v1270_v17  ;;  %v1448_v19 = vpop.f32.mrb[56].mxu0 }
 0x16a   : > { %v1515_v30 = vadd.f32 %v1448_v19, %v1322_v5  ;;  %v6245_v22 = vpop.f32.mrb[57].mxu0  ;;  %v1640_v16 = vpop.f32.mrb[56].mxu1  ;;  %6506 = vmatpush3.bf16.msra.mxu0 %v7036_v28 }
 0x16b   : > { %1348 = vst [vmem:[#allocation2 + $0x60] sm:$0xf] %v1335_v18  ;;  %v1451_v24 = vpop.f32.mrb[58].mxu0  ;;  %v1721_v9 = vrot.slane %v1640_v16, 1  ;;  %v6289_v26 = vpop.f32.mrb[57].mxu1  ;;  %6579 = vmatprep.subr.bf16.mxu0 %v7118_v1 }
 0x16c   : > { %v1516_v32 = vadd.f32 %v1451_v24, %v7789_v0  ;;  %v6246_v12 = vpop.f32.mrb[59].mxu0  ;;  %v1643_v36 = vpop.f32.mrb[58].mxu1 }
 0x16d   : > { %v1722_v6 = vrot.slane %v1643_v36, 1  ;;  %v6290_v39 = vpop.f32.mrb[59].mxu1 }
 0x16f   : > { %v1723_v41 = vsel %vm1720_vm4, %v1721_v9, %v1722_v6 }
 0x170   : > { %v7910_v42 = vadd.f32 %v1723_v41, %v1515_v30 }
 0x171   : > { %v1456_v43 = vpop.f32.mrb[60].mxu0 }
 0x172   : > { %v1517_v44 = vadd.f32 %v1456_v43, %v7795_v21  ;;  %v6249_v10 = vpop.f32.mrb[61].mxu0  ;;  %v1648_v0 = vpop.f32.mrb[60].mxu1 }
 0x173   : > { %v1724_v35 = vrot.slane %v1648_v0, 1  ;;  %v1459_v45 = vpop.f32.mrb[62].mxu0  ;;  %v6293_v46 = vpop.f32.mrb[61].mxu1 }
 0x174   : > { %v1518_v49 = vadd.f32 %v1459_v45, %v7802_v23  ;;  %v6250_v52 = vpop.f32.mrb[63].mxu0  ;;  %v1651_v55 = vpop.f32.mrb[62].mxu1 }
 0x175   : > { %v1725_v56 = vsel %vm1720_vm4, %v1722_v6, %v1724_v35  ;;  %v1726_v29 = vrot.slane %v1651_v55, 1  ;;  %v6294_v38 = vpop.f32.mrb[63].mxu1 }
 0x176   : > { %v7915_v58 = vadd.f32 %v1725_v56, %v1516_v32 }
 0x177   : > { %v1727_v59 = vsel %vm1720_vm4, %v1724_v35, %v1726_v29 }
 0x178   : > { %v7918_v60 = vadd.f32 %v1727_v59, %v1517_v44 }
 0x179   : > { %v1464_v21 = vpop.f32.mrb[64].mxu0 }
 0x17a   : > { %v1519_v61 = vadd.f32 %v1464_v21, %v7809_v20  ;;  %v6253_v33 = vpop.f32.mrb[65].mxu0  ;;  %v1656_v63 = vpop.f32.mrb[64].mxu1 }
 0x17b   : > { %v1728_v31 = vrot.slane %v1656_v63, 1  ;;  %v1467_v2 = vpop.f32.mrb[66].mxu0  ;;  %v6297_v23 = vpop.f32.mrb[65].mxu1 }
 0x17c   : > { %v1520_v3 = vadd.f32 %v1467_v2, %v7813_v47  ;;  %v6254_v54 = vpop.f32.mrb[67].mxu0  ;;  %v1659_v5 = vpop.f32.mrb[66].mxu1 }
 0x17d   : > { %v1729_v7 = vsel %vm1720_vm4, %v1726_v29, %v1728_v31  ;;  %v1730_v8 = vrot.slane %v1659_v5, 1  ;;  %v6298_v50 = vpop.f32.mrb[67].mxu1 }
 0x17e   : > { %v7923_v11 = vadd.f32 %v1729_v7, %v1518_v49 }
 0x17f   : > { %v1731_v57 = vsel %vm1720_vm4, %v1728_v31, %v1730_v8 }
 0x180   : > { %v7926_v13 = vadd.f32 %v1731_v57, %v1519_v61 }
 0x181   : > { %v1472_v20 = vpop.f32.mrb[68].mxu0 }
 0x182   : > { %v1521_v14 = vadd.f32 %v1472_v20, %v7823_v4  ;;  %v6257_v53 = vpop.f32.mrb[69].mxu0  ;;  %v1664_v15 = vpop.f32.mrb[68].mxu1 }
 0x183   : > { %v1732_v48 = vrot.slane %v1664_v15, 1  ;;  %v1475_v51 = vpop.f32.mrb[70].mxu0  ;;  %v6301_v47 = vpop.f32.mrb[69].mxu1 }
 0x184   : > { %v1522_v17 = vadd.f32 %v1475_v51, %v7833_v40  ;;  %v6258_v18 = vpop.f32.mrb[71].mxu0  ;;  %v1667_v19 = vpop.f32.mrb[70].mxu1 }
 0x185   : > { %v1733_v30 = vsel %vm1720_vm4, %v1730_v8, %v1732_v48  ;;  %v1734_v22 = vrot.slane %v1667_v19, 1  ;;  %v6302_v16 = vpop.f32.mrb[71].mxu1 }
 0x186   : > { %v7931_v24 = vadd.f32 %v1733_v30, %v1520_v3 }
 0x187   : > { %v1735_v9 = vsel %vm1720_vm4, %v1732_v48, %v1734_v22 }
 0x188   : > { %v7934_v26 = vadd.f32 %v1735_v9, %v1521_v14 }
 0x189   : > { %v1480_v4 = vpop.f32.mrb[72].mxu0 }
 0x18a   : > { %v1523_v27 = vadd.f32 %v1480_v4, %v7847_v34  ;;  %v6261_v28 = vpop.f32.mrb[73].mxu0  ;;  %v1672_v32 = vpop.f32.mrb[72].mxu1 }
 0x18b   : > { %v1736_v12 = vrot.slane %v1672_v32, 1  ;;  %v1483_v36 = vpop.f32.mrb[74].mxu0  ;;  %v6305_v40 = vpop.f32.mrb[73].mxu1 }
 0x18c   : > { %v1524_v6 = vadd.f32 %v1483_v36, %v7855_v37  ;;  %v6262_v39 = vpop.f32.mrb[75].mxu0  ;;  %v1675_v41 = vpop.f32.mrb[74].mxu1 }
 0x18d   : > { %v1737_v43 = vsel %vm1720_vm4, %v1734_v22, %v1736_v12  ;;  %v1738_v44 = vrot.slane %v1675_v41, 1  ;;  %v6306_v10 = vpop.f32.mrb[75].mxu1 }
 0x18e   : > { %v7939_v0 = vadd.f32 %v1737_v43, %v1522_v17 }
 0x18f   : > { %v1739_v35 = vsel %vm1720_vm4, %v1736_v12, %v1738_v44 }
 0x190   : > { %v7942_v45 = vadd.f32 %v1739_v35, %v1523_v27 }
 0x191   : > { %v1488_v34 = vpop.f32.mrb[76].mxu0 }
 0x192   : > { %v1525_v46 = vadd.f32 %v1488_v34, %v7869_v62  ;;  %v6265_v49 = vpop.f32.mrb[77].mxu0  ;;  %v1680_v52 = vpop.f32.mrb[76].mxu1  ;;  %v1514_v62 = vld [vmem:[#allocation2 + $0x60] sm:$0xf] }
 0x193   : > { %v1740_v55 = vrot.slane %v1680_v52, 1  ;;  %v1491_v56 = vpop.f32.mrb[78].mxu0  ;;  %v6309_v37 = vpop.f32.mrb[77].mxu1 }
 0x194   : > { %v1526_v29 = vadd.f32 %v1491_v56, %v7877_v25  ;;  %v6266_v38 = vpop.f32.mrb[79].mxu0  ;;  %v1683_v59 = vpop.f32.mrb[78].mxu1 }
 0x195   : > { %v1741_v21 = vsel %vm1720_vm4, %v1738_v44, %v1740_v55  ;;  %v1742_v61 = vrot.slane %v1683_v59, 1  ;;  %v6310_v33 = vpop.f32.mrb[79].mxu1 }
 0x196   : > { %v7947_v63 = vadd.f32 %v1741_v21, %v1524_v6 }
 0x197   : > { %v1743_v31 = vsel %vm1720_vm4, %v1740_v55, %v1742_v61 }
 0x198   : > { %v7950_v2 = vadd.f32 %v1743_v31, %v1525_v46 }
 0x199   : > { %v1496_v23 = vpop.f32.mrb[80].mxu0 }
 0x19a   : > { %v1527_v3 = vadd.f32 %v1514_v62, %v1496_v23  ;;  %v6269_v54 = vpop.f32.mrb[81].mxu0  ;;  %v1688_v5 = vpop.f32.mrb[80].mxu1 }
 0x19b   : > { %v1744_v7 = vrot.slane %v1688_v5, 1  ;;  %v1499_v8 = vpop.f32.mrb[82].mxu0  ;;  %v6313_v25 = vpop.f32.mrb[81].mxu1 }
 0x19c   : > { %1540 = vst [vmem:[#allocation2 + $0x60] sm:$0xf] %v1527_v3  ;;  %v6270_v50 = vpop.f32.mrb[83].mxu0  ;;  %v1691_v57 = vpop.f32.mrb[82].mxu1 }
 0x19d   : > { %v1745_v20 = vsel %vm1720_vm4, %v1742_v61, %v1744_v7  ;;  %v6314_v14 = vpop.f32.mrb[83].mxu1  ;;  %v1759_v15 = vsel %vm562_vm1, %v1744_v7, 0.0 }
 0x19e   : > { %v7953_v53 = vadd.f32 %v1745_v20, %v1526_v29 }
 0x1a1   : > { %v1885_v48 = vpop.f32.mrb[84].mxu0 }
 0x1a2   : > { %v6333_v51 = vpop.f32.mrb[85].mxu0 }
 0x1a3   : > { %v1706_v47 = vld [vmem:[#allocation2 + $0x60] sm:$0xf]  ;;  %v1887_v17 = vpop.f32.mrb[86].mxu0  ;;  %v2124_v18 = vpop.f32.mrb[84].mxu1 }
 0x1a4   : > { %v1772_v19 = vadd.f32 %v1759_v15, %v1706_v47  ;;  %v6334_v30 = vpop.f32.mrb[87].mxu0  ;;  %v6377_v22 = vpop.f32.mrb[85].mxu1  ;;  %v1963_v27 = vrot.slane %v1887_v17, 1 }
 0x1a5   : > { %v2126_v16 = vpop.f32.mrb[86].mxu1 }
 0x1a6   : > { %1785 = vst [vmem:[#allocation2 + $0x60] sm:$0xf] %v1772_v19  ;;  %v6378_v9 = vpop.f32.mrb[87].mxu1  ;;  %v2203_v12 = vrot.slane %v2126_v16, 2 }
 0x1a9   : > { %v1892_v4 = vpop.f32.mrb[88].mxu0 }
 0x1aa   : > { %v1964_v28 = vrot.slane %v1892_v4, 1  ;;  %v6337_v32 = vpop.f32.mrb[89].mxu0 }
 0x1ab   : > { %v1895_v36 = vpop.f32.mrb[90].mxu0  ;;  %v2131_v40 = vpop.f32.mrb[88].mxu1 }
 0x1ac   : > { %v1965_v6 = vsel %vm1720_vm4, %v1963_v27, %v1964_v28  ;;  %v1966_v39 = vrot.slane %v1895_v36, 1  ;;  %v6338_v41 = vpop.f32.mrb[91].mxu0  ;;  %v2204_v43 = vrot.slane %v2131_v40, 2  ;;  %v6381_v44 = vpop.f32.mrb[89].mxu1 }
 0x1ad   : > { %v1950_v10 = vld [vmem:[#allocation2 + $0x60] sm:$0xf]  ;;  %v1999_v35 = vadd.f32 %v1965_v6, %v7910_v42  ;;  %v2134_v34 = vpop.f32.mrb[90].mxu1 }
 0x1ae   : > { %2024 = vst [vmem:[#allocation2 + $0x60] sm:$0xf] %v1950_v10  ;;  %v1967_v46 = vsel %vm1720_vm4, %v1964_v28, %v1966_v39  ;;  %v2205_v49 = vsel %vm2202_vm5, %v2203_v12, %v2204_v43  ;;  %v2206_v52 = vrot.slane %v2134_v34, 2  ;;  %v6382_v55 = vpop.f32.mrb[91].mxu1 }
 0x1af   : > { %v2000_v56 = vadd.f32 %v1967_v46, %v7915_v58  ;;  %v7961_v37 = vadd.f32 %v2205_v49, %v1999_v35 }
 0x1b0   : > { %v2207_v29 = vsel %vm2202_vm5, %v2204_v43, %v2206_v52 }
 0x1b1   : > { %v1900_v38 = vpop.f32.mrb[92].mxu0  ;;  %v7964_v59 = vadd.f32 %v2207_v29, %v2000_v56 }
 0x1b2   : > { %v1968_v21 = vrot.slane %v1900_v38, 1  ;;  %v6341_v61 = vpop.f32.mrb[93].mxu0 }
 0x1b3   : > { %v1903_v42 = vpop.f32.mrb[94].mxu0  ;;  %v2139_v33 = vpop.f32.mrb[92].mxu1 }
 0x1b4   : > { %v1969_v31 = vsel %vm1720_vm4, %v1966_v39, %v1968_v21  ;;  %v1970_v62 = vrot.slane %v1903_v42, 1  ;;  %v6342_v23 = vpop.f32.mrb[95].mxu0  ;;  %v2208_v3 = vrot.slane %v2139_v33, 2  ;;  %v6385_v54 = vpop.f32.mrb[93].mxu1 }
 0x1b5   : > { %v2189_v5 = vld [vmem:[#allocation2 + $0x60] sm:$0xf]  ;;  %v2001_v58 = vadd.f32 %v1969_v31, %v7918_v60  ;;  %v2142_v7 = vpop.f32.mrb[94].mxu1 }
 0x1b6   : > { %2264 = vst [vmem:[#allocation2 + $0x60] sm:$0xf] %v2189_v5  ;;  %v1971_v8 = vsel %vm1720_vm4, %v1968_v21, %v1970_v62  ;;  %v2209_v25 = vsel %vm2202_vm5, %v2206_v52, %v2208_v3  ;;  %v2210_v50 = vrot.slane %v2142_v7, 2  ;;  %v6386_v57 = vpop.f32.mrb[95].mxu1 }
 0x1b7   : > { %v2002_v20 = vadd.f32 %v1971_v8, %v7923_v11  ;;  %v7971_v14 = vadd.f32 %v2209_v25, %v2001_v58 }
 0x1b8   : > { %v2211_v15 = vsel %vm2202_vm5, %v2208_v3, %v2210_v50 }
 0x1b9   : > { %v1908_v48 = vpop.f32.mrb[96].mxu0  ;;  %v7974_v51 = vadd.f32 %v2211_v15, %v2002_v20 }
 0x1ba   : > { %v1972_v47 = vrot.slane %v1908_v48, 1  ;;  %v6345_v17 = vpop.f32.mrb[97].mxu0 }
 0x1bb   : > { %v1911_v60 = vpop.f32.mrb[98].mxu0  ;;  %v2147_v18 = vpop.f32.mrb[96].mxu1 }
 0x1bc   : > { %v1973_v19 = vsel %vm1720_vm4, %v1970_v62, %v1972_v47  ;;  %v1974_v30 = vrot.slane %v1911_v60, 1  ;;  %v6346_v22 = vpop.f32.mrb[99].mxu0  ;;  %v2212_v16 = vrot.slane %v2147_v18, 2  ;;  %v6389_v9 = vpop.f32.mrb[97].mxu1 }
 0x1bd   : > { %v2003_v4 = vadd.f32 %v1973_v19, %v7926_v13  ;;  %v2150_v11 = vpop.f32.mrb[98].mxu1  ;;  %v2429_v27 = vld [vmem:[#allocation2 + $0x60] sm:$0xf] }
 0x1be   : > { %v1975_v28 = vsel %vm1720_vm4, %v1972_v47, %v1974_v30  ;;  %v2213_v32 = vsel %vm2202_vm5, %v2210_v50, %v2212_v16  ;;  %v2214_v12 = vrot.slane %v2150_v11, 2  ;;  %2504 = vst [vmem:[#allocation2 + $0x60] sm:$0xf] %v2429_v27  ;;  %v6390_v36 = vpop.f32.mrb[99].mxu1 }
 0x1bf   : > { %v2004_v40 = vadd.f32 %v1975_v28, %v7931_v24  ;;  %v7981_v6 = vadd.f32 %v2213_v32, %v2003_v4 }
 0x1c0   : > { %v2215_v39 = vsel %vm2202_vm5, %v2212_v16, %v2214_v12 }
 0x1c1   : > { %v1916_v41 = vpop.f32.mrb[100].mxu0  ;;  %v7984_v43 = vadd.f32 %v2215_v39, %v2004_v40 }
 0x1c2   : > { %v1976_v44 = vrot.slane %v1916_v41, 1  ;;  %v6349_v13 = vpop.f32.mrb[101].mxu0 }
 0x1c3   : > { %v1919_v10 = vpop.f32.mrb[102].mxu0  ;;  %v2155_v35 = vpop.f32.mrb[100].mxu1 }
 0x1c4   : > { %v1977_v34 = vsel %vm1720_vm4, %v1974_v30, %v1976_v44  ;;  %v1978_v46 = vrot.slane %v1919_v10, 1  ;;  %v6350_v49 = vpop.f32.mrb[103].mxu0  ;;  %v2216_v52 = vrot.slane %v2155_v35, 2  ;;  %v6393_v55 = vpop.f32.mrb[101].mxu1 }
 0x1c5   : > { %v2005_v56 = vadd.f32 %v1977_v34, %v7934_v26  ;;  %v7988_v24 = vld [vmem:[#allocation2 + $0x60] sm:$0xf]  ;;  %v2158_v29 = vpop.f32.mrb[102].mxu1 }
 0x1c6   : > { %v1979_v38 = vsel %vm1720_vm4, %v1976_v44, %v1978_v46  ;;  %2628 = vst [vmem:[#allocation2 + $0x60] sm:$0xf] %v7118_v1  ;;  %v2217_v21 = vsel %vm2202_vm5, %v2214_v12, %v2216_v52  ;;  %v2218_v61 = vrot.slane %v2158_v29, 2  ;;  %v6394_v42 = vpop.f32.mrb[103].mxu1  ;;  %v8019_v29 = vpop.permute.xlu0 %2533 }
 0x1c7   : > { %v2006_v33 = vadd.f32 %v1979_v38, %v7939_v0  ;;  %v7994_v31 = vadd.f32 %v2217_v21, %v2005_v56 }
 0x1c8   : > { %v2219_v62 = vsel %vm2202_vm5, %v2216_v52, %v2218_v61 }
 0x1c9   : > { %v1924_v23 = vpop.f32.mrb[104].mxu0  ;;  %v7997_v3 = vadd.f32 %v2219_v62, %v2006_v33 }
 0x1ca   : > { %v1980_v26 = vrot.slane %v1924_v23, 1  ;;  %v6353_v54 = vpop.f32.mrb[105].mxu0 }
 0x1cb   : > { %v1927_v5 = vpop.f32.mrb[106].mxu0  ;;  %v2163_v58 = vpop.f32.mrb[104].mxu1 }
 0x1cc   : > { %v1981_v7 = vsel %vm1720_vm4, %v1978_v46, %v1980_v26  ;;  %v1982_v8 = vrot.slane %v1927_v5, 1  ;;  %v6354_v25 = vpop.f32.mrb[107].mxu0  ;;  %v2220_v50 = vrot.slane %v2163_v58, 2  ;;  %v6397_v57 = vpop.f32.mrb[105].mxu1 }
 0x1cd   : > { %v2007_v20 = vadd.f32 %v1981_v7, %v7942_v45  ;;  %v2166_v0 = vpop.f32.mrb[106].mxu1  ;;  %v8025_v5 = vpop.permute.xlu0 %2538 }
 0x1ce   : > { %v1983_v15 = vsel %vm1720_vm4, %v1980_v26, %v1982_v8  ;;  %v2221_v48 = vsel %vm2202_vm5, %v2218_v61, %v2220_v50  ;;  %v2222_v47 = vrot.slane %v2166_v0, 2  ;;  %v6398_v17 = vpop.f32.mrb[107].mxu1  ;;  %v8029_v57 = vpop.permute.xlu1 %2543 }
 0x1cf   : > { %v2008_v60 = vadd.f32 %v1983_v15, %v7947_v63  ;;  %v8004_v18 = vadd.f32 %v2221_v48, %v2007_v20  ;;  %v7041_v17 = vld [vmem:[%s8915_s2 + $0xc0] sm:$0xff]  }
 0x1d0   : > { %v2223_v19 = vsel %vm2202_vm5, %v2220_v50, %v2222_v47 }
 0x1d1   : > { %v1932_v30 = vpop.f32.mrb[108].mxu0  ;;  %v8007_v22 = vadd.f32 %v2223_v19, %v2008_v60 }
 0x1d2   : > { %v1984_v16 = vrot.slane %v1932_v30, 1  ;;  %v6357_v9 = vpop.f32.mrb[109].mxu0 }
 0x1d3   : > { %v1935_v4 = vpop.f32.mrb[110].mxu0  ;;  %v2171_v45 = vpop.f32.mrb[108].mxu1 }
 0x1d4   : > { %v1985_v11 = vsel %vm1720_vm4, %v1982_v8, %v1984_v16  ;;  %v1998_v27 = vsel %vm562_vm1, %v1984_v16, 0.0  ;;  %v6358_v28 = vpop.f32.mrb[111].mxu0  ;;  %v2224_v32 = vrot.slane %v2171_v45, 2  ;;  %v6401_v12 = vpop.f32.mrb[109].mxu1  ;;  %v7043_v45 = vld [vmem:[%s8915_s2 + $0xc8] sm:$0xff]  }
 0x1d5   : > { %v2009_v63 = vadd.f32 %v1985_v11, %v7950_v2  ;;  %v2010_v36 = vadd.f32 %v1998_v27, %v7953_v53  ;;  %v2174_v40 = vpop.f32.mrb[110].mxu1 }
 0x1d6   : > { %v2225_v39 = vsel %vm2202_vm5, %v2222_v47, %v2224_v32  ;;  %v2238_v41 = vsel %vm802_vm2, %v2224_v32, 0.0  ;;  %v6402_v44 = vpop.f32.mrb[111].mxu1 }
 0x1d7   : > { %v8015_v13 = vadd.f32 %v2225_v39, %v2009_v63  ;;  %v8017_v10 = vadd.f32 %v2238_v41, %v2010_v36  ;;  %v7039_v39 = vld [vmem:[%s8915_s2 + $0x90] sm:$0xff]  }
 0x1d8   : > { %v7044_v44 = vld [vmem:[%s8915_s2 + $0xd0] sm:$0xff]  }
 0x1d9   : > { %v2364_v35 = vpop.f32.mrb[112].mxu0 }
 0x1da   : > { %v6421_v34 = vpop.f32.mrb[113].mxu0 }
 0x1db   : > { %v2366_v46 = vpop.f32.mrb[114].mxu0 }
 0x1dc   : > { %v6422_v49 = vpop.f32.mrb[115].mxu0  ;;  %v2443_v55 = vrot.slane %v2366_v46, 3 }
 0x1e1   : > { %v2371_v52 = vpop.f32.mrb[116].mxu0 }
 0x1e2   : > { %v2444_v2 = vrot.slane %v2371_v52, 3  ;;  %v6425_v56 = vpop.f32.mrb[117].mxu0  ;;  %v7040_v52 = vld [vmem:[%s8915_s2 + $0x98] sm:$0xff]  }
 0x1e3   : > { %v2374_v53 = vpop.f32.mrb[118].mxu0  ;;  %v7046_v56 = vld [vmem:[%s8915_s2 + $0xd8] sm:$0xff]  }
 0x1e4   : > { %v2445_v38 = vsel %vm2442_vm6, %v2443_v55, %v2444_v2  ;;  %v2446_v21 = vrot.slane %v2374_v53, 3  ;;  %v6426_v61 = vpop.f32.mrb[119].mxu0 }
 0x1e5   : > { %v2479_v42 = vadd.f32 %v2445_v38, %v7961_v37 }
 0x1e6   : > { %v2447_v33 = vsel %vm2442_vm6, %v2444_v2, %v2446_v21 }
 0x1e7   : > { %v2518_v62 = vmax.f32 %v2479_v42, 0.0  ;;  %v2480_v23 = vadd.f32 %v2447_v33, %v7964_v59  ;;  %v7037_v59 = vld [vmem:[%s8915_s2 + $0x80] sm:$0xff]  }
 0x1e9   : > { %v2519_v26 = vmax.f32 %v2480_v23, 0.0  ;;  %v2379_v54 = vpop.f32.mrb[120].mxu0  ;;  %v2596_v8 = vmul.f32 %v8019_v29, %v2518_v62 }
 0x1ea   : > { %v2448_v58 = vrot.slane %v2379_v54, 3  ;;  %v6429_v7 = vpop.f32.mrb[121].mxu0 }
 0x1eb   : > { %v2382_v25 = vpop.f32.mrb[122].mxu0  ;;  %v2597_v50 = vmul.f32 %v8025_v5, %v2519_v26  ;;  %v7042_v26 = vld [vmem:[%s8915_s2 + $0xa0] sm:$0xff]  }
 0x1ec   : > { %v2449_v37 = vsel %vm2442_vm6, %v2446_v21, %v2448_v58  ;;  %v2450_v20 = vrot.slane %v2382_v25, 3  ;;  %v6430_v0 = vpop.f32.mrb[123].mxu0 }
 0x1ed   : > { %v2481_v15 = vadd.f32 %v2449_v37, %v7971_v14  ;;  %v8036_v48 = vpack.c.bf16 %v2597_v50, %v2596_v8  ;;  %v7038_v14 = vld [vmem:[%s8915_s2 + $0x88] sm:$0xff]  }
 0x1ee   : > { %v2451_v47 = vsel %vm2442_vm6, %v2448_v58, %v2450_v20  ;;  %v7047_v58 = vld [vmem:[%s8915_s2 + $0xe0] sm:$0xff]   ;;  %v7045_v37 = vld [vmem:[%s8915_s2 + $0xa8] sm:$0xff]  }
 0x1ef   : > { %v2520_v60 = vmax.f32 %v2481_v15, 0.0  ;;  %v2482_v19 = vadd.f32 %v2451_v47, %v7974_v51  ;;  %6464 = vmatmul.mubr.bf16.vlgmr.msra.gmra.mrb[112].mxu1 %v8036_v48  ;;  %6508 = vmatmul.mubr.bf16.vlgmr.msra.gmra.mrb[140].mxu0 %v8036_v48  ;;  %v8053_v51 = vpop.permute.xlu1 %2548 }
 0x1f0   : > { %6536 = vmatpush3.bf16.msra.mxu1 %v7037_v59  ;;  %6467 = vmatprep.mubr.msk.bf16.mxu1 %vm7119_vm0, %v7118_v1  ;;  %v7049_v59 = vld [vmem:[%s8915_s2 + $0xe8] sm:$0xff]  }
 0x1f1   : > { %v2521_v30 = vmax.f32 %v2482_v19, 0.0  ;;  %v2387_v16 = vpop.f32.mrb[124].mxu0  ;;  %6511 = vmatprep.mubr.msk.bf16.mxu0 %vm7119_vm0, %v7118_v1  ;;  %6537 = vmatprep.subr.bf16.mxu1 %v7118_v1  ;;  %v2598_v27 = vmul.f32 %v8029_v57, %v2520_v60 }
 0x1f2   : > { %v2452_v9 = vrot.slane %v2387_v16, 3  ;;  %v6433_v4 = vpop.f32.mrb[125].mxu0  ;;  %6580 = vmatpush3.bf16.msra.mxu0 %v7041_v17 }
 0x1f3   : > { %v2390_v11 = vpop.f32.mrb[126].mxu0  ;;  %v2599_v28 = vmul.f32 %v8053_v51, %v2521_v30  ;;  %6581 = vmatprep.subr.bf16.mxu0 %v7118_v1 }
 0x1f4   : > { %v2453_v32 = vsel %vm2442_vm6, %v2450_v20, %v2452_v9  ;;  %v2454_v12 = vrot.slane %v2390_v11, 3  ;;  %v6434_v63 = vpop.f32.mrb[127].mxu0  ;;  %6538 = vmatpush3.bf16.msra.mxu1 %v7038_v14 }
 0x1f5   : > { %v2483_v36 = vadd.f32 %v2453_v32, %v7981_v6  ;;  %v8063_v40 = vpack.c.bf16 %v2599_v28, %v2598_v27  ;;  %6539 = vmatprep.subr.bf16.mxu1 %v7118_v1  ;;  %v8080_v6 = vpop.permute.xlu0 %2553 }
 0x1f6   : > { %v2455_v41 = vsel %vm2442_vm6, %v2452_v9, %v2454_v12  ;;  %6582 = vmatpush3.bf16.msra.mxu0 %v7043_v45  ;;  %v7048_v9 = vld [vmem:[%s8915_s2 + $0xb0] sm:$0xff]  }
 0x1f7   : > { %v2522_v35 = vmax.f32 %v2483_v36, 0.0  ;;  %v2484_v34 = vadd.f32 %v2455_v41, %v7984_v43  ;;  %6468 = vmatmul.mubr.bf16.gmra.mrb[116].mxu1 %v8063_v40  ;;  %6512 = vmatmul.mubr.bf16.gmra.mrb[144].mxu0 %v8063_v40  ;;  %v8086_v43 = vpop.permute.xlu1 %2558  ;;  %v7050_v45 = vld [vmem:[%s8915_s2 + $0xf0] sm:$0xff]  }
 0x1f8   : > { %6471 = vmatprep.mubr.msk.bf16.mxu1 %vm7119_vm0, %v7118_v1  ;;  %6515 = vmatprep.mubr.msk.bf16.mxu0 %vm7119_vm0, %v7118_v1 }
 0x1f9   : > { %v2523_v46 = vmax.f32 %v2484_v34, 0.0  ;;  %v2395_v49 = vpop.f32.mrb[128].mxu0  ;;  %6540 = vmatpush3.bf16.msra.mxu1 %v7039_v39  ;;  %6583 = vmatprep.subr.bf16.mxu0 %v7118_v1  ;;  %v2600_v38 = vmul.f32 %v8080_v6, %v2522_v35  ;;  %v7052_v39 = vld [vmem:[%s8915_s2 + $0xf8] sm:$0xff]  }
 0x1fa   : > { %v2456_v55 = vrot.slane %v2395_v49, 3  ;;  %v6437_v2 = vpop.f32.mrb[129].mxu0  ;;  %6541 = vmatprep.subr.bf16.mxu1 %v7118_v1  ;;  %6584 = vmatpush3.bf16.msra.mxu0 %v7044_v44 }
 0x1fb   : > { %v2398_v53 = vpop.f32.mrb[130].mxu0  ;;  %v2601_v21 = vmul.f32 %v8086_v43, %v2523_v46  ;;  %6585 = vmatprep.subr.bf16.mxu0 %v7118_v1 }
 0x1fc   : > { %v2457_v61 = vsel %vm2442_vm6, %v2454_v12, %v2456_v55  ;;  %v2458_v42 = vrot.slane %v2398_v53, 3  ;;  %v6438_v33 = vpop.f32.mrb[131].mxu0 }
 0x1fd   : > { %v2485_v62 = vadd.f32 %v2457_v61, %v7994_v31  ;;  %v8097_v23 = vpack.c.bf16 %v2601_v21, %v2600_v38  ;;  %6542 = vmatpush3.bf16.msra.mxu1 %v7040_v52  ;;  %v8114_v31 = vpop.permute.xlu0 %2563 }
 0x1fe   : > { %v2459_v54 = vsel %vm2442_vm6, %v2456_v55, %v2458_v42  ;;  %6543 = vmatprep.subr.bf16.mxu1 %v7118_v1  ;;  %6586 = vmatpush3.bf16.msra.mxu0 %v7046_v56 }
 0x1ff   : > { %v2524_v7 = vmax.f32 %v2485_v62, 0.0  ;;  %v2486_v8 = vadd.f32 %v2459_v54, %v7997_v3  ;;  %6472 = vmatmul.mubr.bf16.gmra.mrb[120].mxu1 %v8097_v23  ;;  %6516 = vmatmul.mubr.bf16.gmra.mrb[148].mxu0 %v8097_v23  ;;  %v8120_v3 = vpop.permute.xlu1 %2568  ;;  %v7057_v54 = vld [vmem:[%s8915_s2 + $0x140] sm:$0xff]  }
 0x200   : > { %6475 = vmatprep.mubr.msk.bf16.mxu1 %vm7119_vm0, %v7118_v1  ;;  %6519 = vmatprep.mubr.msk.bf16.mxu0 %vm7119_vm0, %v7118_v1 }
 0x201   : > { %v2525_v25 = vmax.f32 %v2486_v8, 0.0  ;;  %v2403_v50 = vpop.f32.mrb[132].mxu0  ;;  %6544 = vmatpush3.bf16.msra.mxu1 %v7042_v26  ;;  %6587 = vmatprep.subr.bf16.mxu0 %v7118_v1  ;;  %v2602_v47 = vmul.f32 %v8114_v31, %v2524_v7  ;;  %v7059_v7 = vld [vmem:[%s8915_s2 + $0x148] sm:$0xff]   ;;  %v7055_v8 = vld [vmem:[%s8915_s2 + $0x110] sm:$0xff]  }
 0x202   : > { %v2460_v20 = vrot.slane %v2403_v50, 3  ;;  %v6441_v0 = vpop.f32.mrb[133].mxu0  ;;  %6545 = vmatprep.subr.bf16.mxu1 %v7118_v1  ;;  %6588 = vmatpush3.bf16.msra.mxu0 %v7047_v58  ;;  %v7054_v58 = vld [vmem:[%s8915_s2 + $0x108] sm:$0xff]   ;;  %v7056_v50 = vld [vmem:[%s8915_s2 + $0x118] sm:$0xff]  }
 0x203   : > { %v2406_v15 = vpop.f32.mrb[134].mxu0  ;;  %v2603_v17 = vmul.f32 %v8120_v3, %v2525_v25  ;;  %6589 = vmatprep.subr.bf16.mxu0 %v7118_v1  ;;  %v8154_v12 = vpop.permute.xlu1 %2578  ;;  %v7060_v25 = vld [vmem:[%s8915_s2 + $0x150] sm:$0xff]   ;;  %v7063_v0 = vld [vmem:[%s8915_s2 + $0x160] sm:$0xff]  }
 0x204   : > { %v2461_v60 = vsel %vm2442_vm6, %v2458_v42, %v2460_v20  ;;  %v2462_v19 = vrot.slane %v2406_v15, 3  ;;  %v6442_v14 = vpop.f32.mrb[135].mxu0  ;;  %v2530_v42 = vmax.f32 %v7988_v24, 0.0  ;;  %v7053_v24 = vld [vmem:[%s8915_s2 + $0x100] sm:$0xff]   ;;  %v7065_v15 = vld [vmem:[%s8915_s2 + $0x168] sm:$0xff]  }
 0x205   : > { %v2487_v30 = vadd.f32 %v2461_v60, %v8004_v18  ;;  %v8131_v16 = vpack.c.bf16 %v2603_v17, %v2602_v47  ;;  %6546 = vmatpush3.bf16.msra.mxu1 %v7045_v37  ;;  %v8148_v18 = vpop.permute.xlu0 %2573  ;;  %v7062_v37 = vld [vmem:[%s8915_s2 + $0x158] sm:$0xff]   ;;  %v7064_v47 = vld [vmem:[%s8915_s2 + $0x130] sm:$0xff]   ;;  %v7069_v14 = vld [vmem:[%s8915_s2 + $0x180] sm:$0xff]  }
 0x206   : > { %v2463_v4 = vsel %vm2442_vm6, %v2460_v20, %v2462_v19  ;;  %6547 = vmatprep.subr.bf16.mxu1 %v7118_v1  ;;  %6590 = vmatpush3.bf16.msra.mxu0 %v7049_v59  ;;  %v7058_v20 = vld [vmem:[%s8915_s2 + $0x120] sm:$0xff]   ;;  %v7061_v59 = vld [vmem:[%s8915_s2 + $0x128] sm:$0xff]   ;;  %v7066_v17 = vld [vmem:[%s8915_s2 + $0x170] sm:$0xff]  }
 0x207   : > { %v2526_v11 = vmax.f32 %v2487_v30, 0.0  ;;  %v2488_v27 = vadd.f32 %v2463_v4, %v8007_v22  ;;  %6476 = vmatmul.mubr.bf16.gmra.mrb[124].mxu1 %v8131_v16  ;;  %6520 = vmatmul.mubr.bf16.gmra.mrb[152].mxu0 %v8131_v16  ;;  %v7051_v22 = vld [vmem:[%s8915_s2 + $0xb8] sm:$0xff]   ;;  %v8174_v21 = vpop.permute.xlu1 %2588  ;;  %v7073_v30 = vld [vmem:[%s8915_s2 + $0x1c0] sm:$0xff]   ;;  %v7075_v4 = vld [vmem:[%s8915_s2 + $0x1c8] sm:$0xff]  }
 0x208   : > { %6479 = vmatprep.mubr.msk.bf16.mxu1 %vm7119_vm0, %v7118_v1  ;;  %6523 = vmatprep.mubr.msk.bf16.mxu0 %vm7119_vm0, %v7118_v1  ;;  %v7067_v60 = vld [vmem:[%s8915_s2 + $0x138] sm:$0xff]  }
 0x209   : > { %v2527_v28 = vmax.f32 %v2488_v27, 0.0  ;;  %v2411_v32 = vpop.f32.mrb[136].mxu0  ;;  %6548 = vmatpush3.bf16.msra.mxu1 %v7048_v9  ;;  %6591 = vmatprep.subr.bf16.mxu0 %v7118_v1  ;;  %v2604_v44 = vmul.f32 %v8148_v18, %v2526_v11  ;;  %v8172_v38 = vpop.permute.xlu0 %2583  ;;  %v7070_v9 = vld [vmem:[%s8915_s2 + $0x188] sm:$0xff]   ;;  %v7076_v11 = vld [vmem:[%s8915_s2 + $0x1d0] sm:$0xff]   ;;  %v7072_v27 = vld [vmem:[%s8915_s2 + $0x198] sm:$0xff]  }
 0x20a   : > { %v2464_v63 = vrot.slane %v2411_v32, 3  ;;  %v6445_v36 = vpop.f32.mrb[137].mxu0  ;;  %6549 = vmatprep.subr.bf16.mxu1 %v7118_v1  ;;  %6592 = vmatpush3.bf16.msra.mxu0 %v7050_v45  ;;  %v7071_v45 = vld [vmem:[%s8915_s2 + $0x190] sm:$0xff]   ;;  %v7074_v32 = vld [vmem:[%s8915_s2 + $0x1a0] sm:$0xff]  }
 0x20b   : > { %v2414_v41 = vpop.f32.mrb[138].mxu0  ;;  %v2605_v35 = vmul.f32 %v8154_v12, %v2527_v28  ;;  %6593 = vmatprep.subr.bf16.mxu0 %v7118_v1  ;;  %v7078_v28 = vld [vmem:[%s8915_s2 + $0x1d8] sm:$0xff]   ;;  %v7081_v36 = vld [vmem:[%s8915_s2 + $0x1e8] sm:$0xff]  }
 0x20c   : > { %v2465_v34 = vsel %vm2442_vm6, %v2462_v19, %v2464_v63  ;;  %v2478_v46 = vsel %vm1042_vm3, %v2464_v63, 0.0  ;;  %v6446_v49 = vpop.f32.mrb[139].mxu0  ;;  %v7068_v19 = vld [vmem:[%s8915_s2 + $0x178] sm:$0xff]   ;;  %v7077_v63 = vld [vmem:[%s8915_s2 + $0x1a8] sm:$0xff]   ;;  %v7082_v41 = vld [vmem:[%s8915_s2 + $0x1f0] sm:$0xff]  }
 0x20d   : > { %v2489_v52 = vadd.f32 %v2465_v34, %v8015_v13  ;;  %v2490_v55 = vadd.f32 %v2478_v46, %v8017_v10  ;;  %v8167_v2 = vpack.c.bf16 %v2605_v35, %v2604_v44  ;;  %6550 = vmatpush3.bf16.msra.mxu1 %v7051_v22  ;;  %v8186_v33 = vpop.permute.xlu0 %2593  ;;  %v7079_v22 = vld [vmem:[%s8915_s2 + $0x1e0] sm:$0xff]   ;;  %v7083_v44 = vld [vmem:[%s8915_s2 + $0x1b8] sm:$0xff]   ;;  %v7086_v46 = vld [vmem:[%s8915_s2 + $0x208] sm:$0xff]  }
 0x20e   : > { %6594 = vmatpush3.bf16.msra.mxu0 %v7052_v39  ;;  %6623 = vmatprep.subr.bf16.mxu1 %v7118_v1  ;;  %v2608_v62 = vmul.f32 %v8186_v33, %v2530_v42  ;;  %v7080_v39 = vld [vmem:[%s8915_s2 + $0x1b0] sm:$0xff]   ;;  %v7084_v35 = vld [vmem:[%s8915_s2 + $0x1f8] sm:$0xff]   ;;  %v7085_v34 = vld [vmem:[%s8915_s2 + $0x200] sm:$0xff]  }
 0x20f   : > { %v2528_v56 = vmax.f32 %v2489_v52, 0.0  ;;  %v2529_v53 = vmax.f32 %v2490_v55, 0.0  ;;  %6480 = vmatmul.mubr.bf16.gmra.mrb[128].mxu1 %v8167_v2  ;;  %6524 = vmatmul.mubr.bf16.gmra.mrb[156].mxu0 %v8167_v2  ;;  %v7087_v49 = vld [vmem:[%s8915_s2 + $0x210] sm:$0xff]   ;;  %v7088_v52 = vld [vmem:[%s8915_s2 + $0x218] sm:$0xff]   ;;  %v7089_v55 = vld [vmem:[%s8915_s2 + $0x220] sm:$0xff]  }
 0x210   : > { %6483 = vmatprep.mubr.msk.bf16.mxu1 %vm7119_vm0, %v7118_v1  ;;  %6527 = vmatprep.mubr.msk.bf16.mxu0 %vm7119_vm0, %v7118_v1  ;;  %v8195_v26 = vpack.c.bf16 %v2608_v62, %v2608_v62 }
 0x211   : > { %v2606_v13 = vmul.f32 %v8172_v38, %v2528_v56  ;;  %v2607_v10 = vmul.f32 %v8174_v21, %v2529_v53  ;;  %6667 = vmatprep.subr.bf16.mxu0 %v7118_v1  ;;  %v7090_v56 = vld [vmem:[%s8915_s2 + $0x228] sm:$0xff]   ;;  %v7091_v53 = vld [vmem:[%s8915_s2 + $0x230] sm:$0xff]  }
 0x213   : > { %v8183_v61 = vpack.c.bf16 %v2607_v10, %v2606_v13  ;;  %v7092_v13 = vld [vmem:[%s8915_s2 + $0x238] sm:$0xff]  }
 0x217   : > { %6484 = vmatmul.mubr.bf16.gmra.mrb[132].mxu1 %v8183_v61  ;;  %6528 = vmatmul.mubr.bf16.gmra.mrb[160].mxu0 %v8183_v61 }
 0x218   : > { %6487 = vmatprep.mubr.msk.bf16.mxu1 %vm7119_vm0, %v7118_v1  ;;  %6531 = vmatprep.mubr.msk.bf16.mxu0 %vm7119_vm0, %v7118_v1 }
 0x21f   : > { %6488 = vmatmul.mubr.bf16.gmra.mrb[136].mxu1 %v8195_v26  ;;  %6532 = vmatmul.mubr.bf16.gmra.mrb[164].mxu0 %v8195_v26 }
 0x220   : > { %6551 = vmatprep.mubr.msk.bf16.mxu1 %vm7119_vm0, %v7118_v1  ;;  %6595 = vmatprep.mubr.msk.bf16.mxu0 %vm7119_vm0, %v7118_v1 }
 0x227   : > { %6552 = vmatmul.mubr.bf16.vlgmr.msra.gmra.mrb[140].mxu1 %v8036_v48  ;;  %6596 = vmatmul.mubr.bf16.vlgmr.msra.gmra.mrb[168].mxu0 %v8036_v48 }
 0x228   : > { %6624 = vmatpush3.bf16.msra.mxu1 %v7053_v24  ;;  %6555 = vmatprep.mubr.msk.bf16.mxu1 %vm7119_vm0, %v7118_v1 }
 0x229   : > { %6599 = vmatprep.mubr.msk.bf16.mxu0 %vm7119_vm0, %v7118_v1  ;;  %6625 = vmatprep.subr.bf16.mxu1 %v7118_v1 }
 0x22a   : > { %6668 = vmatpush3.bf16.msra.mxu0 %v7057_v54 }
 0x22b   : > { %6669 = vmatprep.subr.bf16.mxu0 %v7118_v1 }
 0x22c   : > { %6626 = vmatpush3.bf16.msra.mxu1 %v7054_v58 }
 0x22d   : > { %6627 = vmatprep.subr.bf16.mxu1 %v7118_v1 }
 0x22e   : > { %6670 = vmatpush3.bf16.msra.mxu0 %v7059_v7 }
 0x22f   : > { %6556 = vmatmul.mubr.bf16.gmra.mrb[144].mxu1 %v8063_v40  ;;  %6600 = vmatmul.mubr.bf16.gmra.mrb[172].mxu0 %v8063_v40 }
 0x230   : > { %6559 = vmatprep.mubr.msk.bf16.mxu1 %vm7119_vm0, %v7118_v1  ;;  %6603 = vmatprep.mubr.msk.bf16.mxu0 %vm7119_vm0, %v7118_v1 }
 0x231   : > { %6628 = vmatpush3.bf16.msra.mxu1 %v7055_v8  ;;  %6671 = vmatprep.subr.bf16.mxu0 %v7118_v1 }
 0x232   : > { %6629 = vmatprep.subr.bf16.mxu1 %v7118_v1  ;;  %6672 = vmatpush3.bf16.msra.mxu0 %v7060_v25 }
 0x233   : > { %6673 = vmatprep.subr.bf16.mxu0 %v7118_v1 }
 0x235   : > { %6630 = vmatpush3.bf16.msra.mxu1 %v7056_v50 }
 0x236   : > { %6631 = vmatprep.subr.bf16.mxu1 %v7118_v1  ;;  %6674 = vmatpush3.bf16.msra.mxu0 %v7062_v37 }
 0x237   : > { %6560 = vmatmul.mubr.bf16.gmra.mrb[148].mxu1 %v8097_v23  ;;  %6604 = vmatmul.mubr.bf16.gmra.mrb[176].mxu0 %v8097_v23 }
 0x238   : > { %6563 = vmatprep.mubr.msk.bf16.mxu1 %vm7119_vm0, %v7118_v1  ;;  %6607 = vmatprep.mubr.msk.bf16.mxu0 %vm7119_vm0, %v7118_v1 }
 0x239   : > { %6632 = vmatpush3.bf16.msra.mxu1 %v7058_v20  ;;  %6675 = vmatprep.subr.bf16.mxu0 %v7118_v1 }
 0x23a   : > { %6633 = vmatprep.subr.bf16.mxu1 %v7118_v1  ;;  %6676 = vmatpush3.bf16.msra.mxu0 %v7063_v0 }
 0x23b   : > { %6677 = vmatprep.subr.bf16.mxu0 %v7118_v1 }
 0x23d   : > { %6634 = vmatpush3.bf16.msra.mxu1 %v7061_v59 }
 0x23e   : > { %6635 = vmatprep.subr.bf16.mxu1 %v7118_v1  ;;  %6678 = vmatpush3.bf16.msra.mxu0 %v7065_v15 }
 0x23f   : > { %6564 = vmatmul.mubr.bf16.gmra.mrb[152].mxu1 %v8131_v16  ;;  %6608 = vmatmul.mubr.bf16.gmra.mrb[180].mxu0 %v8131_v16 }
 0x240   : > { %6567 = vmatprep.mubr.msk.bf16.mxu1 %vm7119_vm0, %v7118_v1  ;;  %6611 = vmatprep.mubr.msk.bf16.mxu0 %vm7119_vm0, %v7118_v1 }
 0x241   : > { %6636 = vmatpush3.bf16.msra.mxu1 %v7064_v47  ;;  %6679 = vmatprep.subr.bf16.mxu0 %v7118_v1 }
 0x242   : > { %6637 = vmatprep.subr.bf16.mxu1 %v7118_v1  ;;  %6680 = vmatpush3.bf16.msra.mxu0 %v7066_v17 }
 0x243   : > { %6681 = vmatprep.subr.bf16.mxu0 %v7118_v1 }
 0x245   : > { %6638 = vmatpush3.bf16.msra.mxu1 %v7067_v60 }
 0x246   : > { %6682 = vmatpush3.bf16.msra.mxu0 %v7068_v19  ;;  %6711 = vmatprep.subr.bf16.mxu1 %v7118_v1 }
 0x247   : > { %6568 = vmatmul.mubr.bf16.gmra.mrb[156].mxu1 %v8167_v2  ;;  %6612 = vmatmul.mubr.bf16.gmra.mrb[184].mxu0 %v8167_v2 }
 0x248   : > { %6571 = vmatprep.mubr.msk.bf16.mxu1 %vm7119_vm0, %v7118_v1  ;;  %6615 = vmatprep.mubr.msk.bf16.mxu0 %vm7119_vm0, %v7118_v1 }
 0x249   : > { %6755 = vmatprep.subr.bf16.mxu0 %v7118_v1 }
 0x24f   : > { %6572 = vmatmul.mubr.bf16.gmra.mrb[160].mxu1 %v8183_v61  ;;  %6616 = vmatmul.mubr.bf16.gmra.mrb[188].mxu0 %v8183_v61 }
 0x250   : > { %6575 = vmatprep.mubr.msk.bf16.mxu1 %vm7119_vm0, %v7118_v1  ;;  %6619 = vmatprep.mubr.msk.bf16.mxu0 %vm7119_vm0, %v7118_v1 }
 0x257   : > { %6576 = vmatmul.mubr.bf16.gmra.mrb[164].mxu1 %v8195_v26  ;;  %6620 = vmatmul.mubr.bf16.gmra.mrb[192].mxu0 %v8195_v26 }
 0x258   : > { %6639 = vmatprep.mubr.msk.bf16.mxu1 %vm7119_vm0, %v7118_v1  ;;  %6683 = vmatprep.mubr.msk.bf16.mxu0 %vm7119_vm0, %v7118_v1 }
 0x25f   : > { %6640 = vmatmul.mubr.bf16.vlgmr.msra.gmra.mrb[168].mxu1 %v8036_v48  ;;  %6684 = vmatmul.mubr.bf16.vlgmr.msra.gmra.mrb[196].mxu0 %v8036_v48 }
 0x260   : > { %6712 = vmatpush3.bf16.msra.mxu1 %v7069_v14  ;;  %6643 = vmatprep.mubr.msk.bf16.mxu1 %vm7119_vm0, %v7118_v1 }
 0x261   : > { %6687 = vmatprep.mubr.msk.bf16.mxu0 %vm7119_vm0, %v7118_v1  ;;  %6713 = vmatprep.subr.bf16.mxu1 %v7118_v1 }
 0x262   : > { %6756 = vmatpush3.bf16.msra.mxu0 %v7073_v30 }
 0x263   : > { %6757 = vmatprep.subr.bf16.mxu0 %v7118_v1 }
 0x264   : > { %6714 = vmatpush3.bf16.msra.mxu1 %v7070_v9 }
 0x265   : > { %6715 = vmatprep.subr.bf16.mxu1 %v7118_v1 }
 0x266   : > { %6758 = vmatpush3.bf16.msra.mxu0 %v7075_v4 }
 0x267   : > { %6644 = vmatmul.mubr.bf16.gmra.mrb[172].mxu1 %v8063_v40  ;;  %6688 = vmatmul.mubr.bf16.gmra.mrb[200].mxu0 %v8063_v40 }
 0x268   : > { %6647 = vmatprep.mubr.msk.bf16.mxu1 %vm7119_vm0, %v7118_v1  ;;  %6691 = vmatprep.mubr.msk.bf16.mxu0 %vm7119_vm0, %v7118_v1 }
 0x269   : > { %6716 = vmatpush3.bf16.msra.mxu1 %v7071_v45  ;;  %6759 = vmatprep.subr.bf16.mxu0 %v7118_v1 }
 0x26a   : > { %6717 = vmatprep.subr.bf16.mxu1 %v7118_v1  ;;  %6760 = vmatpush3.bf16.msra.mxu0 %v7076_v11 }
 0x26b   : > { %6761 = vmatprep.subr.bf16.mxu0 %v7118_v1 }
 0x26d   : > { %6718 = vmatpush3.bf16.msra.mxu1 %v7072_v27 }
 0x26e   : > { %6719 = vmatprep.subr.bf16.mxu1 %v7118_v1  ;;  %6762 = vmatpush3.bf16.msra.mxu0 %v7078_v28 }
 0x26f   : > { %6648 = vmatmul.mubr.bf16.gmra.mrb[176].mxu1 %v8097_v23  ;;  %6692 = vmatmul.mubr.bf16.gmra.mrb[204].mxu0 %v8097_v23 }
 0x270   : > { %6651 = vmatprep.mubr.msk.bf16.mxu1 %vm7119_vm0, %v7118_v1  ;;  %6695 = vmatprep.mubr.msk.bf16.mxu0 %vm7119_vm0, %v7118_v1 }
 0x271   : > { %6720 = vmatpush3.bf16.msra.mxu1 %v7074_v32  ;;  %6763 = vmatprep.subr.bf16.mxu0 %v7118_v1 }
 0x272   : > { %6721 = vmatprep.subr.bf16.mxu1 %v7118_v1  ;;  %6764 = vmatpush3.bf16.msra.mxu0 %v7079_v22 }
 0x273   : > { %6765 = vmatprep.subr.bf16.mxu0 %v7118_v1 }
 0x275   : > { %6722 = vmatpush3.bf16.msra.mxu1 %v7077_v63 }
 0x276   : > { %6723 = vmatprep.subr.bf16.mxu1 %v7118_v1  ;;  %6766 = vmatpush3.bf16.msra.mxu0 %v7081_v36 }
 0x277   : > { %6652 = vmatmul.mubr.bf16.gmra.mrb[180].mxu1 %v8131_v16  ;;  %6696 = vmatmul.mubr.bf16.gmra.mrb[208].mxu0 %v8131_v16 }
 0x278   : > { %6655 = vmatprep.mubr.msk.bf16.mxu1 %vm7119_vm0, %v7118_v1  ;;  %6699 = vmatprep.mubr.msk.bf16.mxu0 %vm7119_vm0, %v7118_v1 }
 0x279   : > { %6724 = vmatpush3.bf16.msra.mxu1 %v7080_v39  ;;  %6767 = vmatprep.subr.bf16.mxu0 %v7118_v1 }
 0x27a   : > { %6725 = vmatprep.subr.bf16.mxu1 %v7118_v1  ;;  %6768 = vmatpush3.bf16.msra.mxu0 %v7082_v41 }
 0x27b   : > { %6769 = vmatprep.subr.bf16.mxu0 %v7118_v1 }
 0x27d   : > { %6726 = vmatpush3.bf16.msra.mxu1 %v7083_v44 }
 0x27e   : > { %6770 = vmatpush3.bf16.msra.mxu0 %v7084_v35  ;;  %6799 = vmatprep.subr.bf16.mxu1 %v7118_v1 }
 0x27f   : > { %6656 = vmatmul.mubr.bf16.gmra.mrb[184].mxu1 %v8167_v2  ;;  %6700 = vmatmul.mubr.bf16.gmra.mrb[212].mxu0 %v8167_v2 }
 0x280   : > { %6659 = vmatprep.mubr.msk.bf16.mxu1 %vm7119_vm0, %v7118_v1  ;;  %6703 = vmatprep.mubr.msk.bf16.mxu0 %vm7119_vm0, %v7118_v1 }
 0x287   : > { %6660 = vmatmul.mubr.bf16.gmra.mrb[188].mxu1 %v8183_v61  ;;  %6704 = vmatmul.mubr.bf16.gmra.mrb[216].mxu0 %v8183_v61 }
 0x288   : > { %6663 = vmatprep.mubr.msk.bf16.mxu1 %vm7119_vm0, %v7118_v1  ;;  %6707 = vmatprep.mubr.msk.bf16.mxu0 %vm7119_vm0, %v7118_v1 }
 0x28f   : > { %6664 = vmatmul.mubr.bf16.gmra.mrb[192].mxu1 %v8195_v26  ;;  %6708 = vmatmul.mubr.bf16.gmra.mrb[220].mxu0 %v8195_v26 }
 0x290   : > { %6727 = vmatprep.mubr.msk.bf16.mxu1 %vm7119_vm0, %v7118_v1  ;;  %6771 = vmatprep.mubr.msk.bf16.mxu0 %vm7119_vm0, %v7118_v1 }
 0x297   : > { %6728 = vmatmul.mubr.bf16.vlgmr.msra.gmra.mrb[196].mxu1 %v8036_v48  ;;  %6772 = vmatmul.mubr.bf16.vlgmr.msra.gmra.mrb[224].mxu0 %v8036_v48 }
 0x298   : > { %6800 = vmatpush3.bf16.msra.mxu1 %v7085_v34  ;;  %6731 = vmatprep.mubr.msk.bf16.mxu1 %vm7119_vm0, %v7118_v1 }
 0x299   : > { %6775 = vmatprep.mubr.msk.bf16.mxu0 %vm7119_vm0, %v7118_v1  ;;  %6801 = vmatprep.subr.bf16.mxu1 %v7118_v1 }
 0x29c   : > { %6802 = vmatpush3.bf16.msra.mxu1 %v7086_v46 }
 0x29d   : > { %6803 = vmatprep.subr.bf16.mxu1 %v7118_v1 }
 0x29f   : > { %6732 = vmatmul.mubr.bf16.gmra.mrb[200].mxu1 %v8063_v40  ;;  %6776 = vmatmul.mubr.bf16.gmra.mrb[228].mxu0 %v8063_v40 }
 0x2a0   : > { %6735 = vmatprep.mubr.msk.bf16.mxu1 %vm7119_vm0, %v7118_v1  ;;  %6779 = vmatprep.mubr.msk.bf16.mxu0 %vm7119_vm0, %v7118_v1 }
 0x2a1   : > { %6804 = vmatpush3.bf16.msra.mxu1 %v7087_v49 }
 0x2a2   : > { %6805 = vmatprep.subr.bf16.mxu1 %v7118_v1 }
 0x2a5   : > { %6806 = vmatpush3.bf16.msra.mxu1 %v7088_v52 }
 0x2a6   : > { %6807 = vmatprep.subr.bf16.mxu1 %v7118_v1 }
 0x2a7   : > { %6736 = vmatmul.mubr.bf16.gmra.mrb[204].mxu1 %v8097_v23  ;;  %6780 = vmatmul.mubr.bf16.gmra.mrb[232].mxu0 %v8097_v23 }
 0x2a8   : > { %6739 = vmatprep.mubr.msk.bf16.mxu1 %vm7119_vm0, %v7118_v1  ;;  %6783 = vmatprep.mubr.msk.bf16.mxu0 %vm7119_vm0, %v7118_v1 }
 0x2a9   : > { %6808 = vmatpush3.bf16.msra.mxu1 %v7089_v55 }
 0x2aa   : > { %6809 = vmatprep.subr.bf16.mxu1 %v7118_v1 }
 0x2ad   : > { %6810 = vmatpush3.bf16.msra.mxu1 %v7090_v56 }
 0x2ae   : > { %6811 = vmatprep.subr.bf16.mxu1 %v7118_v1 }
 0x2af   : > { %6740 = vmatmul.mubr.bf16.gmra.mrb[208].mxu1 %v8131_v16  ;;  %6784 = vmatmul.mubr.bf16.gmra.mrb[236].mxu0 %v8131_v16 }
 0x2b0   : > { %6743 = vmatprep.mubr.msk.bf16.mxu1 %vm7119_vm0, %v7118_v1  ;;  %6787 = vmatprep.mubr.msk.bf16.mxu0 %vm7119_vm0, %v7118_v1 }
 0x2b1   : > { %6812 = vmatpush3.bf16.msra.mxu1 %v7091_v53 }
 0x2b2   : > { %6813 = vmatprep.subr.bf16.mxu1 %v7118_v1 }
 0x2b5   : > { %6814 = vmatpush3.bf16.msra.mxu1 %v7092_v13 }
 0x2b7   : > { %6744 = vmatmul.mubr.bf16.gmra.mrb[212].mxu1 %v8167_v2  ;;  %6788 = vmatmul.mubr.bf16.gmra.mrb[240].mxu0 %v8167_v2 }
 0x2b8   : > { %6747 = vmatprep.mubr.msk.bf16.mxu1 %vm7119_vm0, %v7118_v1  ;;  %6791 = vmatprep.mubr.msk.bf16.mxu0 %vm7119_vm0, %v7118_v1 }
 0x2bf   : > { %6748 = vmatmul.mubr.bf16.gmra.mrb[216].mxu1 %v8183_v61  ;;  %6792 = vmatmul.mubr.bf16.gmra.mrb[244].mxu0 %v8183_v61 }
 0x2c0   : > { %6751 = vmatprep.mubr.msk.bf16.mxu1 %vm7119_vm0, %v7118_v1  ;;  %6795 = vmatprep.mubr.msk.bf16.mxu0 %vm7119_vm0, %v7118_v1 }
 0x2c2   : > { %v2727_v10 = vpop.f32.mrb[112].mxu1  ;;  %v2966_v42 = vpop.f32.mrb[140].mxu0 }
 0x2c3   : > { %v2805_v62 = vrot.slane %v2727_v10, 5  ;;  %v3044_v24 = vrot.slane %v2966_v42, 6  ;;  %v6465_v54 = vpop.f32.mrb[113].mxu1  ;;  %v6509_v58 = vpop.f32.mrb[141].mxu0 }
 0x2c4   : > { %v2730_v7 = vpop.f32.mrb[114].mxu1  ;;  %v2969_v8 = vpop.f32.mrb[142].mxu0 }
 0x2c5   : > { %v2840_v25 = vsel %vm562_vm1, 0.0, %v2805_v62  ;;  %v2806_v50 = vrot.slane %v2730_v7, 5  ;;  %v3045_v37 = vrot.slane %v2969_v8, 6  ;;  %v6466_v20 = vpop.f32.mrb[115].mxu1  ;;  %v6510_v0 = vpop.f32.mrb[143].mxu0  ;;  %v3079_v59 = vsel %vm802_vm2, 0.0, %v3044_v24 }
 0x2c6   : > { %v8487_v17 = vadd.f32 %v3079_v59, %v2840_v25 }
 0x2c7   : > { %v2807_v15 = vsel %vm562_vm1, %v2805_v62, %v2806_v50  ;;  %v3046_v47 = vsel %vm802_vm2, %v3044_v24, %v3045_v37  ;;  %6752 = vmatmul.mubr.bf16.gmra.mrb[220].mxu1 %v8195_v26  ;;  %6796 = vmatmul.mubr.bf16.gmra.mrb[248].mxu0 %v8195_v26 }
 0x2c8   : > { %6815 = vmatprep.mubr.msk.bf16.mxu1 %vm7119_vm0, %v7118_v1  ;;  %6875 = vmatprep.mubr.msk.f32.mxu0 %vm7119_vm0, %v7118_v1  ;;  %v8493_v60 = vadd.f32 %v3046_v47, %v2807_v15 }
 0x2ca   : > { %v2735_v19 = vpop.f32.mrb[116].mxu1  ;;  %v2974_v14 = vpop.f32.mrb[144].mxu0 }
 0x2cb   : > { %v2808_v30 = vrot.slane %v2735_v19, 5  ;;  %v3047_v9 = vrot.slane %v2974_v14, 6  ;;  %v6469_v4 = vpop.f32.mrb[117].mxu1  ;;  %v6513_v45 = vpop.f32.mrb[145].mxu0 }
 0x2cc   : > { %v2738_v11 = vpop.f32.mrb[118].mxu1  ;;  %v2977_v27 = vpop.f32.mrb[146].mxu0 }
 0x2cd   : > { %v2809_v28 = vsel %vm562_vm1, %v2806_v50, %v2808_v30  ;;  %v3048_v32 = vsel %vm802_vm2, %v3045_v37, %v3047_v9  ;;  %v2810_v22 = vrot.slane %v2738_v11, 5  ;;  %v3049_v63 = vrot.slane %v2977_v27, 6  ;;  %v6470_v36 = vpop.f32.mrb[119].mxu1  ;;  %v6514_v39 = vpop.f32.mrb[147].mxu0 }
 0x2ce   : > { %v8500_v35 = vadd.f32 %v3048_v32, %v2809_v28 }
 0x2cf   : > { %v2811_v41 = vsel %vm562_vm1, %v2808_v30, %v2810_v22  ;;  %v3050_v44 = vsel %vm802_vm2, %v3047_v9, %v3049_v63  ;;  %6816 = vmatmul.mubr.bf16.vlgmr.msra.gmra.mrb[224].mxu1 %v8036_v48 }
 0x2d0   : > { %6819 = vmatprep.mubr.msk.bf16.mxu1 %vm7119_vm0, %v7118_v1  ;;  %v8504_v34 = vadd.f32 %v3050_v44, %v2811_v41 }
 0x2d2   : > { %v2743_v46 = vpop.f32.mrb[120].mxu1  ;;  %v2982_v49 = vpop.f32.mrb[148].mxu0 }
 0x2d3   : > { %v2812_v52 = vrot.slane %v2743_v46, 5  ;;  %v3051_v55 = vrot.slane %v2982_v49, 6  ;;  %v6473_v56 = vpop.f32.mrb[121].mxu1  ;;  %v6517_v53 = vpop.f32.mrb[149].mxu0 }
 0x2d4   : > { %v2746_v13 = vpop.f32.mrb[122].mxu1  ;;  %v2985_v10 = vpop.f32.mrb[150].mxu0 }
 0x2d5   : > { %v2813_v42 = vsel %vm562_vm1, %v2810_v22, %v2812_v52  ;;  %v3052_v62 = vsel %vm802_vm2, %v3049_v63, %v3051_v55  ;;  %v2814_v48 = vrot.slane %v2746_v13, 5  ;;  %v3053_v24 = vrot.slane %v2985_v10, 6  ;;  %v6474_v54 = vpop.f32.mrb[123].mxu1  ;;  %v6518_v58 = vpop.f32.mrb[151].mxu0 }
 0x2d6   : > { %v8511_v25 = vadd.f32 %v3052_v62, %v2813_v42 }
 0x2d7   : > { %v2815_v7 = vsel %vm562_vm1, %v2812_v52, %v2814_v48  ;;  %v3054_v8 = vsel %vm802_vm2, %v3051_v55, %v3053_v24  ;;  %6820 = vmatmul.mubr.bf16.gmra.mrb[228].mxu1 %v8063_v40 }
 0x2d8   : > { %6823 = vmatprep.mubr.msk.bf16.mxu1 %vm7119_vm0, %v7118_v1  ;;  %v8515_v50 = vadd.f32 %v3054_v8, %v2815_v7 }
 0x2da   : > { %v2751_v37 = vpop.f32.mrb[124].mxu1  ;;  %v2990_v20 = vpop.f32.mrb[152].mxu0 }
 0x2db   : > { %v2816_v0 = vrot.slane %v2751_v37, 5  ;;  %v3055_v59 = vrot.slane %v2990_v20, 6  ;;  %v6477_v15 = vpop.f32.mrb[125].mxu1  ;;  %v6521_v47 = vpop.f32.mrb[153].mxu0 }
 0x2dc   : > { %v2754_v19 = vpop.f32.mrb[126].mxu1  ;;  %v2993_v14 = vpop.f32.mrb[154].mxu0 }
 0x2dd   : > { %v2817_v30 = vsel %vm562_vm1, %v2814_v48, %v2816_v0  ;;  %v3056_v9 = vsel %vm802_vm2, %v3053_v24, %v3055_v59  ;;  %v2818_v40 = vrot.slane %v2754_v19, 5  ;;  %v3057_v4 = vrot.slane %v2993_v14, 6  ;;  %v6478_v45 = vpop.f32.mrb[127].mxu1  ;;  %v6522_v11 = vpop.f32.mrb[155].mxu0 }
 0x2de   : > { %v8522_v32 = vadd.f32 %v3056_v9, %v2817_v30 }
 0x2df   : > { %v2819_v27 = vsel %vm562_vm1, %v2816_v0, %v2818_v40  ;;  %v3058_v28 = vsel %vm802_vm2, %v3055_v59, %v3057_v4  ;;  %6824 = vmatmul.mubr.bf16.gmra.mrb[232].mxu1 %v8097_v23 }
 0x2e0   : > { %6827 = vmatprep.mubr.msk.bf16.mxu1 %vm7119_vm0, %v7118_v1  ;;  %v8526_v22 = vadd.f32 %v3058_v28, %v2819_v27 }
 0x2e2   : > { %v2759_v63 = vpop.f32.mrb[128].mxu1  ;;  %v2998_v36 = vpop.f32.mrb[156].mxu0 }
 0x2e3   : > { %v2820_v39 = vrot.slane %v2759_v63, 5  ;;  %v3059_v41 = vrot.slane %v2998_v36, 6  ;;  %v6481_v44 = vpop.f32.mrb[129].mxu1  ;;  %v6525_v46 = vpop.f32.mrb[157].mxu0 }
 0x2e4   : > { %v2762_v49 = vpop.f32.mrb[130].mxu1  ;;  %v3001_v52 = vpop.f32.mrb[158].mxu0 }
 0x2e5   : > { %v2821_v55 = vsel %vm562_vm1, %v2818_v40, %v2820_v39  ;;  %v3060_v56 = vsel %vm802_vm2, %v3057_v4, %v3059_v41  ;;  %v2822_v23 = vrot.slane %v2762_v49, 5  ;;  %v3061_v53 = vrot.slane %v3001_v52, 6  ;;  %v6482_v13 = vpop.f32.mrb[131].mxu1  ;;  %v6526_v10 = vpop.f32.mrb[159].mxu0 }
 0x2e6   : > { %v8533_v48 = vadd.f32 %v3060_v56, %v2821_v55 }
 0x2e7   : > { %v2823_v42 = vsel %vm562_vm1, %v2820_v39, %v2822_v23  ;;  %v3062_v62 = vsel %vm802_vm2, %v3059_v41, %v3061_v53  ;;  %6828 = vmatmul.mubr.bf16.gmra.mrb[236].mxu1 %v8131_v16  ;;  %v2792_v16 = vld [vmem:[#allocation2 + $0x60] sm:$0xf] }
 0x2e8   : > { %6831 = vmatprep.mubr.msk.bf16.mxu1 %vm7119_vm0, %v7118_v1  ;;  %v8537_v24 = vadd.f32 %v3062_v62, %v2823_v42 }
 0x2ea   : > { %v2767_v54 = vpop.f32.mrb[132].mxu1  ;;  %v3006_v58 = vpop.f32.mrb[160].mxu0 }
 0x2eb   : > { %v2824_v7 = vrot.slane %v2767_v54, 5  ;;  %v3063_v8 = vrot.slane %v3006_v58, 6  ;;  %v6485_v37 = vpop.f32.mrb[133].mxu1  ;;  %v6529_v20 = vpop.f32.mrb[161].mxu0 }
 0x2ec   : > { %v2770_v0 = vpop.f32.mrb[134].mxu1  ;;  %v3009_v59 = vpop.f32.mrb[162].mxu0 }
 0x2ed   : > { %v2825_v15 = vsel %vm562_vm1, %v2822_v23, %v2824_v7  ;;  %v3064_v47 = vsel %vm802_vm2, %v3061_v53, %v3063_v8  ;;  %v2826_v19 = vrot.slane %v2770_v0, 5  ;;  %v3065_v14 = vrot.slane %v3009_v59, 6  ;;  %v6486_v30 = vpop.f32.mrb[135].mxu1  ;;  %v6530_v9 = vpop.f32.mrb[163].mxu0 }
 0x2ee   : > { %v8544_v45 = vadd.f32 %v3064_v47, %v2825_v15 }
 0x2ef   : > { %v2827_v40 = vsel %vm562_vm1, %v2824_v7, %v2826_v19  ;;  %v3066_v4 = vsel %vm802_vm2, %v3063_v8, %v3065_v14  ;;  %6832 = vmatmul.mubr.bf16.gmra.mrb[240].mxu1 %v8167_v2 }
 0x2f0   : > { %v2853_v11 = vadd.f32 %v2827_v40, %v2792_v16  ;;  %6835 = vmatprep.mubr.msk.bf16.mxu1 %vm7119_vm0, %v7118_v1 }
 0x2f2   : > { %2866 = vst [vmem:[#allocation2 + $0x60] sm:$0xf] %v2853_v11  ;;  %v2775_v27 = vpop.f32.mrb[136].mxu1  ;;  %v3014_v28 = vpop.f32.mrb[164].mxu0 }
 0x2f3   : > { %v6489_v63 = vpop.f32.mrb[137].mxu1  ;;  %v6533_v36 = vpop.f32.mrb[165].mxu0 }
 0x2f4   : > { %v2777_v39 = vpop.f32.mrb[138].mxu1  ;;  %v3016_v41 = vpop.f32.mrb[166].mxu0 }
 0x2f5   : > { %v6490_v44 = vpop.f32.mrb[139].mxu1  ;;  %v6534_v46 = vpop.f32.mrb[167].mxu0 }
 0x2f7   : > { %6836 = vmatmul.mubr.bf16.gmra.mrb[244].mxu1 %v8183_v61 }
 0x2f8   : > { %6839 = vmatprep.mubr.msk.bf16.mxu1 %vm7119_vm0, %v7118_v1 }
 0x2f9   : > { %v3031_v2 = vld [vmem:[#allocation2 + $0x60] sm:$0xf] }
 0x2fa   : > { %v3092_v49 = vadd.f32 %v3066_v4, %v3031_v2  ;;  %v3205_v52 = vpop.f32.mrb[140].mxu1  ;;  %v8551_v55 = vpop.f32.mrb[168].mxu0 }
 0x2fb   : > { %v3283_v56 = vrot.slane %v3205_v52, 7  ;;  %v6553_v23 = vpop.f32.mrb[141].mxu1  ;;  %v6597_v53 = vpop.f32.mrb[169].mxu0  ;;  %v3524_v62 = vrot.slane %v8551_v55, 7 }
 0x2fc   : > { %3105 = vst [vmem:[#allocation2 + $0x60] sm:$0xf] %v3092_v49  ;;  %v3208_v13 = vpop.f32.mrb[142].mxu1  ;;  %v3447_v10 = vpop.f32.mrb[170].mxu0 }
 0x2fd   : > { %v3318_v42 = vsel %vm1042_vm3, 0.0, %v3283_v56  ;;  %v3284_v54 = vrot.slane %v3208_v13, 7  ;;  %v3525_v61 = vrot.slane %v3447_v10, 7  ;;  %v6554_v58 = vpop.f32.mrb[143].mxu1  ;;  %v6598_v7 = vpop.f32.mrb[171].mxu0 }
 0x2fe   : > { %v3320_v8 = vadd.f32 %v3318_v42, %v8487_v17 }
 0x2ff   : > { %v3285_v37 = vsel %vm1042_vm3, %v3283_v56, %v3284_v54  ;;  %v3526_v20 = vsel %vm1042_vm3, %v3524_v62, %v3525_v61  ;;  %6840 = vmatmul.mubr.bf16.gmra.mrb[248].mxu1 %v8195_v26 }
 0x300   : > { %v3321_v0 = vadd.f32 %v3285_v37, %v8493_v60  ;;  %v8562_v59 = vadd.f32 %v3526_v20, %v3320_v8  ;;  %6882 = vmatprep.mubr.msk.f32.mxu1 %vm7119_vm0, %v7118_v1 }
 0x302   : > { %v3213_v15 = vpop.f32.mrb[144].mxu1  ;;  %v3452_v47 = vpop.f32.mrb[172].mxu0 }
 0x303   : > { %v3286_v16 = vrot.slane %v3213_v15, 7  ;;  %v3527_v19 = vrot.slane %v3452_v47, 7  ;;  %v6557_v17 = vpop.f32.mrb[145].mxu1  ;;  %v6601_v14 = vpop.f32.mrb[173].mxu0 }
 0x304   : > { %v3216_v30 = vpop.f32.mrb[146].mxu1  ;;  %v3455_v9 = vpop.f32.mrb[174].mxu0 }
 0x305   : > { %v3287_v40 = vsel %vm1042_vm3, %v3284_v54, %v3286_v16  ;;  %v3528_v4 = vsel %vm1042_vm3, %v3525_v61, %v3527_v19  ;;  %v3288_v26 = vrot.slane %v3216_v30, 7  ;;  %v3529_v11 = vrot.slane %v3455_v9, 7  ;;  %v6558_v60 = vpop.f32.mrb[147].mxu1  ;;  %v6602_v27 = vpop.f32.mrb[175].mxu0 }
 0x306   : > { %v3322_v28 = vadd.f32 %v3287_v40, %v8500_v35  ;;  %v8569_v63 = vadd.f32 %v3528_v4, %v3321_v0 }
 0x307   : > { %v3289_v36 = vsel %vm1042_vm3, %v3286_v16, %v3288_v26  ;;  %v3530_v39 = vsel %vm1042_vm3, %v3527_v19, %v3529_v11 }
 0x308   : > { %v3323_v41 = vadd.f32 %v3289_v36, %v8504_v34  ;;  %v8574_v44 = vadd.f32 %v3530_v39, %v3322_v28 }
 0x30a   : > { %v3221_v46 = vpop.f32.mrb[148].mxu1  ;;  %v3460_v2 = vpop.f32.mrb[176].mxu0 }
 0x30b   : > { %v3290_v49 = vrot.slane %v3221_v46, 7  ;;  %v3531_v52 = vrot.slane %v3460_v2, 7  ;;  %v6561_v56 = vpop.f32.mrb[149].mxu1  ;;  %v6605_v23 = vpop.f32.mrb[177].mxu0 }
 0x30c   : > { %v3224_v53 = vpop.f32.mrb[150].mxu1  ;;  %v3463_v13 = vpop.f32.mrb[178].mxu0 }
 0x30d   : > { %v3291_v35 = vsel %vm1042_vm3, %v3288_v26, %v3290_v49  ;;  %v3532_v10 = vsel %vm1042_vm3, %v3529_v11, %v3531_v52  ;;  %v3292_v42 = vrot.slane %v3224_v53, 7  ;;  %v3533_v54 = vrot.slane %v3463_v13, 7  ;;  %v6562_v61 = vpop.f32.mrb[151].mxu1  ;;  %v6606_v58 = vpop.f32.mrb[179].mxu0 }
 0x30e   : > { %v3324_v34 = vadd.f32 %v3291_v35, %v8511_v25  ;;  %v8579_v7 = vadd.f32 %v3532_v10, %v3323_v41 }
 0x30f   : > { %v3293_v8 = vsel %vm1042_vm3, %v3290_v49, %v3292_v42  ;;  %v3534_v37 = vsel %vm1042_vm3, %v3531_v52, %v3533_v54 }
 0x310   : > { %v3325_v20 = vadd.f32 %v3293_v8, %v8515_v50  ;;  %v8584_v0 = vadd.f32 %v3534_v37, %v3324_v34 }
 0x312   : > { %v3229_v15 = vpop.f32.mrb[152].mxu1  ;;  %v3468_v47 = vpop.f32.mrb[180].mxu0 }
 0x313   : > { %v3294_v16 = vrot.slane %v3229_v15, 7  ;;  %v3535_v19 = vrot.slane %v3468_v47, 7  ;;  %v6565_v17 = vpop.f32.mrb[153].mxu1  ;;  %v6609_v14 = vpop.f32.mrb[181].mxu0 }
 0x314   : > { %v3232_v30 = vpop.f32.mrb[154].mxu1  ;;  %v3471_v9 = vpop.f32.mrb[182].mxu0 }
 0x315   : > { %v3295_v25 = vsel %vm1042_vm3, %v3292_v42, %v3294_v16  ;;  %v3536_v40 = vsel %vm1042_vm3, %v3533_v54, %v3535_v19  ;;  %v3296_v4 = vrot.slane %v3232_v30, 7  ;;  %v3537_v26 = vrot.slane %v3471_v9, 7  ;;  %v6566_v11 = vpop.f32.mrb[155].mxu1  ;;  %v6610_v60 = vpop.f32.mrb[183].mxu0 }
 0x316   : > { %v3326_v50 = vadd.f32 %v3295_v25, %v8522_v32  ;;  %v8589_v27 = vadd.f32 %v3536_v40, %v3325_v20 }
 0x317   : > { %v3297_v28 = vsel %vm1042_vm3, %v3294_v16, %v3296_v4  ;;  %v3538_v36 = vsel %vm1042_vm3, %v3535_v19, %v3537_v26 }
 0x318   : > { %v3327_v39 = vadd.f32 %v3297_v28, %v8526_v22  ;;  %v8594_v41 = vadd.f32 %v3538_v36, %v3326_v50  ;;  %v3270_v50 = vld [vmem:[#allocation2 + $0x60] sm:$0xf] }
 0x31a   : > { %v3237_v46 = vpop.f32.mrb[156].mxu1  ;;  %v3476_v2 = vpop.f32.mrb[184].mxu0 }
 0x31b   : > { %v3298_v49 = vrot.slane %v3237_v46, 7  ;;  %v3539_v52 = vrot.slane %v3476_v2, 7  ;;  %v6569_v56 = vpop.f32.mrb[157].mxu1  ;;  %v6613_v23 = vpop.f32.mrb[185].mxu0 }
 0x31c   : > { %v3240_v53 = vpop.f32.mrb[158].mxu1  ;;  %v3479_v13 = vpop.f32.mrb[186].mxu0 }
 0x31d   : > { %v3299_v32 = vsel %vm1042_vm3, %v3296_v4, %v3298_v49  ;;  %v3540_v35 = vsel %vm1042_vm3, %v3537_v26, %v3539_v52  ;;  %v3300_v10 = vrot.slane %v3240_v53, 7  ;;  %v3541_v42 = vrot.slane %v3479_v13, 7  ;;  %v6570_v54 = vpop.f32.mrb[159].mxu1  ;;  %v6614_v61 = vpop.f32.mrb[187].mxu0 }
 0x31e   : > { %v3328_v22 = vadd.f32 %v3299_v32, %v8533_v48  ;;  %v8599_v58 = vadd.f32 %v3540_v35, %v3327_v39 }
 0x31f   : > { %v3301_v34 = vsel %vm1042_vm3, %v3298_v49, %v3300_v10  ;;  %v3542_v8 = vsel %vm1042_vm3, %v3539_v52, %v3541_v42 }
 0x320   : > { %v3329_v37 = vadd.f32 %v3301_v34, %v8537_v24  ;;  %v8604_v20 = vadd.f32 %v3542_v8, %v3328_v22 }
 0x322   : > { %v3245_v15 = vpop.f32.mrb[160].mxu1  ;;  %v3484_v47 = vpop.f32.mrb[188].mxu0 }
 0x323   : > { %v3302_v16 = vrot.slane %v3245_v15, 7  ;;  %v3543_v19 = vrot.slane %v3484_v47, 7  ;;  %v6573_v17 = vpop.f32.mrb[161].mxu1  ;;  %v6617_v14 = vpop.f32.mrb[189].mxu0 }
 0x324   : > { %v3248_v30 = vpop.f32.mrb[162].mxu1  ;;  %v3487_v9 = vpop.f32.mrb[190].mxu0 }
 0x325   : > { %v3303_v48 = vsel %vm1042_vm3, %v3300_v10, %v3302_v16  ;;  %v3544_v25 = vsel %vm1042_vm3, %v3541_v42, %v3543_v19  ;;  %v3304_v40 = vrot.slane %v3248_v30, 7  ;;  %v3545_v4 = vrot.slane %v3487_v9, 7  ;;  %v6574_v26 = vpop.f32.mrb[163].mxu1  ;;  %v6618_v11 = vpop.f32.mrb[191].mxu0 }
 0x326   : > { %v3330_v24 = vadd.f32 %v3303_v48, %v8544_v45  ;;  %v8609_v60 = vadd.f32 %v3544_v25, %v3329_v37  ;;  %v3562_v10 = vsel %vm1042_vm3, 0.0, %v3524_v62 }
 0x327   : > { %v3305_v28 = vsel %vm1042_vm3, %v3302_v16, %v3304_v40  ;;  %v3546_v36 = vsel %vm1042_vm3, %v3543_v19, %v3545_v4 }
 0x328   : > { %v3331_v39 = vadd.f32 %v3305_v28, %v3270_v50  ;;  %v8613_v46 = vadd.f32 %v3546_v36, %v3330_v24 }
 0x32a   : > { %3344 = vst [vmem:[#allocation2 + $0x60] sm:$0xf] %v3331_v39  ;;  %v3253_v2 = vpop.f32.mrb[164].mxu1  ;;  %v3492_v49 = vpop.f32.mrb[192].mxu0 }
 0x32b   : > { %v3547_v52 = vrot.slane %v3492_v49, 7  ;;  %v6577_v56 = vpop.f32.mrb[165].mxu1  ;;  %v6621_v23 = vpop.f32.mrb[193].mxu0 }
 0x32c   : > { %v3255_v53 = vpop.f32.mrb[166].mxu1  ;;  %v3495_v13 = vpop.f32.mrb[194].mxu0  ;;  %v4788_v23 = vld [vmem:[%s8918_s5] sm:$0xff] }
 0x32d   : > { %v3548_v45 = vsel %vm1042_vm3, %v3545_v4, %v3547_v52  ;;  %v6578_v32 = vpop.f32.mrb[167].mxu1  ;;  %v6622_v35 = vpop.f32.mrb[195].mxu0  ;;  %v4789_v53 = vld [vmem:[%s8918_s5 + $0x8] sm:$0xff] }
 0x32e   : > { %v7121_v35 = vmov 0.0|0.0  }
 0x32f   : > { %6897 = vmatprep.subr.bf16.mxu0 %v7121_v35  ;;  %6921 = vmatprep.subr.bf16.mxu1 %v7121_v35 }
 0x331   : > { %v3510_v42 = vld [vmem:[#allocation2 + $0x60] sm:$0xf] }
 0x332   : > { %v3575_v54 = vadd.f32 %v3548_v45, %v3510_v42  ;;  %v3688_v61 = vpop.f32.mrb[168].mxu1  ;;  %v3880_v22 = vpop.f32.mrb[196].mxu0 }
 0x333   : > { %v3755_v34 = vadd.f32 %v3688_v61, %v3562_v10  ;;  %v6641_v8 = vpop.f32.mrb[169].mxu1  ;;  %v6685_v37 = vpop.f32.mrb[197].mxu0  ;;  %v3960_v16 = vrot.slane %v3880_v22, 1  ;;  %v6898_v10 = vpack.c.bf16 %v4789_v53, %v4788_v23 }
 0x334   : > { %3588 = vst [vmem:[#allocation2 + $0x60] sm:$0xf] %v3575_v54  ;;  %v3691_v15 = vpop.f32.mrb[170].mxu1  ;;  %v3883_v47 = vpop.f32.mrb[198].mxu0 }
 0x335   : > { %v3756_v19 = vadd.f32 %v3691_v15, %v8562_v59  ;;  %v3961_v17 = vrot.slane %v3883_v47, 1  ;;  %v6642_v14 = vpop.f32.mrb[171].mxu1  ;;  %v6686_v30 = vpop.f32.mrb[199].mxu0  ;;  %6899 = vmatpush3.bf16.msra.mxu0 %v6898_v10 }
 0x336   : > { %6900 = vmatprep.subr.bf16.mxu0 %v7121_v35 }
 0x337   : > { %v3962_v55 = vsel %vm1720_vm4, %v3960_v16, %v3961_v17 }
 0x338   : > { %v8621_v9 = vadd.f32 %v3962_v55, %v3755_v34 }
 0x33a   : > { %v3696_v62 = vpop.f32.mrb[172].mxu1  ;;  %v3888_v48 = vpop.f32.mrb[200].mxu0 }
 0x33b   : > { %v3757_v25 = vadd.f32 %v3696_v62, %v8569_v63  ;;  %v3963_v40 = vrot.slane %v3888_v48, 1  ;;  %v6645_v4 = vpop.f32.mrb[173].mxu1  ;;  %v6689_v26 = vpop.f32.mrb[201].mxu0 }
 0x33c   : > { %v3699_v11 = vpop.f32.mrb[174].mxu1  ;;  %v3891_v24 = vpop.f32.mrb[202].mxu0 }
 0x33d   : > { %v3964_v50 = vsel %vm1720_vm4, %v3961_v17, %v3963_v40  ;;  %v3758_v59 = vadd.f32 %v3699_v11, %v8574_v44  ;;  %v3965_v28 = vrot.slane %v3891_v24, 1  ;;  %v6646_v36 = vpop.f32.mrb[175].mxu1  ;;  %v6690_v39 = vpop.f32.mrb[203].mxu0  ;;  %v4790_v17 = vld [vmem:[%s8918_s5 + $0x10] sm:$0xff] }
 0x33e   : > { %v8626_v2 = vadd.f32 %v3964_v50, %v3756_v19  ;;  %v4792_v36 = vld [vmem:[%s8918_s5 + $0x20] sm:$0xff] }
 0x33f   : > { %v3966_v49 = vsel %vm1720_vm4, %v3963_v40, %v3965_v28 }
 0x340   : > { %v8629_v52 = vadd.f32 %v3966_v49, %v3757_v25 }
 0x342   : > { %v3704_v56 = vpop.f32.mrb[176].mxu1  ;;  %v3896_v63 = vpop.f32.mrb[204].mxu0 }
 0x343   : > { %v3759_v44 = vadd.f32 %v3704_v56, %v8579_v7  ;;  %v3967_v13 = vrot.slane %v3896_v63, 1  ;;  %v6649_v45 = vpop.f32.mrb[177].mxu1  ;;  %v6693_v32 = vpop.f32.mrb[205].mxu0 }
 0x344   : > { %v3707_v42 = vpop.f32.mrb[178].mxu1  ;;  %v3899_v54 = vpop.f32.mrb[206].mxu0 }
 0x345   : > { %v3968_v61 = vsel %vm1720_vm4, %v3965_v28, %v3967_v13  ;;  %v3760_v22 = vadd.f32 %v3707_v42, %v8584_v0  ;;  %v3969_v34 = vrot.slane %v3899_v54, 1  ;;  %v6650_v8 = vpop.f32.mrb[179].mxu1  ;;  %v6694_v37 = vpop.f32.mrb[207].mxu0  ;;  %v4791_v0 = vld [vmem:[%s8918_s5 + $0x18] sm:$0xff] }
 0x346   : > { %v8642_v7 = vadd.f32 %v3968_v61, %v3758_v59  ;;  %v6901_v48 = vpack.c.bf16 %v4791_v0, %v4790_v17  ;;  %v4795_v8 = vld [vmem:[%s8918_s5 + $0x38] sm:$0xff] }
 0x347   : > { %v3970_v15 = vsel %vm1720_vm4, %v3967_v13, %v3969_v34 }
 0x348   : > { %v8646_v47 = vadd.f32 %v3970_v15, %v3759_v44  ;;  %6902 = vmatpush3.bf16.msra.mxu0 %v6901_v48  ;;  %v4798_v48 = vld [vmem:[%s8918_s5 + $0x50] sm:$0xff] }
 0x349   : > { %6903 = vmatprep.subr.bf16.mxu0 %v7121_v35 }
 0x34a   : > { %v3712_v16 = vpop.f32.mrb[180].mxu1  ;;  %v3904_v19 = vpop.f32.mrb[208].mxu0 }
 0x34b   : > { %v3761_v14 = vadd.f32 %v3712_v16, %v8589_v27  ;;  %v3971_v30 = vrot.slane %v3904_v19, 1  ;;  %v6653_v55 = vpop.f32.mrb[181].mxu1  ;;  %v6697_v62 = vpop.f32.mrb[209].mxu0  ;;  %v4797_v16 = vld [vmem:[%s8918_s5 + $0x48] sm:$0xff] }
 0x34c   : > { %v3715_v25 = vpop.f32.mrb[182].mxu1  ;;  %v3907_v40 = vpop.f32.mrb[210].mxu0 }
 0x34d   : > { %v3972_v4 = vsel %vm1720_vm4, %v3969_v34, %v3971_v30  ;;  %v3762_v26 = vadd.f32 %v3715_v25, %v8594_v41  ;;  %v3973_v11 = vrot.slane %v3907_v40, 1  ;;  %v6654_v24 = vpop.f32.mrb[183].mxu1  ;;  %v6698_v50 = vpop.f32.mrb[211].mxu0  ;;  %v4793_v41 = vld [vmem:[%s8918_s5 + $0x28] sm:$0xff]  ;;  %v4799_v25 = vld [vmem:[%s8918_s5 + $0x58] sm:$0xff] }
 0x34e   : > { %v8657_v59 = vadd.f32 %v3972_v4, %v3760_v22  ;;  %v6904_v39 = vpack.c.bf16 %v4793_v41, %v4792_v36  ;;  %v6913_v36 = vpack.c.bf16 %v4799_v25, %v4798_v48  ;;  %v4874_v48 = vld [vmem:[%s8916_s3] sm:$0xff]  ;;  %v4875_v25 = vld [vmem:[%s8916_s3 + $0x8] sm:$0xff] }
 0x34f   : > { %v3974_v27 = vsel %vm1720_vm4, %v3971_v30, %v3973_v11 }
 0x350   : > { %v8661_v28 = vadd.f32 %v3974_v27, %v3761_v14  ;;  %6905 = vmatpush3.bf16.msra.mxu0 %v6904_v39  ;;  %v4800_v39 = vld [vmem:[%s8918_s5 + $0x60] sm:$0xff] }
 0x351   : > { %6906 = vmatprep.subr.bf16.mxu0 %v7121_v35 }
 0x352   : > { %v3720_v49 = vpop.f32.mrb[184].mxu1  ;;  %v3912_v56 = vpop.f32.mrb[212].mxu0 }
 0x353   : > { %v3763_v63 = vadd.f32 %v3720_v49, %v8599_v58  ;;  %v3975_v23 = vrot.slane %v3912_v56, 1  ;;  %v6657_v53 = vpop.f32.mrb[185].mxu1  ;;  %v6701_v44 = vpop.f32.mrb[213].mxu0  ;;  %v4794_v58 = vld [vmem:[%s8918_s5 + $0x30] sm:$0xff]  ;;  %v4801_v49 = vld [vmem:[%s8918_s5 + $0x68] sm:$0xff] }
 0x354   : > { %v3723_v13 = vpop.f32.mrb[186].mxu1  ;;  %v3915_v45 = vpop.f32.mrb[214].mxu0  ;;  %v6907_v15 = vpack.c.bf16 %v4795_v8, %v4794_v58  ;;  %v6916_v53 = vpack.c.bf16 %v4801_v49, %v4800_v39 }
 0x355   : > { %v3976_v32 = vsel %vm1720_vm4, %v3973_v11, %v3975_v23  ;;  %v3764_v10 = vadd.f32 %v3723_v13, %v8604_v20  ;;  %v3977_v42 = vrot.slane %v3915_v45, 1  ;;  %v6658_v54 = vpop.f32.mrb[187].mxu1  ;;  %v6702_v61 = vpop.f32.mrb[215].mxu0  ;;  %v4796_v20 = vld [vmem:[%s8918_s5 + $0x40] sm:$0xff] }
 0x356   : > { %v8673_v22 = vadd.f32 %v3976_v32, %v3762_v26  ;;  %6908 = vmatpush3.bf16.msra.mxu0 %v6907_v15  ;;  %v6910_v0 = vpack.c.bf16 %v4797_v16, %v4796_v20 }
 0x357   : > { %v3978_v34 = vsel %vm1720_vm4, %v3975_v23, %v3977_v42  ;;  %6909 = vmatprep.subr.bf16.mxu0 %v7121_v35 }
 0x358   : > { %v8682_v37 = vadd.f32 %v3978_v34, %v3763_v63  ;;  %v3754_v63 = vld [vmem:[#allocation2 + $0x60] sm:$0xf] }
 0x35a   : > { %v3728_v19 = vpop.f32.mrb[188].mxu1  ;;  %v3920_v17 = vpop.f32.mrb[216].mxu0  ;;  %6911 = vmatpush3.bf16.msra.mxu0 %v6910_v0 }
 0x35b   : > { %v3765_v14 = vadd.f32 %v3728_v19, %v8609_v60  ;;  %v3979_v30 = vrot.slane %v3920_v17, 1  ;;  %v6661_v55 = vpop.f32.mrb[189].mxu1  ;;  %v6705_v62 = vpop.f32.mrb[217].mxu0  ;;  %6912 = vmatprep.subr.bf16.mxu0 %v7121_v35 }
 0x35c   : > { %v3731_v40 = vpop.f32.mrb[190].mxu1  ;;  %v3923_v4 = vpop.f32.mrb[218].mxu0 }
 0x35d   : > { %v3980_v26 = vsel %vm1720_vm4, %v3977_v42, %v3979_v30  ;;  %v3766_v11 = vadd.f32 %v3731_v40, %v8613_v46  ;;  %v3981_v60 = vrot.slane %v3923_v4, 1  ;;  %v6662_v24 = vpop.f32.mrb[191].mxu1  ;;  %v6706_v50 = vpop.f32.mrb[219].mxu0  ;;  %v4803_v42 = vld [vmem:[%s8918_s5 + $0x78] sm:$0xff] }
 0x35e   : > { %v8700_v27 = vadd.f32 %v3980_v26, %v3764_v10  ;;  %6914 = vmatpush3.bf16.msra.mxu0 %v6913_v36  ;;  %v4802_v10 = vld [vmem:[%s8918_s5 + $0x70] sm:$0xff] }
 0x35f   : > { %v3982_v41 = vsel %vm1720_vm4, %v3979_v30, %v3981_v60  ;;  %6915 = vmatprep.subr.bf16.mxu0 %v7121_v35  ;;  %v6919_v20 = vpack.c.bf16 %v4803_v42, %v4802_v10 }
 0x360   : > { %v8710_v46 = vadd.f32 %v3982_v41, %v3765_v14 }
 0x362   : > { %v3736_v56 = vpop.f32.mrb[192].mxu1  ;;  %v3928_v23 = vpop.f32.mrb[220].mxu0  ;;  %6917 = vmatpush3.bf16.msra.mxu0 %v6916_v53 }
 0x363   : > { %v3767_v44 = vadd.f32 %v3754_v63, %v3736_v56  ;;  %v3983_v13 = vrot.slane %v3928_v23, 1  ;;  %v6665_v45 = vpop.f32.mrb[193].mxu1  ;;  %v6709_v32 = vpop.f32.mrb[221].mxu0  ;;  %6918 = vmatprep.subr.bf16.mxu0 %v7121_v35 }
 0x364   : > { %v3739_v54 = vpop.f32.mrb[194].mxu1  ;;  %v3931_v61 = vpop.f32.mrb[222].mxu0 }
 0x365   : > { %3780 = vst [vmem:[#allocation2 + $0x60] sm:$0xf] %v3767_v44  ;;  %v3984_v34 = vsel %vm1720_vm4, %v3981_v60, %v3983_v13  ;;  %v6666_v58 = vpop.f32.mrb[195].mxu1  ;;  %v6710_v8 = vpop.f32.mrb[223].mxu0  ;;  %v3998_v17 = vsel %vm562_vm1, %v3983_v13, 0.0 }
 0x366   : > { %v8720_v15 = vadd.f32 %v3984_v34, %v3766_v11  ;;  %6920 = vmatpush3.bf16.msra.mxu0 %v6919_v20  ;;  %v6922_v11 = vpack.c.bf16 %v4875_v25, %v4874_v48 }
 0x367   : > { %6885 = vmatprep.subr.mxu0 %v7118_v1 }
 0x368   : > { %6923 = vmatpush3.bf16.msra.mxu1 %v6922_v11 }
 0x369   : > { %6924 = vmatprep.subr.bf16.mxu1 %v7121_v35 }
 0x36a   : > { %v4124_v16 = vpop.f32.mrb[196].mxu1  ;;  %v4363_v19 = vpop.f32.mrb[224].mxu0 }
 0x36b   : > { %v6729_v0 = vpop.f32.mrb[197].mxu1  ;;  %v6773_v14 = vpop.f32.mrb[225].mxu0 }
 0x36c   : > { %v3946_v30 = vld [vmem:[#allocation2 + $0x60] sm:$0xf]  ;;  %v4126_v55 = vpop.f32.mrb[198].mxu1  ;;  %v4365_v62 = vpop.f32.mrb[226].mxu0 }
 0x36d   : > { %v4011_v40 = vadd.f32 %v3998_v17, %v3946_v30  ;;  %v6730_v4 = vpop.f32.mrb[199].mxu1  ;;  %v6774_v26 = vpop.f32.mrb[227].mxu0  ;;  %v4202_v50 = vrot.slane %v4126_v55, 1  ;;  %v4441_v36 = vrot.slane %v4365_v62, 2 }
 0x36f   : > { %4024 = vst [vmem:[#allocation2 + $0x60] sm:$0xf] %v4011_v40 }
 0x372   : > { %v4131_v60 = vpop.f32.mrb[200].mxu1  ;;  %v4370_v24 = vpop.f32.mrb[228].mxu0 }
 0x373   : > { %v4203_v41 = vrot.slane %v4131_v60, 1  ;;  %v4442_v39 = vrot.slane %v4370_v24, 2  ;;  %v6733_v49 = vpop.f32.mrb[201].mxu1  ;;  %v6777_v56 = vpop.f32.mrb[229].mxu0 }
 0x374   : > { %v4134_v63 = vpop.f32.mrb[202].mxu1  ;;  %v4373_v23 = vpop.f32.mrb[230].mxu0 }
 0x375   : > { %v4204_v53 = vsel %vm1720_vm4, %v4202_v50, %v4203_v41  ;;  %v4443_v44 = vsel %vm2202_vm5, %v4441_v36, %v4442_v39  ;;  %v4205_v13 = vrot.slane %v4134_v63, 1  ;;  %v4444_v45 = vrot.slane %v4373_v23, 2  ;;  %v6734_v32 = vpop.f32.mrb[203].mxu1  ;;  %v6778_v10 = vpop.f32.mrb[231].mxu0 }
 0x376   : > { %v4189_v42 = vld [vmem:[#allocation2 + $0x60] sm:$0xf]  ;;  %v4238_v35 = vadd.f32 %v4204_v53, %v8621_v9 }
 0x377   : > { %4263 = vst [vmem:[#allocation2 + $0x60] sm:$0xf] %v4189_v42  ;;  %v4206_v54 = vsel %vm1720_vm4, %v4203_v41, %v4205_v13  ;;  %v4445_v61 = vsel %vm2202_vm5, %v4442_v39, %v4444_v45 }
 0x378   : > { %v8737_v34 = vadd.f32 %v4443_v44, %v4238_v35  ;;  %v4239_v58 = vadd.f32 %v4206_v54, %v8626_v2 }
 0x37a   : > { %v8740_v8 = vadd.f32 %v4445_v61, %v4239_v58  ;;  %v4139_v20 = vpop.f32.mrb[204].mxu1  ;;  %v4378_v16 = vpop.f32.mrb[232].mxu0 }
 0x37b   : > { %v4207_v19 = vrot.slane %v4139_v20, 1  ;;  %v4446_v17 = vrot.slane %v4378_v16, 2  ;;  %v6737_v0 = vpop.f32.mrb[205].mxu1  ;;  %v6781_v14 = vpop.f32.mrb[233].mxu0 }
 0x37c   : > { %v4142_v30 = vpop.f32.mrb[206].mxu1  ;;  %v4381_v55 = vpop.f32.mrb[234].mxu0 }
 0x37d   : > { %v4208_v9 = vsel %vm1720_vm4, %v4205_v13, %v4207_v19  ;;  %v4447_v62 = vsel %vm2202_vm5, %v4444_v45, %v4446_v17  ;;  %v4209_v48 = vrot.slane %v4142_v30, 1  ;;  %v4448_v25 = vrot.slane %v4381_v55, 2  ;;  %v6738_v40 = vpop.f32.mrb[207].mxu1  ;;  %v6782_v4 = vpop.f32.mrb[235].mxu0 }
 0x37e   : > { %v4428_v26 = vld [vmem:[#allocation2 + $0x60] sm:$0xf]  ;;  %v4240_v2 = vadd.f32 %v4208_v9, %v8629_v52 }
 0x37f   : > { %4502 = vst [vmem:[#allocation2 + $0x60] sm:$0xf] %v4428_v26  ;;  %v4210_v11 = vsel %vm1720_vm4, %v4207_v19, %v4209_v48  ;;  %v4449_v60 = vsel %vm2202_vm5, %v4446_v17, %v4448_v25 }
 0x380   : > { %v8747_v24 = vadd.f32 %v4447_v62, %v4240_v2  ;;  %v4241_v50 = vadd.f32 %v4210_v11, %v8642_v7 }
 0x382   : > { %v8750_v36 = vadd.f32 %v4449_v60, %v4241_v50  ;;  %v4147_v41 = vpop.f32.mrb[208].mxu1  ;;  %v4386_v39 = vpop.f32.mrb[236].mxu0 }
 0x383   : > { %v4211_v49 = vrot.slane %v4147_v41, 1  ;;  %v4450_v56 = vrot.slane %v4386_v39, 2  ;;  %v6741_v63 = vpop.f32.mrb[209].mxu1  ;;  %v6785_v23 = vpop.f32.mrb[237].mxu0 }
 0x384   : > { %v4150_v53 = vpop.f32.mrb[210].mxu1  ;;  %v4389_v44 = vpop.f32.mrb[238].mxu0 }
 0x385   : > { %v4212_v52 = vsel %vm1720_vm4, %v4209_v48, %v4211_v49  ;;  %v4451_v13 = vsel %vm2202_vm5, %v4448_v25, %v4450_v56  ;;  %v4213_v45 = vrot.slane %v4150_v53, 1  ;;  %v4452_v32 = vrot.slane %v4389_v44, 2  ;;  %v6742_v10 = vpop.f32.mrb[211].mxu1  ;;  %v6786_v42 = vpop.f32.mrb[239].mxu0 }
 0x386   : > { %v4667_v35 = vld [vmem:[#allocation2 + $0x60] sm:$0xf]  ;;  %v4242_v7 = vadd.f32 %v4212_v52, %v8646_v47 }
 0x387   : > { %4741 = vst [vmem:[#allocation2 + $0x60] sm:$0xf] %v4667_v35  ;;  %v4214_v54 = vsel %vm1720_vm4, %v4211_v49, %v4213_v45  ;;  %v4453_v61 = vsel %vm2202_vm5, %v4450_v56, %v4452_v32 }
 0x388   : > { %v8757_v58 = vadd.f32 %v4451_v13, %v4242_v7  ;;  %v4243_v20 = vadd.f32 %v4214_v54, %v8657_v59 }
 0x38a   : > { %v8760_v16 = vadd.f32 %v4453_v61, %v4243_v20  ;;  %v4155_v19 = vpop.f32.mrb[212].mxu1  ;;  %v4394_v17 = vpop.f32.mrb[240].mxu0 }
 0x38b   : > { %v4215_v0 = vrot.slane %v4155_v19, 1  ;;  %v4454_v14 = vrot.slane %v4394_v17, 2  ;;  %v6745_v30 = vpop.f32.mrb[213].mxu1  ;;  %v6789_v55 = vpop.f32.mrb[241].mxu0 }
 0x38c   : > { %v4158_v9 = vpop.f32.mrb[214].mxu1  ;;  %v4397_v62 = vpop.f32.mrb[242].mxu0 }
 0x38d   : > { %v4216_v47 = vsel %vm1720_vm4, %v4213_v45, %v4215_v0  ;;  %v4455_v48 = vsel %vm2202_vm5, %v4452_v32, %v4454_v14  ;;  %v4217_v25 = vrot.slane %v4158_v9, 1  ;;  %v4456_v40 = vrot.slane %v4397_v62, 2  ;;  %v6746_v4 = vpop.f32.mrb[215].mxu1  ;;  %v6790_v26 = vpop.f32.mrb[243].mxu0 }
 0x38e   : > { %v4244_v59 = vadd.f32 %v4216_v47, %v8661_v28 }
 0x38f   : > { %v4218_v2 = vsel %vm1720_vm4, %v4215_v0, %v4217_v25  ;;  %v4457_v11 = vsel %vm2202_vm5, %v4454_v14, %v4456_v40 }
 0x390   : > { %v8767_v60 = vadd.f32 %v4455_v48, %v4244_v59  ;;  %v4245_v50 = vadd.f32 %v4218_v2, %v8673_v22 }
 0x392   : > { %v8770_v41 = vadd.f32 %v4457_v11, %v4245_v50  ;;  %v4163_v39 = vpop.f32.mrb[216].mxu1  ;;  %v4402_v49 = vpop.f32.mrb[244].mxu0 }
 0x393   : > { %v4219_v56 = vrot.slane %v4163_v39, 1  ;;  %v4458_v63 = vrot.slane %v4402_v49, 2  ;;  %v6749_v23 = vpop.f32.mrb[217].mxu1  ;;  %v6793_v53 = vpop.f32.mrb[245].mxu0 }
 0x394   : > { %v4166_v44 = vpop.f32.mrb[218].mxu1  ;;  %v4405_v52 = vpop.f32.mrb[246].mxu0 }
 0x395   : > { %v4220_v28 = vsel %vm1720_vm4, %v4217_v25, %v4219_v56  ;;  %v4459_v13 = vsel %vm2202_vm5, %v4456_v40, %v4458_v63  ;;  %v4221_v45 = vrot.slane %v4166_v44, 1  ;;  %v4460_v32 = vrot.slane %v4405_v52, 2  ;;  %v6750_v10 = vpop.f32.mrb[219].mxu1  ;;  %v6794_v42 = vpop.f32.mrb[247].mxu0 }
 0x396   : > { %v4246_v22 = vadd.f32 %v4220_v28, %v8682_v37 }
 0x397   : > { %v4222_v35 = vsel %vm1720_vm4, %v4219_v56, %v4221_v45  ;;  %v4461_v7 = vsel %vm2202_vm5, %v4458_v63, %v4460_v32 }
 0x398   : > { %v8777_v54 = vadd.f32 %v4459_v13, %v4246_v22  ;;  %v4247_v61 = vadd.f32 %v4222_v35, %v8700_v27 }
 0x39a   : > { %v8780_v20 = vadd.f32 %v4461_v7, %v4247_v61  ;;  %v4171_v19 = vpop.f32.mrb[220].mxu1  ;;  %v4410_v17 = vpop.f32.mrb[248].mxu0 }
 0x39b   : > { %v4223_v0 = vrot.slane %v4171_v19, 1  ;;  %v4462_v14 = vrot.slane %v4410_v17, 2  ;;  %v6753_v30 = vpop.f32.mrb[221].mxu1  ;;  %v6797_v55 = vpop.f32.mrb[249].mxu0 }
 0x39c   : > { %v4174_v9 = vpop.f32.mrb[222].mxu1  ;;  %v4413_v62 = vpop.f32.mrb[250].mxu0 }
 0x39d   : > { %v4224_v37 = vsel %vm1720_vm4, %v4221_v45, %v4223_v0  ;;  %v4237_v47 = vsel %vm562_vm1, %v4223_v0, 0.0  ;;  %v4463_v48 = vsel %vm2202_vm5, %v4460_v32, %v4462_v14  ;;  %v6754_v25 = vpop.f32.mrb[223].mxu1  ;;  %v6798_v40 = vpop.f32.mrb[251].mxu0  ;;  %v4476_v26 = vsel %vm802_vm2, %v4462_v14, 0.0 }
 0x39e   : > { %v4248_v27 = vadd.f32 %v4224_v37, %v8710_v46  ;;  %v4249_v4 = vadd.f32 %v4237_v47, %v8720_v15 }
 0x3a0   : > { %v8788_v59 = vadd.f32 %v4463_v48, %v4248_v27  ;;  %v8790_v2 = vadd.f32 %v4476_v26, %v4249_v4 }
 0x3a2   : > { %v4602_v11 = vpop.f32.mrb[224].mxu1 }
 0x3a3   : > { %v6817_v50 = vpop.f32.mrb[225].mxu1 }
 0x3a4   : > { %v4604_v39 = vpop.f32.mrb[226].mxu1 }
 0x3a5   : > { %v6818_v49 = vpop.f32.mrb[227].mxu1  ;;  %v4680_v63 = vrot.slane %v4604_v39, 3 }
 0x3aa   : > { %v4609_v56 = vpop.f32.mrb[228].mxu1 }
 0x3ab   : > { %v4681_v23 = vrot.slane %v4609_v56, 3  ;;  %v6821_v53 = vpop.f32.mrb[229].mxu1 }
 0x3ac   : > { %v4612_v44 = vpop.f32.mrb[230].mxu1 }
 0x3ad   : > { %v4682_v52 = vsel %vm2442_vm6, %v4680_v63, %v4681_v23  ;;  %v4683_v46 = vrot.slane %v4612_v44, 3  ;;  %v6822_v28 = vpop.f32.mrb[231].mxu1 }
 0x3ae   : > { %v4716_v15 = vadd.f32 %v4682_v52, %v8737_v34 }
 0x3af   : > { %v4684_v13 = vsel %vm2442_vm6, %v4681_v23, %v4683_v46 }
 0x3b0   : > { %v4717_v45 = vadd.f32 %v4684_v13, %v8740_v8  ;;  %v8806_v48 = vmul.f32 %v4716_v15, %v8019_v29 }
 0x3b2   : > { %v4617_v32 = vpop.f32.mrb[232].mxu1  ;;  %v8801_v8 = vmul.f32 %v4717_v45, %v8025_v5 }
 0x3b3   : > { %v4685_v10 = vrot.slane %v4617_v32, 3  ;;  %v6825_v42 = vpop.f32.mrb[233].mxu1 }
 0x3b4   : > { %v4620_v22 = vpop.f32.mrb[234].mxu1  ;;  %v4768_v5 = vadd.f32 %v8801_v8, %v8806_v48 }
 0x3b5   : > { %v4686_v35 = vsel %vm2442_vm6, %v4683_v46, %v4685_v10  ;;  %v4687_v7 = vrot.slane %v4620_v22, 3  ;;  %v6826_v61 = vpop.f32.mrb[235].mxu1 }
 0x3b6   : > { %v4718_v19 = vadd.f32 %v4686_v35, %v8747_v24 }
 0x3b7   : > { %v4688_v17 = vsel %vm2442_vm6, %v4685_v10, %v4687_v7 }
 0x3b8   : > { %v4719_v0 = vadd.f32 %v4688_v17, %v8750_v36  ;;  %v8809_v24 = vmul.f32 %v4718_v19, %v8029_v57 }
 0x3ba   : > { %v4625_v14 = vpop.f32.mrb[236].mxu1  ;;  %v8816_v27 = vmul.f32 %v4719_v0, %v8053_v51  ;;  %v4769_v4 = vadd.f32 %v4768_v5, %v8809_v24 }
 0x3bb   : > { %v4689_v34 = vrot.slane %v4625_v14, 3  ;;  %v6829_v30 = vpop.f32.mrb[237].mxu1  ;;  %v4754_v14 = vld [vmem:[#allocation2 + $0x60] sm:$0xf] }
 0x3bc   : > { %v4628_v55 = vpop.f32.mrb[238].mxu1  ;;  %v4770_v49 = vadd.f32 %v4769_v4, %v8816_v27 }
 0x3bd   : > { %v4690_v9 = vsel %vm2442_vm6, %v4687_v7, %v4689_v34  ;;  %v4691_v62 = vrot.slane %v4628_v55, 3  ;;  %v6830_v37 = vpop.f32.mrb[239].mxu1 }
 0x3be   : > { %v4720_v47 = vadd.f32 %v4690_v9, %v8757_v58 }
 0x3bf   : > { %v4692_v36 = vsel %vm2442_vm6, %v4689_v34, %v4691_v62 }
 0x3c0   : > { %v4721_v25 = vadd.f32 %v4692_v36, %v8760_v16  ;;  %v8820_v11 = vmul.f32 %v4720_v47, %v8080_v6 }
 0x3c2   : > { %v4633_v40 = vpop.f32.mrb[240].mxu1  ;;  %v8828_v63 = vmul.f32 %v4721_v25, %v8086_v43  ;;  %v4771_v23 = vadd.f32 %v4770_v49, %v8820_v11 }
 0x3c3   : > { %v4693_v58 = vrot.slane %v4633_v40, 3  ;;  %v6833_v26 = vpop.f32.mrb[241].mxu1  ;;  %v4951_v40 = vld [vmem:[%s8917_s4] sm:$0xf] }
 0x3c4   : > { %v4636_v29 = vpop.f32.mrb[242].mxu1 }
 0x3c5   : > { %v4694_v57 = vsel %vm2442_vm6, %v4691_v62, %v4693_v58  ;;  %v4695_v50 = vrot.slane %v4636_v29, 3  ;;  %v6834_v39 = vpop.f32.mrb[243].mxu1  ;;  %v5035_v29 = vld [vmem:[%s8919_s6] sm:$0xff] }
 0x3c6   : > { %v4722_v16 = vadd.f32 %v4694_v57, %v8767_v60  ;;  %v4772_v60 = vadd.f32 %v4771_v23, %v8828_v63  ;;  %v5110_v23 = vlaneseq }
 0x3c7   : > { %v4696_v56 = vsel %vm2442_vm6, %v4693_v58, %v4695_v50 }
 0x3c8   : > { %v4723_v51 = vadd.f32 %v4696_v56, %v8770_v41  ;;  %v8832_v6 = vmul.f32 %v4722_v16, %v8114_v31 }
 0x3ca   : > { %v4641_v53 = vpop.f32.mrb[244].mxu1  ;;  %v8838_v43 = vmul.f32 %v4723_v51, %v8120_v3  ;;  %v4773_v45 = vadd.f32 %v4772_v60, %v8832_v6 }
 0x3cb   : > { %v4697_v44 = vrot.slane %v4641_v53, 3  ;;  %v6837_v52 = vpop.f32.mrb[245].mxu1  ;;  %v5111_v53 = vshrl.u32 %v5110_v23, 7 }
 0x3cc   : > { %v4644_v46 = vpop.f32.mrb[246].mxu1  ;;  %v4774_v22 = vadd.f32 %v4773_v45, %v8838_v43  ;;  %v7103_v52 = vld [vmem:[%s7247_s18] sm:$0xff]  }
 0x3cd   : > { %v4698_v28 = vsel %vm2442_vm6, %v4695_v50, %v4697_v44  ;;  %v4699_v15 = vrot.slane %v4644_v46, 3  ;;  %v6838_v13 = vpop.f32.mrb[247].mxu1  ;;  %v5127_v46 = vunpack.c.l.bf16 %v7103_v52  ;;  %v5128_v60 = vunpack.c.h.bf16 %v7103_v52 }
 0x3ce   : > { %v4724_v41 = vadd.f32 %v4698_v28, %v8777_v54  ;;  %v7104_v28 = vld [vmem:[%s7247_s18 + $0x8] sm:$0xff]  }
 0x3cf   : > { %v4700_v32 = vsel %vm2442_vm6, %v4697_v44, %v4699_v15  ;;  %v5112_v44 = vsub.s32 0, %v5111_v53  ;;  %v5130_v13 = vunpack.c.h.bf16 %v7104_v28 }
 0x3d0   : > { %v4725_v31 = vadd.f32 %v4700_v32, %v8780_v20  ;;  %v8844_v10 = vmul.f32 %v4724_v41, %v8148_v18  ;;  %v7105_v41 = vld [vmem:[%s7247_s18 + $0x10] sm:$0xff]  }
 0x3d1   : > { %v5131_v45 = vunpack.c.l.bf16 %v7105_v41  ;;  %v5132_v32 = vunpack.c.h.bf16 %v7105_v41 }
 0x3d2   : > { %v4649_v42 = vpop.f32.mrb[248].mxu1  ;;  %v8848_v54 = vmul.f32 %v4725_v31, %v8154_v12  ;;  %v4775_v3 = vadd.f32 %v4774_v22, %v8844_v10  ;;  %v8860_v12 = vmul.f32 %v4754_v14, %v8186_v33  ;;  %v7109_v14 = vld [vmem:[%s7247_s18 + $0x30] sm:$0x3] }
 0x3d3   : > { %v4701_v35 = vrot.slane %v4649_v42, 3  ;;  %v6841_v7 = vpop.f32.mrb[249].mxu1  ;;  %v7106_v42 = vld [vmem:[%s7247_s18 + $0x18] sm:$0xff]  }
 0x3d4   : > { %v4652_v61 = vpop.f32.mrb[250].mxu1  ;;  %v4776_v30 = vadd.f32 %v4775_v3, %v8848_v54  ;;  %v5133_v22 = vunpack.c.l.bf16 %v7106_v42  ;;  %v7107_v7 = vld [vmem:[%s7247_s18 + $0x20] sm:$0xff]  }
 0x3d5   : > { %v4702_v19 = vsel %vm2442_vm6, %v4699_v15, %v4701_v35  ;;  %v4715_v17 = vsel %vm1042_vm3, %v4701_v35, 0.0  ;;  %v6842_v0 = vpop.f32.mrb[251].mxu1  ;;  %v5129_v15 = vunpack.c.l.bf16 %v7104_v28  ;;  %v5134_v35 = vunpack.c.h.bf16 %v7106_v42 }
 0x3d6   : > { %v4726_v20 = vadd.f32 %v4702_v19, %v8788_v59  ;;  %v4727_v18 = vadd.f32 %v4715_v17, %v8790_v2  ;;  %v4780_v59 = vsel %vm4779_vm7, %v8860_v12, 0.0  ;;  %v5135_v61 = vunpack.c.l.bf16 %v7107_v7  ;;  %v7108_v0 = vld [vmem:[%s7247_s18 + $0x28] sm:$0xff]  }
 0x3d7   : > { %v5136_v17 = vunpack.c.h.bf16 %v7107_v7 }
 0x3d8   : > { %v8856_v34 = vmul.f32 %v4726_v20, %v8172_v38  ;;  %v8863_v55 = vmul.f32 %v4727_v18, %v8174_v21  ;;  %v5137_v20 = vunpack.c.l.bf16 %v7108_v0  ;;  %v5138_v18 = vunpack.c.h.bf16 %v7108_v0 }
 0x3da   : > { %v4777_v9 = vadd.f32 %v4776_v30, %v8856_v34  ;;  %v5139_v30 = vunpack.c.l.bf16 %v7109_v14 }
 0x3dc   : > { %v4778_v62 = vadd.f32 %v4777_v9, %v8863_v55 }
 0x3de   : > { %v4781_v2 = vadd.f32 %v4780_v59, %v4778_v62 }
 0x3e0   : > { %v4782_v37 = vrot.slane %v4781_v2, 4 }
 0x3e2   : > { %v4783_v38 = vadd.f32 %v4782_v37, %v4781_v2 }
 0x3e4   : > { %v4784_v47 = vrot.slane %v4783_v38, 2 }
 0x3e6   : > { %v4785_v36 = vadd.f32 %v4784_v47, %v4783_v38 }
 0x3e8   : > { %v4786_v25 = vrot.slane %v4785_v36, 1 }
 0x3ea   : > { %v4787_v5 = vadd.f32 %v4786_v25, %v4785_v36 }
 0x3ec   : > { %6876 = vmatmul.mubr.f32.vlgmr.msra.gmra.mrb[252].mxu0 %v4787_v5 }
 0x3ed   : > { %6887 = vmatprep.mubr.msk.f32.mxu0 %vm7119_vm0, %v7118_v1  ;;  %6886 = vmatpush3.msk.msra.mxu0 %vm4779_vm7, %v4951_v40 }
 0x4bf   : > { %v4870_v21 = vpop.f32.mrb[252].mxu0 }
 0x4c0   : > { %v6877_v33 = vpop.f32.mrb[253].mxu0  ;;  %6883 = vmatmul.mubr.msk.f32.vlgmr.msra.gmra.mrb[252].mxu1 %vm4876_vm8, %v4870_v21 }
 0x4c1   : > { %6894 = vmatprep.mubr.msk.f32.mxu1 %vm7119_vm0, %v7118_v1  ;;  %v5036_v1 = vld [vmem:[%s8919_s6 + $0x8] sm:$0xff] }
 0x4c2   : > { %v6925_v57 = vpack.c.bf16 %v5036_v1, %v5035_v29 }
 0x4c4   : > { %6926 = vmatpush3.bf16.msra.mxu1 %v6925_v57 }
 0x593   : > { %v4946_v4 = vpop.f32.mrb[252].mxu1 }
 0x594   : > { %v4950_v58 = vmax.f32 %v4946_v4, 0.0  ;;  %v6884_v26 = vpop.f32.mrb[253].mxu1 }
 0x596   : > { %6888 = vmatmul.mubr.msk.f32.vlgmr.msra.gmra.mrb[254].mxu0 %vm4952_vm9, %v4950_v58 }
 0x669   : > { %v5025_v50 = vpop.f32.mrb[254].mxu0 }
 0x66a   : > { %v5691_v39 = vmul.f32 -1.442695, %v5025_v50  ;;  %v6889_v16 = vpop.f32.mrb[255].mxu0 }
 0x66c   : > { %7099 = vpow2.f32 %v5691_v39 }
 0x676   : > { %v7100_v49 = vpop.eup %7099 }
 0x677   : > { %v5032_v56 = vadd.f32 1.0, %v7100_v49 }
 0x679   : > { %7101 = vrcp.f32 %v5032_v56 }
 0x683   : > { %v7102_v51 = vpop.eup %7101 }
 0x684   : > { %6895 = vmatmul.mubr.msk.f32.vlgmr.msra.gmra.mrb[254].mxu1 %vm4876_vm8, %v7102_v51 }
 0x757   : > { %v5106_v31 = vpop.f32.mrb[254].mxu1 }
 0x758   : > { %v5113_v3 = vrot.slane %v5106_v31, %v5112_v44  ;;  %v6896_v19 = vpop.f32.mrb[255].mxu1 }
 0x75a   : > { %v5114_v9 = vmul.f32 %v5113_v3, %v8806_v48  ;;  %v5115_v62 = vmul.f32 %v5113_v3, %v8801_v8  ;;  %v5116_v59 = vmul.f32 %v5113_v3, %v8809_v24  ;;  %v5117_v2 = vmul.f32 %v5113_v3, %v8816_v27 }
 0x75b   : > { %v5118_v37 = vmul.f32 %v5113_v3, %v8820_v11  ;;  %v5119_v38 = vmul.f32 %v5113_v3, %v8828_v63  ;;  %v5120_v47 = vmul.f32 %v5113_v3, %v8832_v6  ;;  %v5121_v36 = vmul.f32 %v5113_v3, %v8838_v43 }
 0x75c   : > { %v5122_v25 = vmul.f32 %v5113_v3, %v8844_v10  ;;  %v5123_v5 = vmul.f32 %v5113_v3, %v8848_v54  ;;  %v5124_v48 = vmul.f32 %v5113_v3, %v8856_v34  ;;  %v5125_v8 = vmul.f32 %v5113_v3, %v8863_v55 }
 0x75d   : > { %v5126_v24 = vmul.f32 %v5113_v3, %v8860_v12  ;;  %v5140_v27 = vadd.f32 %v5127_v46, %v5114_v9  ;;  %v5141_v21 = vadd.f32 %v5128_v60, %v5115_v62  ;;  %v5142_v11 = vadd.f32 %v5129_v15, %v5116_v59 }
 0x75e   : > { %v5143_v33 = vadd.f32 %v5130_v13, %v5117_v2  ;;  %v5144_v40 = vadd.f32 %v5131_v45, %v5118_v37  ;;  %v5145_v63 = vadd.f32 %v5132_v32, %v5119_v38  ;;  %v5146_v4 = vadd.f32 %v5133_v22, %v5120_v47 }
 0x75f   : > { %v5147_v6 = vadd.f32 %v5134_v35, %v5121_v36  ;;  %v5148_v43 = vadd.f32 %v5135_v61, %v5122_v25  ;;  %v5149_v10 = vadd.f32 %v5136_v17, %v5123_v5  ;;  %v5150_v54 = vadd.f32 %v5137_v20, %v5124_v48 }
 0x760   : > { %v5151_v34 = vadd.f32 %v5138_v18, %v5125_v8  ;;  %v5152_v55 = vadd.f32 %v5139_v30, %v5126_v24  ;;  %v5724_v58 = vpack.c.bf16 %v5141_v21, %v5140_v27  ;;  %v5729_v12 = vpack.c.bf16 %v5143_v33, %v5142_v11 }
 0x761   : > { %v5734_v26 = vpack.c.bf16 %v5145_v63, %v5144_v40  ;;  %v5739_v29 = vpack.c.bf16 %v5147_v6, %v5146_v4  ;;  %v5744_v1 = vpack.c.bf16 %v5149_v10, %v5148_v43 }
 0x762   : > { %v5720_v57 = vpack.c.bf16 %v5152_v55, %v5152_v55  ;;  %5725 = vst [vmem:[%s305_s24] sm:$0xff] %v5724_v58   ;;  %5751 = vst [vmem:[%s305_s24 + $0x8] sm:$0xff] %v5729_v12   ;;  %v5749_v50 = vpack.c.bf16 %v5151_v34, %v5150_v54 }
 0x763   : > { %5752 = vst [vmem:[%s305_s24 + $0x10] sm:$0xff] %v5734_v26   ;;  %5753 = vst [vmem:[%s305_s24 + $0x18] sm:$0xff] %v5739_v29  }
 0x764   : > { %5754 = vst [vmem:[%s305_s24 + $0x20] sm:$0xff] %v5744_v1   ;;  %5755 = vst [vmem:[%s305_s24 + $0x28] sm:$0xff] %v5749_v50  }
 0x765   : > { %5218 = vst [vmem:[%s305_s24 + $0x30] sm:$0x3] %v5720_v57 }
 0x766 PF: > { %s18_s27 = sadd.s32 1, %s7116_s27  }
 0x767   : > { %p15_p4 = scmp.ge.s32.totalorder %s18_s27, 4  }
 0x769   :  { %17 = sbr.rel (!%p15_p4) target bundleno = 1 (0x1), region = 98 }

// kernel: encoder_forward.15
= control target key start
LH: loop header
LB: loop body
LE: loop exit
PB: predicated region body
PF: predicated region fallthrough
CT: control target
= control target key end

     0   :  { %s362_s9 = smov 0   ;;  %s388_s0 = inlined_call_operand.vmem [shape: bf16[2,16,48], index: 0, kind: input, shape index: {}]   ;;  %s389_s1 = inlined_call_operand.vmem [shape: bf16[48,64], index: 1, kind: input, shape index: {}]   ;;  %s390_s2 = inlined_call_operand.vmem [shape: bf16[2,16,64], index: 2, kind: output, shape index: {}]  }
   0x1 LB: > { %s287_s10 = sadd.s32 4294967295, %s343_s9   ;;  %p291_p0 = scmp.ge.s32.totalorder %s343_s9, 1  ;;  %s343_s9 = sphi %s362_s9, %s12_s9  }
   0x2   : > { %p112_p1 = scmp.lt.s32.totalorder %s343_s9, 3 }
   0x4   : > { %p113_p2 = pnand %p291_p0, %p112_p1 }
   0x5   : > { %v333_v0 = vld [vmem:[%s389_s1] sm:$0xff] (!%p113_p2)   ;;  %v345_v1 = vmov (!%p113_p2), 0.0   ;;  %v334_v2 = vld [vmem:[%s389_s1 + $0x8] sm:$0xff] (!%p113_p2)   ;;  %vm346_vm0 = vmmov (!%p113_p2), 0   ;;  %p134_p3 = scmp.lt.s32.totalorder (!%p113_p2), %s287_s10, 1  ;;  %v335_v3 = vld [vmem:[%s389_s1 + $0x10] sm:$0xff] (!%p113_p2)  }
   0x6   : > { %116 = sbr.rel (%p113_p2) target bundleno = 235 (0xeb), region = 28  ;;  %313 = vmatprep.subr.bf16.mxu0 (!%p113_p2), %v345_v1  ;;  %319 = vmatprep.mubr.msk.bf16.mxu0 (!%p113_p2), %vm346_vm0, %v345_v1  ;;  %vm176_vm1 = vcmask (!%p113_p2), 392192   ;;  %vm229_vm2 = vcmask (!%p113_p2), 519168  }
   0x7   : > { %314 = vmatpush3.bf16.msra.mxu0 (!%p113_p2), %v333_v0 }
   0x8   : > { %315 = vmatprep.subr.bf16.mxu0 (!%p113_p2), %v345_v1 }
   0xb   : > { %316 = vmatpush3.bf16.msra.mxu0 (!%p113_p2), %v334_v2 }
   0xc   : > { %317 = vmatprep.subr.bf16.mxu0 (!%p113_p2), %v345_v1 }
   0xd   : > { %s392_s10 = smov (!%p134_p3, %s287_s10), 1 }
   0xe   : > { %s305_s17 = sshll.u32 %s392_s10, 3 }
   0xf   : > { %s138_s20 = scalar_lea.vmem %s388_s0, %s305_s17  ;;  %318 = vmatpush3.bf16.msra.mxu0 %v335_v3  ;;  %s143_s23 = scalar_lea.vmem %s390_s2, %s305_s17 }
  0x10   : > { %v336_v4 = vld [vmem:[%s138_s20] sm:$0xff]  }
  0x12   : > { %320 = vmatmul.mubr.msk.bf16.vlgmr.msra.gmra.mrb[0].mxu0 %vm176_vm1, %v336_v4 }
  0xe5   : > { %v214_v5 = vpop.f32.mrb[0].mxu0 }
  0xe6   : > { %v307_v6 = vpack.c.bf16 %v214_v5, %v214_v5  ;;  %v321_v7 = vpop.f32.mrb[1].mxu0 }
  0xe7   : > { %v217_v8 = vpop.f32.mrb[2].mxu0 }
  0xe8   : > { %230 = vst.msk [vmem:[%s143_s23] sm:$0xf] %vm229_vm2, %v307_v6  ;;  %v308_v9 = vpack.c.bf16 %v217_v8, %v217_v8  ;;  %v322_v10 = vpop.f32.mrb[3].mxu0 }
  0xea   : > { %231 = vst.msk [vmem:[%s143_s23 + $0x4] sm:$0xf] %vm229_vm2, %v308_v9 }
  0xeb PF: > { %s12_s9 = sadd.s32 1, %s343_s9  }
  0xec   : > { %p9_p4 = scmp.ge.s32.totalorder %s12_s9, 4  }
  0xee   :  { %11 = sbr.rel (!%p9_p4) target bundleno = 1 (0x1), region = 58 }

// kernel: encoder_forward.13
= control target key start
LH: loop header
LB: loop body
LE: loop exit
PB: predicated region body
PF: predicated region fallthrough
CT: control target
= control target key end

     0   :  { %s4571_s27 = smov 0   ;;  %s5596_s0 = inlined_call_operand.vmem [shape: bf16[2,36,96], index: 0, kind: input, shape index: {}]   ;;  %s5597_s1 = inlined_call_operand.vmem [shape: bf16[9,96,96], index: 1, kind: input, shape index: {}]   ;;  %s5598_s2 = inlined_call_operand.vmem [shape: bf16[9,96,96], index: 2, kind: input, shape index: {}]   ;;  %s5599_s3 = inlined_call_operand.vmem [shape: f32[24,6], index: 3, kind: input, shape index: {}]   ;;  %s5600_s4 = inlined_call_operand.vmem [shape: f32[6,24], index: 4, kind: input, shape index: {}]   ;;  %s5601_s5 = inlined_call_operand.vmem [shape: f32[96,24], index: 5, kind: input, shape index: {}]   ;;  %s5602_s6 = inlined_call_operand.vmem [shape: f32[24,96], index: 6, kind: input, shape index: {}]   ;;  %s5603_s7 = inlined_call_operand.vmem [shape: f32[36,1], index: 7, kind: input, shape index: {}]   ;;  %s5604_s8 = inlined_call_operand.vmem [shape: bf16[2,36,96], index: 8, kind: output, shape index: {}]  }
   0x1 LB: > { %s3306_s28 = sadd.s32 4294967295, %s4520_s27   ;;  %p3310_p0 = scmp.ge.s32.totalorder %s4520_s27, 1  ;;  %s4520_s27 = sphi %s4571_s27, %s18_s27  }
   0x2   : > { %p262_p1 = scmp.lt.s32.totalorder %s4520_s27, 3 }
   0x4   : > { %p263_p2 = pnand %p3310_p0, %p262_p1 }
   0x5   : > { %v4394_v0 = vld [vmem:[%s5597_s1] sm:$0xff] (!%p263_p2)   ;;  %v4522_v1 = vmov (!%p263_p2), 0.0   ;;  %v4395_v2 = vld [vmem:[%s5597_s1 + $0x30] sm:$0xff] (!%p263_p2)   ;;  %v4396_v3 = vld [vmem:[%s5597_s1 + $0x8] sm:$0xff] (!%p263_p2)   ;;  %vm4523_vm0 = vmmov (!%p263_p2), 0   ;;  %p4594_p3 = scmp.lt.s32.totalorder (!%p263_p2), %s3306_s28, 1 }
   0x6   : > { %266 = sbr.rel (%p263_p2) target bundleno = 1610 (0x64a), region = 52  ;;  %3873 = vmatprep.subr.bf16.mxu0 (!%p263_p2), %v4522_v1  ;;  %3897 = vmatprep.subr.bf16.mxu1 (!%p263_p2), %v4522_v1  ;;  %v4397_v4 = vld [vmem:[%s5597_s1 + $0x38] sm:$0xff] (!%p263_p2)   ;;  %vm317_vm1 = vcmask (!%p263_p2), 785408   ;;  %v4398_v5 = vld [vmem:[%s5597_s1 + $0x10] sm:$0xff] (!%p263_p2)   ;;  %v4399_v6 = vld [vmem:[%s5597_s1 + $0x40] sm:$0xff] (!%p263_p2)   ;;  %v4524_v8 = vmov (!%p263_p2), 0  }
   0x7   : > { %3874 = vmatpush3.bf16.msra.mxu0 (!%p263_p2), %v4394_v0  ;;  %3885 = vmatprep.mubr.msk.bf16.mxu0 (!%p263_p2), %vm4523_vm0, %v4522_v1  ;;  %318 = vst.msk [vmem:[#allocation2] sm:$0xff] (!%p263_p2), %vm317_vm1, %v4522_v1  ;;  %319 = vst.msk [vmem:[#allocation2 + $0x8] sm:$0xff] (!%p263_p2), %vm317_vm1, %v4522_v1  ;;  %v4400_v7 = vld [vmem:[%s5597_s1 + $0x18] sm:$0xff] (!%p263_p2)   ;;  %v4401_v9 = vld [vmem:[%s5597_s1 + $0x48] sm:$0xff] (!%p263_p2)   ;;  %vm322_vm2 = vcmask (!%p263_p2), 781312   ;;  %vm458_vm3 = vcmask (!%p263_p2), 1046528  }
   0x8   : > { %3898 = vmatpush3.bf16.msra.mxu1 (!%p263_p2), %v4395_v2  ;;  %3875 = vmatprep.subr.bf16.mxu0 (!%p263_p2), %v4522_v1  ;;  %320 = vst.msk [vmem:[#allocation2 + $0x10] sm:$0xff] (!%p263_p2), %vm317_vm1, %v4522_v1  ;;  %321 = vst.msk [vmem:[#allocation2 + $0x18] sm:$0xff] (!%p263_p2), %vm317_vm1, %v4522_v1  ;;  %v4402_v10 = vld [vmem:[%s5597_s1 + $0x20] sm:$0xff] (!%p263_p2)   ;;  %v4403_v11 = vld [vmem:[%s5597_s1 + $0x50] sm:$0xff] (!%p263_p2)   ;;  %vm595_vm4 = vcmask (!%p263_p2), 1045504   ;;  %vm732_vm5 = vcmask (!%p263_p2), 1044480  }
   0x9   : > { %3899 = vmatprep.subr.bf16.mxu1 (!%p263_p2), %v4522_v1  ;;  %3909 = vmatprep.mubr.msk.bf16.mxu1 (!%p263_p2), %vm4523_vm0, %v4522_v1  ;;  %v4404_v12 = vld [vmem:[%s5597_s1 + $0x28] sm:$0xff] (!%p263_p2)   ;;  %v4405_v14 = vld [vmem:[%s5597_s1 + $0x58] sm:$0xff] (!%p263_p2)   ;;  %v4407_v15 = vld [vmem:[%s5597_s1 + $0x60] sm:$0xff] (!%p263_p2)   ;;  %323 = vst.msk [vmem:[#allocation2 + $0x20] sm:$0xf] (!%p263_p2), %vm322_vm2, %v4522_v1  ;;  %vm871_vm6 = vcmask (!%p263_p2), 1040384  }
   0xa   : > { %4392 = vset.pattern.permute.xlu0 (!%p263_p2), %v4524_v8  ;;  %4393 = vset.pattern.permute.xlu1 (!%p263_p2), %v4524_v8  ;;  %v4408_v16 = vld [vmem:[%s5597_s1 + $0x90] sm:$0xff] (!%p263_p2)   ;;  %v4409_v17 = vld [vmem:[%s5597_s1 + $0x68] sm:$0xff] (!%p263_p2)   ;;  %v4410_v19 = vld [vmem:[%s5597_s1 + $0x98] sm:$0xff] (!%p263_p2)   ;;  %vm1146_vm7 = vcmask (!%p263_p2), 1042432   ;;  %vm1412_vm8 = vcmask (!%p263_p2), 1041408   ;;  %vm2970_vm9 = vcmask (!%p263_p2), 195584  }
   0xb   : > { %3876 = vmatpush3.bf16.msra.mxu0 (!%p263_p2), %v4396_v3  ;;  %v4412_v20 = vld [vmem:[%s5597_s1 + $0x70] sm:$0xff] (!%p263_p2)   ;;  %v4413_v21 = vld [vmem:[%s5597_s1 + $0xa0] sm:$0xff] (!%p263_p2)   ;;  %v4414_v22 = vld [vmem:[%s5597_s1 + $0x78] sm:$0xff] (!%p263_p2)   ;;  %vm3046_vm10 = vcmask (!%p263_p2), 48128   ;;  %vm3249_vm11 = vcmask (!%p263_p2), 779264  }
   0xc   : > { %3900 = vmatpush3.bf16.msra.mxu1 (!%p263_p2), %v4397_v4  ;;  %3877 = vmatprep.subr.bf16.mxu0 (!%p263_p2), %v4522_v1  ;;  %v4415_v24 = vld [vmem:[%s5597_s1 + $0xa8] sm:$0xff] (!%p263_p2)   ;;  %v4417_v26 = vld [vmem:[%s5597_s1 + $0x80] sm:$0xff] (!%p263_p2)   ;;  %v4418_v27 = vld [vmem:[%s5597_s1 + $0xb0] sm:$0xff] (!%p263_p2)  }
   0xd   : > { %s5607_s28 = smov (!%p4594_p3, %s3306_s28), 1  ;;  %3901 = vmatprep.subr.bf16.mxu1 %v4522_v1  ;;  %v4419_v28 = vld [vmem:[%s5597_s1 + $0x88] sm:$0xff]   ;;  %v4420_v29 = vld [vmem:[%s5597_s1 + $0xb8] sm:$0xff]   ;;  %v4421_v30 = vld [vmem:[%s5597_s1 + $0xc0] sm:$0xff]  }
   0xe   : > { %s4379_s24 = smul.u32 20, %s5607_s28  ;;  %v4422_v31 = vld [vmem:[%s5597_s1 + $0xf0] sm:$0xff]   ;;  %v4423_v32 = vld [vmem:[%s5597_s1 + $0xc8] sm:$0xff]   ;;  %v4424_v33 = vld [vmem:[%s5597_s1 + $0xf8] sm:$0xff]  }
   0xf   : > { %3878 = vmatpush3.bf16.msra.mxu0 %v4398_v5  ;;  %v4425_v34 = vld [vmem:[%s5597_s1 + $0xd0] sm:$0xff]   ;;  %v4426_v35 = vld [vmem:[%s5597_s1 + $0x100] sm:$0xff]   ;;  %v4427_v37 = vld [vmem:[%s5597_s1 + $0xd8] sm:$0xff]  }
  0x10   : > { %3902 = vmatpush3.bf16.msra.mxu1 %v4399_v6  ;;  %3879 = vmatprep.subr.bf16.mxu0 %v4522_v1  ;;  %s4648_s11 = scalar_lea.vmem %s5596_s0, %s4379_s24  ;;  %v307_v36 = vld [vmem:[%s5603_s7] sm:$0xff]  ;;  %v308_v38 = vld [vmem:[%s5603_s7 + $0x8] sm:$0xff]  ;;  %v309_v39 = vld [vmem:[%s5603_s7 + $0x10] sm:$0xff]  ;;  %s305_s25 = scalar_lea.vmem %s5604_s8, %s4379_s24 }
  0x11   : > { %3903 = vmatprep.subr.bf16.mxu1 %v4522_v1  ;;  %v4655_v13 = vld [vmem:[%s4648_s11] sm:$0xff]   ;;  %v4678_v18 = vld [vmem:[%s4648_s11 + $0x8] sm:$0xff]   ;;  %v316_v23 = vld [vmem:[%s4648_s11 + $0x10] sm:$0x3]  ;;  %1588 = vperm.xlu0 %4392, %v307_v36  }
  0x12   : > { %v4712_v25 = vcombine.low %v316_v23, %v316_v23  ;;  %v4428_v40 = vld [vmem:[%s5597_s1 + $0x108] sm:$0xff]   ;;  %1598 = vperm.xlu1 %4393, %v309_v39   ;;  %v310_v41 = vld [vmem:[%s5603_s7 + $0x18] sm:$0xff]  ;;  %v4429_v42 = vld [vmem:[%s5597_s1 + $0xe0] sm:$0xff]  }
  0x13   : > { %3880 = vmatpush3.bf16.msra.mxu0 %v4400_v7  ;;  %v311_v43 = vld [vmem:[%s5603_s7 + $0x20] sm:$0xf]  ;;  %v4430_v44 = vld [vmem:[%s5597_s1 + $0x110] sm:$0xff]   ;;  %v4431_v45 = vld [vmem:[%s5597_s1 + $0xe8] sm:$0xff]  }
  0x14   : > { %3904 = vmatpush3.bf16.msra.mxu1 %v4401_v9  ;;  %3881 = vmatprep.subr.bf16.mxu0 %v4522_v1  ;;  %v4432_v46 = vld [vmem:[%s5597_s1 + $0x118] sm:$0xff]   ;;  %v4433_v47 = vld [vmem:[%s5597_s1 + $0x120] sm:$0xff]   ;;  %v4435_v48 = vld [vmem:[%s5597_s1 + $0x150] sm:$0xff]  }
  0x15   : > { %3905 = vmatprep.subr.bf16.mxu1 %v4522_v1  ;;  %1593 = vperm.xlu0 %4392, %v308_v38   ;;  %v4434_v49 = vld [vmem:[%s5597_s1 + $0x128] sm:$0xff]   ;;  %v4437_v50 = vld [vmem:[%s5597_s1 + $0x158] sm:$0xff]   ;;  %v4436_v51 = vld [vmem:[%s5597_s1 + $0x130] sm:$0xff]  }
  0x16   : > { %1603 = vperm.xlu1 %4393, %v310_v41   ;;  %v4439_v52 = vld [vmem:[%s5597_s1 + $0x160] sm:$0xff]   ;;  %v4438_v53 = vld [vmem:[%s5597_s1 + $0x138] sm:$0xff]   ;;  %v4441_v54 = vld [vmem:[%s5597_s1 + $0x168] sm:$0xff]  }
  0x17   : > { %3882 = vmatpush3.bf16.msra.mxu0 %v4402_v10  ;;  %v4440_v55 = vld [vmem:[%s5597_s1 + $0x140] sm:$0xff]   ;;  %v4443_v56 = vld [vmem:[%s5597_s1 + $0x170] sm:$0xff]   ;;  %v4442_v57 = vld [vmem:[%s5597_s1 + $0x148] sm:$0xff]  }
  0x18   : > { %3906 = vmatpush3.bf16.msra.mxu1 %v4403_v11  ;;  %3883 = vmatprep.subr.bf16.mxu0 %v4522_v1  ;;  %v4445_v58 = vld [vmem:[%s5597_s1 + $0x178] sm:$0xff]   ;;  %v4444_v59 = vld [vmem:[%s5597_s1 + $0x180] sm:$0xff]   ;;  %v4446_v60 = vld [vmem:[%s5597_s1 + $0x188] sm:$0xff]  }
  0x19   : > { %3907 = vmatprep.subr.bf16.mxu1 %v4522_v1  ;;  %1608 = vperm.xlu0 %4392, %v311_v43   ;;  %v4447_v61 = vld [vmem:[%s5597_s1 + $0x190] sm:$0xff]   ;;  %v4448_v62 = vld [vmem:[%s5597_s1 + $0x198] sm:$0xff]   ;;  %v4449_v63 = vld [vmem:[%s5597_s1 + $0x1a0] sm:$0xff]  }
  0x1a   : > { %v4450_v0 = vld [vmem:[%s5597_s1 + $0x1a8] sm:$0xff]   ;;  %v4451_v2 = vld [vmem:[%s5598_s2] sm:$0xff]   ;;  %v4452_v3 = vld [vmem:[%s5598_s2 + $0x30] sm:$0xff]  }
  0x1b   : > { %3884 = vmatpush3.bf16.msra.mxu0 %v4404_v12  ;;  %v4453_v4 = vld [vmem:[%s5598_s2 + $0x8] sm:$0xff]   ;;  %v4454_v5 = vld [vmem:[%s5598_s2 + $0x38] sm:$0xff]   ;;  %v4455_v6 = vld [vmem:[%s5598_s2 + $0x10] sm:$0xff]  }
  0x1c   : > { %3908 = vmatpush3.bf16.msra.mxu1 %v4405_v14  ;;  %3921 = vmatprep.subr.bf16.mxu0 %v4522_v1  ;;  %v4456_v7 = vld [vmem:[%s5598_s2 + $0x40] sm:$0xff]   ;;  %v4457_v8 = vld [vmem:[%s5598_s2 + $0x18] sm:$0xff]   ;;  %v4458_v9 = vld [vmem:[%s5598_s2 + $0x48] sm:$0xff]  }
  0x1d   : > { %3945 = vmatprep.subr.bf16.mxu1 %v4522_v1  ;;  %v4459_v10 = vld [vmem:[%s5598_s2 + $0x20] sm:$0xff]   ;;  %v4460_v11 = vld [vmem:[%s5598_s2 + $0x50] sm:$0xff]   ;;  %v4461_v12 = vld [vmem:[%s5598_s2 + $0x28] sm:$0xff]  }
  0x1e   : > { %3886 = vmatmul.mubr.msk.bf16.vlgmr.msra.gmra.mrb[0].mxu0 %vm317_vm1, %v4655_v13  ;;  %v453_v39 = vld [vmem:[#allocation2 + $0x20] sm:$0xf]  ;;  %v452_v43 = vld [vmem:[#allocation2 + $0x18] sm:$0xff] }
  0x1f   : > { %3910 = vmatmul.mubr.msk.bf16.vlgmr.msra.gmra.mrb[0].mxu1 %vm317_vm1, %v4655_v13  ;;  %3922 = vmatpush3.bf16.msra.mxu0 %v4407_v15  ;;  %v449_v15 = vld [vmem:[#allocation2] sm:$0xff] }
  0x20   : > { %3946 = vmatpush3.bf16.msra.mxu1 %v4408_v16  ;;  %3923 = vmatprep.subr.bf16.mxu0 %v4522_v1 }
  0x21   : > { %3947 = vmatprep.subr.bf16.mxu1 %v4522_v1  ;;  %3889 = vmatprep.mubr.msk.bf16.mxu0 %vm4523_vm0, %v4522_v1 }
  0x22   : > { %3913 = vmatprep.mubr.msk.bf16.mxu1 %vm4523_vm0, %v4522_v1 }
  0x23   : > { %3924 = vmatpush3.bf16.msra.mxu0 %v4409_v17 }
  0x24   : > { %3948 = vmatpush3.bf16.msra.mxu1 %v4410_v19  ;;  %3925 = vmatprep.subr.bf16.mxu0 %v4522_v1 }
  0x25   : > { %3949 = vmatprep.subr.bf16.mxu1 %v4522_v1 }
  0x26   : > { %3890 = vmatmul.mubr.msk.bf16.gmra.mrb[4].mxu0 %vm317_vm1, %v4678_v18 }
  0x27   : > { %3914 = vmatmul.mubr.msk.bf16.gmra.mrb[4].mxu1 %vm317_vm1, %v4678_v18  ;;  %3926 = vmatpush3.bf16.msra.mxu0 %v4412_v20 }
  0x28   : > { %3950 = vmatpush3.bf16.msra.mxu1 %v4413_v21  ;;  %3927 = vmatprep.subr.bf16.mxu0 %v4522_v1 }
  0x29   : > { %3951 = vmatprep.subr.bf16.mxu1 %v4522_v1  ;;  %3893 = vmatprep.mubr.msk.bf16.mxu0 %vm4523_vm0, %v4522_v1 }
  0x2a   : > { %3917 = vmatprep.mubr.msk.bf16.mxu1 %vm4523_vm0, %v4522_v1 }
  0x2b   : > { %3928 = vmatpush3.bf16.msra.mxu0 %v4414_v22  ;;  %v450_v22 = vld [vmem:[#allocation2 + $0x8] sm:$0xff] }
  0x2c   : > { %3952 = vmatpush3.bf16.msra.mxu1 %v4415_v24  ;;  %3929 = vmatprep.subr.bf16.mxu0 %v4522_v1 }
  0x2d   : > { %3953 = vmatprep.subr.bf16.mxu1 %v4522_v1 }
  0x2e   : > { %3894 = vmatmul.mubr.msk.bf16.gmra.mrb[8].mxu0 %vm317_vm1, %v4712_v25 }
  0x2f   : > { %3918 = vmatmul.mubr.msk.bf16.gmra.mrb[8].mxu1 %vm317_vm1, %v4712_v25  ;;  %3930 = vmatpush3.bf16.msra.mxu0 %v4417_v26 }
  0x30   : > { %3954 = vmatpush3.bf16.msra.mxu1 %v4418_v27  ;;  %3931 = vmatprep.subr.bf16.mxu0 %v4522_v1 }
  0x31   : > { %3955 = vmatprep.subr.bf16.mxu1 %v4522_v1  ;;  %3933 = vmatprep.mubr.msk.bf16.mxu0 %vm4523_vm0, %v4522_v1 }
  0x32   : > { %3957 = vmatprep.mubr.msk.bf16.mxu1 %vm4523_vm0, %v4522_v1 }
  0x33   : > { %3932 = vmatpush3.bf16.msra.mxu0 %v4419_v28 }
  0x34   : > { %3956 = vmatpush3.bf16.msra.mxu1 %v4420_v29  ;;  %3969 = vmatprep.subr.bf16.mxu0 %v4522_v1 }
  0x35   : > { %3993 = vmatprep.subr.bf16.mxu1 %v4522_v1 }
  0x36   : > { %3934 = vmatmul.mubr.msk.bf16.vlgmr.msra.gmra.mrb[12].mxu0 %vm317_vm1, %v4655_v13 }
  0x37   : > { %3958 = vmatmul.mubr.msk.bf16.vlgmr.msra.gmra.mrb[12].mxu1 %vm317_vm1, %v4655_v13  ;;  %3970 = vmatpush3.bf16.msra.mxu0 %v4421_v30 }
  0x38   : > { %3994 = vmatpush3.bf16.msra.mxu1 %v4422_v31  ;;  %3971 = vmatprep.subr.bf16.mxu0 %v4522_v1 }
  0x39   : > { %3995 = vmatprep.subr.bf16.mxu1 %v4522_v1  ;;  %3937 = vmatprep.mubr.msk.bf16.mxu0 %vm4523_vm0, %v4522_v1 }
  0x3a   : > { %3961 = vmatprep.mubr.msk.bf16.mxu1 %vm4523_vm0, %v4522_v1 }
  0x3b   : > { %3972 = vmatpush3.bf16.msra.mxu0 %v4423_v32 }
  0x3c   : > { %3996 = vmatpush3.bf16.msra.mxu1 %v4424_v33  ;;  %3973 = vmatprep.subr.bf16.mxu0 %v4522_v1 }
  0x3d   : > { %3997 = vmatprep.subr.bf16.mxu1 %v4522_v1 }
  0x3e   : > { %3938 = vmatmul.mubr.msk.bf16.gmra.mrb[16].mxu0 %vm317_vm1, %v4678_v18 }
  0x3f   : > { %3962 = vmatmul.mubr.msk.bf16.gmra.mrb[16].mxu1 %vm317_vm1, %v4678_v18  ;;  %3974 = vmatpush3.bf16.msra.mxu0 %v4425_v34  ;;  %v451_v34 = vld [vmem:[#allocation2 + $0x10] sm:$0xff] }
  0x40   : > { %3998 = vmatpush3.bf16.msra.mxu1 %v4426_v35  ;;  %3975 = vmatprep.subr.bf16.mxu0 %v4522_v1 }
  0x41   : > { %3999 = vmatprep.subr.bf16.mxu1 %v4522_v1  ;;  %3941 = vmatprep.mubr.msk.bf16.mxu0 %vm4523_vm0, %v4522_v1 }
  0x42   : > { %3965 = vmatprep.mubr.msk.bf16.mxu1 %vm4523_vm0, %v4522_v1 }
  0x43   : > { %3976 = vmatpush3.bf16.msra.mxu0 %v4427_v37 }
  0x44   : > { %4000 = vmatpush3.bf16.msra.mxu1 %v4428_v40  ;;  %3977 = vmatprep.subr.bf16.mxu0 %v4522_v1 }
  0x45   : > { %4001 = vmatprep.subr.bf16.mxu1 %v4522_v1 }
  0x46   : > { %3942 = vmatmul.mubr.msk.bf16.gmra.mrb[20].mxu0 %vm317_vm1, %v4712_v25 }
  0x47   : > { %3966 = vmatmul.mubr.msk.bf16.gmra.mrb[20].mxu1 %vm317_vm1, %v4712_v25  ;;  %3978 = vmatpush3.bf16.msra.mxu0 %v4429_v42 }
  0x48   : > { %4002 = vmatpush3.bf16.msra.mxu1 %v4430_v44  ;;  %3979 = vmatprep.subr.bf16.mxu0 %v4522_v1 }
  0x49   : > { %4003 = vmatprep.subr.bf16.mxu1 %v4522_v1  ;;  %3981 = vmatprep.mubr.msk.bf16.mxu0 %vm4523_vm0, %v4522_v1 }
  0x4a   : > { %4005 = vmatprep.mubr.msk.bf16.mxu1 %vm4523_vm0, %v4522_v1 }
  0x4b   : > { %3980 = vmatpush3.bf16.msra.mxu0 %v4431_v45 }
  0x4c   : > { %4004 = vmatpush3.bf16.msra.mxu1 %v4432_v46  ;;  %4017 = vmatprep.subr.bf16.mxu0 %v4522_v1 }
  0x4d   : > { %4041 = vmatprep.subr.bf16.mxu1 %v4522_v1 }
  0x4e   : > { %3982 = vmatmul.mubr.msk.bf16.vlgmr.msra.gmra.mrb[24].mxu0 %vm317_vm1, %v4655_v13 }
  0x4f   : > { %4006 = vmatmul.mubr.msk.bf16.vlgmr.msra.gmra.mrb[24].mxu1 %vm317_vm1, %v4655_v13  ;;  %4018 = vmatpush3.bf16.msra.mxu0 %v4433_v47 }
  0x50   : > { %4019 = vmatprep.subr.bf16.mxu0 %v4522_v1  ;;  %3985 = vmatprep.mubr.msk.bf16.mxu0 %vm4523_vm0, %v4522_v1 }
  0x51   : > { %4009 = vmatprep.mubr.msk.bf16.mxu1 %vm4523_vm0, %v4522_v1  ;;  %4042 = vmatpush3.bf16.msra.mxu1 %v4435_v48 }
  0x52   : > { %4043 = vmatprep.subr.bf16.mxu1 %v4522_v1 }
  0x53   : > { %4020 = vmatpush3.bf16.msra.mxu0 %v4434_v49 }
  0x54   : > { %4021 = vmatprep.subr.bf16.mxu0 %v4522_v1 }
  0x55   : > { %4044 = vmatpush3.bf16.msra.mxu1 %v4437_v50 }
  0x56   : > { %3986 = vmatmul.mubr.msk.bf16.gmra.mrb[28].mxu0 %vm317_vm1, %v4678_v18  ;;  %4045 = vmatprep.subr.bf16.mxu1 %v4522_v1 }
  0x57   : > { %4010 = vmatmul.mubr.msk.bf16.gmra.mrb[28].mxu1 %vm317_vm1, %v4678_v18  ;;  %4022 = vmatpush3.bf16.msra.mxu0 %v4436_v51 }
  0x58   : > { %4023 = vmatprep.subr.bf16.mxu0 %v4522_v1  ;;  %3989 = vmatprep.mubr.msk.bf16.mxu0 %vm4523_vm0, %v4522_v1 }
  0x59   : > { %4013 = vmatprep.mubr.msk.bf16.mxu1 %vm4523_vm0, %v4522_v1  ;;  %4046 = vmatpush3.bf16.msra.mxu1 %v4439_v52 }
  0x5a   : > { %4047 = vmatprep.subr.bf16.mxu1 %v4522_v1 }
  0x5b   : > { %4024 = vmatpush3.bf16.msra.mxu0 %v4438_v53 }
  0x5c   : > { %4025 = vmatprep.subr.bf16.mxu0 %v4522_v1 }
  0x5d   : > { %4048 = vmatpush3.bf16.msra.mxu1 %v4441_v54 }
  0x5e   : > { %3990 = vmatmul.mubr.msk.bf16.gmra.mrb[32].mxu0 %vm317_vm1, %v4712_v25  ;;  %4049 = vmatprep.subr.bf16.mxu1 %v4522_v1 }
  0x5f   : > { %4014 = vmatmul.mubr.msk.bf16.gmra.mrb[32].mxu1 %vm317_vm1, %v4712_v25  ;;  %4026 = vmatpush3.bf16.msra.mxu0 %v4440_v55 }
  0x60   : > { %4027 = vmatprep.subr.bf16.mxu0 %v4522_v1  ;;  %4029 = vmatprep.mubr.msk.bf16.mxu0 %vm4523_vm0, %v4522_v1 }
  0x61   : > { %4050 = vmatpush3.bf16.msra.mxu1 %v4443_v56  ;;  %4053 = vmatprep.mubr.msk.bf16.mxu1 %vm4523_vm0, %v4522_v1 }
  0x62   : > { %4051 = vmatprep.subr.bf16.mxu1 %v4522_v1 }
  0x63   : > { %4028 = vmatpush3.bf16.msra.mxu0 %v4442_v57 }
  0x64   : > { %4065 = vmatprep.subr.bf16.mxu0 %v4522_v1 }
  0x65   : > { %4052 = vmatpush3.bf16.msra.mxu1 %v4445_v58 }
  0x66   : > { %4030 = vmatmul.mubr.msk.bf16.vlgmr.msra.gmra.mrb[36].mxu0 %vm317_vm1, %v4655_v13  ;;  %4089 = vmatprep.subr.bf16.mxu1 %v4522_v1 }
  0x67   : > { %4066 = vmatpush3.bf16.msra.mxu0 %v4444_v59  ;;  %4033 = vmatprep.mubr.msk.bf16.mxu0 %vm4523_vm0, %v4522_v1 }
  0x68   : > { %4067 = vmatprep.subr.bf16.mxu0 %v4522_v1  ;;  %4054 = vmatmul.mubr.msk.bf16.vlgmr.msra.gmra.mrb[36].mxu1 %vm317_vm1, %v4655_v13 }
  0x69   : > { %4057 = vmatprep.mubr.msk.bf16.mxu1 %vm4523_vm0, %v4522_v1  ;;  %4090 = vmatpush3.bf16.msra.mxu1 %v4451_v2 }
  0x6a   : > { %4091 = vmatprep.subr.bf16.mxu1 %v4522_v1 }
  0x6b   : > { %4068 = vmatpush3.bf16.msra.mxu0 %v4446_v60 }
  0x6c   : > { %4069 = vmatprep.subr.bf16.mxu0 %v4522_v1 }
  0x6d   : > { %4092 = vmatpush3.bf16.msra.mxu1 %v4453_v4 }
  0x6e   : > { %4034 = vmatmul.mubr.msk.bf16.gmra.mrb[40].mxu0 %vm317_vm1, %v4678_v18  ;;  %4093 = vmatprep.subr.bf16.mxu1 %v4522_v1 }
  0x6f   : > { %4070 = vmatpush3.bf16.msra.mxu0 %v4447_v61  ;;  %4037 = vmatprep.mubr.msk.bf16.mxu0 %vm4523_vm0, %v4522_v1 }
  0x70   : > { %4071 = vmatprep.subr.bf16.mxu0 %v4522_v1  ;;  %4058 = vmatmul.mubr.msk.bf16.gmra.mrb[40].mxu1 %vm317_vm1, %v4678_v18 }
  0x71   : > { %4061 = vmatprep.mubr.msk.bf16.mxu1 %vm4523_vm0, %v4522_v1  ;;  %4094 = vmatpush3.bf16.msra.mxu1 %v4455_v6 }
  0x72   : > { %4095 = vmatprep.subr.bf16.mxu1 %v4522_v1 }
  0x73   : > { %4072 = vmatpush3.bf16.msra.mxu0 %v4448_v62 }
  0x74   : > { %4073 = vmatprep.subr.bf16.mxu0 %v4522_v1 }
  0x75   : > { %4096 = vmatpush3.bf16.msra.mxu1 %v4457_v8 }
  0x76   : > { %4038 = vmatmul.mubr.msk.bf16.gmra.mrb[44].mxu0 %vm317_vm1, %v4712_v25  ;;  %4097 = vmatprep.subr.bf16.mxu1 %v4522_v1 }
  0x77   : > { %4074 = vmatpush3.bf16.msra.mxu0 %v4449_v63  ;;  %4077 = vmatprep.mubr.msk.bf16.mxu0 %vm4523_vm0, %v4522_v1 }
  0x78   : > { %4075 = vmatprep.subr.bf16.mxu0 %v4522_v1  ;;  %4062 = vmatmul.mubr.msk.bf16.gmra.mrb[44].mxu1 %vm317_vm1, %v4712_v25 }
  0x79   : > { %4101 = vmatprep.mubr.msk.bf16.mxu1 %vm4523_vm0, %v4522_v1  ;;  %4098 = vmatpush3.bf16.msra.mxu1 %v4459_v10 }
  0x7a   : > { %4099 = vmatprep.subr.bf16.mxu1 %v4522_v1 }
  0x7b   : > { %4076 = vmatpush3.bf16.msra.mxu0 %v4450_v0 }
  0x7c   : > { %4113 = vmatprep.subr.bf16.mxu0 %v4522_v1 }
  0x7d   : > { %4100 = vmatpush3.bf16.msra.mxu1 %v4461_v12 }
  0x7e   : > { %4078 = vmatmul.mubr.msk.bf16.vlgmr.msra.gmra.mrb[48].mxu0 %vm317_vm1, %v4655_v13  ;;  %v4462_v13 = vld [vmem:[%s5598_s2 + $0x58] sm:$0xff]   ;;  %4137 = vmatprep.subr.bf16.mxu1 %v4522_v1 }
  0x7f   : > { %4081 = vmatprep.mubr.msk.bf16.mxu0 %vm4523_vm0, %v4522_v1  ;;  %4114 = vmatpush3.bf16.msra.mxu0 %v4452_v3 }
  0x80   : > { %4115 = vmatprep.subr.bf16.mxu0 %v4522_v1 }
  0x83   : > { %4116 = vmatpush3.bf16.msra.mxu0 %v4454_v5 }
  0x84   : > { %4117 = vmatprep.subr.bf16.mxu0 %v4522_v1 }
  0x86   : > { %4082 = vmatmul.mubr.msk.bf16.gmra.mrb[52].mxu0 %vm317_vm1, %v4678_v18 }
  0x87   : > { %4085 = vmatprep.mubr.msk.bf16.mxu0 %vm4523_vm0, %v4522_v1  ;;  %4118 = vmatpush3.bf16.msra.mxu0 %v4456_v7 }
  0x88   : > { %4119 = vmatprep.subr.bf16.mxu0 %v4522_v1 }
  0x8b   : > { %4120 = vmatpush3.bf16.msra.mxu0 %v4458_v9 }
  0x8c   : > { %4121 = vmatprep.subr.bf16.mxu0 %v4522_v1 }
  0x8e   : > { %4086 = vmatmul.mubr.msk.bf16.gmra.mrb[56].mxu0 %vm317_vm1, %v4712_v25 }
  0x8f   : > { %4125 = vmatprep.mubr.msk.bf16.mxu0 %vm4523_vm0, %v4522_v1  ;;  %4122 = vmatpush3.bf16.msra.mxu0 %v4460_v11 }
  0x90   : > { %4123 = vmatprep.subr.bf16.mxu0 %v4522_v1 }
  0x93   : > { %4124 = vmatpush3.bf16.msra.mxu0 %v4462_v13 }
  0x94   : > { %4161 = vmatprep.subr.bf16.mxu0 %v4522_v1 }
  0xf1   : > { %v428_v14 = vpop.f32.mrb[0].mxu0 }
  0xf2   : > { %v459_v16 = vrot.slane %v428_v14, 1  ;;  %v3887_v17 = vpop.f32.mrb[1].mxu0  ;;  %v565_v18 = vpop.f32.mrb[0].mxu1 }
  0xf3   : > { %v431_v19 = vpop.f32.mrb[2].mxu0  ;;  %v3911_v20 = vpop.f32.mrb[1].mxu1  ;;  %v596_v27 = vrot.slane %v565_v18, 2 }
  0xf4   : > { %v471_v21 = vsel %vm458_vm3, 0.0, %v459_v16  ;;  %v460_v23 = vrot.slane %v431_v19, 1  ;;  %v3888_v24 = vpop.f32.mrb[3].mxu0  ;;  %v568_v25 = vpop.f32.mrb[2].mxu1 }
  0xf5   : > { %v472_v26 = vadd.f32 %v471_v21, %v449_v15  ;;  %v597_v28 = vrot.slane %v568_v25, 2  ;;  %v3912_v29 = vpop.f32.mrb[3].mxu1  ;;  %v608_v45 = vsel %vm595_vm4, 0.0, %v596_v27 }
  0xf6   : > { %v461_v30 = vsel %vm458_vm3, %v459_v16, %v460_v23 }
  0xf7   : > { %477 = vst.msk [vmem:[#allocation2] sm:$0xff] %vm317_vm1, %v472_v26  ;;  %v473_v31 = vadd.f32 %v461_v30, %v450_v22  ;;  %v598_v32 = vsel %vm595_vm4, %v596_v27, %v597_v28 }
  0xf9   : > { %478 = vst.msk [vmem:[#allocation2 + $0x8] sm:$0xff] %vm317_vm1, %v473_v31  ;;  %v436_v33 = vpop.f32.mrb[4].mxu0 }
  0xfa   : > { %v462_v35 = vrot.slane %v436_v33, 1  ;;  %v3891_v36 = vpop.f32.mrb[5].mxu0  ;;  %v573_v37 = vpop.f32.mrb[4].mxu1 }
  0xfb   : > { %v439_v38 = vpop.f32.mrb[6].mxu0  ;;  %v599_v40 = vrot.slane %v573_v37, 2  ;;  %v3915_v41 = vpop.f32.mrb[5].mxu1 }
  0xfc   : > { %v463_v42 = vsel %vm458_vm3, %v460_v23, %v462_v35  ;;  %v464_v44 = vrot.slane %v439_v38, 1  ;;  %v3892_v46 = vpop.f32.mrb[7].mxu0  ;;  %v576_v47 = vpop.f32.mrb[6].mxu1 }
  0xfd   : > { %v474_v48 = vadd.f32 %v463_v42, %v451_v34  ;;  %v600_v49 = vsel %vm595_vm4, %v597_v28, %v599_v40  ;;  %v601_v50 = vrot.slane %v576_v47, 2  ;;  %v3916_v51 = vpop.f32.mrb[7].mxu1 }
  0xfe   : > { %v465_v52 = vsel %vm458_vm3, %v462_v35, %v464_v44  ;;  %v476_v53 = vadd.f32 %v464_v44, %v453_v39  ;;  %v586_v54 = vld [vmem:[#allocation2] sm:$0xff] }
  0xff   : > { %479 = vst.msk [vmem:[#allocation2 + $0x10] sm:$0xff] %vm317_vm1, %v474_v48  ;;  %v475_v55 = vadd.f32 %v465_v52, %v452_v43  ;;  %v609_v56 = vadd.f32 %v608_v45, %v586_v54  ;;  %v602_v57 = vsel %vm595_vm4, %v599_v40, %v601_v50 }
 0x100   : > { %481 = vst.msk [vmem:[#allocation2 + $0x20] sm:$0xf] %vm322_vm2, %v476_v53  ;;  %v587_v58 = vld [vmem:[#allocation2 + $0x8] sm:$0xff] }
 0x101   : > { %480 = vst.msk [vmem:[#allocation2 + $0x18] sm:$0xff] %vm317_vm1, %v475_v55  ;;  %614 = vst.msk [vmem:[#allocation2] sm:$0xff] %vm317_vm1, %v609_v56  ;;  %v610_v59 = vadd.f32 %v598_v32, %v587_v58  ;;  %v444_v60 = vpop.f32.mrb[8].mxu0 }
 0x102   : > { %v3895_v61 = vpop.f32.mrb[9].mxu0  ;;  %v581_v62 = vpop.f32.mrb[8].mxu1 }
 0x103   : > { %615 = vst.msk [vmem:[#allocation2 + $0x8] sm:$0xff] %vm317_vm1, %v610_v59  ;;  %v446_v63 = vpop.f32.mrb[10].mxu0  ;;  %v3919_v0 = vpop.f32.mrb[9].mxu1 }
 0x104   : > { %v3896_v2 = vpop.f32.mrb[11].mxu0  ;;  %v583_v3 = vpop.f32.mrb[10].mxu1 }
 0x105   : > { %v3920_v4 = vpop.f32.mrb[11].mxu1 }
 0x106   : > { %v588_v5 = vld [vmem:[#allocation2 + $0x10] sm:$0xff] }
 0x107   : > { %v590_v6 = vld [vmem:[#allocation2 + $0x20] sm:$0xf]  ;;  %v611_v7 = vadd.f32 %v600_v49, %v588_v5 }
 0x108   : > { %v589_v8 = vld [vmem:[#allocation2 + $0x18] sm:$0xff]  ;;  %v613_v9 = vadd.f32 %v601_v50, %v590_v6  ;;  %v723_v17 = vld [vmem:[#allocation2] sm:$0xff] }
 0x109   : > { %616 = vst.msk [vmem:[#allocation2 + $0x10] sm:$0xff] %vm317_vm1, %v611_v7  ;;  %v612_v10 = vadd.f32 %v602_v57, %v589_v8  ;;  %v702_v11 = vpop.f32.mrb[12].mxu0 }
 0x10a   : > { %618 = vst.msk [vmem:[#allocation2 + $0x20] sm:$0xf] %vm322_vm2, %v613_v9  ;;  %v733_v12 = vrot.slane %v702_v11, 3  ;;  %v3935_v13 = vpop.f32.mrb[13].mxu0  ;;  %v839_v14 = vpop.f32.mrb[12].mxu1  ;;  %v724_v26 = vld [vmem:[#allocation2 + $0x8] sm:$0xff] }
 0x10b   : > { %617 = vst.msk [vmem:[#allocation2 + $0x18] sm:$0xff] %vm317_vm1, %v612_v10  ;;  %v705_v15 = vpop.f32.mrb[14].mxu0  ;;  %v3959_v16 = vpop.f32.mrb[13].mxu1  ;;  %v872_v23 = vrot.slane %v839_v14, 7 }
 0x10c   : > { %v745_v18 = vsel %vm732_vm5, 0.0, %v733_v12  ;;  %v734_v19 = vrot.slane %v705_v15, 3  ;;  %v3936_v20 = vpop.f32.mrb[15].mxu0  ;;  %v842_v21 = vpop.f32.mrb[14].mxu1 }
 0x10d   : > { %v746_v22 = vadd.f32 %v745_v18, %v723_v17  ;;  %v873_v24 = vrot.slane %v842_v21, 7  ;;  %v3960_v25 = vpop.f32.mrb[15].mxu1  ;;  %v886_v40 = vsel %vm871_vm6, 0.0, %v872_v23 }
 0x10e   : > { %v735_v27 = vsel %vm732_vm5, %v733_v12, %v734_v19 }
 0x10f   : > { %751 = vst.msk [vmem:[#allocation2] sm:$0xff] %vm317_vm1, %v746_v22  ;;  %v747_v28 = vadd.f32 %v735_v27, %v724_v26  ;;  %v874_v29 = vsel %vm871_vm6, %v872_v23, %v873_v24 }
 0x110   : > { %v725_v37 = vld [vmem:[#allocation2 + $0x10] sm:$0xff] }
 0x111   : > { %752 = vst.msk [vmem:[#allocation2 + $0x8] sm:$0xff] %vm317_vm1, %v747_v28  ;;  %v710_v30 = vpop.f32.mrb[16].mxu0  ;;  %v727_v43 = vld [vmem:[#allocation2 + $0x20] sm:$0xf] }
 0x112   : > { %v736_v31 = vrot.slane %v710_v30, 3  ;;  %v3939_v32 = vpop.f32.mrb[17].mxu0  ;;  %v847_v33 = vpop.f32.mrb[16].mxu1  ;;  %v726_v48 = vld [vmem:[#allocation2 + $0x18] sm:$0xff] }
 0x113   : > { %v713_v34 = vpop.f32.mrb[18].mxu0  ;;  %v875_v35 = vrot.slane %v847_v33, 7  ;;  %v3963_v36 = vpop.f32.mrb[17].mxu1 }
 0x114   : > { %v737_v38 = vsel %vm732_vm5, %v734_v19, %v736_v31  ;;  %v738_v39 = vrot.slane %v713_v34, 3  ;;  %v3940_v41 = vpop.f32.mrb[19].mxu0  ;;  %v850_v42 = vpop.f32.mrb[18].mxu1 }
 0x115   : > { %v748_v44 = vadd.f32 %v737_v38, %v725_v37  ;;  %v876_v45 = vsel %vm871_vm6, %v873_v24, %v875_v35  ;;  %v877_v46 = vrot.slane %v850_v42, 7  ;;  %v3964_v47 = vpop.f32.mrb[19].mxu1 }
 0x116   : > { %v739_v49 = vsel %vm732_vm5, %v736_v31, %v738_v39  ;;  %v750_v50 = vadd.f32 %v738_v39, %v727_v43  ;;  %v861_v51 = vld [vmem:[#allocation2] sm:$0xff] }
 0x117   : > { %753 = vst.msk [vmem:[#allocation2 + $0x10] sm:$0xff] %vm317_vm1, %v748_v44  ;;  %v749_v52 = vadd.f32 %v739_v49, %v726_v48  ;;  %v887_v53 = vadd.f32 %v886_v40, %v861_v51  ;;  %v878_v54 = vsel %vm871_vm6, %v875_v35, %v877_v46 }
 0x118   : > { %755 = vst.msk [vmem:[#allocation2 + $0x20] sm:$0xf] %vm322_vm2, %v750_v50  ;;  %v862_v55 = vld [vmem:[#allocation2 + $0x8] sm:$0xff] }
 0x119   : > { %754 = vst.msk [vmem:[#allocation2 + $0x18] sm:$0xff] %vm317_vm1, %v749_v52  ;;  %892 = vst.msk [vmem:[#allocation2] sm:$0xff] %vm317_vm1, %v887_v53  ;;  %v888_v56 = vadd.f32 %v874_v29, %v862_v55  ;;  %v718_v57 = vpop.f32.mrb[20].mxu0 }
 0x11a   : > { %v3943_v58 = vpop.f32.mrb[21].mxu0  ;;  %v855_v59 = vpop.f32.mrb[20].mxu1 }
 0x11b   : > { %893 = vst.msk [vmem:[#allocation2 + $0x8] sm:$0xff] %vm317_vm1, %v888_v56  ;;  %v720_v60 = vpop.f32.mrb[22].mxu0  ;;  %v879_v61 = vrot.slane %v855_v59, 7  ;;  %v3967_v62 = vpop.f32.mrb[21].mxu1 }
 0x11c   : > { %v3944_v63 = vpop.f32.mrb[23].mxu0  ;;  %v858_v0 = vpop.f32.mrb[22].mxu1 }
 0x11d   : > { %v880_v2 = vsel %vm871_vm6, %v877_v46, %v879_v61  ;;  %v3968_v3 = vpop.f32.mrb[23].mxu1 }
 0x11e   : > { %v863_v4 = vld [vmem:[#allocation2 + $0x10] sm:$0xff] }
 0x11f   : > { %v865_v5 = vld [vmem:[#allocation2 + $0x20] sm:$0xf]  ;;  %v889_v6 = vadd.f32 %v876_v45, %v863_v4 }
 0x120   : > { %v864_v7 = vld [vmem:[#allocation2 + $0x18] sm:$0xff]  ;;  %v891_v8 = vadd.f32 %v880_v2, %v865_v5  ;;  %v1002_v9 = vld [vmem:[#allocation2] sm:$0xff] }
 0x121   : > { %894 = vst.msk [vmem:[#allocation2 + $0x10] sm:$0xff] %vm317_vm1, %v889_v6  ;;  %v890_v10 = vadd.f32 %v878_v54, %v864_v7  ;;  %v980_v11 = vpop.f32.mrb[24].mxu0 }
 0x122   : > { %896 = vst.msk [vmem:[#allocation2 + $0x20] sm:$0xf] %vm322_vm2, %v891_v8  ;;  %v1007_v12 = vadd.f32 %v1002_v9, %v980_v11  ;;  %v3983_v13 = vpop.f32.mrb[25].mxu0  ;;  %v1003_v14 = vld [vmem:[#allocation2 + $0x8] sm:$0xff]  ;;  %v1100_v15 = vpop.f32.mrb[24].mxu1 }
 0x123   : > { %895 = vst.msk [vmem:[#allocation2 + $0x18] sm:$0xff] %vm317_vm1, %v890_v10  ;;  %v983_v16 = vpop.f32.mrb[26].mxu0  ;;  %v1132_v17 = vrot.slane %v1100_v15, 1  ;;  %v4007_v18 = vpop.f32.mrb[25].mxu1 }
 0x124   : > { %1012 = vst.msk [vmem:[#allocation2] sm:$0xff] %vm317_vm1, %v1007_v12  ;;  %v1008_v19 = vadd.f32 %v1003_v14, %v983_v16  ;;  %v3984_v20 = vpop.f32.mrb[27].mxu0  ;;  %v1103_v21 = vpop.f32.mrb[26].mxu1 }
 0x125   : > { %v1133_v22 = vrot.slane %v1103_v21, 1  ;;  %v4008_v23 = vpop.f32.mrb[27].mxu1 }
 0x126   : > { %1013 = vst.msk [vmem:[#allocation2 + $0x8] sm:$0xff] %vm317_vm1, %v1008_v19 }
 0x127   : > { %v1134_v24 = vsel %vm458_vm3, %v1132_v17, %v1133_v22 }
 0x128   : > { %v1004_v25 = vld [vmem:[#allocation2 + $0x10] sm:$0xff] }
 0x129   : > { %v988_v26 = vpop.f32.mrb[28].mxu0  ;;  %v1006_v45 = vld [vmem:[#allocation2 + $0x20] sm:$0xf] }
 0x12a   : > { %v1009_v27 = vadd.f32 %v1004_v25, %v988_v26  ;;  %v3987_v28 = vpop.f32.mrb[29].mxu0  ;;  %v1108_v29 = vpop.f32.mrb[28].mxu1  ;;  %v1005_v30 = vld [vmem:[#allocation2 + $0x18] sm:$0xff] }
 0x12b   : > { %v1122_v31 = vld [vmem:[#allocation2] sm:$0xff]  ;;  %v1135_v32 = vrot.slane %v1108_v29, 1  ;;  %v991_v33 = vpop.f32.mrb[30].mxu0  ;;  %v4011_v34 = vpop.f32.mrb[29].mxu1 }
 0x12c   : > { %v1148_v35 = vadd.f32 %v1134_v24, %v1122_v31  ;;  %1014 = vst.msk [vmem:[#allocation2 + $0x10] sm:$0xff] %vm317_vm1, %v1009_v27  ;;  %v1010_v36 = vadd.f32 %v1005_v30, %v991_v33  ;;  %v3988_v37 = vpop.f32.mrb[31].mxu0  ;;  %v1111_v38 = vpop.f32.mrb[30].mxu1 }
 0x12d   : > { %v1123_v39 = vld [vmem:[#allocation2 + $0x8] sm:$0xff]  ;;  %v1136_v40 = vsel %vm458_vm3, %v1133_v22, %v1135_v32  ;;  %v1137_v41 = vrot.slane %v1111_v38, 1  ;;  %v4012_v42 = vpop.f32.mrb[31].mxu1 }
 0x12e   : > { %1153 = vst.msk [vmem:[#allocation2] sm:$0xff] %vm317_vm1, %v1148_v35  ;;  %v1149_v43 = vadd.f32 %v1136_v40, %v1123_v39  ;;  %1015 = vst.msk [vmem:[#allocation2 + $0x18] sm:$0xff] %vm317_vm1, %v1010_v36 }
 0x12f   : > { %v1138_v44 = vsel %vm458_vm3, %v1135_v32, %v1137_v41 }
 0x130   : > { %1154 = vst.msk [vmem:[#allocation2 + $0x8] sm:$0xff] %vm317_vm1, %v1149_v43 }
 0x131   : > { %v996_v46 = vpop.f32.mrb[32].mxu0 }
 0x132   : > { %v1011_v47 = vadd.f32 %v1006_v45, %v996_v46  ;;  %v3991_v48 = vpop.f32.mrb[33].mxu0  ;;  %v1116_v49 = vpop.f32.mrb[32].mxu1 }
 0x133   : > { %v1124_v50 = vld [vmem:[#allocation2 + $0x10] sm:$0xff]  ;;  %v1139_v51 = vrot.slane %v1116_v49, 1  ;;  %v999_v52 = vpop.f32.mrb[34].mxu0  ;;  %v4015_v53 = vpop.f32.mrb[33].mxu1 }
 0x134   : > { %v1150_v54 = vadd.f32 %v1138_v44, %v1124_v50  ;;  %1016 = vst.msk [vmem:[#allocation2 + $0x20] sm:$0xf] %vm322_vm2, %v1011_v47  ;;  %v3992_v55 = vpop.f32.mrb[35].mxu0  ;;  %v1119_v56 = vpop.f32.mrb[34].mxu1 }
 0x135   : > { %v1125_v57 = vld [vmem:[#allocation2 + $0x18] sm:$0xff]  ;;  %v1140_v58 = vsel %vm458_vm3, %v1137_v41, %v1139_v51  ;;  %v4016_v59 = vpop.f32.mrb[35].mxu1  ;;  %v1147_v61 = vsel %vm1146_vm7, %v1139_v51, 0.0  ;;  %v1263_v11 = vld [vmem:[#allocation2] sm:$0xff] }
 0x136   : > { %1155 = vst.msk [vmem:[#allocation2 + $0x10] sm:$0xff] %vm317_vm1, %v1150_v54  ;;  %v1151_v60 = vadd.f32 %v1140_v58, %v1125_v57 }
 0x137   : > { %v1264_v22 = vld [vmem:[#allocation2 + $0x8] sm:$0xff] }
 0x138   : > { %1156 = vst.msk [vmem:[#allocation2 + $0x18] sm:$0xff] %vm317_vm1, %v1151_v60 }
 0x139   : > { %v1241_v62 = vpop.f32.mrb[36].mxu0 }
 0x13a   : > { %v4031_v63 = vpop.f32.mrb[37].mxu0  ;;  %v1273_v5 = vrot.slane %v1241_v62, 5 }
 0x13b   : > { %v1126_v0 = vld [vmem:[#allocation2 + $0x20] sm:$0xf]  ;;  %v1244_v2 = vpop.f32.mrb[38].mxu0  ;;  %v1380_v3 = vpop.f32.mrb[36].mxu1 }
 0x13c   : > { %v1152_v4 = vadd.f32 %v1147_v61, %v1126_v0  ;;  %v1274_v6 = vrot.slane %v1244_v2, 5  ;;  %v4032_v7 = vpop.f32.mrb[39].mxu0  ;;  %v1413_v8 = vrot.slane %v1380_v3, 6  ;;  %v4055_v9 = vpop.f32.mrb[37].mxu1 }
 0x13d   : > { %v1383_v10 = vpop.f32.mrb[38].mxu1  ;;  %v1265_v31 = vld [vmem:[#allocation2 + $0x10] sm:$0xff] }
 0x13e   : > { %1157 = vst.msk [vmem:[#allocation2 + $0x20] sm:$0xf] %vm322_vm2, %v1152_v4  ;;  %v1275_v12 = vsel %vm1146_vm7, %v1273_v5, %v1274_v6  ;;  %v1414_v13 = vrot.slane %v1383_v10, 6  ;;  %v4056_v14 = vpop.f32.mrb[39].mxu1 }
 0x13f   : > { %v1287_v15 = vadd.f32 %v1275_v12, %v1263_v11  ;;  %v1266_v50 = vld [vmem:[#allocation2 + $0x18] sm:$0xff] }
 0x140   : > { %v1415_v16 = vsel %vm1412_vm8, %v1413_v8, %v1414_v13 }
 0x141   : > { %1292 = vst.msk [vmem:[#allocation2] sm:$0xff] %vm317_vm1, %v1287_v15  ;;  %v1249_v17 = vpop.f32.mrb[40].mxu0 }
 0x142   : > { %v1276_v18 = vrot.slane %v1249_v17, 5  ;;  %v4035_v19 = vpop.f32.mrb[41].mxu0 }
 0x143   : > { %v1252_v20 = vpop.f32.mrb[42].mxu0  ;;  %v1388_v21 = vpop.f32.mrb[40].mxu1 }
 0x144   : > { %v1277_v23 = vsel %vm1146_vm7, %v1274_v6, %v1276_v18  ;;  %v1278_v24 = vrot.slane %v1252_v20, 5  ;;  %v4036_v25 = vpop.f32.mrb[43].mxu0  ;;  %v1416_v26 = vrot.slane %v1388_v21, 6  ;;  %v4059_v27 = vpop.f32.mrb[41].mxu1 }
 0x145   : > { %v1267_v28 = vld [vmem:[#allocation2 + $0x20] sm:$0xf]  ;;  %v1288_v29 = vadd.f32 %v1277_v23, %v1264_v22  ;;  %v1391_v30 = vpop.f32.mrb[42].mxu1  ;;  %v5096_v25 = vpop.permute.xlu0 %1588 }
 0x146   : > { %1296 = vst.msk [vmem:[#allocation2 + $0x20] sm:$0xf] %vm322_vm2, %v1267_v28  ;;  %v1279_v32 = vsel %vm1146_vm7, %v1276_v18, %v1278_v24  ;;  %v1417_v33 = vsel %vm1412_vm8, %v1414_v13, %v1416_v26  ;;  %v1418_v34 = vrot.slane %v1391_v30, 6  ;;  %v4060_v35 = vpop.f32.mrb[43].mxu1 }
 0x147   : > { %1293 = vst.msk [vmem:[#allocation2 + $0x8] sm:$0xff] %vm317_vm1, %v1288_v29  ;;  %v1289_v36 = vadd.f32 %v1279_v32, %v1265_v31 }
 0x148   : > { %v1402_v37 = vld [vmem:[#allocation2] sm:$0xff]  ;;  %v1419_v38 = vsel %vm1412_vm8, %v1416_v26, %v1418_v34 }
 0x149   : > { %1294 = vst.msk [vmem:[#allocation2 + $0x10] sm:$0xff] %vm317_vm1, %v1289_v36  ;;  %v1427_v39 = vadd.f32 %v1415_v16, %v1402_v37  ;;  %v1257_v40 = vpop.f32.mrb[44].mxu0  ;;  %v5102_v37 = vpop.permute.xlu0 %1593 }
 0x14a   : > { %v1280_v41 = vrot.slane %v1257_v40, 5  ;;  %v4039_v42 = vpop.f32.mrb[45].mxu0 }
 0x14b   : > { %1432 = vst.msk [vmem:[#allocation2] sm:$0xff] %vm317_vm1, %v1427_v39  ;;  %v1260_v43 = vpop.f32.mrb[46].mxu0  ;;  %v1396_v44 = vpop.f32.mrb[44].mxu1  ;;  %v4464_v42 = vld [vmem:[%s5598_s2 + $0x90] sm:$0xff]  }
 0x14c   : > { %v1281_v45 = vsel %vm1146_vm7, %v1278_v24, %v1280_v41  ;;  %v4040_v46 = vpop.f32.mrb[47].mxu0  ;;  %v1420_v47 = vrot.slane %v1396_v44, 6  ;;  %v4063_v48 = vpop.f32.mrb[45].mxu1  ;;  %v4463_v41 = vld [vmem:[%s5598_s2 + $0x60] sm:$0xff]  }
 0x14d   : > { %v1406_v49 = vld [vmem:[#allocation2 + $0x20] sm:$0xf]  ;;  %v1286_v51 = vsel %vm458_vm3, %v1281_v45, 0.0  ;;  %v1399_v52 = vpop.f32.mrb[46].mxu1  ;;  %v5117_v44 = vpop.permute.xlu1 %1598  ;;  %v4465_v46 = vld [vmem:[%s5598_s2 + $0x68] sm:$0xff]  }
 0x14e   : > { %1436 = vst.msk [vmem:[#allocation2 + $0x20] sm:$0xf] %vm322_vm2, %v1406_v49  ;;  %v1403_v53 = vld [vmem:[#allocation2 + $0x8] sm:$0xff]  ;;  %v1290_v54 = vadd.f32 %v1286_v51, %v1266_v50  ;;  %v1421_v55 = vsel %vm1412_vm8, %v1418_v34, %v1420_v47  ;;  %v4064_v56 = vpop.f32.mrb[47].mxu1  ;;  %v4466_v47 = vld [vmem:[%s5598_s2 + $0x98] sm:$0xff]  }
 0x14f   : > { %v1428_v57 = vadd.f32 %v1417_v33, %v1403_v53  ;;  %v1426_v7 = vsel %vm595_vm4, %v1421_v55, 0.0  ;;  %v4467_v53 = vld [vmem:[%s5598_s2 + $0x70] sm:$0xff]  }
 0x150   : > { %1295 = vst.msk [vmem:[#allocation2 + $0x18] sm:$0xff] %vm317_vm1, %v1290_v54  ;;  %v1404_v58 = vld [vmem:[#allocation2 + $0x10] sm:$0xff]  ;;  %v4468_v54 = vld [vmem:[%s5598_s2 + $0xa0] sm:$0xff]  }
 0x151   : > { %1433 = vst.msk [vmem:[#allocation2 + $0x8] sm:$0xff] %vm317_vm1, %v1428_v57  ;;  %v1429_v59 = vadd.f32 %v1419_v38, %v1404_v58  ;;  %v1520_v60 = vpop.f32.mrb[48].mxu0  ;;  %v5137_v50 = vpop.permute.xlu1 %1603  ;;  %v4469_v58 = vld [vmem:[%s5598_s2 + $0x78] sm:$0xff]  }
 0x152   : > { %v4079_v61 = vpop.f32.mrb[49].mxu0  ;;  %v1552_v63 = vrot.slane %v1520_v60, 7  ;;  %v1542_v4 = vld [vmem:[#allocation2] sm:$0xff]  ;;  %v5152_v57 = vpop.permute.xlu0 %1608 }
 0x153   : > { %1434 = vst.msk [vmem:[#allocation2 + $0x10] sm:$0xff] %vm317_vm1, %v1429_v59  ;;  %v1523_v62 = vpop.f32.mrb[50].mxu0  ;;  %v4470_v59 = vld [vmem:[%s5598_s2 + $0xa8] sm:$0xff]   ;;  %v4471_v61 = vld [vmem:[%s5598_s2 + $0x80] sm:$0xff]  }
 0x154   : > { %v1553_v0 = vrot.slane %v1523_v62, 7  ;;  %v4080_v2 = vpop.f32.mrb[51].mxu0  ;;  %v4472_v62 = vld [vmem:[%s5598_s2 + $0xb0] sm:$0xff]  }
 0x155   : > { %v1546_v3 = vld [vmem:[#allocation2 + $0x20] sm:$0xf]  ;;  %v4474_v2 = vld [vmem:[%s5598_s2 + $0xb8] sm:$0xff]  }
 0x156   : > { %v1554_v5 = vsel %vm871_vm6, %v1552_v63, %v1553_v0  ;;  %1575 = vst.msk [vmem:[#allocation2 + $0x20] sm:$0xf] %vm322_vm2, %v1546_v3  ;;  %v4475_v3 = vld [vmem:[%s5598_s2 + $0xc0] sm:$0xff]  }
 0x157   : > { %v1405_v6 = vld [vmem:[#allocation2 + $0x18] sm:$0xff]  ;;  %v1566_v8 = vadd.f32 %v1554_v5, %v1542_v4  ;;  %v4476_v4 = vld [vmem:[%s5598_s2 + $0xf0] sm:$0xff]   ;;  %v4477_v5 = vld [vmem:[%s5598_s2 + $0xc8] sm:$0xff]  }
 0x158   : > { %v1430_v9 = vadd.f32 %v1426_v7, %v1405_v6  ;;  %v1543_v14 = vld [vmem:[#allocation2 + $0x8] sm:$0xff]  ;;  %v4478_v6 = vld [vmem:[%s5598_s2 + $0xf8] sm:$0xff]   ;;  %v4479_v7 = vld [vmem:[%s5598_s2 + $0xd0] sm:$0xff]  }
 0x159   : > { %1571 = vst.msk [vmem:[#allocation2] sm:$0xff] %vm317_vm1, %v1566_v8  ;;  %v1528_v10 = vpop.f32.mrb[52].mxu0  ;;  %v4480_v8 = vld [vmem:[%s5598_s2 + $0x100] sm:$0xff]  }
 0x15a   : > { %1435 = vst.msk [vmem:[#allocation2 + $0x18] sm:$0xff] %vm317_vm1, %v1430_v9  ;;  %v1555_v11 = vrot.slane %v1528_v10, 7  ;;  %v4083_v12 = vpop.f32.mrb[53].mxu0  ;;  %v1544_v20 = vld [vmem:[#allocation2 + $0x10] sm:$0xff]  ;;  %v4481_v9 = vld [vmem:[%s5598_s2 + $0xd8] sm:$0xff]   ;;  %v4482_v10 = vld [vmem:[%s5598_s2 + $0x108] sm:$0xff]  }
 0x15b   : > { %v1531_v13 = vpop.f32.mrb[54].mxu0  ;;  %v4484_v12 = vld [vmem:[%s5598_s2 + $0x110] sm:$0xff]  }
 0x15c   : > { %v1556_v15 = vsel %vm871_vm6, %v1553_v0, %v1555_v11  ;;  %v1557_v16 = vrot.slane %v1531_v13, 7  ;;  %v4084_v17 = vpop.f32.mrb[55].mxu0  ;;  %v4473_v0 = vld [vmem:[%s5598_s2 + $0x88] sm:$0xff]  }
 0x15d   : > { %v1567_v18 = vadd.f32 %v1556_v15, %v1543_v14  ;;  %v5087_v19 = vld [vmem:[#allocation2 + $0x20] sm:$0xf]  ;;  %v4485_v13 = vld [vmem:[%s5598_s2 + $0xe8] sm:$0xff]   ;;  %v4486_v14 = vld [vmem:[%s5598_s2 + $0x118] sm:$0xff]  }
 0x15e   : > { %v1558_v21 = vsel %vm871_vm6, %v1555_v11, %v1557_v16  ;;  %1623 = vst.msk [vmem:[#allocation2 + $0x20] sm:$0xf] %vm322_vm2, %v4522_v1  ;;  %v1585_v55 = vmax.f32 %v5087_v19, 0.0  ;;  %v4483_v11 = vld [vmem:[%s5598_s2 + $0xe0] sm:$0xff]   ;;  %v4489_v17 = vld [vmem:[%s5598_s2 + $0x128] sm:$0xff]   ;;  %v4491_v19 = vld [vmem:[%s5598_s2 + $0x130] sm:$0xff]  }
 0x15f   : > { %1572 = vst.msk [vmem:[#allocation2 + $0x8] sm:$0xff] %vm317_vm1, %v1567_v18  ;;  %v1568_v22 = vadd.f32 %v1558_v21, %v1544_v20  ;;  %v4487_v15 = vld [vmem:[%s5598_s2 + $0x120] sm:$0xff]   ;;  %v4490_v18 = vld [vmem:[%s5598_s2 + $0x158] sm:$0xff]  }
 0x160   : > { %v1576_v23 = vld [vmem:[#allocation2] sm:$0xff]  ;;  %v1615_v60 = vmul.f32 %v5152_v57, %v1585_v55  ;;  %v4493_v21 = vld [vmem:[%s5598_s2 + $0x138] sm:$0xff]  }
 0x161   : > { %1619 = vst.msk [vmem:[#allocation2] sm:$0xff] %vm317_vm1, %v4522_v1  ;;  %1573 = vst.msk [vmem:[#allocation2 + $0x10] sm:$0xff] %vm317_vm1, %v1568_v22  ;;  %v1536_v24 = vpop.f32.mrb[56].mxu0  ;;  %v1581_v31 = vmax.f32 %v1576_v23, 0.0  ;;  %v1545_v32 = vld [vmem:[#allocation2 + $0x18] sm:$0xff]  ;;  %v4492_v20 = vld [vmem:[%s5598_s2 + $0x160] sm:$0xff]  }
 0x162   : > { %v1559_v26 = vrot.slane %v1536_v24, 7  ;;  %v4087_v27 = vpop.f32.mrb[57].mxu0  ;;  %v5177_v63 = vpack.c.bf16 %v1615_v60, %v1615_v60  ;;  %v4494_v22 = vld [vmem:[%s5598_s2 + $0x168] sm:$0xff]   ;;  %v4495_v23 = vld [vmem:[%s5598_s2 + $0x140] sm:$0xff]   ;;  %v4496_v24 = vld [vmem:[%s5598_s2 + $0x170] sm:$0xff]  }
 0x163   : > { %v1539_v28 = vpop.f32.mrb[58].mxu0  ;;  %v1611_v39 = vmul.f32 %v5096_v25, %v1581_v31  ;;  %v4498_v27 = vld [vmem:[%s5598_s2 + $0x178] sm:$0xff]  }
 0x164   : > { %v1560_v29 = vsel %vm871_vm6, %v1557_v16, %v1559_v26  ;;  %v4088_v30 = vpop.f32.mrb[59].mxu0  ;;  %v4488_v16 = vld [vmem:[%s5598_s2 + $0x150] sm:$0xff]   ;;  %v4497_v26 = vld [vmem:[%s5598_s2 + $0x148] sm:$0xff]   ;;  %v4499_v28 = vld [vmem:[%s5598_s2 + $0x180] sm:$0xff]  }
 0x165   : > { %v1565_v33 = vsel %vm732_vm5, %v1560_v29, 0.0  ;;  %v4500_v29 = vld [vmem:[%s5598_s2 + $0x188] sm:$0xff]   ;;  %v4501_v30 = vld [vmem:[%s5598_s2 + $0x190] sm:$0xff]   ;;  %v4502_v31 = vld [vmem:[%s5598_s2 + $0x198] sm:$0xff]  }
 0x166   : > { %v1577_v34 = vld [vmem:[#allocation2 + $0x8] sm:$0xff]  ;;  %v1569_v35 = vadd.f32 %v1565_v33, %v1545_v32  ;;  %v4503_v32 = vld [vmem:[%s5598_s2 + $0x1a0] sm:$0xff]  }
 0x167   : > { %v1582_v36 = vmax.f32 %v1577_v34, 0.0  ;;  %1620 = vst.msk [vmem:[#allocation2 + $0x8] sm:$0xff] %vm317_vm1, %v4522_v1  ;;  %v4504_v33 = vld [vmem:[%s5598_s2 + $0x1a8] sm:$0xff]   ;;  %v2882_v34 = vld [vmem:[%s5601_s5] sm:$0xff] }
 0x168   : > { %1574 = vst.msk [vmem:[#allocation2 + $0x18] sm:$0xff] %vm317_vm1, %v1569_v35  ;;  %v1578_v38 = vld [vmem:[#allocation2 + $0x10] sm:$0xff]  ;;  %v2883_v35 = vld [vmem:[%s5601_s5 + $0x8] sm:$0xff] }
 0x169   : > { %v1612_v40 = vmul.f32 %v5102_v37, %v1582_v36  ;;  %1621 = vst.msk [vmem:[#allocation2 + $0x10] sm:$0xff] %vm317_vm1, %v4522_v1  ;;  %v1583_v45 = vmax.f32 %v1578_v38, 0.0  ;;  %v2884_v36 = vld [vmem:[%s5601_s5 + $0x10] sm:$0xff]  ;;  %v4525_v38 = vmov 0.0|0.0  }
 0x16b   : > { %v5115_v43 = vpack.c.bf16 %v1612_v40, %v1611_v39  ;;  %v1613_v51 = vmul.f32 %v5117_v44, %v1583_v45  ;;  %v4356_v39 = vpack.c.bf16 %v2883_v35, %v2882_v34  ;;  %v2885_v40 = vld [vmem:[%s5601_s5 + $0x18] sm:$0xff] }
 0x16d   : > { %4102 = vmatmul.mubr.msk.bf16.vlgmr.msra.gmra.mrb[48].mxu1 %vm317_vm1, %v5115_v43  ;;  %4126 = vmatmul.mubr.msk.bf16.vlgmr.msra.gmra.mrb[60].mxu0 %vm317_vm1, %v5115_v43 }
 0x16e   : > { %4138 = vmatpush3.bf16.msra.mxu1 %v4463_v41  ;;  %4162 = vmatpush3.bf16.msra.mxu0 %v4464_v42  ;;  %v4359_v41 = vpack.c.bf16 %v2885_v40, %v2884_v36  ;;  %v2886_v42 = vld [vmem:[%s5601_s5 + $0x20] sm:$0xff] }
 0x16f   : > { %v1579_v48 = vld [vmem:[#allocation2 + $0x18] sm:$0xff]  ;;  %4139 = vmatprep.subr.bf16.mxu1 %v4522_v1  ;;  %4163 = vmatprep.subr.bf16.mxu0 %v4522_v1 }
 0x170   : > { %v1584_v49 = vmax.f32 %v1579_v48, 0.0  ;;  %1622 = vst.msk [vmem:[#allocation2 + $0x18] sm:$0xff] %vm317_vm1, %v4522_v1  ;;  %4105 = vmatprep.mubr.msk.bf16.mxu1 %vm4523_vm0, %v4522_v1  ;;  %4129 = vmatprep.mubr.msk.bf16.mxu0 %vm4523_vm0, %v4522_v1 }
 0x172   : > { %v1614_v52 = vmul.f32 %v5137_v50, %v1584_v49  ;;  %4140 = vmatpush3.bf16.msra.mxu1 %v4465_v46  ;;  %4164 = vmatpush3.bf16.msra.mxu0 %v4466_v47  ;;  %v2888_v46 = vld [vmem:[%s5601_s5 + $0x30] sm:$0xff]  ;;  %v2889_v47 = vld [vmem:[%s5601_s5 + $0x38] sm:$0xff] }
 0x173   : > { %4141 = vmatprep.subr.bf16.mxu1 %v4522_v1  ;;  %4165 = vmatprep.subr.bf16.mxu0 %v4522_v1 }
 0x174   : > { %v5150_v56 = vpack.c.bf16 %v1614_v52, %v1613_v51  ;;  %v1736_v51 = vld [vmem:[#allocation2] sm:$0xff] }
 0x176   : > { %4106 = vmatmul.mubr.msk.bf16.gmra.mrb[52].mxu1 %vm317_vm1, %v5150_v56  ;;  %4130 = vmatmul.mubr.msk.bf16.gmra.mrb[64].mxu0 %vm317_vm1, %v5150_v56 }
 0x177   : > { %4142 = vmatpush3.bf16.msra.mxu1 %v4467_v53  ;;  %4166 = vmatpush3.bf16.msra.mxu0 %v4468_v54 }
 0x178   : > { %4143 = vmatprep.subr.bf16.mxu1 %v4522_v1  ;;  %4167 = vmatprep.subr.bf16.mxu0 %v4522_v1 }
 0x179   : > { %4109 = vmatprep.mubr.msk.bf16.mxu1 %vm4523_vm0, %v4522_v1  ;;  %4133 = vmatprep.mubr.msk.bf16.mxu0 %vm4523_vm0, %v4522_v1 }
 0x17b   : > { %4144 = vmatpush3.bf16.msra.mxu1 %v4469_v58  ;;  %4168 = vmatpush3.bf16.msra.mxu0 %v4470_v59  ;;  %v4365_v59 = vpack.c.bf16 %v2889_v47, %v2888_v46 }
 0x17c   : > { %4145 = vmatprep.subr.bf16.mxu1 %v4522_v1  ;;  %4169 = vmatprep.subr.bf16.mxu0 %v4522_v1 }
 0x17e   : > { %4110 = vmatmul.mubr.msk.bf16.gmra.mrb[56].mxu1 %vm317_vm1, %v5177_v63  ;;  %4134 = vmatmul.mubr.msk.bf16.gmra.mrb[68].mxu0 %vm317_vm1, %v5177_v63 }
 0x17f   : > { %4146 = vmatpush3.bf16.msra.mxu1 %v4471_v61  ;;  %4170 = vmatpush3.bf16.msra.mxu0 %v4472_v62 }
 0x180   : > { %4147 = vmatprep.subr.bf16.mxu1 %v4522_v1  ;;  %4171 = vmatprep.subr.bf16.mxu0 %v4522_v1 }
 0x181   : > { %4149 = vmatprep.mubr.msk.bf16.mxu1 %vm4523_vm0, %v4522_v1  ;;  %4173 = vmatprep.mubr.msk.bf16.mxu0 %vm4523_vm0, %v4522_v1 }
 0x183   : > { %4148 = vmatpush3.bf16.msra.mxu1 %v4473_v0  ;;  %4172 = vmatpush3.bf16.msra.mxu0 %v4474_v2 }
 0x184   : > { %4185 = vmatprep.subr.bf16.mxu1 %v4522_v1  ;;  %4209 = vmatprep.subr.bf16.mxu0 %v4522_v1 }
 0x186   : > { %4150 = vmatmul.mubr.msk.bf16.vlgmr.msra.gmra.mrb[60].mxu1 %vm317_vm1, %v5115_v43  ;;  %4174 = vmatmul.mubr.msk.bf16.vlgmr.msra.gmra.mrb[72].mxu0 %vm317_vm1, %v5115_v43 }
 0x187   : > { %4186 = vmatpush3.bf16.msra.mxu1 %v4475_v3  ;;  %4210 = vmatpush3.bf16.msra.mxu0 %v4476_v4  ;;  %v2890_v4 = vld [vmem:[%s5601_s5 + $0x40] sm:$0xff] }
 0x188   : > { %4187 = vmatprep.subr.bf16.mxu1 %v4522_v1  ;;  %4211 = vmatprep.subr.bf16.mxu0 %v4522_v1 }
 0x189   : > { %4153 = vmatprep.mubr.msk.bf16.mxu1 %vm4523_vm0, %v4522_v1  ;;  %4177 = vmatprep.mubr.msk.bf16.mxu0 %vm4523_vm0, %v4522_v1 }
 0x18b   : > { %4188 = vmatpush3.bf16.msra.mxu1 %v4477_v5  ;;  %4212 = vmatpush3.bf16.msra.mxu0 %v4478_v6  ;;  %v2891_v5 = vld [vmem:[%s5601_s5 + $0x48] sm:$0xff] }
 0x18c   : > { %4189 = vmatprep.subr.bf16.mxu1 %v4522_v1  ;;  %4213 = vmatprep.subr.bf16.mxu0 %v4522_v1 }
 0x18e   : > { %4154 = vmatmul.mubr.msk.bf16.gmra.mrb[64].mxu1 %vm317_vm1, %v5150_v56  ;;  %4178 = vmatmul.mubr.msk.bf16.gmra.mrb[76].mxu0 %vm317_vm1, %v5150_v56 }
 0x18f   : > { %4190 = vmatpush3.bf16.msra.mxu1 %v4479_v7  ;;  %4214 = vmatpush3.bf16.msra.mxu0 %v4480_v8 }
 0x190   : > { %4191 = vmatprep.subr.bf16.mxu1 %v4522_v1  ;;  %4215 = vmatprep.subr.bf16.mxu0 %v4522_v1 }
 0x191   : > { %4157 = vmatprep.mubr.msk.bf16.mxu1 %vm4523_vm0, %v4522_v1  ;;  %4181 = vmatprep.mubr.msk.bf16.mxu0 %vm4523_vm0, %v4522_v1 }
 0x193   : > { %4192 = vmatpush3.bf16.msra.mxu1 %v4481_v9  ;;  %4216 = vmatpush3.bf16.msra.mxu0 %v4482_v10  ;;  %v4368_v9 = vpack.c.bf16 %v2891_v5, %v2890_v4  ;;  %v2892_v10 = vld [vmem:[%s5601_s5 + $0x50] sm:$0xff] }
 0x194   : > { %4193 = vmatprep.subr.bf16.mxu1 %v4522_v1  ;;  %4217 = vmatprep.subr.bf16.mxu0 %v4522_v1 }
 0x196   : > { %4158 = vmatmul.mubr.msk.bf16.gmra.mrb[68].mxu1 %vm317_vm1, %v5177_v63  ;;  %4182 = vmatmul.mubr.msk.bf16.gmra.mrb[80].mxu0 %vm317_vm1, %v5177_v63 }
 0x197   : > { %4194 = vmatpush3.bf16.msra.mxu1 %v4483_v11  ;;  %4218 = vmatpush3.bf16.msra.mxu0 %v4484_v12  ;;  %v2893_v11 = vld [vmem:[%s5601_s5 + $0x58] sm:$0xff] }
 0x198   : > { %4195 = vmatprep.subr.bf16.mxu1 %v4522_v1  ;;  %4219 = vmatprep.subr.bf16.mxu0 %v4522_v1 }
 0x199   : > { %4197 = vmatprep.mubr.msk.bf16.mxu1 %vm4523_vm0, %v4522_v1  ;;  %4221 = vmatprep.mubr.msk.bf16.mxu0 %vm4523_vm0, %v4522_v1 }
 0x19b   : > { %4196 = vmatpush3.bf16.msra.mxu1 %v4485_v13  ;;  %4220 = vmatpush3.bf16.msra.mxu0 %v4486_v14  ;;  %v1738_v14 = vld [vmem:[#allocation2 + $0x10] sm:$0xff] }
 0x19c   : > { %4233 = vmatprep.subr.bf16.mxu1 %v4522_v1  ;;  %4257 = vmatprep.subr.bf16.mxu0 %v4522_v1 }
 0x19e   : > { %4198 = vmatmul.mubr.msk.bf16.vlgmr.msra.gmra.mrb[72].mxu1 %vm317_vm1, %v5115_v43  ;;  %4222 = vmatmul.mubr.msk.bf16.vlgmr.msra.gmra.mrb[84].mxu0 %vm317_vm1, %v5115_v43 }
 0x19f   : > { %4234 = vmatpush3.bf16.msra.mxu1 %v4487_v15  ;;  %4258 = vmatpush3.bf16.msra.mxu0 %v4488_v16 }
 0x1a0   : > { %4235 = vmatprep.subr.bf16.mxu1 %v4522_v1  ;;  %4259 = vmatprep.subr.bf16.mxu0 %v4522_v1 }
 0x1a1   : > { %4201 = vmatprep.mubr.msk.bf16.mxu1 %vm4523_vm0, %v4522_v1  ;;  %4225 = vmatprep.mubr.msk.bf16.mxu0 %vm4523_vm0, %v4522_v1 }
 0x1a3   : > { %4236 = vmatpush3.bf16.msra.mxu1 %v4489_v17  ;;  %4260 = vmatpush3.bf16.msra.mxu0 %v4490_v18 }
 0x1a4   : > { %4237 = vmatprep.subr.bf16.mxu1 %v4522_v1  ;;  %4261 = vmatprep.subr.bf16.mxu0 %v4522_v1 }
 0x1a6   : > { %4202 = vmatmul.mubr.msk.bf16.gmra.mrb[76].mxu1 %vm317_vm1, %v5150_v56  ;;  %4226 = vmatmul.mubr.msk.bf16.gmra.mrb[88].mxu0 %vm317_vm1, %v5150_v56 }
 0x1a7   : > { %4238 = vmatpush3.bf16.msra.mxu1 %v4491_v19  ;;  %4262 = vmatpush3.bf16.msra.mxu0 %v4492_v20  ;;  %v1740_v20 = vld [vmem:[#allocation2 + $0x20] sm:$0xf] }
 0x1a8   : > { %4239 = vmatprep.subr.bf16.mxu1 %v4522_v1  ;;  %4263 = vmatprep.subr.bf16.mxu0 %v4522_v1 }
 0x1a9   : > { %4205 = vmatprep.mubr.msk.bf16.mxu1 %vm4523_vm0, %v4522_v1  ;;  %4229 = vmatprep.mubr.msk.bf16.mxu0 %vm4523_vm0, %v4522_v1 }
 0x1ab   : > { %4240 = vmatpush3.bf16.msra.mxu1 %v4493_v21  ;;  %4264 = vmatpush3.bf16.msra.mxu0 %v4494_v22  ;;  %v4371_v22 = vpack.c.bf16 %v2893_v11, %v2892_v10 }
 0x1ac   : > { %4241 = vmatprep.subr.bf16.mxu1 %v4522_v1  ;;  %4265 = vmatprep.subr.bf16.mxu0 %v4522_v1 }
 0x1ae   : > { %4206 = vmatmul.mubr.msk.bf16.gmra.mrb[80].mxu1 %vm317_vm1, %v5177_v63  ;;  %4230 = vmatmul.mubr.msk.bf16.gmra.mrb[92].mxu0 %vm317_vm1, %v5177_v63 }
 0x1af   : > { %4242 = vmatpush3.bf16.msra.mxu1 %v4495_v23  ;;  %4266 = vmatpush3.bf16.msra.mxu0 %v4496_v24 }
 0x1b0   : > { %4243 = vmatprep.subr.bf16.mxu1 %v4522_v1  ;;  %4267 = vmatprep.subr.bf16.mxu0 %v4522_v1 }
 0x1b1   : > { %4245 = vmatprep.mubr.msk.bf16.mxu1 %vm4523_vm0, %v4522_v1  ;;  %4269 = vmatprep.mubr.msk.bf16.mxu0 %vm4523_vm0, %v4522_v1 }
 0x1b3   : > { %4244 = vmatpush3.bf16.msra.mxu1 %v4497_v26  ;;  %4268 = vmatpush3.bf16.msra.mxu0 %v4498_v27  ;;  %v1739_v26 = vld [vmem:[#allocation2 + $0x18] sm:$0xff] }
 0x1b4   : > { %4281 = vmatprep.subr.bf16.mxu1 %v4522_v1  ;;  %4355 = vmatprep.subr.bf16.mxu0 %v4525_v38 }
 0x1b6   : > { %4246 = vmatmul.mubr.msk.bf16.vlgmr.msra.gmra.mrb[84].mxu1 %vm317_vm1, %v5115_v43  ;;  %4270 = vmatmul.mubr.msk.bf16.vlgmr.msra.gmra.mrb[96].mxu0 %vm317_vm1, %v5115_v43 }
 0x1b7   : > { %4282 = vmatpush3.bf16.msra.mxu1 %v4499_v28  ;;  %4249 = vmatprep.mubr.msk.bf16.mxu1 %vm4523_vm0, %v4522_v1 }
 0x1b8   : > { %4283 = vmatprep.subr.bf16.mxu1 %v4522_v1  ;;  %4273 = vmatprep.mubr.msk.bf16.mxu0 %vm4523_vm0, %v4522_v1 }
 0x1b9   : > { %4357 = vmatpush3.bf16.msra.mxu0 %v4356_v39 }
 0x1ba   : > { %4358 = vmatprep.subr.bf16.mxu0 %v4525_v38 }
 0x1bb   : > { %4284 = vmatpush3.bf16.msra.mxu1 %v4500_v29 }
 0x1bc   : > { %4285 = vmatprep.subr.bf16.mxu1 %v4522_v1 }
 0x1bd   : > { %4360 = vmatpush3.bf16.msra.mxu0 %v4359_v41 }
 0x1be   : > { %4250 = vmatmul.mubr.msk.bf16.gmra.mrb[88].mxu1 %vm317_vm1, %v5150_v56  ;;  %4274 = vmatmul.mubr.msk.bf16.gmra.mrb[100].mxu0 %vm317_vm1, %v5150_v56 }
 0x1bf   : > { %4286 = vmatpush3.bf16.msra.mxu1 %v4501_v30  ;;  %4253 = vmatprep.mubr.msk.bf16.mxu1 %vm4523_vm0, %v4522_v1 }
 0x1c0   : > { %4287 = vmatprep.subr.bf16.mxu1 %v4522_v1  ;;  %4277 = vmatprep.mubr.msk.bf16.mxu0 %vm4523_vm0, %v4522_v1 }
 0x1c1   : > { %4361 = vmatprep.subr.bf16.mxu0 %v4525_v38 }
 0x1c3   : > { %4288 = vmatpush3.bf16.msra.mxu1 %v4502_v31 }
 0x1c4   : > { %4289 = vmatprep.subr.bf16.mxu1 %v4522_v1 }
 0x1c6   : > { %4254 = vmatmul.mubr.msk.bf16.gmra.mrb[92].mxu1 %vm317_vm1, %v5177_v63  ;;  %4278 = vmatmul.mubr.msk.bf16.gmra.mrb[104].mxu0 %vm317_vm1, %v5177_v63 }
 0x1c7   : > { %4290 = vmatpush3.bf16.msra.mxu1 %v4503_v32  ;;  %4293 = vmatprep.mubr.msk.bf16.mxu1 %vm4523_vm0, %v4522_v1 }
 0x1c8   : > { %4291 = vmatprep.subr.bf16.mxu1 %v4522_v1  ;;  %4329 = vmatprep.mubr.msk.f32.mxu0 %vm4523_vm0, %v4522_v1 }
 0x1cb   : > { %4292 = vmatpush3.bf16.msra.mxu1 %v4504_v33 }
 0x1cc   : > { %4373 = vmatprep.subr.bf16.mxu1 %v4525_v38 }
 0x1ce   : > { %4294 = vmatmul.mubr.msk.bf16.vlgmr.msra.gmra.mrb[96].mxu1 %vm317_vm1, %v5115_v43  ;;  %v2887_v43 = vld [vmem:[%s5601_s5 + $0x28] sm:$0xff] }
 0x1cf   : > { %4297 = vmatprep.mubr.msk.bf16.mxu1 %vm4523_vm0, %v4522_v1  ;;  %v4362_v45 = vpack.c.bf16 %v2887_v43, %v2886_v42 }
 0x1d1   : > { %4363 = vmatpush3.bf16.msra.mxu0 %v4362_v45 }
 0x1d2   : > { %4364 = vmatprep.subr.bf16.mxu0 %v4525_v38 }
 0x1d5   : > { %4366 = vmatpush3.bf16.msra.mxu0 %v4365_v59 }
 0x1d6   : > { %4298 = vmatmul.mubr.msk.bf16.gmra.mrb[100].mxu1 %vm317_vm1, %v5150_v56  ;;  %v1737_v56 = vld [vmem:[#allocation2 + $0x8] sm:$0xff]  ;;  %4367 = vmatprep.subr.bf16.mxu0 %v4525_v38 }
 0x1d7   : > { %4301 = vmatprep.mubr.msk.bf16.mxu1 %vm4523_vm0, %v4522_v1 }
 0x1d9   : > { %4369 = vmatpush3.bf16.msra.mxu0 %v4368_v9 }
 0x1da   : > { %4370 = vmatprep.subr.bf16.mxu0 %v4525_v38 }
 0x1dd   : > { %4372 = vmatpush3.bf16.msra.mxu0 %v4371_v22 }
 0x1de   : > { %4302 = vmatmul.mubr.msk.bf16.gmra.mrb[104].mxu1 %vm317_vm1, %v5177_v63  ;;  %4341 = vmatprep.subr.mxu0 %v4522_v1 }
 0x1df   : > { %4338 = vmatprep.mubr.msk.f32.mxu1 %vm4523_vm0, %v4522_v1 }
 0x240   : > { %v1715_v48 = vpop.f32.mrb[48].mxu1  ;;  %v1851_v49 = vpop.f32.mrb[60].mxu0 }
 0x241   : > { %v1745_v52 = vrot.slane %v1715_v48, 1  ;;  %v4103_v53 = vpop.f32.mrb[49].mxu1  ;;  %v4127_v54 = vpop.f32.mrb[61].mxu0  ;;  %v1881_v61 = vrot.slane %v1851_v49, 2 }
 0x242   : > { %v1718_v55 = vpop.f32.mrb[50].mxu1  ;;  %v1854_v58 = vpop.f32.mrb[62].mxu0 }
 0x243   : > { %v1757_v60 = vsel %vm458_vm3, 0.0, %v1745_v52  ;;  %v1746_v62 = vrot.slane %v1718_v55, 1  ;;  %v1882_v63 = vrot.slane %v1854_v58, 2  ;;  %v4104_v0 = vpop.f32.mrb[51].mxu1  ;;  %v4128_v2 = vpop.f32.mrb[63].mxu0  ;;  %v1893_v32 = vsel %vm595_vm4, 0.0, %v1881_v61 }
 0x244   : > { %v1758_v3 = vadd.f32 %v1757_v60, %v1736_v51  ;;  %v2967_v51 = vld [vmem:[%s5599_s3] sm:$0xff]  ;;  %v2969_v60 = vld [vmem:[%s5599_s3 + $0x10] sm:$0xff] }
 0x245   : > { %v1747_v6 = vsel %vm458_vm3, %v1745_v52, %v1746_v62  ;;  %v1883_v7 = vsel %vm595_vm4, %v1881_v61, %v1882_v63  ;;  %v2968_v52 = vld [vmem:[%s5599_s3 + $0x8] sm:$0xff] }
 0x246   : > { %1763 = vst.msk [vmem:[#allocation2] sm:$0xff] %vm317_vm1, %v1758_v3  ;;  %v1759_v8 = vadd.f32 %v1747_v6, %v1737_v56  ;;  %v4374_v55 = vpack.c.bf16 %v2968_v52, %v2967_v51 }
 0x248   : > { %1764 = vst.msk [vmem:[#allocation2 + $0x8] sm:$0xff] %vm317_vm1, %v1759_v8  ;;  %4375 = vmatpush3.bf16.msra.mxu1 %v4374_v55 }
 0x249   : > { %v1723_v12 = vpop.f32.mrb[52].mxu1  ;;  %v1859_v13 = vpop.f32.mrb[64].mxu0  ;;  %4336 = vmatprep.subr.mxu1 %v4522_v1 }
 0x24a   : > { %v1748_v15 = vrot.slane %v1723_v12, 1  ;;  %v1884_v16 = vrot.slane %v1859_v13, 2  ;;  %v4107_v17 = vpop.f32.mrb[53].mxu1  ;;  %v4131_v18 = vpop.f32.mrb[65].mxu0 }
 0x24b   : > { %v1726_v19 = vpop.f32.mrb[54].mxu1  ;;  %v1862_v21 = vpop.f32.mrb[66].mxu0 }
 0x24c   : > { %v1749_v23 = vsel %vm458_vm3, %v1746_v62, %v1748_v15  ;;  %v1885_v24 = vsel %vm595_vm4, %v1882_v63, %v1884_v16  ;;  %v1750_v27 = vrot.slane %v1726_v19, 1  ;;  %v1886_v28 = vrot.slane %v1862_v21, 2  ;;  %v4108_v29 = vpop.f32.mrb[55].mxu1  ;;  %v4132_v30 = vpop.f32.mrb[67].mxu0  ;;  %4337 = vmatpush3.msra.mxu1 %v2969_v60 }
 0x24d   : > { %v1872_v31 = vld [vmem:[#allocation2] sm:$0xff]  ;;  %v1760_v33 = vadd.f32 %v1749_v23, %v1738_v14  ;;  %4376 = vmatprep.subr.bf16.mxu1 %v4525_v38 }
 0x24e   : > { %v1894_v34 = vadd.f32 %v1893_v32, %v1872_v31  ;;  %v1751_v35 = vsel %vm458_vm3, %v1748_v15, %v1750_v27  ;;  %v1762_v36 = vadd.f32 %v1750_v27, %v1740_v20  ;;  %v1887_v39 = vsel %vm595_vm4, %v1884_v16, %v1886_v28 }
 0x24f   : > { %v1873_v40 = vld [vmem:[#allocation2 + $0x8] sm:$0xff]  ;;  %1765 = vst.msk [vmem:[#allocation2 + $0x10] sm:$0xff] %vm317_vm1, %v1760_v33  ;;  %v1761_v41 = vadd.f32 %v1751_v35, %v1739_v26 }
 0x250   : > { %1899 = vst.msk [vmem:[#allocation2] sm:$0xff] %vm317_vm1, %v1894_v34  ;;  %v1895_v42 = vadd.f32 %v1883_v7, %v1873_v40 }
 0x251   : > { %1767 = vst.msk [vmem:[#allocation2 + $0x20] sm:$0xf] %vm322_vm2, %v1762_v36  ;;  %v1731_v43 = vpop.f32.mrb[56].mxu1  ;;  %v1867_v45 = vpop.f32.mrb[68].mxu0 }
 0x252   : > { %1766 = vst.msk [vmem:[#allocation2 + $0x18] sm:$0xff] %vm317_vm1, %v1761_v41  ;;  %1900 = vst.msk [vmem:[#allocation2 + $0x8] sm:$0xff] %vm317_vm1, %v1895_v42  ;;  %v4111_v46 = vpop.f32.mrb[57].mxu1  ;;  %v4135_v47 = vpop.f32.mrb[69].mxu0 }
 0x253   : > { %v1733_v48 = vpop.f32.mrb[58].mxu1  ;;  %v1869_v49 = vpop.f32.mrb[70].mxu0 }
 0x254   : > { %v4112_v53 = vpop.f32.mrb[59].mxu1  ;;  %v4136_v54 = vpop.f32.mrb[71].mxu0 }
 0x256   : > { %v1874_v56 = vld [vmem:[#allocation2 + $0x10] sm:$0xff] }
 0x257   : > { %v1896_v58 = vadd.f32 %v1885_v24, %v1874_v56  ;;  %v2008_v6 = vld [vmem:[#allocation2] sm:$0xff] }
 0x258   : > { %v1876_v59 = vld [vmem:[#allocation2 + $0x20] sm:$0xf] }
 0x259   : > { %v1875_v61 = vld [vmem:[#allocation2 + $0x18] sm:$0xff]  ;;  %v1898_v62 = vadd.f32 %v1886_v28, %v1876_v59  ;;  %1901 = vst.msk [vmem:[#allocation2 + $0x10] sm:$0xff] %vm317_vm1, %v1896_v58  ;;  %v1987_v0 = vpop.f32.mrb[60].mxu1  ;;  %v2123_v2 = vpop.f32.mrb[72].mxu0  ;;  %v2009_v16 = vld [vmem:[#allocation2 + $0x8] sm:$0xff] }
 0x25a   : > { %v1897_v63 = vadd.f32 %v1887_v39, %v1875_v61  ;;  %v2017_v3 = vrot.slane %v1987_v0, 3  ;;  %v4151_v4 = vpop.f32.mrb[61].mxu1  ;;  %v4175_v5 = vpop.f32.mrb[73].mxu0  ;;  %v2155_v10 = vrot.slane %v2123_v2, 7 }
 0x25b   : > { %1903 = vst.msk [vmem:[#allocation2 + $0x20] sm:$0xf] %vm322_vm2, %v1898_v62  ;;  %v1990_v7 = vpop.f32.mrb[62].mxu1  ;;  %v2126_v8 = vpop.f32.mrb[74].mxu0 }
 0x25c   : > { %1902 = vst.msk [vmem:[#allocation2 + $0x18] sm:$0xff] %vm317_vm1, %v1897_v63  ;;  %v2029_v9 = vsel %vm732_vm5, 0.0, %v2017_v3  ;;  %v2018_v11 = vrot.slane %v1990_v7, 3  ;;  %v2156_v12 = vrot.slane %v2126_v8, 7  ;;  %v4152_v13 = vpop.f32.mrb[63].mxu1  ;;  %v4176_v14 = vpop.f32.mrb[75].mxu0 }
 0x25d   : > { %v2030_v15 = vadd.f32 %v2029_v9, %v2008_v6  ;;  %v2169_v40 = vsel %vm871_vm6, 0.0, %v2155_v10 }
 0x25e   : > { %v2019_v17 = vsel %vm732_vm5, %v2017_v3, %v2018_v11  ;;  %v2157_v18 = vsel %vm871_vm6, %v2155_v10, %v2156_v12 }
 0x25f   : > { %2035 = vst.msk [vmem:[#allocation2] sm:$0xff] %vm317_vm1, %v2030_v15  ;;  %v2031_v19 = vadd.f32 %v2019_v17, %v2009_v16 }
 0x260   : > { %v2010_v28 = vld [vmem:[#allocation2 + $0x10] sm:$0xff] }
 0x261   : > { %2036 = vst.msk [vmem:[#allocation2 + $0x8] sm:$0xff] %vm317_vm1, %v2031_v19  ;;  %v1995_v20 = vpop.f32.mrb[64].mxu1  ;;  %v2131_v38 = vpop.f32.mrb[76].mxu0 }
 0x262   : > { %v2020_v21 = vrot.slane %v1995_v20, 3  ;;  %v2158_v22 = vrot.slane %v2131_v38, 7  ;;  %v4155_v23 = vpop.f32.mrb[65].mxu1  ;;  %v4179_v24 = vpop.f32.mrb[77].mxu0  ;;  %v2012_v36 = vld [vmem:[#allocation2 + $0x20] sm:$0xf] }
 0x263   : > { %v1998_v26 = vpop.f32.mrb[66].mxu1  ;;  %v2134_v27 = vpop.f32.mrb[78].mxu0  ;;  %v2011_v41 = vld [vmem:[#allocation2 + $0x18] sm:$0xff] }
 0x264   : > { %v2021_v29 = vsel %vm732_vm5, %v2018_v11, %v2020_v21  ;;  %v2159_v30 = vsel %vm871_vm6, %v2156_v12, %v2158_v22  ;;  %v2022_v31 = vrot.slane %v1998_v26, 3  ;;  %v2160_v32 = vrot.slane %v2134_v27, 7  ;;  %v4156_v33 = vpop.f32.mrb[67].mxu1  ;;  %v4180_v34 = vpop.f32.mrb[79].mxu0 }
 0x265   : > { %v2032_v35 = vadd.f32 %v2021_v29, %v2010_v28 }
 0x266   : > { %v2145_v39 = vld [vmem:[#allocation2] sm:$0xff]  ;;  %v2023_v42 = vsel %vm732_vm5, %v2020_v21, %v2022_v31  ;;  %v2034_v43 = vadd.f32 %v2022_v31, %v2012_v36  ;;  %v2161_v45 = vsel %vm871_vm6, %v2158_v22, %v2160_v32 }
 0x267   : > { %v2170_v46 = vadd.f32 %v2169_v40, %v2145_v39  ;;  %2037 = vst.msk [vmem:[#allocation2 + $0x10] sm:$0xff] %vm317_vm1, %v2032_v35  ;;  %v2033_v47 = vadd.f32 %v2023_v42, %v2011_v41 }
 0x268   : > { %v2146_v48 = vld [vmem:[#allocation2 + $0x8] sm:$0xff]  ;;  %2039 = vst.msk [vmem:[#allocation2 + $0x20] sm:$0xf] %vm322_vm2, %v2034_v43 }
 0x269   : > { %2175 = vst.msk [vmem:[#allocation2] sm:$0xff] %vm317_vm1, %v2170_v46  ;;  %v2171_v49 = vadd.f32 %v2157_v18, %v2146_v48  ;;  %2038 = vst.msk [vmem:[#allocation2 + $0x18] sm:$0xff] %vm317_vm1, %v2033_v47  ;;  %v2003_v51 = vpop.f32.mrb[68].mxu1  ;;  %v2139_v52 = vpop.f32.mrb[80].mxu0 }
 0x26a   : > { %v2162_v53 = vrot.slane %v2139_v52, 7  ;;  %v4159_v54 = vpop.f32.mrb[69].mxu1  ;;  %v4183_v55 = vpop.f32.mrb[81].mxu0 }
 0x26b   : > { %2176 = vst.msk [vmem:[#allocation2 + $0x8] sm:$0xff] %vm317_vm1, %v2171_v49  ;;  %v2005_v56 = vpop.f32.mrb[70].mxu1  ;;  %v2142_v58 = vpop.f32.mrb[82].mxu0 }
 0x26c   : > { %v2163_v59 = vsel %vm871_vm6, %v2160_v32, %v2162_v53  ;;  %v4160_v60 = vpop.f32.mrb[71].mxu1  ;;  %v4184_v61 = vpop.f32.mrb[83].mxu0 }
 0x26e   : > { %v2147_v62 = vld [vmem:[#allocation2 + $0x10] sm:$0xff] }
 0x26f   : > { %v2172_v63 = vadd.f32 %v2159_v30, %v2147_v62  ;;  %v2149_v0 = vld [vmem:[#allocation2 + $0x20] sm:$0xf] }
 0x270   : > { %v2148_v2 = vld [vmem:[#allocation2 + $0x18] sm:$0xff]  ;;  %v2174_v3 = vadd.f32 %v2163_v59, %v2149_v0  ;;  %v2285_v4 = vld [vmem:[#allocation2] sm:$0xff] }
 0x271   : > { %2177 = vst.msk [vmem:[#allocation2 + $0x10] sm:$0xff] %vm317_vm1, %v2172_v63  ;;  %v2173_v5 = vadd.f32 %v2161_v45, %v2148_v2  ;;  %v2263_v6 = vpop.f32.mrb[72].mxu1  ;;  %v2383_v7 = vpop.f32.mrb[84].mxu0 }
 0x272   : > { %2179 = vst.msk [vmem:[#allocation2 + $0x20] sm:$0xf] %vm322_vm2, %v2174_v3  ;;  %v2290_v8 = vadd.f32 %v2285_v4, %v2263_v6  ;;  %v4199_v9 = vpop.f32.mrb[73].mxu1  ;;  %v4223_v10 = vpop.f32.mrb[85].mxu0  ;;  %v2286_v11 = vld [vmem:[#allocation2 + $0x8] sm:$0xff]  ;;  %v2415_v14 = vrot.slane %v2383_v7, 1 }
 0x273   : > { %2178 = vst.msk [vmem:[#allocation2 + $0x18] sm:$0xff] %vm317_vm1, %v2173_v5  ;;  %v2266_v12 = vpop.f32.mrb[74].mxu1  ;;  %v2386_v13 = vpop.f32.mrb[86].mxu0 }
 0x274   : > { %2295 = vst.msk [vmem:[#allocation2] sm:$0xff] %vm317_vm1, %v2290_v8  ;;  %v2291_v15 = vadd.f32 %v2286_v11, %v2266_v12  ;;  %v2416_v16 = vrot.slane %v2386_v13, 1  ;;  %v4200_v17 = vpop.f32.mrb[75].mxu1  ;;  %v4224_v18 = vpop.f32.mrb[87].mxu0 }
 0x276   : > { %2296 = vst.msk [vmem:[#allocation2 + $0x8] sm:$0xff] %vm317_vm1, %v2291_v15  ;;  %v2417_v19 = vsel %vm458_vm3, %v2415_v14, %v2416_v16 }
 0x278   : > { %v2287_v20 = vld [vmem:[#allocation2 + $0x10] sm:$0xff] }
 0x279   : > { %v2271_v38 = vpop.f32.mrb[76].mxu1  ;;  %v2391_v21 = vpop.f32.mrb[88].mxu0  ;;  %v2289_v43 = vld [vmem:[#allocation2 + $0x20] sm:$0xf] }
 0x27a   : > { %v2292_v22 = vadd.f32 %v2287_v20, %v2271_v38  ;;  %v2418_v23 = vrot.slane %v2391_v21, 1  ;;  %v4203_v24 = vpop.f32.mrb[77].mxu1  ;;  %v4227_v26 = vpop.f32.mrb[89].mxu0  ;;  %v2288_v27 = vld [vmem:[#allocation2 + $0x18] sm:$0xff] }
 0x27b   : > { %v2405_v28 = vld [vmem:[#allocation2] sm:$0xff]  ;;  %v2274_v29 = vpop.f32.mrb[78].mxu1  ;;  %v2394_v30 = vpop.f32.mrb[90].mxu0 }
 0x27c   : > { %v2430_v31 = vadd.f32 %v2417_v19, %v2405_v28  ;;  %2297 = vst.msk [vmem:[#allocation2 + $0x10] sm:$0xff] %vm317_vm1, %v2292_v22  ;;  %v2419_v32 = vsel %vm458_vm3, %v2416_v16, %v2418_v23  ;;  %v2293_v33 = vadd.f32 %v2288_v27, %v2274_v29  ;;  %v2420_v34 = vrot.slane %v2394_v30, 1  ;;  %v4204_v35 = vpop.f32.mrb[79].mxu1  ;;  %v4228_v36 = vpop.f32.mrb[91].mxu0 }
 0x27d   : > { %v2406_v39 = vld [vmem:[#allocation2 + $0x8] sm:$0xff] }
 0x27e   : > { %2435 = vst.msk [vmem:[#allocation2] sm:$0xff] %vm317_vm1, %v2430_v31  ;;  %v2431_v40 = vadd.f32 %v2419_v32, %v2406_v39  ;;  %2298 = vst.msk [vmem:[#allocation2 + $0x18] sm:$0xff] %vm317_vm1, %v2293_v33  ;;  %v2421_v41 = vsel %vm458_vm3, %v2418_v23, %v2420_v34 }
 0x280   : > { %2436 = vst.msk [vmem:[#allocation2 + $0x8] sm:$0xff] %vm317_vm1, %v2431_v40 }
 0x281   : > { %v2279_v42 = vpop.f32.mrb[80].mxu1  ;;  %v2399_v45 = vpop.f32.mrb[92].mxu0 }
 0x282   : > { %v2294_v46 = vadd.f32 %v2289_v43, %v2279_v42  ;;  %v2422_v47 = vrot.slane %v2399_v45, 1  ;;  %v4207_v48 = vpop.f32.mrb[81].mxu1  ;;  %v4231_v49 = vpop.f32.mrb[93].mxu0 }
 0x283   : > { %v2407_v51 = vld [vmem:[#allocation2 + $0x10] sm:$0xff]  ;;  %v2282_v52 = vpop.f32.mrb[82].mxu1  ;;  %v2402_v53 = vpop.f32.mrb[94].mxu0 }
 0x284   : > { %v2432_v54 = vadd.f32 %v2421_v41, %v2407_v51  ;;  %2299 = vst.msk [vmem:[#allocation2 + $0x20] sm:$0xf] %vm322_vm2, %v2294_v46  ;;  %v2423_v55 = vsel %vm458_vm3, %v2420_v34, %v2422_v47  ;;  %v4208_v56 = vpop.f32.mrb[83].mxu1  ;;  %v4232_v58 = vpop.f32.mrb[95].mxu0  ;;  %v2429_v3 = vsel %vm1146_vm7, %v2422_v47, 0.0 }
 0x285   : > { %v2408_v59 = vld [vmem:[#allocation2 + $0x18] sm:$0xff]  ;;  %v2545_v13 = vld [vmem:[#allocation2] sm:$0xff] }
 0x286   : > { %2437 = vst.msk [vmem:[#allocation2 + $0x10] sm:$0xff] %vm317_vm1, %v2432_v54  ;;  %v2433_v60 = vadd.f32 %v2423_v55, %v2408_v59 }
 0x287   : > { %v2546_v24 = vld [vmem:[#allocation2 + $0x8] sm:$0xff] }
 0x288   : > { %2438 = vst.msk [vmem:[#allocation2 + $0x18] sm:$0xff] %vm317_vm1, %v2433_v60 }
 0x289   : > { %v2523_v61 = vpop.f32.mrb[84].mxu1  ;;  %v2662_v62 = vpop.f32.mrb[96].mxu0 }
 0x28a   : > { %v4247_v63 = vpop.f32.mrb[85].mxu1  ;;  %v4271_v0 = vpop.f32.mrb[97].mxu0  ;;  %v2555_v4 = vrot.slane %v2523_v61, 5  ;;  %v2694_v8 = vrot.slane %v2662_v62, 6 }
 0x28b   : > { %v2409_v2 = vld [vmem:[#allocation2 + $0x20] sm:$0xf]  ;;  %v2526_v5 = vpop.f32.mrb[86].mxu1  ;;  %v2665_v6 = vpop.f32.mrb[98].mxu0 }
 0x28c   : > { %v2434_v7 = vadd.f32 %v2429_v3, %v2409_v2  ;;  %v2556_v9 = vrot.slane %v2526_v5, 5  ;;  %v2695_v10 = vrot.slane %v2665_v6, 6  ;;  %v4248_v11 = vpop.f32.mrb[87].mxu1  ;;  %v4272_v12 = vpop.f32.mrb[99].mxu0 }
 0x28d   : > { %v2547_v34 = vld [vmem:[#allocation2 + $0x10] sm:$0xff] }
 0x28e   : > { %2439 = vst.msk [vmem:[#allocation2 + $0x20] sm:$0xf] %vm322_vm2, %v2434_v7  ;;  %v2557_v14 = vsel %vm1146_vm7, %v2555_v4, %v2556_v9  ;;  %v2696_v15 = vsel %vm1412_vm8, %v2694_v8, %v2695_v10 }
 0x28f   : > { %v2569_v16 = vadd.f32 %v2557_v14, %v2545_v13  ;;  %v2548_v58 = vld [vmem:[#allocation2 + $0x18] sm:$0xff] }
 0x291   : > { %2574 = vst.msk [vmem:[#allocation2] sm:$0xff] %vm317_vm1, %v2569_v16  ;;  %v2531_v17 = vpop.f32.mrb[88].mxu1  ;;  %v2670_v18 = vpop.f32.mrb[100].mxu0 }
 0x292   : > { %v2558_v19 = vrot.slane %v2531_v17, 5  ;;  %v2697_v20 = vrot.slane %v2670_v18, 6  ;;  %v4251_v38 = vpop.f32.mrb[89].mxu1  ;;  %v4275_v21 = vpop.f32.mrb[101].mxu0 }
 0x293   : > { %v2534_v22 = vpop.f32.mrb[90].mxu1  ;;  %v2673_v23 = vpop.f32.mrb[102].mxu0 }
 0x294   : > { %v2559_v26 = vsel %vm1146_vm7, %v2556_v9, %v2558_v19  ;;  %v2698_v27 = vsel %vm1412_vm8, %v2695_v10, %v2697_v20  ;;  %v2560_v28 = vrot.slane %v2534_v22, 5  ;;  %v2699_v29 = vrot.slane %v2673_v23, 6  ;;  %v4252_v30 = vpop.f32.mrb[91].mxu1  ;;  %v4276_v31 = vpop.f32.mrb[103].mxu0 }
 0x295   : > { %v2549_v32 = vld [vmem:[#allocation2 + $0x20] sm:$0xf]  ;;  %v2570_v33 = vadd.f32 %v2559_v26, %v2546_v24 }
 0x296   : > { %2578 = vst.msk [vmem:[#allocation2 + $0x20] sm:$0xf] %vm322_vm2, %v2549_v32  ;;  %v2561_v35 = vsel %vm1146_vm7, %v2558_v19, %v2560_v28  ;;  %v2700_v36 = vsel %vm1412_vm8, %v2697_v20, %v2699_v29 }
 0x297   : > { %2575 = vst.msk [vmem:[#allocation2 + $0x8] sm:$0xff] %vm317_vm1, %v2570_v33  ;;  %v2571_v39 = vadd.f32 %v2561_v35, %v2547_v34 }
 0x298   : > { %v2684_v40 = vld [vmem:[#allocation2] sm:$0xff] }
 0x299   : > { %v2708_v41 = vadd.f32 %v2696_v15, %v2684_v40  ;;  %2576 = vst.msk [vmem:[#allocation2 + $0x10] sm:$0xff] %vm317_vm1, %v2571_v39  ;;  %v2539_v42 = vpop.f32.mrb[92].mxu1  ;;  %v2678_v43 = vpop.f32.mrb[104].mxu0 }
 0x29a   : > { %v2562_v45 = vrot.slane %v2539_v42, 5  ;;  %v2701_v46 = vrot.slane %v2678_v43, 6  ;;  %v4255_v47 = vpop.f32.mrb[93].mxu1  ;;  %v4279_v48 = vpop.f32.mrb[105].mxu0 }
 0x29b   : > { %2713 = vst.msk [vmem:[#allocation2] sm:$0xff] %vm317_vm1, %v2708_v41  ;;  %v2542_v49 = vpop.f32.mrb[94].mxu1  ;;  %v2681_v51 = vpop.f32.mrb[106].mxu0 }
 0x29c   : > { %v2563_v52 = vsel %vm1146_vm7, %v2560_v28, %v2562_v45  ;;  %v2702_v53 = vsel %vm1412_vm8, %v2699_v29, %v2701_v46  ;;  %v4256_v54 = vpop.f32.mrb[95].mxu1  ;;  %v4280_v55 = vpop.f32.mrb[107].mxu0 }
 0x29d   : > { %v2688_v56 = vld [vmem:[#allocation2 + $0x20] sm:$0xf]  ;;  %v2568_v59 = vsel %vm458_vm3, %v2563_v52, 0.0  ;;  %v2707_v12 = vsel %vm595_vm4, %v2702_v53, 0.0 }
 0x29e   : > { %2717 = vst.msk [vmem:[#allocation2 + $0x20] sm:$0xf] %vm322_vm2, %v2688_v56  ;;  %v2685_v60 = vld [vmem:[#allocation2 + $0x8] sm:$0xff]  ;;  %v2572_v61 = vadd.f32 %v2568_v59, %v2548_v58 }
 0x29f   : > { %v2709_v62 = vadd.f32 %v2698_v27, %v2685_v60 }
 0x2a0   : > { %v2686_v63 = vld [vmem:[#allocation2 + $0x10] sm:$0xff]  ;;  %2577 = vst.msk [vmem:[#allocation2 + $0x18] sm:$0xff] %vm317_vm1, %v2572_v61 }
 0x2a1   : > { %2714 = vst.msk [vmem:[#allocation2 + $0x8] sm:$0xff] %vm317_vm1, %v2709_v62  ;;  %v2710_v0 = vadd.f32 %v2700_v36, %v2686_v63  ;;  %v2801_v2 = vpop.f32.mrb[96].mxu1  ;;  %v3045_v63 = vld [vmem:[%s5600_s4] sm:$0x3f] }
 0x2a2   : > { %v4295_v3 = vpop.f32.mrb[97].mxu1  ;;  %v2833_v5 = vrot.slane %v2801_v2, 7  ;;  %v2823_v9 = vld [vmem:[#allocation2] sm:$0xff] }
 0x2a3   : > { %2715 = vst.msk [vmem:[#allocation2 + $0x10] sm:$0xff] %vm317_vm1, %v2710_v0  ;;  %v2804_v4 = vpop.f32.mrb[98].mxu1 }
 0x2a4   : > { %v2834_v6 = vrot.slane %v2804_v4, 7  ;;  %v4296_v7 = vpop.f32.mrb[99].mxu1  ;;  %v3129_v4 = vld [vmem:[%s5602_s6] sm:$0xff] }
 0x2a5   : > { %v2827_v8 = vld [vmem:[#allocation2 + $0x20] sm:$0xf]  ;;  %v3131_v7 = vld [vmem:[%s5602_s6 + $0x10] sm:$0xff] }
 0x2a6   : > { %2856 = vst.msk [vmem:[#allocation2 + $0x20] sm:$0xf] %vm322_vm2, %v2827_v8  ;;  %v2835_v10 = vsel %vm871_vm6, %v2833_v5, %v2834_v6  ;;  %v3130_v5 = vld [vmem:[%s5602_s6 + $0x8] sm:$0xff] }
 0x2a7   : > { %v2687_v11 = vld [vmem:[#allocation2 + $0x18] sm:$0xff]  ;;  %v2847_v13 = vadd.f32 %v2835_v10, %v2823_v9 }
 0x2a8   : > { %v2711_v14 = vadd.f32 %v2707_v12, %v2687_v11  ;;  %v2824_v19 = vld [vmem:[#allocation2 + $0x8] sm:$0xff] }
 0x2a9   : > { %2852 = vst.msk [vmem:[#allocation2] sm:$0xff] %vm317_vm1, %v2847_v13  ;;  %v2809_v15 = vpop.f32.mrb[100].mxu1 }
 0x2aa   : > { %2716 = vst.msk [vmem:[#allocation2 + $0x18] sm:$0xff] %vm317_vm1, %v2711_v14  ;;  %v2836_v16 = vrot.slane %v2809_v15, 7  ;;  %v4299_v17 = vpop.f32.mrb[101].mxu1  ;;  %v2825_v23 = vld [vmem:[#allocation2 + $0x10] sm:$0xff]  ;;  %v3205_v14 = vlaneseq }
 0x2ab   : > { %v2812_v18 = vpop.f32.mrb[102].mxu1  ;;  %v4511_v17 = vld [vmem:[%s4648_s11] sm:$0xff]  }
 0x2ac   : > { %v2837_v20 = vsel %vm871_vm6, %v2834_v6, %v2836_v16  ;;  %v2838_v38 = vrot.slane %v2812_v18, 7  ;;  %v4300_v21 = vpop.f32.mrb[103].mxu1  ;;  %v4377_v6 = vpack.c.bf16 %v3130_v5, %v3129_v4  ;;  %v3214_v18 = vunpack.c.l.bf16 %v4511_v17 }
 0x2ad   : > { %v2848_v22 = vadd.f32 %v2837_v20, %v2824_v19  ;;  %v2861_v47 = vld [vmem:[#allocation2 + $0x20] sm:$0xf]  ;;  %v3215_v20 = vunpack.c.h.bf16 %v4511_v17 }
 0x2ae   : > { %v2839_v24 = vsel %vm871_vm6, %v2836_v16, %v2838_v38 }
 0x2af   : > { %2853 = vst.msk [vmem:[#allocation2 + $0x8] sm:$0xff] %vm317_vm1, %v2848_v22  ;;  %v2849_v26 = vadd.f32 %v2839_v24, %v2825_v23  ;;  %v4513_v24 = vld [vmem:[%s4648_s11 + $0x10] sm:$0x3] }
 0x2b0   : > { %v2857_v35 = vld [vmem:[#allocation2] sm:$0xff] }
 0x2b1   : > { %2854 = vst.msk [vmem:[#allocation2 + $0x10] sm:$0xff] %vm317_vm1, %v2849_v26  ;;  %v2817_v27 = vpop.f32.mrb[104].mxu1  ;;  %v2826_v33 = vld [vmem:[#allocation2 + $0x18] sm:$0xff]  ;;  %v5542_v42 = vmul.f32 %v2857_v35, %v5096_v25  ;;  %v2866_v25 = vmul.f32 %v2861_v47, %v5152_v57  ;;  %v3218_v26 = vunpack.c.l.bf16 %v4513_v24 }
 0x2b2   : > { %v2840_v28 = vrot.slane %v2817_v27, 7  ;;  %v4303_v29 = vpop.f32.mrb[105].mxu1 }
 0x2b3   : > { %v2820_v30 = vpop.f32.mrb[106].mxu1  ;;  %v2867_v46 = vsel %vm317_vm1, %v5542_v42, 0.0  ;;  %v2874_v54 = vsel %vm322_vm2, %v2866_v25, 0.0 }
 0x2b4   : > { %v2841_v31 = vsel %vm871_vm6, %v2838_v38, %v2840_v28  ;;  %v4304_v32 = vpop.f32.mrb[107].mxu1  ;;  %v4512_v38 = vld [vmem:[%s4648_s11 + $0x8] sm:$0xff]  }
 0x2b5   : > { %v2846_v34 = vsel %vm732_vm5, %v2841_v31, 0.0  ;;  %v3216_v21 = vunpack.c.l.bf16 %v4512_v38  ;;  %v3217_v22 = vunpack.c.h.bf16 %v4512_v38 }
 0x2b6   : > { %v2850_v36 = vadd.f32 %v2846_v34, %v2826_v33  ;;  %v2858_v39 = vld [vmem:[#allocation2 + $0x8] sm:$0xff] }
 0x2b7   : > { %v5538_v40 = vmul.f32 %v2858_v39, %v5102_v37 }
 0x2b8   : > { %2855 = vst.msk [vmem:[#allocation2 + $0x18] sm:$0xff] %vm317_vm1, %v2850_v36  ;;  %v2859_v41 = vld [vmem:[#allocation2 + $0x10] sm:$0xff] }
 0x2b9   : > { %v5545_v43 = vmul.f32 %v2859_v41, %v5117_v44  ;;  %v2868_v45 = vsel %vm317_vm1, %v5538_v40, 0.0 }
 0x2ba   : > { %v2869_v48 = vadd.f32 %v2868_v45, %v2867_v46 }
 0x2bb   : > { %v2870_v37 = vsel %vm317_vm1, %v5545_v43, 0.0 }
 0x2bc   : > { %v2871_v52 = vadd.f32 %v2870_v37, %v2869_v48 }
 0x2bf   : > { %v2860_v49 = vld [vmem:[#allocation2 + $0x18] sm:$0xff] }
 0x2c0   : > { %v2865_v51 = vmul.f32 %v2860_v49, %v5137_v50 }
 0x2c2   : > { %v2872_v44 = vsel %vm317_vm1, %v2865_v51, 0.0 }
 0x2c3   : > { %v2873_v53 = vadd.f32 %v2872_v44, %v2871_v52 }
 0x2c5   : > { %v2875_v55 = vadd.f32 %v2874_v54, %v2873_v53 }
 0x2c7   : > { %v2876_v56 = vrot.slane %v2875_v55, 4 }
 0x2c9   : > { %v2877_v58 = vadd.f32 %v2876_v56, %v2875_v55 }
 0x2cb   : > { %v2878_v59 = vrot.slane %v2877_v58, 2 }
 0x2cd   : > { %v2879_v60 = vadd.f32 %v2878_v59, %v2877_v58 }
 0x2cf   : > { %v2880_v61 = vrot.slane %v2879_v60, 1 }
 0x2d1   : > { %v2881_v62 = vadd.f32 %v2880_v61, %v2879_v60 }
 0x2d3   : > { %4330 = vmatmul.mubr.msk.f32.vlgmr.msra.gmra.mrb[108].mxu0 %vm317_vm1, %v2881_v62 }
 0x2d4   : > { %4343 = vmatprep.mubr.msk.f32.mxu0 %vm4523_vm0, %v4522_v1  ;;  %4342 = vmatpush3.msk.msra.mxu0 %vm595_vm4, %v3045_v63 }
 0x3a6   : > { %v2963_v50 = vpop.f32.mrb[108].mxu0 }
 0x3a7   : > { %v4331_v57 = vpop.f32.mrb[109].mxu0  ;;  %4339 = vmatmul.mubr.msk.f32.vlgmr.msra.gmra.mrb[108].mxu1 %vm2970_vm9, %v2963_v50 }
 0x3a8   : > { %4352 = vmatprep.mubr.msk.f32.mxu1 %vm4523_vm0, %v4522_v1  ;;  %4378 = vmatpush3.bf16.msra.mxu1 %v4377_v6 }
 0x3a9   : > { %4350 = vmatprep.subr.mxu1 %v4522_v1  ;;  %v3206_v1 = vshrl.u32 %v3205_v14, 7 }
 0x3ab   : > { %v3207_v15 = vsub.s32 0, %v3206_v1 }
 0x3ac   : > { %4351 = vmatpush3.msra.mxu1 %v3131_v7 }
 0x47a   : > { %v3040_v0 = vpop.f32.mrb[108].mxu1 }
 0x47b   : > { %v3044_v2 = vmax.f32 %v3040_v0, 0.0  ;;  %v4340_v3 = vpop.f32.mrb[109].mxu1 }
 0x47d   : > { %4344 = vmatmul.mubr.msk.f32.vlgmr.msra.gmra.mrb[110].mxu0 %vm3046_vm10, %v3044_v2 }
 0x550   : > { %v3119_v8 = vpop.f32.mrb[110].mxu0 }
 0x551   : > { %v3674_v9 = vmul.f32 -1.442695, %v3119_v8  ;;  %v4345_v10 = vpop.f32.mrb[111].mxu0 }
 0x553   : > { %4507 = vpow2.f32 %v3674_v9 }
 0x55d   : > { %v4508_v11 = vpop.eup %4507 }
 0x55e   : > { %v3126_v12 = vadd.f32 1.0, %v4508_v11 }
 0x560   : > { %4509 = vrcp.f32 %v3126_v12 }
 0x56a   : > { %v4510_v13 = vpop.eup %4509 }
 0x56b   : > { %4353 = vmatmul.mubr.msk.f32.vlgmr.msra.gmra.mrb[110].mxu1 %vm2970_vm9, %v4510_v13 }
 0x63e   : > { %v3201_v16 = vpop.f32.mrb[110].mxu1 }
 0x63f   : > { %v3208_v19 = vrot.slane %v3201_v16, %v3207_v15  ;;  %v4354_v23 = vpop.f32.mrb[111].mxu1 }
 0x641   : > { %v3209_v27 = vmul.f32 %v3208_v19, %v5542_v42  ;;  %v3210_v28 = vmul.f32 %v3208_v19, %v5538_v40  ;;  %v3211_v29 = vmul.f32 %v3208_v19, %v5545_v43  ;;  %v3212_v30 = vmul.f32 %v3208_v19, %v2865_v51 }
 0x642   : > { %v3213_v31 = vmul.f32 %v3208_v19, %v2866_v25 }
 0x643   : > { %v3219_v32 = vadd.f32 %v3214_v18, %v3209_v27  ;;  %v3220_v33 = vadd.f32 %v3215_v20, %v3210_v28  ;;  %v3221_v34 = vadd.f32 %v3216_v21, %v3211_v29  ;;  %v3222_v35 = vadd.f32 %v3217_v22, %v3212_v30 }
 0x644   : > { %v3223_v36 = vadd.f32 %v3218_v26, %v3213_v31 }
 0x645   : > { %v3683_v39 = vpack.c.bf16 %v3219_v32, %v3219_v32  ;;  %v3684_v41 = vpack.c.bf16 %v3220_v33, %v3220_v33  ;;  %v3685_v42 = vpack.c.bf16 %v3221_v34, %v3221_v34  ;;  %v3686_v45 = vpack.c.bf16 %v3222_v35, %v3222_v35 }
 0x646   : > { %v3687_v40 = vpack.c.bf16 %v3223_v36, %v3223_v36 }
 0x647   : > { %3245 = vst.msk [vmem:[%s305_s25] sm:$0xf] %vm322_vm2, %v3683_v39  ;;  %3246 = vst.msk [vmem:[%s305_s25 + $0x4] sm:$0xf] %vm322_vm2, %v3684_v41 }
 0x648   : > { %3247 = vst.msk [vmem:[%s305_s25 + $0x8] sm:$0xf] %vm322_vm2, %v3685_v42  ;;  %3248 = vst.msk [vmem:[%s305_s25 + $0xc] sm:$0xf] %vm322_vm2, %v3686_v45 }
 0x649   : > { %3250 = vst.msk [vmem:[%s305_s25 + $0x10] sm:$0x3] %vm3249_vm11, %v3687_v40 }
 0x64a PF: > { %s18_s27 = sadd.s32 1, %s4520_s27  }
 0x64b   : > { %p15_p4 = scmp.ge.s32.totalorder %s18_s27, 4  }
 0x64d   :  { %17 = sbr.rel (!%p15_p4) target bundleno = 1 (0x1), region = 98 }

// kernel: encoder_forward.16
= control target key start
LH: loop header
LB: loop body
LE: loop exit
PB: predicated region body
PF: predicated region fallthrough
CT: control target
= control target key end

     0   :  { %s3109_s27 = smov 0   ;;  %s3664_s0 = inlined_call_operand.vmem [shape: bf16[2,16,64], index: 0, kind: input, shape index: {}]   ;;  %s3665_s1 = inlined_call_operand.vmem [shape: bf16[9,64,64], index: 1, kind: input, shape index: {}]   ;;  %s3666_s2 = inlined_call_operand.vmem [shape: bf16[9,64,64], index: 2, kind: input, shape index: {}]   ;;  %s3667_s3 = inlined_call_operand.vmem [shape: f32[32,8], index: 3, kind: input, shape index: {}]   ;;  %s3668_s4 = inlined_call_operand.vmem [shape: f32[8,32], index: 4, kind: input, shape index: {}]   ;;  %s3669_s5 = inlined_call_operand.vmem [shape: f32[64,32], index: 5, kind: input, shape index: {}]   ;;  %s3670_s6 = inlined_call_operand.vmem [shape: f32[32,64], index: 6, kind: input, shape index: {}]   ;;  %s3671_s7 = inlined_call_operand.vmem [shape: f32[16,1], index: 7, kind: input, shape index: {}]   ;;  %s3672_s8 = inlined_call_operand.vmem [shape: bf16[2,16,64], index: 8, kind: output, shape index: {}]  }
   0x1 LB: > { %s2322_s28 = sadd.s32 4294967295, %s3058_s27   ;;  %p2326_p0 = scmp.ge.s32.totalorder %s3058_s27, 1  ;;  %s3058_s27 = sphi %s3109_s27, %s18_s27  }
   0x2   : > { %p262_p1 = scmp.lt.s32.totalorder %s3058_s27, 3 }
   0x4   : > { %p263_p2 = pnand %p2326_p0, %p262_p1 }
   0x5   : > { %v2973_v0 = vld [vmem:[%s3665_s1] sm:$0xff] (!%p263_p2)   ;;  %v3060_v1 = vmov (!%p263_p2), 0.0   ;;  %v2974_v2 = vld [vmem:[%s3665_s1 + $0x8] sm:$0xff] (!%p263_p2)   ;;  %vm3061_vm0 = vmmov (!%p263_p2), 0   ;;  %p296_p3 = scmp.lt.s32.totalorder (!%p263_p2), %s2322_s28, 1  ;;  %vm311_vm1 = vcmask (!%p263_p2), 523264  }
   0x6   : > { %266 = sbr.rel (%p263_p2) target bundleno = 1544 (0x608), region = 52  ;;  %2674 = vmatprep.subr.bf16.mxu0 (!%p263_p2), %v3060_v1  ;;  %2686 = vmatprep.subr.bf16.mxu1 (!%p263_p2), %v3060_v1  ;;  %v2975_v3 = vld [vmem:[%s3665_s1 + $0x20] sm:$0xff] (!%p263_p2)   ;;  %v2977_v4 = vld [vmem:[%s3665_s1 + $0x28] sm:$0xff] (!%p263_p2)   ;;  %312 = vst.msk [vmem:[#allocation2] sm:$0xff] (!%p263_p2), %vm311_vm1, %v3060_v1  ;;  %313 = vst.msk [vmem:[#allocation2 + $0x8] sm:$0xff] (!%p263_p2), %vm311_vm1, %v3060_v1  ;;  %v3062_v6 = vmov (!%p263_p2), 0  }
   0x7   : > { %2675 = vmatpush3.bf16.msra.mxu0 (!%p263_p2), %v2973_v0  ;;  %2682 = vmatprep.mubr.msk.bf16.mxu0 (!%p263_p2), %vm3061_vm0, %v3060_v1  ;;  %v2976_v5 = vld [vmem:[%s3665_s1 + $0x10] sm:$0xff] (!%p263_p2)   ;;  %v2978_v8 = vld [vmem:[%s3665_s1 + $0x18] sm:$0xff] (!%p263_p2)   ;;  %v2981_v11 = vld [vmem:[%s3665_s1 + $0x40] sm:$0xff] (!%p263_p2)   ;;  %vm399_vm2 = vcmask (!%p263_p2), 1044480   ;;  %vm488_vm3 = vcmask (!%p263_p2), 1043456   ;;  %vm577_vm4 = vcmask (!%p263_p2), 1042432  }
   0x8   : > { %2676 = vmatprep.subr.bf16.mxu0 (!%p263_p2), %v3060_v1  ;;  %2694 = vmatprep.mubr.msk.bf16.mxu1 (!%p263_p2), %vm3061_vm0, %v3060_v1  ;;  %v2980_v7 = vld [vmem:[%s3665_s1 + $0x30] sm:$0xff] (!%p263_p2)   ;;  %v2982_v10 = vld [vmem:[%s3665_s1 + $0x38] sm:$0xff] (!%p263_p2)   ;;  %v2985_v12 = vld [vmem:[%s3665_s1 + $0x60] sm:$0xff] (!%p263_p2)   ;;  %vm666_vm5 = vcmask (!%p263_p2), 1040384   ;;  %vm835_vm6 = vcmask (!%p263_p2), 1046528   ;;  %vm2013_vm7 = vcmask (!%p263_p2), 261120  }
   0x9   : > { %2687 = vmatpush3.bf16.msra.mxu1 (!%p263_p2), %v2975_v3  ;;  %2972 = vset.pattern.permute.xlu0 (!%p263_p2), %v3062_v6  ;;  %v2983_v13 = vld [vmem:[%s3665_s1 + $0x48] sm:$0xff] (!%p263_p2)   ;;  %v2984_v15 = vld [vmem:[%s3665_s1 + $0x50] sm:$0xff] (!%p263_p2)   ;;  %v2986_v17 = vld [vmem:[%s3665_s1 + $0x58] sm:$0xff] (!%p263_p2)   ;;  %vm2089_vm8 = vcmask (!%p263_p2), 64512   ;;  %vm2264_vm9 = vcmask (!%p263_p2), 519168  }
   0xa   : > { %2688 = vmatprep.subr.bf16.mxu1 (!%p263_p2), %v3060_v1  ;;  %v2987_v14 = vld [vmem:[%s3665_s1 + $0x68] sm:$0xff] (!%p263_p2)   ;;  %v2988_v16 = vld [vmem:[%s3665_s1 + $0x70] sm:$0xff] (!%p263_p2)   ;;  %v2989_v18 = vld [vmem:[%s3665_s1 + $0x78] sm:$0xff] (!%p263_p2)  }
   0xb   : > { %2677 = vmatpush3.bf16.msra.mxu0 (!%p263_p2), %v2974_v2  ;;  %v2990_v19 = vld [vmem:[%s3665_s1 + $0x80] sm:$0xff] (!%p263_p2)   ;;  %v2991_v21 = vld [vmem:[%s3665_s1 + $0x88] sm:$0xff] (!%p263_p2)   ;;  %v2993_v22 = vld [vmem:[%s3665_s1 + $0x90] sm:$0xff] (!%p263_p2)  }
   0xc   : > { %2678 = vmatprep.subr.bf16.mxu0 (!%p263_p2), %v3060_v1  ;;  %v2992_v20 = vld [vmem:[%s3665_s1 + $0xa0] sm:$0xff] (!%p263_p2)   ;;  %v2994_v23 = vld [vmem:[%s3665_s1 + $0xa8] sm:$0xff] (!%p263_p2)   ;;  %v2996_v26 = vld [vmem:[%s3665_s1 + $0xb0] sm:$0xff] (!%p263_p2)  }
   0xd   : > { %s3674_s28 = smov (!%p296_p3, %s2322_s28), 1  ;;  %2689 = vmatpush3.bf16.msra.mxu1 %v2977_v4  ;;  %v307_v24 = vld [vmem:[%s3671_s7] sm:$0xff]  ;;  %v308_v25 = vld [vmem:[%s3671_s7 + $0x8] sm:$0xff]  ;;  %v2995_v27 = vld [vmem:[%s3665_s1 + $0x98] sm:$0xff]  }
   0xe   : > { %s2559_s17 = sshll.u32 %s3674_s28, 3  ;;  %2690 = vmatprep.subr.bf16.mxu1 %v3060_v1  ;;  %1116 = vperm.xlu0 %2972, %v307_v24   ;;  %v2998_v28 = vld [vmem:[%s3665_s1 + $0xb8] sm:$0xff]   ;;  %v2997_v29 = vld [vmem:[%s3665_s1 + $0xc0] sm:$0xff]   ;;  %v2999_v31 = vld [vmem:[%s3665_s1 + $0xc8] sm:$0xff]  }
   0xf   : > { %s3153_s20 = scalar_lea.vmem %s3664_s0, %s2559_s17  ;;  %2679 = vmatpush3.bf16.msra.mxu0 %v2976_v5  ;;  %v3001_v30 = vld [vmem:[%s3665_s1 + $0xe0] sm:$0xff]   ;;  %v3003_v32 = vld [vmem:[%s3665_s1 + $0xe8] sm:$0xff]   ;;  %v3000_v33 = vld [vmem:[%s3665_s1 + $0xd0] sm:$0xff]   ;;  %s305_s13 = scalar_lea.vmem %s3672_s8, %s2559_s17 }
  0x10   : > { %v3163_v9 = vld [vmem:[%s3153_s20] sm:$0xff]   ;;  %2680 = vmatprep.subr.bf16.mxu0 %v3060_v1  ;;  %v3004_v34 = vld [vmem:[%s3665_s1 + $0xf0] sm:$0xff]   ;;  %v3002_v35 = vld [vmem:[%s3665_s1 + $0xd8] sm:$0xff]  }
  0x11   : > { %2691 = vmatpush3.bf16.msra.mxu1 %v2980_v7  ;;  %v3006_v36 = vld [vmem:[%s3665_s1 + $0xf8] sm:$0xff]   ;;  %v3005_v37 = vld [vmem:[%s3665_s1 + $0x100] sm:$0xff]   ;;  %v3007_v38 = vld [vmem:[%s3665_s1 + $0x108] sm:$0xff]  }
  0x12   : > { %2692 = vmatprep.subr.bf16.mxu1 %v3060_v1  ;;  %1121 = vperm.xlu0 %2972, %v308_v25   ;;  %v3008_v39 = vld [vmem:[%s3665_s1 + $0x110] sm:$0xff]   ;;  %v3009_v40 = vld [vmem:[%s3665_s1 + $0x118] sm:$0xff]   ;;  %v3010_v41 = vld [vmem:[%s3666_s2] sm:$0xff]  }
  0x13   : > { %2681 = vmatpush3.bf16.msra.mxu0 %v2978_v8  ;;  %v3011_v42 = vld [vmem:[%s3666_s2 + $0x20] sm:$0xff]   ;;  %v3012_v43 = vld [vmem:[%s3666_s2 + $0x8] sm:$0xff]   ;;  %v3014_v45 = vld [vmem:[%s3666_s2 + $0x10] sm:$0xff]  }
  0x14   : > { %2698 = vmatprep.subr.bf16.mxu0 %v3060_v1  ;;  %v3013_v44 = vld [vmem:[%s3666_s2 + $0x28] sm:$0xff]   ;;  %v3015_v46 = vld [vmem:[%s3666_s2 + $0x30] sm:$0xff]   ;;  %v3016_v47 = vld [vmem:[%s3666_s2 + $0x18] sm:$0xff]  }
  0x15   : > { %2693 = vmatpush3.bf16.msra.mxu1 %v2982_v10  ;;  %v3017_v48 = vld [vmem:[%s3666_s2 + $0x38] sm:$0xff]   ;;  %v395_v50 = vld [vmem:[#allocation2] sm:$0xff]  ;;  %v396_v56 = vld [vmem:[#allocation2 + $0x8] sm:$0xff] }
  0x16   : > { %2683 = vmatmul.mubr.msk.bf16.vlgmr.msra.gmra.mrb[0].mxu0 %vm311_vm1, %v3163_v9  ;;  %2710 = vmatprep.subr.bf16.mxu1 %v3060_v1 }
  0x17   : > { %2699 = vmatpush3.bf16.msra.mxu0 %v2981_v11  ;;  %2706 = vmatprep.mubr.msk.bf16.mxu0 %vm3061_vm0, %v3060_v1 }
  0x18   : > { %2700 = vmatprep.subr.bf16.mxu0 %v3060_v1  ;;  %2695 = vmatmul.mubr.msk.bf16.vlgmr.msra.gmra.mrb[0].mxu1 %vm311_vm1, %v3163_v9 }
  0x19   : > { %2711 = vmatpush3.bf16.msra.mxu1 %v2985_v12  ;;  %2718 = vmatprep.mubr.msk.bf16.mxu1 %vm3061_vm0, %v3060_v1 }
  0x1a   : > { %2712 = vmatprep.subr.bf16.mxu1 %v3060_v1 }
  0x1b   : > { %2701 = vmatpush3.bf16.msra.mxu0 %v2983_v13 }
  0x1c   : > { %2702 = vmatprep.subr.bf16.mxu0 %v3060_v1 }
  0x1d   : > { %2713 = vmatpush3.bf16.msra.mxu1 %v2987_v14 }
  0x1e   : > { %2714 = vmatprep.subr.bf16.mxu1 %v3060_v1 }
  0x1f   : > { %2703 = vmatpush3.bf16.msra.mxu0 %v2984_v15 }
  0x20   : > { %2704 = vmatprep.subr.bf16.mxu0 %v3060_v1 }
  0x21   : > { %2715 = vmatpush3.bf16.msra.mxu1 %v2988_v16 }
  0x22   : > { %2716 = vmatprep.subr.bf16.mxu1 %v3060_v1 }
  0x23   : > { %2705 = vmatpush3.bf16.msra.mxu0 %v2986_v17 }
  0x24   : > { %2722 = vmatprep.subr.bf16.mxu0 %v3060_v1 }
  0x25   : > { %2717 = vmatpush3.bf16.msra.mxu1 %v2989_v18 }
  0x26   : > { %2707 = vmatmul.mubr.msk.bf16.vlgmr.msra.gmra.mrb[4].mxu0 %vm311_vm1, %v3163_v9  ;;  %2734 = vmatprep.subr.bf16.mxu1 %v3060_v1 }
  0x27   : > { %2723 = vmatpush3.bf16.msra.mxu0 %v2990_v19  ;;  %2730 = vmatprep.mubr.msk.bf16.mxu0 %vm3061_vm0, %v3060_v1 }
  0x28   : > { %2719 = vmatmul.mubr.msk.bf16.vlgmr.msra.gmra.mrb[4].mxu1 %vm311_vm1, %v3163_v9  ;;  %2724 = vmatprep.subr.bf16.mxu0 %v3060_v1 }
  0x29   : > { %2735 = vmatpush3.bf16.msra.mxu1 %v2992_v20  ;;  %2742 = vmatprep.mubr.msk.bf16.mxu1 %vm3061_vm0, %v3060_v1 }
  0x2a   : > { %2736 = vmatprep.subr.bf16.mxu1 %v3060_v1 }
  0x2b   : > { %2725 = vmatpush3.bf16.msra.mxu0 %v2991_v21 }
  0x2c   : > { %2726 = vmatprep.subr.bf16.mxu0 %v3060_v1 }
  0x2d   : > { %2737 = vmatpush3.bf16.msra.mxu1 %v2994_v23 }
  0x2e   : > { %2738 = vmatprep.subr.bf16.mxu1 %v3060_v1 }
  0x2f   : > { %2727 = vmatpush3.bf16.msra.mxu0 %v2993_v22 }
  0x30   : > { %2728 = vmatprep.subr.bf16.mxu0 %v3060_v1 }
  0x31   : > { %2739 = vmatpush3.bf16.msra.mxu1 %v2996_v26 }
  0x32   : > { %2740 = vmatprep.subr.bf16.mxu1 %v3060_v1 }
  0x33   : > { %2729 = vmatpush3.bf16.msra.mxu0 %v2995_v27 }
  0x34   : > { %2746 = vmatprep.subr.bf16.mxu0 %v3060_v1 }
  0x35   : > { %2741 = vmatpush3.bf16.msra.mxu1 %v2998_v28 }
  0x36   : > { %2731 = vmatmul.mubr.msk.bf16.vlgmr.msra.gmra.mrb[8].mxu0 %vm311_vm1, %v3163_v9  ;;  %2758 = vmatprep.subr.bf16.mxu1 %v3060_v1 }
  0x37   : > { %2747 = vmatpush3.bf16.msra.mxu0 %v2997_v29  ;;  %2754 = vmatprep.mubr.msk.bf16.mxu0 %vm3061_vm0, %v3060_v1 }
  0x38   : > { %2748 = vmatprep.subr.bf16.mxu0 %v3060_v1  ;;  %2743 = vmatmul.mubr.msk.bf16.vlgmr.msra.gmra.mrb[8].mxu1 %vm311_vm1, %v3163_v9 }
  0x39   : > { %2759 = vmatpush3.bf16.msra.mxu1 %v3001_v30  ;;  %2766 = vmatprep.mubr.msk.bf16.mxu1 %vm3061_vm0, %v3060_v1 }
  0x3a   : > { %2760 = vmatprep.subr.bf16.mxu1 %v3060_v1 }
  0x3b   : > { %2749 = vmatpush3.bf16.msra.mxu0 %v2999_v31 }
  0x3c   : > { %2750 = vmatprep.subr.bf16.mxu0 %v3060_v1 }
  0x3d   : > { %2761 = vmatpush3.bf16.msra.mxu1 %v3003_v32 }
  0x3e   : > { %2762 = vmatprep.subr.bf16.mxu1 %v3060_v1 }
  0x3f   : > { %2751 = vmatpush3.bf16.msra.mxu0 %v3000_v33 }
  0x40   : > { %2752 = vmatprep.subr.bf16.mxu0 %v3060_v1 }
  0x41   : > { %2763 = vmatpush3.bf16.msra.mxu1 %v3004_v34 }
  0x42   : > { %2764 = vmatprep.subr.bf16.mxu1 %v3060_v1 }
  0x43   : > { %2753 = vmatpush3.bf16.msra.mxu0 %v3002_v35 }
  0x44   : > { %2770 = vmatprep.subr.bf16.mxu0 %v3060_v1 }
  0x45   : > { %2765 = vmatpush3.bf16.msra.mxu1 %v3006_v36 }
  0x46   : > { %2755 = vmatmul.mubr.msk.bf16.vlgmr.msra.gmra.mrb[12].mxu0 %vm311_vm1, %v3163_v9  ;;  %2782 = vmatprep.subr.bf16.mxu1 %v3060_v1 }
  0x47   : > { %2771 = vmatpush3.bf16.msra.mxu0 %v3005_v37  ;;  %2778 = vmatprep.mubr.msk.bf16.mxu0 %vm3061_vm0, %v3060_v1 }
  0x48   : > { %2772 = vmatprep.subr.bf16.mxu0 %v3060_v1  ;;  %2767 = vmatmul.mubr.msk.bf16.vlgmr.msra.gmra.mrb[12].mxu1 %vm311_vm1, %v3163_v9 }
  0x49   : > { %2790 = vmatprep.mubr.msk.bf16.mxu1 %vm3061_vm0, %v3060_v1  ;;  %2783 = vmatpush3.bf16.msra.mxu1 %v3010_v41 }
  0x4a   : > { %2784 = vmatprep.subr.bf16.mxu1 %v3060_v1 }
  0x4b   : > { %2773 = vmatpush3.bf16.msra.mxu0 %v3007_v38 }
  0x4c   : > { %2774 = vmatprep.subr.bf16.mxu0 %v3060_v1 }
  0x4d   : > { %2785 = vmatpush3.bf16.msra.mxu1 %v3012_v43 }
  0x4e   : > { %2786 = vmatprep.subr.bf16.mxu1 %v3060_v1 }
  0x4f   : > { %2775 = vmatpush3.bf16.msra.mxu0 %v3008_v39 }
  0x50   : > { %2776 = vmatprep.subr.bf16.mxu0 %v3060_v1 }
  0x51   : > { %2787 = vmatpush3.bf16.msra.mxu1 %v3014_v45 }
  0x52   : > { %2788 = vmatprep.subr.bf16.mxu1 %v3060_v1 }
  0x53   : > { %2777 = vmatpush3.bf16.msra.mxu0 %v3009_v40 }
  0x54   : > { %2794 = vmatprep.subr.bf16.mxu0 %v3060_v1 }
  0x55   : > { %2789 = vmatpush3.bf16.msra.mxu1 %v3016_v47 }
  0x56   : > { %2779 = vmatmul.mubr.msk.bf16.vlgmr.msra.gmra.mrb[16].mxu0 %vm311_vm1, %v3163_v9  ;;  %2806 = vmatprep.subr.bf16.mxu1 %v3060_v1 }
  0x57   : > { %2802 = vmatprep.mubr.msk.bf16.mxu0 %vm3061_vm0, %v3060_v1  ;;  %2795 = vmatpush3.bf16.msra.mxu0 %v3011_v42 }
  0x58   : > { %2796 = vmatprep.subr.bf16.mxu0 %v3060_v1 }
  0x5b   : > { %2797 = vmatpush3.bf16.msra.mxu0 %v3013_v44 }
  0x5c   : > { %2798 = vmatprep.subr.bf16.mxu0 %v3060_v1 }
  0x5f   : > { %2799 = vmatpush3.bf16.msra.mxu0 %v3015_v46 }
  0x60   : > { %2800 = vmatprep.subr.bf16.mxu0 %v3060_v1 }
  0x63   : > { %2801 = vmatpush3.bf16.msra.mxu0 %v3017_v48 }
  0x64   : > { %2818 = vmatprep.subr.bf16.mxu0 %v3060_v1 }
  0xe9   : > { %v388_v49 = vpop.f32.mrb[0].mxu0 }
  0xea   : > { %v400_v51 = vrot.slane %v388_v49, 3  ;;  %v2684_v52 = vpop.f32.mrb[1].mxu0 }
  0xeb   : > { %v391_v53 = vpop.f32.mrb[2].mxu0  ;;  %v477_v54 = vpop.f32.mrb[0].mxu1 }
  0xec   : > { %v405_v55 = vsel %vm399_vm2, 0.0, %v400_v51  ;;  %v401_v57 = vrot.slane %v391_v53, 3  ;;  %v2685_v58 = vpop.f32.mrb[3].mxu0  ;;  %v489_v59 = vrot.slane %v477_v54, 4  ;;  %v2696_v60 = vpop.f32.mrb[1].mxu1 }
  0xed   : > { %v406_v61 = vadd.f32 %v405_v55, %v395_v50  ;;  %v480_v62 = vpop.f32.mrb[2].mxu1 }
  0xee   : > { %v402_v63 = vsel %vm399_vm2, %v400_v51, %v401_v57  ;;  %v490_v0 = vrot.slane %v480_v62, 4  ;;  %v2697_v2 = vpop.f32.mrb[3].mxu1  ;;  %v494_v5 = vsel %vm488_vm3, 0.0, %v489_v59 }
  0xef   : > { %408 = vst.msk [vmem:[#allocation2] sm:$0xff] %vm311_vm1, %v406_v61  ;;  %v407_v3 = vadd.f32 %v402_v63, %v396_v56 }
  0xf0   : > { %v491_v4 = vsel %vm488_vm3, %v489_v59, %v490_v0 }
  0xf1   : > { %409 = vst.msk [vmem:[#allocation2 + $0x8] sm:$0xff] %vm311_vm1, %v407_v3 }
  0xf6   : > { %v484_v6 = vld [vmem:[#allocation2] sm:$0xff] }
  0xf7   : > { %v495_v7 = vadd.f32 %v494_v5, %v484_v6 }
  0xf8   : > { %v485_v8 = vld [vmem:[#allocation2 + $0x8] sm:$0xff] }
  0xf9   : > { %497 = vst.msk [vmem:[#allocation2] sm:$0xff] %vm311_vm1, %v495_v7  ;;  %v496_v9 = vadd.f32 %v491_v4, %v485_v8  ;;  %v566_v10 = vpop.f32.mrb[4].mxu0 }
  0xfa   : > { %v578_v11 = vrot.slane %v566_v10, 5  ;;  %v2708_v12 = vpop.f32.mrb[5].mxu0 }
  0xfb   : > { %498 = vst.msk [vmem:[#allocation2 + $0x8] sm:$0xff] %vm311_vm1, %v496_v9  ;;  %v569_v13 = vpop.f32.mrb[6].mxu0  ;;  %v655_v14 = vpop.f32.mrb[4].mxu1 }
  0xfc   : > { %v579_v15 = vrot.slane %v569_v13, 5  ;;  %v2709_v16 = vpop.f32.mrb[7].mxu0  ;;  %v667_v17 = vrot.slane %v655_v14, 7  ;;  %v2720_v18 = vpop.f32.mrb[5].mxu1  ;;  %v583_v20 = vsel %vm577_vm4, 0.0, %v578_v11 }
  0xfd   : > { %v658_v19 = vpop.f32.mrb[6].mxu1 }
  0xfe   : > { %v580_v21 = vsel %vm577_vm4, %v578_v11, %v579_v15  ;;  %v668_v22 = vrot.slane %v658_v19, 7  ;;  %v2721_v23 = vpop.f32.mrb[7].mxu1  ;;  %v672_v29 = vsel %vm666_vm5, 0.0, %v667_v17 }
 0x100   : > { %v573_v24 = vld [vmem:[#allocation2] sm:$0xff]  ;;  %v669_v25 = vsel %vm666_vm5, %v667_v17, %v668_v22 }
 0x101   : > { %v584_v26 = vadd.f32 %v583_v20, %v573_v24 }
 0x102   : > { %v574_v27 = vld [vmem:[#allocation2 + $0x8] sm:$0xff] }
 0x103   : > { %586 = vst.msk [vmem:[#allocation2] sm:$0xff] %vm311_vm1, %v584_v26  ;;  %v585_v28 = vadd.f32 %v580_v21, %v574_v27  ;;  %v3392_v27 = vpop.permute.xlu0 %1116 }
 0x105   : > { %587 = vst.msk [vmem:[#allocation2 + $0x8] sm:$0xff] %vm311_vm1, %v585_v28 }
 0x109   : > { %v744_v30 = vpop.f32.mrb[8].mxu0 }
 0x10a   : > { %v662_v31 = vld [vmem:[#allocation2] sm:$0xff]  ;;  %v2732_v32 = vpop.f32.mrb[9].mxu0 }
 0x10b   : > { %v673_v33 = vadd.f32 %v672_v29, %v662_v31  ;;  %v747_v34 = vpop.f32.mrb[10].mxu0  ;;  %v824_v35 = vpop.f32.mrb[8].mxu1 }
 0x10c   : > { %v663_v36 = vld [vmem:[#allocation2 + $0x8] sm:$0xff]  ;;  %v2733_v37 = vpop.f32.mrb[11].mxu0  ;;  %v836_v38 = vrot.slane %v824_v35, 1  ;;  %v2744_v39 = vpop.f32.mrb[9].mxu1  ;;  %v3018_v35 = vld [vmem:[%s3666_s2 + $0x40] sm:$0xff]  }
 0x10d   : > { %675 = vst.msk [vmem:[#allocation2] sm:$0xff] %vm311_vm1, %v673_v33  ;;  %v674_v40 = vadd.f32 %v669_v25, %v663_v36  ;;  %v827_v41 = vpop.f32.mrb[10].mxu1  ;;  %v3398_v32 = vpop.permute.xlu0 %1121  ;;  %v3019_v36 = vld [vmem:[%s3666_s2 + $0x60] sm:$0xff]   ;;  %v3021_v39 = vld [vmem:[%s3666_s2 + $0x68] sm:$0xff]  }
 0x10e   : > { %v837_v42 = vrot.slane %v827_v41, 1  ;;  %v2745_v43 = vpop.f32.mrb[11].mxu1  ;;  %v3023_v41 = vld [vmem:[%s3666_s2 + $0x70] sm:$0xff]  }
 0x10f   : > { %676 = vst.msk [vmem:[#allocation2 + $0x8] sm:$0xff] %vm311_vm1, %v674_v40  ;;  %v3022_v40 = vld [vmem:[%s3666_s2 + $0x50] sm:$0xff]   ;;  %v3025_v43 = vld [vmem:[%s3666_s2 + $0x78] sm:$0xff]  }
 0x110   : > { %v838_v44 = vsel %vm835_vm6, %v836_v38, %v837_v42  ;;  %v841_v2 = vsel %vm835_vm6, %v837_v42, 0.0  ;;  %v3020_v38 = vld [vmem:[%s3666_s2 + $0x48] sm:$0xff]   ;;  %v3024_v42 = vld [vmem:[%s3666_s2 + $0x58] sm:$0xff]  }
 0x114   : > { %v751_v45 = vld [vmem:[#allocation2] sm:$0xff] }
 0x115   : > { %v753_v46 = vadd.f32 %v751_v45, %v744_v30  ;;  %v3027_v45 = vld [vmem:[%s3666_s2 + $0xa0] sm:$0xff]  }
 0x116   : > { %v752_v47 = vld [vmem:[#allocation2 + $0x8] sm:$0xff] }
 0x117   : > { %755 = vst.msk [vmem:[#allocation2] sm:$0xff] %vm311_vm1, %v753_v46  ;;  %v754_v48 = vadd.f32 %v752_v47, %v747_v34  ;;  %v3028_v46 = vld [vmem:[%s3666_s2 + $0x88] sm:$0xff]  }
 0x118   : > { %v3029_v47 = vld [vmem:[%s3666_s2 + $0xa8] sm:$0xff]  }
 0x119   : > { %756 = vst.msk [vmem:[#allocation2 + $0x8] sm:$0xff] %vm311_vm1, %v754_v48  ;;  %v913_v49 = vpop.f32.mrb[12].mxu0  ;;  %v3030_v48 = vld [vmem:[%s3666_s2 + $0x90] sm:$0xff]  }
 0x11a   : > { %v924_v50 = vrot.slane %v913_v49, 3  ;;  %v2756_v51 = vpop.f32.mrb[13].mxu0  ;;  %v3031_v49 = vld [vmem:[%s3666_s2 + $0xb0] sm:$0xff]  }
 0x11b   : > { %v916_v52 = vpop.f32.mrb[14].mxu0  ;;  %v1001_v53 = vpop.f32.mrb[12].mxu1  ;;  %v3033_v51 = vld [vmem:[%s3666_s2 + $0xb8] sm:$0xff]  }
 0x11c   : > { %v925_v54 = vrot.slane %v916_v52, 3  ;;  %v2757_v55 = vpop.f32.mrb[15].mxu0  ;;  %v1012_v56 = vrot.slane %v1001_v53, 4  ;;  %v2768_v57 = vpop.f32.mrb[13].mxu1  ;;  %v3034_v52 = vld [vmem:[%s3666_s2 + $0xc0] sm:$0xff]  }
 0x11d   : > { %v1004_v58 = vpop.f32.mrb[14].mxu1  ;;  %v3035_v53 = vld [vmem:[%s3666_s2 + $0xe0] sm:$0xff]   ;;  %v3037_v55 = vld [vmem:[%s3666_s2 + $0xe8] sm:$0xff]   ;;  %v3039_v57 = vld [vmem:[%s3666_s2 + $0xf0] sm:$0xff]  }
 0x11e   : > { %v831_v59 = vld [vmem:[#allocation2] sm:$0xff]  ;;  %v926_v60 = vsel %vm399_vm2, %v924_v50, %v925_v54  ;;  %v1013_v61 = vrot.slane %v1004_v58, 4  ;;  %v2769_v62 = vpop.f32.mrb[15].mxu1  ;;  %v929_v9 = vsel %vm399_vm2, %v925_v54, 0.0  ;;  %v3032_v50 = vld [vmem:[%s3666_s2 + $0x98] sm:$0xff]   ;;  %v3036_v54 = vld [vmem:[%s3666_s2 + $0xc8] sm:$0xff]  }
 0x11f   : > { %v842_v63 = vadd.f32 %v838_v44, %v831_v59  ;;  %v3026_v44 = vld [vmem:[%s3666_s2 + $0x80] sm:$0xff]   ;;  %v3040_v58 = vld [vmem:[%s3666_s2 + $0xd8] sm:$0xff]   ;;  %v3044_v62 = vld [vmem:[%s3666_s2 + $0x110] sm:$0xff]  }
 0x120   : > { %v832_v0 = vld [vmem:[#allocation2 + $0x8] sm:$0xff]  ;;  %v1014_v3 = vsel %vm488_vm3, %v1012_v56, %v1013_v61  ;;  %v1017_v20 = vsel %vm488_vm3, %v1013_v61, 0.0  ;;  %v3038_v56 = vld [vmem:[%s3666_s2 + $0xd0] sm:$0xff]   ;;  %v3041_v59 = vld [vmem:[%s3666_s2 + $0xf8] sm:$0xff]  }
 0x121   : > { %v843_v4 = vadd.f32 %v841_v2, %v832_v0  ;;  %844 = vst.msk [vmem:[#allocation2] sm:$0xff] %vm311_vm1, %v842_v63  ;;  %v3043_v61 = vld [vmem:[%s3666_s2 + $0x108] sm:$0xff]   ;;  %v3045_v63 = vld [vmem:[%s3666_s2 + $0x118] sm:$0xff]   ;;  %v1928_v0 = vld [vmem:[%s3669_s5] sm:$0xff] }
 0x122   : > { %v1929_v2 = vld [vmem:[%s3669_s5 + $0x8] sm:$0xff] }
 0x123   : > { %845 = vst.msk [vmem:[#allocation2 + $0x8] sm:$0xff] %vm311_vm1, %v843_v4  ;;  %v3063_v4 = vmov 0.0|0.0  }
 0x128   : > { %v920_v5 = vld [vmem:[#allocation2] sm:$0xff] }
 0x129   : > { %v930_v6 = vadd.f32 %v926_v60, %v920_v5  ;;  %v1089_v7 = vpop.f32.mrb[16].mxu0  ;;  %v3042_v60 = vld [vmem:[%s3666_s2 + $0x100] sm:$0xff]   ;;  %v2937_v5 = vpack.c.bf16 %v1929_v2, %v1928_v0 }
 0x12a   : > { %v921_v8 = vld [vmem:[#allocation2 + $0x8] sm:$0xff]  ;;  %v1100_v10 = vrot.slane %v1089_v7, 5  ;;  %v2780_v11 = vpop.f32.mrb[17].mxu0 }
 0x12b   : > { %v931_v12 = vadd.f32 %v929_v9, %v921_v8  ;;  %932 = vst.msk [vmem:[#allocation2] sm:$0xff] %vm311_vm1, %v930_v6  ;;  %v1092_v13 = vpop.f32.mrb[18].mxu0  ;;  %v1931_v6 = vld [vmem:[%s3669_s5 + $0x18] sm:$0xff]  ;;  %v1932_v8 = vld [vmem:[%s3669_s5 + $0x20] sm:$0xff]  ;;  %v1933_v9 = vld [vmem:[%s3669_s5 + $0x28] sm:$0xff] }
 0x12c   : > { %v1101_v14 = vrot.slane %v1092_v13, 5  ;;  %v2781_v15 = vpop.f32.mrb[19].mxu0  ;;  %v1934_v11 = vld [vmem:[%s3669_s5 + $0x30] sm:$0xff] }
 0x12d   : > { %933 = vst.msk [vmem:[#allocation2 + $0x8] sm:$0xff] %vm311_vm1, %v931_v12  ;;  %v1935_v12 = vld [vmem:[%s3669_s5 + $0x38] sm:$0xff]  ;;  %v2010_v15 = vld [vmem:[%s3667_s3 + $0x8] sm:$0xff] }
 0x12e   : > { %v1102_v16 = vsel %vm577_vm4, %v1100_v10, %v1101_v14  ;;  %v1105_v25 = vsel %vm577_vm4, %v1101_v14, 0.0  ;;  %v2943_v10 = vpack.c.bf16 %v1933_v9, %v1932_v8  ;;  %v2946_v13 = vpack.c.bf16 %v1935_v12, %v1934_v11  ;;  %v2009_v14 = vld [vmem:[%s3667_s3] sm:$0xff] }
 0x132   : > { %v1008_v17 = vld [vmem:[#allocation2] sm:$0xff] }
 0x133   : > { %v1018_v18 = vadd.f32 %v1014_v3, %v1008_v17  ;;  %v1930_v3 = vld [vmem:[%s3669_s5 + $0x10] sm:$0xff]  ;;  %v2949_v17 = vpack.c.bf16 %v2010_v15, %v2009_v14 }
 0x134   : > { %v1009_v19 = vld [vmem:[#allocation2 + $0x8] sm:$0xff]  ;;  %v2940_v7 = vpack.c.bf16 %v1931_v6, %v1930_v3 }
 0x135   : > { %v1019_v21 = vadd.f32 %v1017_v20, %v1009_v19  ;;  %1020 = vst.msk [vmem:[#allocation2] sm:$0xff] %vm311_vm1, %v1018_v18  ;;  %v2012_v18 = vld [vmem:[%s3667_s3 + $0x18] sm:$0xff] }
 0x137   : > { %1021 = vst.msk [vmem:[#allocation2 + $0x8] sm:$0xff] %vm311_vm1, %v1019_v21 }
 0x13c   : > { %v1096_v22 = vld [vmem:[#allocation2] sm:$0xff] }
 0x13d   : > { %v1106_v23 = vadd.f32 %v1102_v16, %v1096_v22  ;;  %v2011_v16 = vld [vmem:[%s3667_s3 + $0x10] sm:$0xff] }
 0x13e   : > { %v1097_v24 = vld [vmem:[#allocation2 + $0x8] sm:$0xff]  ;;  %v2952_v19 = vpack.c.bf16 %v2012_v18, %v2011_v16 }
 0x13f   : > { %v1107_v26 = vadd.f32 %v1105_v25, %v1097_v24  ;;  %1108 = vst.msk [vmem:[#allocation2] sm:$0xff] %vm311_vm1, %v1106_v23 }
 0x141   : > { %1109 = vst.msk [vmem:[#allocation2 + $0x8] sm:$0xff] %vm311_vm1, %v1107_v26 }
 0x146   : > { %v1110_v28 = vld [vmem:[#allocation2] sm:$0xff] }
 0x147   : > { %v1112_v29 = vmax.f32 %v1110_v28, 0.0  ;;  %1127 = vst.msk [vmem:[#allocation2] sm:$0xff] %vm311_vm1, %v3060_v1 }
 0x148   : > { %v1111_v30 = vld [vmem:[#allocation2 + $0x8] sm:$0xff] }
 0x149   : > { %v1113_v31 = vmax.f32 %v1111_v30, 0.0  ;;  %1128 = vst.msk [vmem:[#allocation2 + $0x8] sm:$0xff] %vm311_vm1, %v3060_v1  ;;  %v1124_v33 = vmul.f32 %v3392_v27, %v1112_v29 }
 0x14b   : > { %v1125_v34 = vmul.f32 %v3398_v32, %v1113_v31 }
 0x14d   : > { %v3408_v37 = vpack.c.bf16 %v1125_v34, %v1124_v33 }
 0x14e   : > { %v1205_v22 = vld [vmem:[#allocation2] sm:$0xff] }
 0x14f   : > { %2791 = vmatmul.mubr.msk.bf16.vlgmr.msra.gmra.mrb[16].mxu1 %vm311_vm1, %v3408_v37  ;;  %2803 = vmatmul.mubr.msk.bf16.vlgmr.msra.gmra.mrb[20].mxu0 %vm311_vm1, %v3408_v37 }
 0x150   : > { %2807 = vmatpush3.bf16.msra.mxu1 %v3018_v35  ;;  %2819 = vmatpush3.bf16.msra.mxu0 %v3019_v36  ;;  %v1206_v28 = vld [vmem:[#allocation2 + $0x8] sm:$0xff] }
 0x151   : > { %2808 = vmatprep.subr.bf16.mxu1 %v3060_v1  ;;  %2820 = vmatprep.subr.bf16.mxu0 %v3060_v1 }
 0x152   : > { %2814 = vmatprep.mubr.msk.bf16.mxu1 %vm3061_vm0, %v3060_v1  ;;  %2826 = vmatprep.mubr.msk.bf16.mxu0 %vm3061_vm0, %v3060_v1 }
 0x154   : > { %2809 = vmatpush3.bf16.msra.mxu1 %v3020_v38  ;;  %2821 = vmatpush3.bf16.msra.mxu0 %v3021_v39 }
 0x155   : > { %2810 = vmatprep.subr.bf16.mxu1 %v3060_v1  ;;  %2822 = vmatprep.subr.bf16.mxu0 %v3060_v1 }
 0x158   : > { %2811 = vmatpush3.bf16.msra.mxu1 %v3022_v40  ;;  %2823 = vmatpush3.bf16.msra.mxu0 %v3023_v41 }
 0x159   : > { %2812 = vmatprep.subr.bf16.mxu1 %v3060_v1  ;;  %2824 = vmatprep.subr.bf16.mxu0 %v3060_v1 }
 0x15c   : > { %2813 = vmatpush3.bf16.msra.mxu1 %v3024_v42  ;;  %2825 = vmatpush3.bf16.msra.mxu0 %v3025_v43 }
 0x15d   : > { %2830 = vmatprep.subr.bf16.mxu1 %v3060_v1  ;;  %2842 = vmatprep.subr.bf16.mxu0 %v3060_v1 }
 0x15f   : > { %2815 = vmatmul.mubr.msk.bf16.vlgmr.msra.gmra.mrb[20].mxu1 %vm311_vm1, %v3408_v37  ;;  %2827 = vmatmul.mubr.msk.bf16.vlgmr.msra.gmra.mrb[24].mxu0 %vm311_vm1, %v3408_v37 }
 0x160   : > { %2831 = vmatpush3.bf16.msra.mxu1 %v3026_v44  ;;  %2843 = vmatpush3.bf16.msra.mxu0 %v3027_v45 }
 0x161   : > { %2832 = vmatprep.subr.bf16.mxu1 %v3060_v1  ;;  %2844 = vmatprep.subr.bf16.mxu0 %v3060_v1 }
 0x162   : > { %2838 = vmatprep.mubr.msk.bf16.mxu1 %vm3061_vm0, %v3060_v1  ;;  %2850 = vmatprep.mubr.msk.bf16.mxu0 %vm3061_vm0, %v3060_v1 }
 0x164   : > { %2833 = vmatpush3.bf16.msra.mxu1 %v3028_v46  ;;  %2845 = vmatpush3.bf16.msra.mxu0 %v3029_v47 }
 0x165   : > { %2834 = vmatprep.subr.bf16.mxu1 %v3060_v1  ;;  %2846 = vmatprep.subr.bf16.mxu0 %v3060_v1 }
 0x168   : > { %2835 = vmatpush3.bf16.msra.mxu1 %v3030_v48  ;;  %2847 = vmatpush3.bf16.msra.mxu0 %v3031_v49 }
 0x169   : > { %2836 = vmatprep.subr.bf16.mxu1 %v3060_v1  ;;  %2848 = vmatprep.subr.bf16.mxu0 %v3060_v1 }
 0x16c   : > { %2837 = vmatpush3.bf16.msra.mxu1 %v3032_v50  ;;  %2849 = vmatpush3.bf16.msra.mxu0 %v3033_v51 }
 0x16d   : > { %2854 = vmatprep.subr.bf16.mxu1 %v3060_v1  ;;  %2866 = vmatprep.subr.bf16.mxu0 %v3060_v1 }
 0x16f   : > { %2839 = vmatmul.mubr.msk.bf16.vlgmr.msra.gmra.mrb[24].mxu1 %vm311_vm1, %v3408_v37  ;;  %2851 = vmatmul.mubr.msk.bf16.vlgmr.msra.gmra.mrb[28].mxu0 %vm311_vm1, %v3408_v37 }
 0x170   : > { %2855 = vmatpush3.bf16.msra.mxu1 %v3034_v52  ;;  %2867 = vmatpush3.bf16.msra.mxu0 %v3035_v53 }
 0x171   : > { %2856 = vmatprep.subr.bf16.mxu1 %v3060_v1  ;;  %2868 = vmatprep.subr.bf16.mxu0 %v3060_v1 }
 0x172   : > { %2862 = vmatprep.mubr.msk.bf16.mxu1 %vm3061_vm0, %v3060_v1  ;;  %2874 = vmatprep.mubr.msk.bf16.mxu0 %vm3061_vm0, %v3060_v1 }
 0x174   : > { %2857 = vmatpush3.bf16.msra.mxu1 %v3036_v54  ;;  %2869 = vmatpush3.bf16.msra.mxu0 %v3037_v55 }
 0x175   : > { %2858 = vmatprep.subr.bf16.mxu1 %v3060_v1  ;;  %2870 = vmatprep.subr.bf16.mxu0 %v3060_v1 }
 0x178   : > { %2859 = vmatpush3.bf16.msra.mxu1 %v3038_v56  ;;  %2871 = vmatpush3.bf16.msra.mxu0 %v3039_v57 }
 0x179   : > { %2860 = vmatprep.subr.bf16.mxu1 %v3060_v1  ;;  %2872 = vmatprep.subr.bf16.mxu0 %v3060_v1 }
 0x17c   : > { %2861 = vmatpush3.bf16.msra.mxu1 %v3040_v58  ;;  %2873 = vmatpush3.bf16.msra.mxu0 %v3041_v59 }
 0x17d   : > { %2878 = vmatprep.subr.bf16.mxu1 %v3060_v1  ;;  %2936 = vmatprep.subr.bf16.mxu0 %v3063_v4 }
 0x17f   : > { %2863 = vmatmul.mubr.msk.bf16.vlgmr.msra.gmra.mrb[28].mxu1 %vm311_vm1, %v3408_v37  ;;  %2875 = vmatmul.mubr.msk.bf16.vlgmr.msra.gmra.mrb[32].mxu0 %vm311_vm1, %v3408_v37 }
 0x180   : > { %2879 = vmatpush3.bf16.msra.mxu1 %v3042_v60  ;;  %2886 = vmatprep.mubr.msk.bf16.mxu1 %vm3061_vm0, %v3060_v1 }
 0x181   : > { %2880 = vmatprep.subr.bf16.mxu1 %v3060_v1  ;;  %2906 = vmatprep.mubr.msk.f32.mxu0 %vm3061_vm0, %v3060_v1 }
 0x182   : > { %2938 = vmatpush3.bf16.msra.mxu0 %v2937_v5 }
 0x183   : > { %2939 = vmatprep.subr.bf16.mxu0 %v3063_v4 }
 0x184   : > { %2881 = vmatpush3.bf16.msra.mxu1 %v3043_v61 }
 0x185   : > { %2882 = vmatprep.subr.bf16.mxu1 %v3060_v1 }
 0x186   : > { %2941 = vmatpush3.bf16.msra.mxu0 %v2940_v7 }
 0x187   : > { %2942 = vmatprep.subr.bf16.mxu0 %v3063_v4 }
 0x188   : > { %2883 = vmatpush3.bf16.msra.mxu1 %v3044_v62 }
 0x189   : > { %2884 = vmatprep.subr.bf16.mxu1 %v3060_v1 }
 0x18a   : > { %2944 = vmatpush3.bf16.msra.mxu0 %v2943_v10 }
 0x18b   : > { %2945 = vmatprep.subr.bf16.mxu0 %v3063_v4 }
 0x18c   : > { %2885 = vmatpush3.bf16.msra.mxu1 %v3045_v63 }
 0x18d   : > { %2948 = vmatprep.subr.bf16.mxu1 %v3063_v4 }
 0x18e   : > { %2947 = vmatpush3.bf16.msra.mxu0 %v2946_v13 }
 0x18f   : > { %2887 = vmatmul.mubr.msk.bf16.vlgmr.msra.gmra.mrb[32].mxu1 %vm311_vm1, %v3408_v37 }
 0x190   : > { %2917 = vmatprep.mubr.msk.f32.mxu1 %vm3061_vm0, %v3060_v1  ;;  %2950 = vmatpush3.bf16.msra.mxu1 %v2949_v17 }
 0x191   : > { %2951 = vmatprep.subr.bf16.mxu1 %v3063_v4 }
 0x194   : > { %2953 = vmatpush3.bf16.msra.mxu1 %v2952_v19 }
 0x195   : > { %2920 = vmatprep.subr.mxu1 %v3060_v1 }
 0x222   : > { %v1198_v20 = vpop.f32.mrb[16].mxu1  ;;  %v1286_v21 = vpop.f32.mrb[20].mxu0 }
 0x223   : > { %v1209_v23 = vrot.slane %v1198_v20, 3  ;;  %v2792_v24 = vpop.f32.mrb[17].mxu1  ;;  %v2804_v25 = vpop.f32.mrb[21].mxu0  ;;  %v1297_v31 = vrot.slane %v1286_v21, 4 }
 0x224   : > { %v1201_v26 = vpop.f32.mrb[18].mxu1  ;;  %v1289_v29 = vpop.f32.mrb[22].mxu0 }
 0x225   : > { %v1214_v30 = vsel %vm399_vm2, 0.0, %v1209_v23  ;;  %v1210_v33 = vrot.slane %v1201_v26, 3  ;;  %v1298_v34 = vrot.slane %v1289_v29, 4  ;;  %v2793_v35 = vpop.f32.mrb[19].mxu1  ;;  %v2805_v36 = vpop.f32.mrb[23].mxu0  ;;  %v1302_v42 = vsel %vm488_vm3, 0.0, %v1297_v31 }
 0x226   : > { %v1215_v37 = vadd.f32 %v1214_v30, %v1205_v22 }
 0x227   : > { %v1211_v38 = vsel %vm399_vm2, %v1209_v23, %v1210_v33  ;;  %v1299_v39 = vsel %vm488_vm3, %v1297_v31, %v1298_v34 }
 0x228   : > { %1217 = vst.msk [vmem:[#allocation2] sm:$0xff] %vm311_vm1, %v1215_v37  ;;  %v1216_v40 = vadd.f32 %v1211_v38, %v1206_v28 }
 0x22a   : > { %1218 = vst.msk [vmem:[#allocation2 + $0x8] sm:$0xff] %vm311_vm1, %v1216_v40 }
 0x22f   : > { %v1293_v41 = vld [vmem:[#allocation2] sm:$0xff] }
 0x230   : > { %v1303_v43 = vadd.f32 %v1302_v42, %v1293_v41 }
 0x231   : > { %v1294_v44 = vld [vmem:[#allocation2 + $0x8] sm:$0xff] }
 0x232   : > { %1305 = vst.msk [vmem:[#allocation2] sm:$0xff] %vm311_vm1, %v1303_v43  ;;  %v1304_v45 = vadd.f32 %v1299_v39, %v1294_v44  ;;  %v1374_v46 = vpop.f32.mrb[20].mxu1  ;;  %v1462_v47 = vpop.f32.mrb[24].mxu0 }
 0x233   : > { %v2816_v48 = vpop.f32.mrb[21].mxu1  ;;  %v2828_v49 = vpop.f32.mrb[25].mxu0  ;;  %v1385_v52 = vrot.slane %v1374_v46, 5  ;;  %v1473_v53 = vrot.slane %v1462_v47, 7 }
 0x234   : > { %1306 = vst.msk [vmem:[#allocation2 + $0x8] sm:$0xff] %vm311_vm1, %v1304_v45  ;;  %v1377_v50 = vpop.f32.mrb[22].mxu1  ;;  %v1465_v51 = vpop.f32.mrb[26].mxu0 }
 0x235   : > { %v1386_v54 = vrot.slane %v1377_v50, 5  ;;  %v1474_v55 = vrot.slane %v1465_v51, 7  ;;  %v2817_v56 = vpop.f32.mrb[23].mxu1  ;;  %v2829_v57 = vpop.f32.mrb[27].mxu0  ;;  %v1390_v61 = vsel %vm577_vm4, 0.0, %v1385_v52  ;;  %v1478_v6 = vsel %vm666_vm5, 0.0, %v1473_v53 }
 0x237   : > { %v1387_v58 = vsel %vm577_vm4, %v1385_v52, %v1386_v54  ;;  %v1475_v59 = vsel %vm666_vm5, %v1473_v53, %v1474_v55 }
 0x239   : > { %v1381_v60 = vld [vmem:[#allocation2] sm:$0xff] }
 0x23a   : > { %v1391_v62 = vadd.f32 %v1390_v61, %v1381_v60 }
 0x23b   : > { %v1382_v63 = vld [vmem:[#allocation2 + $0x8] sm:$0xff] }
 0x23c   : > { %1393 = vst.msk [vmem:[#allocation2] sm:$0xff] %vm311_vm1, %v1391_v62  ;;  %v1392_v0 = vadd.f32 %v1387_v58, %v1382_v63 }
 0x23e   : > { %1394 = vst.msk [vmem:[#allocation2 + $0x8] sm:$0xff] %vm311_vm1, %v1392_v0 }
 0x242   : > { %v1550_v2 = vpop.f32.mrb[24].mxu1  ;;  %v1630_v3 = vpop.f32.mrb[28].mxu0 }
 0x243   : > { %v1469_v5 = vld [vmem:[#allocation2] sm:$0xff]  ;;  %v2840_v7 = vpop.f32.mrb[25].mxu1  ;;  %v2852_v8 = vpop.f32.mrb[29].mxu0  ;;  %v1641_v13 = vrot.slane %v1630_v3, 1 }
 0x244   : > { %v1479_v9 = vadd.f32 %v1478_v6, %v1469_v5  ;;  %v1553_v10 = vpop.f32.mrb[26].mxu1  ;;  %v1633_v11 = vpop.f32.mrb[30].mxu0 }
 0x245   : > { %v1470_v12 = vld [vmem:[#allocation2 + $0x8] sm:$0xff]  ;;  %v1642_v14 = vrot.slane %v1633_v11, 1  ;;  %v2841_v15 = vpop.f32.mrb[27].mxu1  ;;  %v2853_v16 = vpop.f32.mrb[31].mxu0 }
 0x246   : > { %1481 = vst.msk [vmem:[#allocation2] sm:$0xff] %vm311_vm1, %v1479_v9  ;;  %v1480_v17 = vadd.f32 %v1475_v59, %v1470_v12 }
 0x247   : > { %v1643_v18 = vsel %vm835_vm6, %v1641_v13, %v1642_v14  ;;  %v1646_v42 = vsel %vm835_vm6, %v1642_v14, 0.0 }
 0x248   : > { %1482 = vst.msk [vmem:[#allocation2 + $0x8] sm:$0xff] %vm311_vm1, %v1480_v17 }
 0x24d   : > { %v1557_v19 = vld [vmem:[#allocation2] sm:$0xff] }
 0x24e   : > { %v1559_v20 = vadd.f32 %v1557_v19, %v1550_v2 }
 0x24f   : > { %v1558_v21 = vld [vmem:[#allocation2 + $0x8] sm:$0xff] }
 0x250   : > { %1561 = vst.msk [vmem:[#allocation2] sm:$0xff] %vm311_vm1, %v1559_v20  ;;  %v1560_v22 = vadd.f32 %v1558_v21, %v1553_v10  ;;  %v2169_v21 = vld [vmem:[%s3670_s6] sm:$0xff] }
 0x252   : > { %1562 = vst.msk [vmem:[#allocation2 + $0x8] sm:$0xff] %vm311_vm1, %v1560_v22  ;;  %v1718_v23 = vpop.f32.mrb[28].mxu1  ;;  %v1806_v24 = vpop.f32.mrb[32].mxu0  ;;  %v2170_v22 = vld [vmem:[%s3670_s6 + $0x8] sm:$0xff] }
 0x253   : > { %v2864_v25 = vpop.f32.mrb[29].mxu1  ;;  %v2876_v26 = vpop.f32.mrb[33].mxu0  ;;  %v1729_v30 = vrot.slane %v1718_v23, 3  ;;  %v1817_v31 = vrot.slane %v1806_v24, 4  ;;  %v2171_v23 = vld [vmem:[%s3670_s6 + $0x10] sm:$0xff]  ;;  %v2955_v24 = vpack.c.bf16 %v2170_v22, %v2169_v21 }
 0x254   : > { %v1721_v28 = vpop.f32.mrb[30].mxu1  ;;  %v1809_v29 = vpop.f32.mrb[34].mxu0  ;;  %v2172_v25 = vld [vmem:[%s3670_s6 + $0x18] sm:$0xff] }
 0x255   : > { %v1730_v33 = vrot.slane %v1721_v28, 3  ;;  %v1818_v34 = vrot.slane %v1809_v29, 4  ;;  %v2865_v35 = vpop.f32.mrb[31].mxu1  ;;  %v2877_v36 = vpop.f32.mrb[35].mxu0  ;;  %v2958_v26 = vpack.c.bf16 %v2172_v25, %v2171_v23 }
 0x257   : > { %v1637_v37 = vld [vmem:[#allocation2] sm:$0xff]  ;;  %v1731_v38 = vsel %vm399_vm2, %v1729_v30, %v1730_v33  ;;  %v1819_v39 = vsel %vm488_vm3, %v1817_v31, %v1818_v34  ;;  %v1734_v48 = vsel %vm399_vm2, %v1730_v33, 0.0  ;;  %v1822_v59 = vsel %vm488_vm3, %v1818_v34, 0.0 }
 0x258   : > { %v1647_v40 = vadd.f32 %v1643_v18, %v1637_v37  ;;  %v2246_v34 = vlaneseq }
 0x259   : > { %v1638_v41 = vld [vmem:[#allocation2 + $0x8] sm:$0xff] }
 0x25a   : > { %v1648_v43 = vadd.f32 %v1646_v42, %v1638_v41  ;;  %1649 = vst.msk [vmem:[#allocation2] sm:$0xff] %vm311_vm1, %v1647_v40  ;;  %v2247_v35 = vshrl.u32 %v2246_v34, 7 }
 0x25c   : > { %1650 = vst.msk [vmem:[#allocation2 + $0x8] sm:$0xff] %vm311_vm1, %v1648_v43  ;;  %v2248_v36 = vsub.s32 0, %v2247_v35 }
 0x261   : > { %v1725_v44 = vld [vmem:[#allocation2] sm:$0xff] }
 0x262   : > { %v1735_v45 = vadd.f32 %v1731_v38, %v1725_v44  ;;  %v1894_v46 = vpop.f32.mrb[32].mxu1 }
 0x263   : > { %v1726_v47 = vld [vmem:[#allocation2 + $0x8] sm:$0xff]  ;;  %v2888_v49 = vpop.f32.mrb[33].mxu1  ;;  %v1905_v52 = vrot.slane %v1894_v46, 5 }
 0x264   : > { %v1736_v50 = vadd.f32 %v1734_v48, %v1726_v47  ;;  %1737 = vst.msk [vmem:[#allocation2] sm:$0xff] %vm311_vm1, %v1735_v45  ;;  %v1897_v51 = vpop.f32.mrb[34].mxu1 }
 0x265   : > { %v1906_v53 = vrot.slane %v1897_v51, 5  ;;  %v2889_v54 = vpop.f32.mrb[35].mxu1 }
 0x266   : > { %1738 = vst.msk [vmem:[#allocation2 + $0x8] sm:$0xff] %vm311_vm1, %v1736_v50 }
 0x267   : > { %v1907_v55 = vsel %vm577_vm4, %v1905_v52, %v1906_v53  ;;  %v1910_v0 = vsel %vm577_vm4, %v1906_v53, 0.0 }
 0x26b   : > { %v1813_v56 = vld [vmem:[#allocation2] sm:$0xff] }
 0x26c   : > { %v1823_v57 = vadd.f32 %v1819_v39, %v1813_v56  ;;  %v3051_v39 = vld [vmem:[%s3153_s20] sm:$0xff]  }
 0x26d   : > { %v1814_v58 = vld [vmem:[#allocation2 + $0x8] sm:$0xff]  ;;  %v2253_v40 = vunpack.c.h.bf16 %v3051_v39 }
 0x26e   : > { %v1824_v60 = vadd.f32 %v1822_v59, %v1814_v58  ;;  %1825 = vst.msk [vmem:[#allocation2] sm:$0xff] %vm311_vm1, %v1823_v57 }
 0x270   : > { %1826 = vst.msk [vmem:[#allocation2 + $0x8] sm:$0xff] %vm311_vm1, %v1824_v60 }
 0x275   : > { %v1901_v61 = vld [vmem:[#allocation2] sm:$0xff] }
 0x276   : > { %v1911_v62 = vadd.f32 %v1907_v55, %v1901_v61 }
 0x277   : > { %v1902_v63 = vld [vmem:[#allocation2 + $0x8] sm:$0xff] }
 0x278   : > { %v1912_v2 = vadd.f32 %v1910_v0, %v1902_v63  ;;  %1913 = vst.msk [vmem:[#allocation2] sm:$0xff] %vm311_vm1, %v1911_v62 }
 0x27a   : > { %1914 = vst.msk [vmem:[#allocation2 + $0x8] sm:$0xff] %vm311_vm1, %v1912_v2 }
 0x27f   : > { %v1915_v3 = vld [vmem:[#allocation2] sm:$0xff] }
 0x280   : > { %v1917_v5 = vmul.f32 %v1915_v3, %v3392_v27  ;;  %v2088_v27 = vld [vmem:[%s3668_s4] sm:$0xff] }
 0x281   : > { %v1916_v6 = vld [vmem:[#allocation2 + $0x8] sm:$0xff] }
 0x282   : > { %v1918_v7 = vmul.f32 %v1916_v6, %v3398_v32  ;;  %v1919_v8 = vsel %vm311_vm1, %v1917_v5, 0.0 }
 0x284   : > { %v1920_v9 = vsel %vm311_vm1, %v1918_v7, 0.0 }
 0x285   : > { %v1921_v10 = vadd.f32 %v1920_v9, %v1919_v8 }
 0x287   : > { %v1922_v11 = vrot.slane %v1921_v10, 4 }
 0x289   : > { %v1923_v12 = vadd.f32 %v1922_v11, %v1921_v10 }
 0x28b   : > { %v1924_v13 = vrot.slane %v1923_v12, 2 }
 0x28d   : > { %v1925_v14 = vadd.f32 %v1924_v13, %v1923_v12 }
 0x28f   : > { %v1926_v15 = vrot.slane %v1925_v14, 1 }
 0x291   : > { %v1927_v16 = vadd.f32 %v1926_v15, %v1925_v14 }
 0x293   : > { %2907 = vmatmul.mubr.msk.f32.vlgmr.msra.gmra.mrb[36].mxu0 %vm311_vm1, %v1927_v16 }
 0x366   : > { %v2005_v17 = vpop.f32.mrb[36].mxu0 }
 0x367   : > { %v2908_v32 = vpop.f32.mrb[37].mxu0  ;;  %2918 = vmatmul.mubr.msk.f32.vlgmr.msra.gmra.mrb[36].mxu1 %vm2013_vm7, %v2005_v17 }
 0x368   : > { %2921 = vmatpush3.msra.mxu1 %v2088_v27  ;;  %2922 = vmatprep.mubr.msk.f32.mxu1 %vm3061_vm0, %v3060_v1 }
 0x369   : > { %2954 = vmatprep.subr.bf16.mxu1 %v3063_v4 }
 0x43a   : > { %v2083_v18 = vpop.f32.mrb[36].mxu1 }
 0x43b   : > { %v2087_v19 = vmax.f32 %v2083_v18, 0.0  ;;  %v2919_v20 = vpop.f32.mrb[37].mxu1 }
 0x43d   : > { %2923 = vmatmul.mubr.msk.f32.vlgmr.msra.gmra.mrb[38].mxu1 %vm2089_vm8, %v2087_v19 }
 0x43e   : > { %2933 = vmatprep.mubr.msk.f32.mxu1 %vm3061_vm0, %v3060_v1  ;;  %2956 = vmatpush3.bf16.msra.mxu1 %v2955_v24 }
 0x43f   : > { %2957 = vmatprep.subr.bf16.mxu1 %v3063_v4  ;;  %v2252_v4 = vunpack.c.l.bf16 %v3051_v39 }
 0x442   : > { %2959 = vmatpush3.bf16.msra.mxu1 %v2958_v26 }
 0x510   : > { %v2159_v1 = vpop.f32.mrb[38].mxu1 }
 0x511   : > { %v2553_v28 = vmul.f32 -1.442695, %v2159_v1  ;;  %v2924_v29 = vpop.f32.mrb[39].mxu1 }
 0x513   : > { %3047 = vpow2.f32 %v2553_v28 }
 0x51d   : > { %v3048_v30 = vpop.eup %3047 }
 0x51e   : > { %v2166_v31 = vadd.f32 1.0, %v3048_v30 }
 0x520   : > { %3049 = vrcp.f32 %v2166_v31 }
 0x52a   : > { %v3050_v33 = vpop.eup %3049 }
 0x52b   : > { %2934 = vmatmul.mubr.msk.f32.vlgmr.msra.gmra.mrb[40].mxu1 %vm2013_vm7, %v3050_v33 }
 0x5fe   : > { %v2242_v37 = vpop.f32.mrb[40].mxu1 }
 0x5ff   : > { %v2249_v38 = vrot.slane %v2242_v37, %v2248_v36  ;;  %v2935_v41 = vpop.f32.mrb[41].mxu1 }
 0x601   : > { %v2250_v42 = vmul.f32 %v2249_v38, %v1917_v5  ;;  %v2251_v43 = vmul.f32 %v2249_v38, %v1918_v7 }
 0x603   : > { %v2254_v44 = vadd.f32 %v2252_v4, %v2250_v42  ;;  %v2255_v45 = vadd.f32 %v2253_v40, %v2251_v43 }
 0x605   : > { %v2561_v46 = vpack.c.bf16 %v2254_v44, %v2254_v44  ;;  %v2562_v47 = vpack.c.bf16 %v2255_v45, %v2255_v45 }
 0x607   : > { %2265 = vst.msk [vmem:[%s305_s13] sm:$0xf] %vm2264_vm9, %v2561_v46  ;;  %2266 = vst.msk [vmem:[%s305_s13 + $0x4] sm:$0xf] %vm2264_vm9, %v2562_v47 }
 0x608 PF: > { %s18_s27 = sadd.s32 1, %s3058_s27  }
 0x609   : > { %p15_p4 = scmp.ge.s32.totalorder %s18_s27, 4  }
 0x60b   :  { %17 = sbr.rel (!%p15_p4) target bundleno = 1 (0x1), region = 98 }

</bundles_post_ra>
